<compile_context>
chip_gen: v7x
topology: tpu7x:2x2x1
jax: 0.10.0
libtpu: 0.0.40
codegen_flags: <defaults>
</compile_context>

<pallas_src>
import math

import jax
import jax.numpy as jnp
from jax.experimental import pallas as pl
from jax.experimental.pallas import tpu as pltpu

# ----------------------------- config -----------------------------
B = 2
ENC_IN = 4
DEC_IN = 4
C_OUT = 4
SEQ_LEN = 16
LABEL_LEN = 8
PRED_LEN = 8
DEC_LEN = LABEL_LEN + PRED_LEN
D_MODEL = 32
N_HEADS = 4
HEAD_DIM = D_MODEL // N_HEADS
E_LAYERS = 3
D_LAYERS = 2
D_FF = 32

# stacks = list(range(e_layers, 2, -1)) == [3]  ->  EncoderStack holds a
# single Encoder and inp_len == seq_len, so the stack concat is a no-op.
STACKS = list(range(E_LAYERS, 2, -1))
assert len(STACKS) == 1 and STACKS[0] == E_LAYERS
assert ENC_IN == DEC_IN
assert D_MODEL % N_HEADS == 0
assert D_FF <= D_MODEL            # FFN W2 rows are stored inside the 32-row slab

C_IN = ENC_IN
ATT_SCALE = 1.0 / math.sqrt(HEAD_DIM)
BN_EVAL_SCALE = 1.0 / math.sqrt(1.0 + 1e-5)   # BatchNorm1d eval, init stats
NEG_PAD = -3.0e38                              # MaxPool edge padding

# ------------------- packed-parameter layout (static) -------------------
# Weight slab w_big: (D_MODEL, NUM_BLK*128).  One 128-lane block per group:
#   attention block : [Wq(32) | Wk(32) | Wv(32) | Wo(32)]
#   ffn block       : [W1(32) | W2(32) | pad(64)]
#   conv block      : [tap0(32) | tap1(32) | tap2(32) | pad(32)]
#   proj block      : [Wproj(4) | pad(124)]
# Bias/LN slab vec_big: (32, 128).  One row per group:
#   attention bias : [bq|bk|bv|bo], ffn bias: [b1|b2|pad],
#   layernorm      : [gamma|beta|pad], conv bias: [b|pad], proj bias: [b|pad]


def _blk_enc_att(i): return 2 * i
def _blk_enc_ffn(i): return 2 * i + 1
BLK_CONV0 = 2 * E_LAYERS
def _blk_conv(i): return BLK_CONV0 + i
BLK_DEC0 = BLK_CONV0 + (E_LAYERS - 1)
def _blk_dec_sa(j): return BLK_DEC0 + 3 * j
def _blk_dec_ca(j): return BLK_DEC0 + 3 * j + 1
def _blk_dec_ffn(j): return BLK_DEC0 + 3 * j + 2
BLK_PROJ = BLK_DEC0 + 3 * D_LAYERS
NUM_BLK = BLK_PROJ + 1

def _row_enc_attb(i): return 4 * i
def _row_enc_ffnb(i): return 4 * i + 1
def _row_enc_ln1(i): return 4 * i + 2
def _row_enc_ln2(i): return 4 * i + 3
ROW_ENC_NORM = 4 * E_LAYERS
ROW_CONV0 = ROW_ENC_NORM + 1
def _row_conv(i): return ROW_CONV0 + i
ROW_DEC0 = ROW_CONV0 + (E_LAYERS - 1)
def _row_dec_sab(j): return ROW_DEC0 + 6 * j
def _row_dec_cab(j): return ROW_DEC0 + 6 * j + 1
def _row_dec_ffnb(j): return ROW_DEC0 + 6 * j + 2
def _row_dec_ln1(j): return ROW_DEC0 + 6 * j + 3
def _row_dec_ln2(j): return ROW_DEC0 + 6 * j + 4
def _row_dec_ln3(j): return ROW_DEC0 + 6 * j + 5
ROW_DEC_NORM = ROW_DEC0 + 6 * D_LAYERS
ROW_PROJ = ROW_DEC_NORM + 1
NUM_VEC_ROWS = ROW_PROJ + 1
VEC_ROWS_PAD = ((NUM_VEC_ROWS + 7) // 8) * 8


# ------------------------ shared math helpers ------------------------


def _erf(x):
    # Abramowitz & Stegun 7.1.26 (|abs err| <= 1.5e-7): exact-GELU semantics
    # to f32 precision without relying on a lax.erf lowering inside Mosaic.
    p = 0.3275911
    a1, a2, a3, a4, a5 = (0.254829592, -0.284496736, 1.421413741,
                          -1.453152027, 1.061405429)
    s = jnp.where(x >= 0.0, 1.0, -1.0)
    z = jnp.abs(x)
    t = 1.0 / (1.0 + p * z)
    poly = t * (a1 + t * (a2 + t * (a3 + t * (a4 + t * a5))))
    return s * (1.0 - poly * jnp.exp(-z * z))


def _gelu(x):
    return 0.5 * x * (1.0 + _erf(x * 0.7071067811865476))


def _elu(x):
    return jnp.where(x > 0.0, x, jnp.exp(jnp.minimum(x, 0.0)) - 1.0)


def _mm(a, b):
    return jnp.dot(a, b, preferred_element_type=jnp.float32)


# ------------------------ in-kernel building blocks ------------------------


def _ln(x, vec_ref, row):
    g = vec_ref[row:row + 1, 0:D_MODEL]
    b = vec_ref[row:row + 1, D_MODEL:2 * D_MODEL]
    mu = jnp.mean(x, axis=-1, keepdims=True)
    xc = x - mu
    var = jnp.mean(xc * xc, axis=-1, keepdims=True)
    return xc * jax.lax.rsqrt(var + 1e-5) * g + b


def _circular_prev_next(x, scr):
    """Returns (x[(l-1)%L], x[(l+1)%L]) via a VMEM staging buffer.

    No L x L permutation matmuls and no cross-sublane concatenates; just
    cheap staged stores + loads.
    """
    L, C = x.shape
    scr[1:L + 1, 0:C] = x
    scr[0:1, 0:C] = scr[L:L + 1, 0:C]          # wrap: x[L-1]
    scr[L + 1:L + 2, 0:C] = scr[1:2, 0:C]      # wrap: x[0]
    return scr[0:L, 0:C], scr[2:L + 2, 0:C]


def _token_embed(x, emb_ref, which, scr):
    # TokenEmbedding: Conv1d(c_in, d_model, k=3, circular padding, bias=False).
    base = which * 3 * C_IN
    xp, xn = _circular_prev_next(x, scr)
    return (_mm(xp, emb_ref[base:base + C_IN, :])
            + _mm(x, emb_ref[base + C_IN:base + 2 * C_IN, :])
            + _mm(xn, emb_ref[base + 2 * C_IN:base + 3 * C_IN, :]))


def _attn_block(xq, xkv, w_ref, vec_ref, blk, row, scr, causal, fuse_qkv):
    """All-heads softmax attention; QKV projection fused into one matmul."""
    L, S = xq.shape[0], xkv.shape[0]
    base = blk * 128
    if fuse_qkv:                               # self attention: one 96-lane matmul
        wqkv = w_ref[:, base:base + 3 * D_MODEL]
        bqkv = vec_ref[row:row + 1, 0:3 * D_MODEL]
        scr[0:L, 0:3 * D_MODEL] = _mm(xq, wqkv) + bqkv
    else:                                      # cross attention: Q from xq, KV from xkv
        wq = w_ref[:, base:base + D_MODEL]
        wkv = w_ref[:, base + D_MODEL:base + 3 * D_MODEL]
        bq = vec_ref[row:row + 1, 0:D_MODEL]
        bkv = vec_ref[row:row + 1, D_MODEL:3 * D_MODEL]
        scr[0:L, 0:D_MODEL] = _mm(xq, wq) + bq
        scr[0:S, D_MODEL:3 * D_MODEL] = _mm(xkv, wkv) + bkv

    if causal:
        ri = jax.lax.broadcasted_iota(jnp.int32, (L, S), 0)
        ci = jax.lax.broadcasted_iota(jnp.int32, (L, S), 1)
        neg = jnp.where(ci <= ri, 0.0, -1e30).astype(jnp.float32)

    out = None
    for h in range(N_HEADS):
        q = scr[0:L, h * HEAD_DIM:(h + 1) * HEAD_DIM]
        k = scr[0:S, D_MODEL + h * HEAD_DIM:D_MODEL + (h + 1) * HEAD_DIM]
        v = scr[0:S, 2 * D_MODEL + h * HEAD_DIM:2 * D_MODEL + (h + 1) * HEAD_DIM]
        s = jax.lax.dot_general(q, k, (((1,), (1,)), ((), ())),
                                preferred_element_type=jnp.float32) * ATT_SCALE
        if causal:
            s = s + neg
        m = jnp.max(s, axis=-1, keepdims=True)
        p = jnp.exp(s - m)
        inv = pl.reciprocal(jnp.sum(p, axis=-1, keepdims=True), approx=False)
        o = _mm(p * inv, v)
        # Per-head rows of the out-projection (sum over heads == concat+Linear).
        wo_h = w_ref[h * HEAD_DIM:(h + 1) * HEAD_DIM,
                     base + 3 * D_MODEL:base + 4 * D_MODEL]
        contrib = _mm(o, wo_h)
        out = contrib if out is None else out + contrib
    return out + vec_ref[row:row + 1, 3 * D_MODEL:4 * D_MODEL]


def _ffn(x, w_ref, vec_ref, blk, row):
    base = blk * 128
    w1 = w_ref[:, base:base + D_FF]
    w2 = w_ref[0:D_FF, base + D_FF:base + D_FF + D_MODEL]
    b1 = vec_ref[row:row + 1, 0:D_FF]
    b2 = vec_ref[row:row + 1, D_FF:D_FF + D_MODEL]
    h = _gelu(_mm(x, w1) + b1)
    return _mm(h, w2) + b2


def _conv_distil(x, w_ref, vec_ref, blk, row, scr):
    # Distil ConvLayer: circular conv(k=3) -> BN(eval) -> ELU -> MaxPool(3,2,1).
    L = x.shape[0]
    Lout = (L - 1) // 2 + 1
    base = blk * 128
    xp, xn = _circular_prev_next(x, scr)
    y = (_mm(xp, w_ref[:, base:base + D_MODEL])
         + _mm(x, w_ref[:, base + D_MODEL:base + 2 * D_MODEL])
         + _mm(xn, w_ref[:, base + 2 * D_MODEL:base + 3 * D_MODEL])
         + vec_ref[row:row + 1, 0:D_MODEL])
    y = _elu(y * BN_EVAL_SCALE)
    # MaxPool1d(kernel=3, stride=2, padding=1); edge padding = very negative.
    pad = jnp.full((1, D_MODEL), NEG_PAD, jnp.float32)
    scr[1:L + 1, 0:D_MODEL] = y
    scr[0:1, 0:D_MODEL] = pad
    scr[L + 1:L + 2, 0:D_MODEL] = pad
    z = jnp.maximum(jnp.maximum(scr[0:L, 0:D_MODEL], y), scr[2:L + 2, 0:D_MODEL])
    scr[0:L, 0:D_MODEL] = z
    # Stride-2 downsample straight from VMEM (no selection matmul).
    return scr[pl.ds(0, Lout, stride=2), 0:D_MODEL]


def _encoder_layer(x, w_ref, vec_ref, i, scr):
    attn = _attn_block(x, x, w_ref, vec_ref, _blk_enc_att(i), _row_enc_attb(i),
                       scr, causal=False, fuse_qkv=True)
    x = _ln(x + attn, vec_ref, _row_enc_ln1(i))
    y = _ffn(x, w_ref, vec_ref, _blk_enc_ffn(i), _row_enc_ffnb(i))
    return _ln(x + y, vec_ref, _row_enc_ln2(i))


def _decoder_layer(x, cross, w_ref, vec_ref, j, scr):
    sa = _attn_block(x, x, w_ref, vec_ref, _blk_dec_sa(j), _row_dec_sab(j),
                     scr, causal=True, fuse_qkv=True)
    x = _ln(x + sa, vec_ref, _row_dec_ln1(j))
    ca = _attn_block(x, cross, w_ref, vec_ref, _blk_dec_ca(j), _row_dec_cab(j),
                     scr, causal=False, fuse_qkv=False)
    x = _ln(x + ca, vec_ref, _row_dec_ln2(j))
    y = _ffn(x, w_ref, vec_ref, _blk_dec_ffn(j), _row_dec_ffnb(j))
    return _ln(x + y, vec_ref, _row_dec_ln3(j))


# ----------------------------- fused kernel -----------------------------


def _informer_kernel(x_enc_ref, add_enc_ref, x_dec_ref, add_dec_ref,
                     emb_ref, w_ref, vec_ref, o_ref, scr):
    # ---- DataEmbedding (token conv + positional/temporal additive) ----
    enc = _token_embed(x_enc_ref[0], emb_ref, 0, scr) + add_enc_ref[0]
    dec = _token_embed(x_dec_ref[0], emb_ref, 1, scr) + add_dec_ref[0]

    # ---- EncoderStack (single encoder: 3 layers, 2 distil conv layers) ----
    x = enc
    for i in range(E_LAYERS):
        x = _encoder_layer(x, w_ref, vec_ref, i, scr)
        if i < E_LAYERS - 1:
            x = _conv_distil(x, w_ref, vec_ref, _blk_conv(i), _row_conv(i), scr)
    cross = _ln(x, vec_ref, ROW_ENC_NORM)          # (4, 32)

    # ---- Decoder + final norm + projection (last PRED_LEN rows only) ----
    y = dec
    for j in range(D_LAYERS):
        y = _decoder_layer(y, cross, w_ref, vec_ref, j, scr)
    y = _ln(y, vec_ref, ROW_DEC_NORM)
    yp = y[DEC_LEN - PRED_LEN:DEC_LEN, :]          # (8, 32), 8-aligned slice
    wp = w_ref[:, BLK_PROJ * 128:BLK_PROJ * 128 + C_OUT]
    bp = vec_ref[ROW_PROJ:ROW_PROJ + 1, 0:C_OUT]
    o_ref[0] = _mm(yp, wp) + bp


# ----------------------------- wrapper -----------------------------


def informer_forward(params, x_enc, x_mark_enc, x_dec, x_mark_dec):
    bx = x_enc.shape[0]
    add_enc = pos_temporal_add(params["temporal"], x_mark_enc)
    add_dec = pos_temporal_add(params["temporal"], x_mark_dec)
    return pl.pallas_call(
        _informer_kernel,
        out_shape=jax.ShapeDtypeStruct((bx, PRED_LEN, C_OUT), jnp.float32),
        grid=(bx,),
        in_specs=[
            pl.BlockSpec((1, SEQ_LEN, ENC_IN), lambda b: (b, 0, 0)),
            pl.BlockSpec((1, SEQ_LEN, D_MODEL), lambda b: (b, 0, 0)),
            pl.BlockSpec((1, DEC_LEN, DEC_IN), lambda b: (b, 0, 0)),
            pl.BlockSpec((1, DEC_LEN, D_MODEL), lambda b: (b, 0, 0)),
            pl.BlockSpec(params["emb_w"].shape, lambda b: (0, 0)),
            pl.BlockSpec(params["w_big"].shape, lambda b: (0, 0)),
            pl.BlockSpec(params["vec_big"].shape, lambda b: (0, 0)),
        ],
        out_specs=pl.BlockSpec((1, PRED_LEN, C_OUT), lambda b: (b, 0, 0)),
        scratch_shapes=[pltpu.VMEM((DEC_LEN + 2, 3 * D_MODEL), jnp.float32)],
        compiler_params=pltpu.CompilerParams(
            dimension_semantics=("parallel",)),   # batch -> 2 TCs on v7x
    )(x_enc, add_enc, x_dec, add_dec,
      params["emb_w"], params["w_big"], params["vec_big"])


# ----------------------------- plain-JAX glue -----------------------------


def sinusoid_table(n_pos, d_model):
    pos = jnp.arange(n_pos, dtype=jnp.float32)[:, None]
    div = jnp.exp(jnp.arange(0, d_model, 2, dtype=jnp.float32)
                  * (-math.log(10000.0) / d_model))
    pe = jnp.zeros((n_pos, d_model), jnp.float32)
    pe = pe.at[:, 0::2].set(jnp.sin(pos * div))
    pe = pe.at[:, 1::2].set(jnp.cos(pos * div))
    return pe


def pos_temporal_add(tables, x_mark):
    # Positional + fixed temporal embeddings (tiny table gathers; kept in XLA).
    L = x_mark.shape[1]
    pos = sinusoid_table(L, D_MODEL)[None]
    month = jnp.take(tables["month"], x_mark[:, :, 0], axis=0)
    day = jnp.take(tables["day"], x_mark[:, :, 1], axis=0)
    weekday = jnp.take(tables["weekday"], x_mark[:, :, 2], axis=0)
    hour = jnp.take(tables["hour"], x_mark[:, :, 3], axis=0)
    return pos + hour + weekday + day + month


# ----------------------------- parameter init -----------------------------


def init_params(key):
    keys = iter(jax.random.split(key, 512))

    def nrm(shape, scale):
        return jax.random.normal(next(keys), shape, jnp.float32) * scale

    def padw(m):
        return jnp.pad(m, ((0, 0), (0, 128 - m.shape[1])))

    s_dm = 1.0 / math.sqrt(D_MODEL)
    blocks, rows = {}, {}

    def add_attn(blk, row):
        blocks[blk] = jnp.concatenate(                     # [Wq|Wk|Wv|Wo]
            [nrm((D_MODEL, D_MODEL), s_dm) for _ in range(4)], axis=1)
        rows[row] = nrm((1, 128), 0.02)                    # [bq|bk|bv|bo]

    def add_ffn(blk, row):
        w1 = nrm((D_MODEL, D_FF), s_dm)
        w2 = nrm((D_FF, D_MODEL), 1.0 / math.sqrt(D_FF))
        blocks[blk] = padw(jnp.concatenate([w1, w2], axis=1))
        rows[row] = padw(nrm((1, D_FF + D_MODEL), 0.02))

    def add_ln(row):
        rows[row] = padw(jnp.concatenate(
            [jnp.ones((1, D_MODEL), jnp.float32),
             jnp.zeros((1, D_MODEL), jnp.float32)], axis=1))

    for i in range(E_LAYERS):
        add_attn(_blk_enc_att(i), _row_enc_attb(i))
        add_ffn(_blk_enc_ffn(i), _row_enc_ffnb(i))
        add_ln(_row_enc_ln1(i))
        add_ln(_row_enc_ln2(i))
    add_ln(ROW_ENC_NORM)
    for i in range(E_LAYERS - 1):
        blocks[_blk_conv(i)] = padw(jnp.concatenate(
            [nrm((D_MODEL, D_MODEL), 1.0 / math.sqrt(3 * D_MODEL))
             for _ in range(3)], axis=1))
        rows[_row_conv(i)] = padw(nrm((1, D_MODEL), 0.02))
    for j in range(D_LAYERS):
        add_attn(_blk_dec_sa(j), _row_dec_sab(j))
        add_attn(_blk_dec_ca(j), _row_dec_cab(j))
        add_ffn(_blk_dec_ffn(j), _row_dec_ffnb(j))
        add_ln(_row_dec_ln1(j))
        add_ln(_row_dec_ln2(j))
        add_ln(_row_dec_ln3(j))
    add_ln(ROW_DEC_NORM)
    blocks[BLK_PROJ] = padw(nrm((D_MODEL, C_OUT), s_dm))
    rows[ROW_PROJ] = padw(nrm((1, C_OUT), 0.02))

    w_big = jnp.concatenate([blocks[i] for i in range(NUM_BLK)], axis=1)
    vec = jnp.concatenate([rows[i] for i in range(NUM_VEC_ROWS)], axis=0)
    vec_big = jnp.pad(vec, ((0, VEC_ROWS_PAD - NUM_VEC_ROWS), (0, 0)))

    emb_w = nrm((2 * 3 * C_IN, D_MODEL), 1.0 / math.sqrt(3 * C_IN))
    temporal = dict(month=sinusoid_table(13, D_MODEL),
                    day=sinusoid_table(32, D_MODEL),
                    weekday=sinusoid_table(7, D_MODEL),
                    hour=sinusoid_table(24, D_MODEL))
    return dict(w_big=w_big, vec_big=vec_big, emb_w=emb_w, temporal=temporal)


# ----------------------- pure-JAX reference (self-check) -----------------------


def _dotp(a, b):
    return jnp.dot(a, b, preferred_element_type=jnp.float32,
                   precision=jax.lax.Precision.HIGHEST)


def _reference_forward(params, x_enc, add_enc, x_dec, add_dec):
    w, vec, emb = params["w_big"], params["vec_big"], params["emb_w"]

    def ln(x, row):
        g = vec[row, 0:D_MODEL][None]
        b = vec[row, D_MODEL:2 * D_MODEL][None]
        mu = jnp.mean(x, -1, keepdims=True)
        xc = x - mu
        var = jnp.mean(xc * xc, -1, keepdims=True)
        return xc * jax.lax.rsqrt(var + 1e-5) * g + b

    def token_embed(x, which):
        base = which * 3 * C_IN
        xp, xn = jnp.roll(x, 1, axis=0), jnp.roll(x, -1, axis=0)
        return (_dotp(xp, emb[base:base + C_IN])
                + _dotp(x, emb[base + C_IN:base + 2 * C_IN])
                + _dotp(xn, emb[base + 2 * C_IN:base + 3 * C_IN]))

    def attention(xq, xkv, blk, row, causal):
        base = blk * 128
        L, S = xq.shape[0], xkv.shape[0]
        q = _dotp(xq, w[:, base:base + D_MODEL]) + vec[row, 0:D_MODEL][None]
        k = _dotp(xkv, w[:, base + D_MODEL:base + 2 * D_MODEL]) + vec[row, D_MODEL:2 * D_MODEL][None]
        v = _dotp(xkv, w[:, base + 2 * D_MODEL:base + 3 * D_MODEL]) + vec[row, 2 * D_MODEL:3 * D_MODEL][None]
        neg = jnp.where(jnp.arange(S)[None, :] <= jnp.arange(L)[:, None], 0.0, -1e30)
        out = 0.0
        for h in range(N_HEADS):
            sl = slice(h * HEAD_DIM, (h + 1) * HEAD_DIM)
            s = _dotp(q[:, sl], k[:, sl].T) * ATT_SCALE
            if causal:
                s = s + neg
            p = jnp.exp(s - jnp.max(s, -1, keepdims=True))
            p = p / jnp.sum(p, -1, keepdims=True)
            o = _dotp(p, v[:, sl])
            out = out + _dotp(o, w[h * HEAD_DIM:(h + 1) * HEAD_DIM,
                                   base + 3 * D_MODEL:base + 4 * D_MODEL])
        return out + vec[row, 3 * D_MODEL:4 * D_MODEL][None]

    def ffn(x, blk, row):
        base = blk * 128
        h = _gelu(_dotp(x, w[:, base:base + D_FF]) + vec[row, 0:D_FF][None])
        return (_dotp(h, w[0:D_FF, base + D_FF:base + D_FF + D_MODEL])
                + vec[row, D_FF:D_FF + D_MODEL][None])

    def conv_distil(x, blk, row):
        base = blk * 128
        xp, xn = jnp.roll(x, 1, axis=0), jnp.roll(x, -1, axis=0)
        y = (_dotp(xp, w[:, base:base + D_MODEL])
             + _dotp(x, w[:, base + D_MODEL:base + 2 * D_MODEL])
             + _dotp(xn, w[:, base + 2 * D_MODEL:base + 3 * D_MODEL])
             + vec[row, 0:D_MODEL][None])
        y = _elu(y * BN_EVAL_SCALE)
        pad = jnp.full((1, D_MODEL), NEG_PAD, jnp.float32)
        yprev = jnp.concatenate([pad, y[:-1]], 0)
        ynext = jnp.concatenate([y[1:], pad], 0)
        return jnp.maximum(jnp.maximum(yprev, y), ynext)[0::2]

    def one_batch(xe, ae, xd, ad):
        x = token_embed(xe, 0) + ae
        d = token_embed(xd, 1) + ad
        for i in range(E_LAYERS):
            a = attention(x, x, _blk_enc_att(i), _row_enc_attb(i), False)
            x = ln(x + a, _row_enc_ln1(i))
            x = ln(x + ffn(x, _blk_enc_ffn(i), _row_enc_ffnb(i)), _row_enc_ln2(i))
            if i < E_LAYERS - 1:
                x = conv_distil(x, _blk_conv(i), _row_conv(i))
        cross = ln(x, ROW_ENC_NORM)
        y = d
        for j in range(D_LAYERS):
            sa = attention(y, y, _blk_dec_sa(j), _row_dec_sab(j), True)
            y = ln(y + sa, _row_dec_ln1(j))
            ca = attention(y, cross, _blk_dec_ca(j), _row_dec_cab(j), False)
            y = ln(y + ca, _row_dec_ln2(j))
            y = ln(y + ffn(y, _blk_dec_ffn(j), _row_dec_ffnb(j)), _row_dec_ln3(j))
        y = ln(y, ROW_DEC_NORM)
        yp = y[DEC_LEN - PRED_LEN:]
        return (_dotp(yp, w[:, BLK_PROJ * 128:BLK_PROJ * 128 + C_OUT])
                + vec[ROW_PROJ, 0:C_OUT][None])

    outs = [one_batch(x_enc[b], add_enc[b], x_dec[b], add_dec[b])
            for b in range(x_enc.shape[0])]
    return jnp.stack(outs, 0)


# ----------------------------- main -----------------------------

if __name__ == "__main__":
    key = jax.random.PRNGKey(0)
    k1, k2, k3, k4, kp = jax.random.split(key, 5)

    x_enc = jax.random.normal(k1, (B, SEQ_LEN, ENC_IN), jnp.float32)
    x_dec = jax.random.normal(k2, (B, DEC_LEN, DEC_IN), jnp.float32)

    def rand_mark(k, L):
        km, kd, kw, kh = jax.random.split(k, 4)
        month = jax.random.randint(km, (B, L), 0, 13)
        day = jax.random.randint(kd, (B, L), 0, 32)
        weekday = jax.random.randint(kw, (B, L), 0, 7)
        hour = jax.random.randint(kh, (B, L), 0, 24)
        return jnp.stack([month, day, weekday, hour], axis=-1).astype(jnp.int32)

    x_mark_enc = rand_mark(k3, SEQ_LEN)
    x_mark_dec = rand_mark(k4, DEC_LEN)

    params = init_params(kp)

    fwd = jax.jit(informer_forward)
    out = jax.block_until_ready(fwd(params, x_enc, x_mark_enc, x_dec, x_mark_dec))

    assert out.shape == (B, PRED_LEN, C_OUT), out.shape
    assert bool(jnp.all(jnp.isfinite(out)))

    # Numerical self-check of the fused kernel against a pure-JAX reference
    # of the same math (same packed parameters).
    add_enc = pos_temporal_add(params["temporal"], x_mark_enc)
    add_dec = pos_temporal_add(params["temporal"], x_mark_dec)
    ref = jax.block_until_ready(
        jax.jit(_reference_forward)(params, x_enc, add_enc, x_dec, add_dec))
    err = float(jnp.max(jnp.abs(out - ref)))
    assert err < 2e-2, f"kernel/reference mismatch: max abs err {err}"

    print("KERNEL_OK")
</pallas_src>

<mosaic_0001>
module attributes {stable_mosaic.version = 11 : i64} {
  func.func @_informer_kernel(%arg0: i32, %arg1: memref<1x16x4xf32, #tpu.memory_space<vmem>>, %arg2: memref<1x16x32xf32, #tpu.memory_space<vmem>>, %arg3: memref<1x16x4xf32, #tpu.memory_space<vmem>>, %arg4: memref<1x16x32xf32, #tpu.memory_space<vmem>>, %arg5: memref<24x32xf32, #tpu.memory_space<vmem>>, %arg6: memref<32x1920xf32, #tpu.memory_space<vmem>>, %arg7: memref<32x128xf32, #tpu.memory_space<vmem>>, %arg8: memref<1x8x4xf32, #tpu.memory_space<vmem>>, %arg9: memref<18x96xf32, #tpu.memory_space<vmem>>) attributes {dimension_semantics = [#tpu.dimension_semantics<parallel>], iteration_bounds = array<i64: 2>, scalar_prefetch = 0 : i64, scratch_operands = 1 : i64, tpu.core_type = #tpu.core_type<tc>, window_params = [{transform_indices = @transform_0, window_bounds = array<i64: 1, 16, 4>}, {transform_indices = @transform_1, window_bounds = array<i64: 1, 16, 32>}, {transform_indices = @transform_2, window_bounds = array<i64: 1, 16, 4>}, {transform_indices = @transform_3, window_bounds = array<i64: 1, 16, 32>}, {pipeline_mode = #tpu.pipeline_mode<synchronous>, transform_indices = @transform_4, window_bounds = array<i64: 24, 32>}, {pipeline_mode = #tpu.pipeline_mode<synchronous>, transform_indices = @transform_5, window_bounds = array<i64: 32, 1920>}, {pipeline_mode = #tpu.pipeline_mode<synchronous>, transform_indices = @transform_6, window_bounds = array<i64: 32, 128>}, {transform_indices = @transform_7, window_bounds = array<i64: 1, 8, 4>}]} {
    %c0 = arith.constant 0 : index
    %c0_0 = arith.constant 0 : index
    %c0_1 = arith.constant 0 : index
    %0 = vector.load %arg1[%c0, %c0_0, %c0_1] : memref<1x16x4xf32, #tpu.memory_space<vmem>>, vector<1x16x4xf32>
    %1 = vector.shape_cast %0 : vector<1x16x4xf32> to vector<16x4xf32>
    %c1 = arith.constant 1 : index
    %c0_2 = arith.constant 0 : index
    %2 = vector.load %arg9[%c1, %c0_2] : memref<18x96xf32, #tpu.memory_space<vmem>>, vector<16x4xf32>
    tpu.vector_store %arg9[%c1, %c0_2], %1 {strides = array<i32>} : memref<18x96xf32, #tpu.memory_space<vmem>>, vector<16x4xf32>,
    %c16 = arith.constant 16 : index
    %c0_3 = arith.constant 0 : index
    %3 = vector.load %arg9[%c16, %c0_3] : memref<18x96xf32, #tpu.memory_space<vmem>>, vector<1x4xf32>
    %c0_4 = arith.constant 0 : index
    %c0_5 = arith.constant 0 : index
    %4 = vector.load %arg9[%c0_4, %c0_5] : memref<18x96xf32, #tpu.memory_space<vmem>>, vector<1x4xf32>
    tpu.vector_store %arg9[%c0_4, %c0_5], %3 {strides = array<i32>} : memref<18x96xf32, #tpu.memory_space<vmem>>, vector<1x4xf32>,
    %c1_6 = arith.constant 1 : index
    %c0_7 = arith.constant 0 : index
    %5 = vector.load %arg9[%c1_6, %c0_7] : memref<18x96xf32, #tpu.memory_space<vmem>>, vector<1x4xf32>
    %c17 = arith.constant 17 : index
    %c0_8 = arith.constant 0 : index
    %6 = vector.load %arg9[%c17, %c0_8] : memref<18x96xf32, #tpu.memory_space<vmem>>, vector<1x4xf32>
    tpu.vector_store %arg9[%c17, %c0_8], %5 {strides = array<i32>} : memref<18x96xf32, #tpu.memory_space<vmem>>, vector<1x4xf32>,
    %c0_9 = arith.constant 0 : index
    %c0_10 = arith.constant 0 : index
    %7 = vector.load %arg9[%c0_9, %c0_10] : memref<18x96xf32, #tpu.memory_space<vmem>>, vector<16x4xf32>
    %c2 = arith.constant 2 : index
    %c0_11 = arith.constant 0 : index
    %8 = vector.load %arg9[%c2, %c0_11] : memref<18x96xf32, #tpu.memory_space<vmem>>, vector<16x4xf32>
    %c0_12 = arith.constant 0 : index
    %c0_13 = arith.constant 0 : index
    %9 = vector.load %arg5[%c0_12, %c0_13] : memref<24x32xf32, #tpu.memory_space<vmem>>, vector<4x32xf32>
    %cst = arith.constant dense<0.000000e+00> : vector<16x32xf32>
    %10 = tpu.matmul %7, %9, %cst {dimension_numbers = #tpu.dot_dimension_numbers<[1], [0], [0], [1], [0, 0, 1, 1], [], []>} : vector<16x4xf32>, vector<4x32xf32>, vector<16x32xf32> -> vector<16x32xf32>
    %c4 = arith.constant 4 : index
    %c0_14 = arith.constant 0 : index
    %11 = vector.load %arg5[%c4, %c0_14] : memref<24x32xf32, #tpu.memory_space<vmem>>, vector<4x32xf32>
    %cst_15 = arith.constant dense<0.000000e+00> : vector<16x32xf32>
    %12 = tpu.matmul %1, %11, %cst_15 {dimension_numbers = #tpu.dot_dimension_numbers<[1], [0], [0], [1], [0, 0, 1, 1], [], []>} : vector<16x4xf32>, vector<4x32xf32>, vector<16x32xf32> -> vector<16x32xf32>
    %13 = arith.addf %10, %12 : vector<16x32xf32>
    %c8 = arith.constant 8 : index
    %c0_16 = arith.constant 0 : index
    %14 = vector.load %arg5[%c8, %c0_16] : memref<24x32xf32, #tpu.memory_space<vmem>>, vector<4x32xf32>
    %cst_17 = arith.constant dense<0.000000e+00> : vector<16x32xf32>
    %15 = tpu.matmul %8, %14, %cst_17 {dimension_numbers = #tpu.dot_dimension_numbers<[1], [0], [0], [1], [0, 0, 1, 1], [], []>} : vector<16x4xf32>, vector<4x32xf32>, vector<16x32xf32> -> vector<16x32xf32>
    %16 = arith.addf %13, %15 : vector<16x32xf32>
    %c0_18 = arith.constant 0 : index
    %c0_19 = arith.constant 0 : index
    %c0_20 = arith.constant 0 : index
    %17 = vector.load %arg2[%c0_18, %c0_19, %c0_20] : memref<1x16x32xf32, #tpu.memory_space<vmem>>, vector<1x16x32xf32>
    %18 = vector.shape_cast %17 : vector<1x16x32xf32> to vector<16x32xf32>
    %19 = arith.addf %16, %18 : vector<16x32xf32>
    %c0_21 = arith.constant 0 : index
    %c0_22 = arith.constant 0 : index
    %c0_23 = arith.constant 0 : index
    %20 = vector.load %arg3[%c0_21, %c0_22, %c0_23] : memref<1x16x4xf32, #tpu.memory_space<vmem>>, vector<1x16x4xf32>
    %21 = vector.shape_cast %20 : vector<1x16x4xf32> to vector<16x4xf32>
    %c1_24 = arith.constant 1 : index
    %c0_25 = arith.constant 0 : index
    %22 = vector.load %arg9[%c1_24, %c0_25] : memref<18x96xf32, #tpu.memory_space<vmem>>, vector<16x4xf32>
    tpu.vector_store %arg9[%c1_24, %c0_25], %21 {strides = array<i32>} : memref<18x96xf32, #tpu.memory_space<vmem>>, vector<16x4xf32>,
    %c16_26 = arith.constant 16 : index
    %c0_27 = arith.constant 0 : index
    %23 = vector.load %arg9[%c16_26, %c0_27] : memref<18x96xf32, #tpu.memory_space<vmem>>, vector<1x4xf32>
    %c0_28 = arith.constant 0 : index
    %c0_29 = arith.constant 0 : index
    %24 = vector.load %arg9[%c0_28, %c0_29] : memref<18x96xf32, #tpu.memory_space<vmem>>, vector<1x4xf32>
    tpu.vector_store %arg9[%c0_28, %c0_29], %23 {strides = array<i32>} : memref<18x96xf32, #tpu.memory_space<vmem>>, vector<1x4xf32>,
    %c1_30 = arith.constant 1 : index
    %c0_31 = arith.constant 0 : index
    %25 = vector.load %arg9[%c1_30, %c0_31] : memref<18x96xf32, #tpu.memory_space<vmem>>, vector<1x4xf32>
    %c17_32 = arith.constant 17 : index
    %c0_33 = arith.constant 0 : index
    %26 = vector.load %arg9[%c17_32, %c0_33] : memref<18x96xf32, #tpu.memory_space<vmem>>, vector<1x4xf32>
    tpu.vector_store %arg9[%c17_32, %c0_33], %25 {strides = array<i32>} : memref<18x96xf32, #tpu.memory_space<vmem>>, vector<1x4xf32>,
    %c0_34 = arith.constant 0 : index
    %c0_35 = arith.constant 0 : index
    %27 = vector.load %arg9[%c0_34, %c0_35] : memref<18x96xf32, #tpu.memory_space<vmem>>, vector<16x4xf32>
    %c2_36 = arith.constant 2 : index
    %c0_37 = arith.constant 0 : index
    %28 = vector.load %arg9[%c2_36, %c0_37] : memref<18x96xf32, #tpu.memory_space<vmem>>, vector<16x4xf32>
    %c12 = arith.constant 12 : index
    %c0_38 = arith.constant 0 : index
    %29 = vector.load %arg5[%c12, %c0_38] : memref<24x32xf32, #tpu.memory_space<vmem>>, vector<4x32xf32>
    %cst_39 = arith.constant dense<0.000000e+00> : vector<16x32xf32>
    %30 = tpu.matmul %27, %29, %cst_39 {dimension_numbers = #tpu.dot_dimension_numbers<[1], [0], [0], [1], [0, 0, 1, 1], [], []>} : vector<16x4xf32>, vector<4x32xf32>, vector<16x32xf32> -> vector<16x32xf32>
    %c16_40 = arith.constant 16 : index
    %c0_41 = arith.constant 0 : index
    %31 = vector.load %arg5[%c16_40, %c0_41] : memref<24x32xf32, #tpu.memory_space<vmem>>, vector<4x32xf32>
    %cst_42 = arith.constant dense<0.000000e+00> : vector<16x32xf32>
    %32 = tpu.matmul %21, %31, %cst_42 {dimension_numbers = #tpu.dot_dimension_numbers<[1], [0], [0], [1], [0, 0, 1, 1], [], []>} : vector<16x4xf32>, vector<4x32xf32>, vector<16x32xf32> -> vector<16x32xf32>
    %33 = arith.addf %30, %32 : vector<16x32xf32>
    %c20 = arith.constant 20 : index
    %c0_43 = arith.constant 0 : index
    %34 = vector.load %arg5[%c20, %c0_43] : memref<24x32xf32, #tpu.memory_space<vmem>>, vector<4x32xf32>
    %cst_44 = arith.constant dense<0.000000e+00> : vector<16x32xf32>
    %35 = tpu.matmul %28, %34, %cst_44 {dimension_numbers = #tpu.dot_dimension_numbers<[1], [0], [0], [1], [0, 0, 1, 1], [], []>} : vector<16x4xf32>, vector<4x32xf32>, vector<16x32xf32> -> vector<16x32xf32>
    %36 = arith.addf %33, %35 : vector<16x32xf32>
    %c0_45 = arith.constant 0 : index
    %c0_46 = arith.constant 0 : index
    %c0_47 = arith.constant 0 : index
    %37 = vector.load %arg4[%c0_45, %c0_46, %c0_47] : memref<1x16x32xf32, #tpu.memory_space<vmem>>, vector<1x16x32xf32>
    %38 = vector.shape_cast %37 : vector<1x16x32xf32> to vector<16x32xf32>
    %39 = arith.addf %36, %38 : vector<16x32xf32>
    %c0_48 = arith.constant 0 : index
    %c0_49 = arith.constant 0 : index
    %40 = vector.load %arg6[%c0_48, %c0_49] : memref<32x1920xf32, #tpu.memory_space<vmem>>, vector<32x96xf32>
    %c0_50 = arith.constant 0 : index
    %c0_51 = arith.constant 0 : index
    %41 = vector.load %arg7[%c0_50, %c0_51] : memref<32x128xf32, #tpu.memory_space<vmem>>, vector<1x96xf32>
    %cst_52 = arith.constant dense<0.000000e+00> : vector<16x96xf32>
    %42 = tpu.matmul %19, %40, %cst_52 {dimension_numbers = #tpu.dot_dimension_numbers<[1], [0], [0], [1], [0, 0, 1, 1], [], []>} : vector<16x32xf32>, vector<32x96xf32>, vector<16x96xf32> -> vector<16x96xf32>
    %43 = vector.broadcast %41 : vector<1x96xf32> to vector<16x96xf32>
    %44 = arith.addf %42, %43 : vector<16x96xf32>
    %c0_53 = arith.constant 0 : index
    %c0_54 = arith.constant 0 : index
    %45 = vector.load %arg9[%c0_53, %c0_54] : memref<18x96xf32, #tpu.memory_space<vmem>>, vector<16x96xf32>
    tpu.vector_store %arg9[%c0_53, %c0_54], %44 {strides = array<i32>} : memref<18x96xf32, #tpu.memory_space<vmem>>, vector<16x96xf32>,
    %c0_55 = arith.constant 0 : index
    %c0_56 = arith.constant 0 : index
    %46 = vector.load %arg9[%c0_55, %c0_56] : memref<18x96xf32, #tpu.memory_space<vmem>>, vector<16x8xf32>
    %c0_57 = arith.constant 0 : index
    %c32 = arith.constant 32 : index
    %47 = vector.load %arg9[%c0_57, %c32] : memref<18x96xf32, #tpu.memory_space<vmem>>, vector<16x8xf32>
    %c0_58 = arith.constant 0 : index
    %c64 = arith.constant 64 : index
    %48 = vector.load %arg9[%c0_58, %c64] : memref<18x96xf32, #tpu.memory_space<vmem>>, vector<16x8xf32>
    %cst_59 = arith.constant dense<0.000000e+00> : vector<16x16xf32>
    %49 = tpu.matmul %46, %47, %cst_59 {dimension_numbers = #tpu.dot_dimension_numbers<[1], [1], [0], [0], [0, 0, 1, 0], [], []>} : vector<16x8xf32>, vector<16x8xf32>, vector<16x16xf32> -> vector<16x16xf32>
    %cst_60 = arith.constant 0.353553385 : f32
    %50 = vector.broadcast %cst_60 : f32 to vector<16x16xf32>
    %51 = arith.mulf %49, %50 : vector<16x16xf32>
    %cst_61 = arith.constant dense<0xFF800000> : vector<16xf32>
    %52 = vector.multi_reduction <maximumf>, %51, %cst_61 [1] : vector<16x16xf32> to vector<16xf32>
    %53 = vector.shape_cast %52 : vector<16xf32> to vector<16x1xf32>
    %54 = vector.broadcast %53 : vector<16x1xf32> to vector<16x16xf32>
    %55 = arith.subf %51, %54 : vector<16x16xf32>
    %56 = math.exp %55 : vector<16x16xf32>
    %cst_62 = arith.constant dense<0.000000e+00> : vector<16xf32>
    %57 = vector.multi_reduction <add>, %56, %cst_62 [1] : vector<16x16xf32> to vector<16xf32>
    %58 = vector.shape_cast %57 : vector<16xf32> to vector<16x1xf32>
    %59 = tpu.reciprocal %58 : vector<16x1xf32> -> vector<16x1xf32>
    %60 = vector.broadcast %59 : vector<16x1xf32> to vector<16x16xf32>
    %61 = arith.mulf %56, %60 : vector<16x16xf32>
    %cst_63 = arith.constant dense<0.000000e+00> : vector<16x8xf32>
    %62 = tpu.matmul %61, %48, %cst_63 {dimension_numbers = #tpu.dot_dimension_numbers<[1], [0], [0], [1], [0, 0, 1, 1], [], []>} : vector<16x16xf32>, vector<16x8xf32>, vector<16x8xf32> -> vector<16x8xf32>
    %c0_64 = arith.constant 0 : index
    %c96 = arith.constant 96 : index
    %63 = vector.load %arg6[%c0_64, %c96] : memref<32x1920xf32, #tpu.memory_space<vmem>>, vector<8x32xf32>
    %cst_65 = arith.constant dense<0.000000e+00> : vector<16x32xf32>
    %64 = tpu.matmul %62, %63, %cst_65 {dimension_numbers = #tpu.dot_dimension_numbers<[1], [0], [0], [1], [0, 0, 1, 1], [], []>} : vector<16x8xf32>, vector<8x32xf32>, vector<16x32xf32> -> vector<16x32xf32>
    %c0_66 = arith.constant 0 : index
    %c8_67 = arith.constant 8 : index
    %65 = vector.load %arg9[%c0_66, %c8_67] : memref<18x96xf32, #tpu.memory_space<vmem>>, vector<16x8xf32>
    %c0_68 = arith.constant 0 : index
    %c40 = arith.constant 40 : index
    %66 = vector.load %arg9[%c0_68, %c40] : memref<18x96xf32, #tpu.memory_space<vmem>>, vector<16x8xf32>
    %c0_69 = arith.constant 0 : index
    %c72 = arith.constant 72 : index
    %67 = vector.load %arg9[%c0_69, %c72] : memref<18x96xf32, #tpu.memory_space<vmem>>, vector<16x8xf32>
    %cst_70 = arith.constant dense<0.000000e+00> : vector<16x16xf32>
    %68 = tpu.matmul %65, %66, %cst_70 {dimension_numbers = #tpu.dot_dimension_numbers<[1], [1], [0], [0], [0, 0, 1, 0], [], []>} : vector<16x8xf32>, vector<16x8xf32>, vector<16x16xf32> -> vector<16x16xf32>
    %cst_71 = arith.constant 0.353553385 : f32
    %69 = vector.broadcast %cst_71 : f32 to vector<16x16xf32>
    %70 = arith.mulf %68, %69 : vector<16x16xf32>
    %cst_72 = arith.constant dense<0xFF800000> : vector<16xf32>
    %71 = vector.multi_reduction <maximumf>, %70, %cst_72 [1] : vector<16x16xf32> to vector<16xf32>
    %72 = vector.shape_cast %71 : vector<16xf32> to vector<16x1xf32>
    %73 = vector.broadcast %72 : vector<16x1xf32> to vector<16x16xf32>
    %74 = arith.subf %70, %73 : vector<16x16xf32>
    %75 = math.exp %74 : vector<16x16xf32>
    %cst_73 = arith.constant dense<0.000000e+00> : vector<16xf32>
    %76 = vector.multi_reduction <add>, %75, %cst_73 [1] : vector<16x16xf32> to vector<16xf32>
    %77 = vector.shape_cast %76 : vector<16xf32> to vector<16x1xf32>
    %78 = tpu.reciprocal %77 : vector<16x1xf32> -> vector<16x1xf32>
    %79 = vector.broadcast %78 : vector<16x1xf32> to vector<16x16xf32>
    %80 = arith.mulf %75, %79 : vector<16x16xf32>
    %cst_74 = arith.constant dense<0.000000e+00> : vector<16x8xf32>
    %81 = tpu.matmul %80, %67, %cst_74 {dimension_numbers = #tpu.dot_dimension_numbers<[1], [0], [0], [1], [0, 0, 1, 1], [], []>} : vector<16x16xf32>, vector<16x8xf32>, vector<16x8xf32> -> vector<16x8xf32>
    %c8_75 = arith.constant 8 : index
    %c96_76 = arith.constant 96 : index
    %82 = vector.load %arg6[%c8_75, %c96_76] : memref<32x1920xf32, #tpu.memory_space<vmem>>, vector<8x32xf32>
    %cst_77 = arith.constant dense<0.000000e+00> : vector<16x32xf32>
    %83 = tpu.matmul %81, %82, %cst_77 {dimension_numbers = #tpu.dot_dimension_numbers<[1], [0], [0], [1], [0, 0, 1, 1], [], []>} : vector<16x8xf32>, vector<8x32xf32>, vector<16x32xf32> -> vector<16x32xf32>
    %84 = arith.addf %64, %83 : vector<16x32xf32>
    %c0_78 = arith.constant 0 : index
    %c16_79 = arith.constant 16 : index
    %85 = vector.load %arg9[%c0_78, %c16_79] : memref<18x96xf32, #tpu.memory_space<vmem>>, vector<16x8xf32>
    %c0_80 = arith.constant 0 : index
    %c48 = arith.constant 48 : index
    %86 = vector.load %arg9[%c0_80, %c48] : memref<18x96xf32, #tpu.memory_space<vmem>>, vector<16x8xf32>
    %c0_81 = arith.constant 0 : index
    %c80 = arith.constant 80 : index
    %87 = vector.load %arg9[%c0_81, %c80] : memref<18x96xf32, #tpu.memory_space<vmem>>, vector<16x8xf32>
    %cst_82 = arith.constant dense<0.000000e+00> : vector<16x16xf32>
    %88 = tpu.matmul %85, %86, %cst_82 {dimension_numbers = #tpu.dot_dimension_numbers<[1], [1], [0], [0], [0, 0, 1, 0], [], []>} : vector<16x8xf32>, vector<16x8xf32>, vector<16x16xf32> -> vector<16x16xf32>
    %cst_83 = arith.constant 0.353553385 : f32
    %89 = vector.broadcast %cst_83 : f32 to vector<16x16xf32>
    %90 = arith.mulf %88, %89 : vector<16x16xf32>
    %cst_84 = arith.constant dense<0xFF800000> : vector<16xf32>
    %91 = vector.multi_reduction <maximumf>, %90, %cst_84 [1] : vector<16x16xf32> to vector<16xf32>
    %92 = vector.shape_cast %91 : vector<16xf32> to vector<16x1xf32>
    %93 = vector.broadcast %92 : vector<16x1xf32> to vector<16x16xf32>
    %94 = arith.subf %90, %93 : vector<16x16xf32>
    %95 = math.exp %94 : vector<16x16xf32>
    %cst_85 = arith.constant dense<0.000000e+00> : vector<16xf32>
    %96 = vector.multi_reduction <add>, %95, %cst_85 [1] : vector<16x16xf32> to vector<16xf32>
    %97 = vector.shape_cast %96 : vector<16xf32> to vector<16x1xf32>
    %98 = tpu.reciprocal %97 : vector<16x1xf32> -> vector<16x1xf32>
    %99 = vector.broadcast %98 : vector<16x1xf32> to vector<16x16xf32>
    %100 = arith.mulf %95, %99 : vector<16x16xf32>
    %cst_86 = arith.constant dense<0.000000e+00> : vector<16x8xf32>
    %101 = tpu.matmul %100, %87, %cst_86 {dimension_numbers = #tpu.dot_dimension_numbers<[1], [0], [0], [1], [0, 0, 1, 1], [], []>} : vector<16x16xf32>, vector<16x8xf32>, vector<16x8xf32> -> vector<16x8xf32>
    %c16_87 = arith.constant 16 : index
    %c96_88 = arith.constant 96 : index
    %102 = vector.load %arg6[%c16_87, %c96_88] : memref<32x1920xf32, #tpu.memory_space<vmem>>, vector<8x32xf32>
    %cst_89 = arith.constant dense<0.000000e+00> : vector<16x32xf32>
    %103 = tpu.matmul %101, %102, %cst_89 {dimension_numbers = #tpu.dot_dimension_numbers<[1], [0], [0], [1], [0, 0, 1, 1], [], []>} : vector<16x8xf32>, vector<8x32xf32>, vector<16x32xf32> -> vector<16x32xf32>
    %104 = arith.addf %84, %103 : vector<16x32xf32>
    %c0_90 = arith.constant 0 : index
    %c24 = arith.constant 24 : index
    %105 = vector.load %arg9[%c0_90, %c24] : memref<18x96xf32, #tpu.memory_space<vmem>>, vector<16x8xf32>
    %c0_91 = arith.constant 0 : index
    %c56 = arith.constant 56 : index
    %106 = vector.load %arg9[%c0_91, %c56] : memref<18x96xf32, #tpu.memory_space<vmem>>, vector<16x8xf32>
    %c0_92 = arith.constant 0 : index
    %c88 = arith.constant 88 : index
    %107 = vector.load %arg9[%c0_92, %c88] : memref<18x96xf32, #tpu.memory_space<vmem>>, vector<16x8xf32>
    %cst_93 = arith.constant dense<0.000000e+00> : vector<16x16xf32>
    %108 = tpu.matmul %105, %106, %cst_93 {dimension_numbers = #tpu.dot_dimension_numbers<[1], [1], [0], [0], [0, 0, 1, 0], [], []>} : vector<16x8xf32>, vector<16x8xf32>, vector<16x16xf32> -> vector<16x16xf32>
    %cst_94 = arith.constant 0.353553385 : f32
    %109 = vector.broadcast %cst_94 : f32 to vector<16x16xf32>
    %110 = arith.mulf %108, %109 : vector<16x16xf32>
    %cst_95 = arith.constant dense<0xFF800000> : vector<16xf32>
    %111 = vector.multi_reduction <maximumf>, %110, %cst_95 [1] : vector<16x16xf32> to vector<16xf32>
    %112 = vector.shape_cast %111 : vector<16xf32> to vector<16x1xf32>
    %113 = vector.broadcast %112 : vector<16x1xf32> to vector<16x16xf32>
    %114 = arith.subf %110, %113 : vector<16x16xf32>
    %115 = math.exp %114 : vector<16x16xf32>
    %cst_96 = arith.constant dense<0.000000e+00> : vector<16xf32>
    %116 = vector.multi_reduction <add>, %115, %cst_96 [1] : vector<16x16xf32> to vector<16xf32>
    %117 = vector.shape_cast %116 : vector<16xf32> to vector<16x1xf32>
    %118 = tpu.reciprocal %117 : vector<16x1xf32> -> vector<16x1xf32>
    %119 = vector.broadcast %118 : vector<16x1xf32> to vector<16x16xf32>
    %120 = arith.mulf %115, %119 : vector<16x16xf32>
    %cst_97 = arith.constant dense<0.000000e+00> : vector<16x8xf32>
    %121 = tpu.matmul %120, %107, %cst_97 {dimension_numbers = #tpu.dot_dimension_numbers<[1], [0], [0], [1], [0, 0, 1, 1], [], []>} : vector<16x16xf32>, vector<16x8xf32>, vector<16x8xf32> -> vector<16x8xf32>
    %c24_98 = arith.constant 24 : index
    %c96_99 = arith.constant 96 : index
    %122 = vector.load %arg6[%c24_98, %c96_99] : memref<32x1920xf32, #tpu.memory_space<vmem>>, vector<8x32xf32>
    %cst_100 = arith.constant dense<0.000000e+00> : vector<16x32xf32>
    %123 = tpu.matmul %121, %122, %cst_100 {dimension_numbers = #tpu.dot_dimension_numbers<[1], [0], [0], [1], [0, 0, 1, 1], [], []>} : vector<16x8xf32>, vector<8x32xf32>, vector<16x32xf32> -> vector<16x32xf32>
    %124 = arith.addf %104, %123 : vector<16x32xf32>
    %c0_101 = arith.constant 0 : index
    %c96_102 = arith.constant 96 : index
    %125 = vector.load %arg7[%c0_101, %c96_102] : memref<32x128xf32, #tpu.memory_space<vmem>>, vector<1x32xf32>
    %126 = vector.broadcast %125 : vector<1x32xf32> to vector<16x32xf32>
    %127 = arith.addf %124, %126 : vector<16x32xf32>
    %128 = arith.addf %19, %127 : vector<16x32xf32>
    %c2_103 = arith.constant 2 : index
    %c0_104 = arith.constant 0 : index
    %129 = vector.load %arg7[%c2_103, %c0_104] : memref<32x128xf32, #tpu.memory_space<vmem>>, vector<1x32xf32>
    %c2_105 = arith.constant 2 : index
    %c32_106 = arith.constant 32 : index
    %130 = vector.load %arg7[%c2_105, %c32_106] : memref<32x128xf32, #tpu.memory_space<vmem>>, vector<1x32xf32>
    %cst_107 = arith.constant dense<0.000000e+00> : vector<16xf32>
    %131 = vector.multi_reduction <add>, %128, %cst_107 [1] : vector<16x32xf32> to vector<16xf32>
    %132 = vector.shape_cast %131 : vector<16xf32> to vector<16x1xf32>
    %cst_108 = arith.constant 3.200000e+01 : f32
    %133 = vector.broadcast %cst_108 : f32 to vector<16x1xf32>
    %134 = arith.divf %132, %133 : vector<16x1xf32>
    %135 = vector.broadcast %134 : vector<16x1xf32> to vector<16x32xf32>
    %136 = arith.subf %128, %135 : vector<16x32xf32>
    %137 = arith.mulf %136, %136 : vector<16x32xf32>
    %cst_109 = arith.constant dense<0.000000e+00> : vector<16xf32>
    %138 = vector.multi_reduction <add>, %137, %cst_109 [1] : vector<16x32xf32> to vector<16xf32>
    %139 = vector.shape_cast %138 : vector<16xf32> to vector<16x1xf32>
    %cst_110 = arith.constant 3.200000e+01 : f32
    %140 = vector.broadcast %cst_110 : f32 to vector<16x1xf32>
    %141 = arith.divf %139, %140 : vector<16x1xf32>
    %cst_111 = arith.constant 9.99999974E-6 : f32
    %142 = vector.broadcast %cst_111 : f32 to vector<16x1xf32>
    %143 = arith.addf %141, %142 : vector<16x1xf32>
    %144 = math.rsqrt %143 : vector<16x1xf32>
    %145 = vector.broadcast %144 : vector<16x1xf32> to vector<16x32xf32>
    %146 = arith.mulf %136, %145 : vector<16x32xf32>
    %147 = vector.broadcast %129 : vector<1x32xf32> to vector<16x32xf32>
    %148 = arith.mulf %146, %147 : vector<16x32xf32>
    %149 = vector.broadcast %130 : vector<1x32xf32> to vector<16x32xf32>
    %150 = arith.addf %148, %149 : vector<16x32xf32>
    %c0_112 = arith.constant 0 : index
    %c128 = arith.constant 128 : index
    %151 = vector.load %arg6[%c0_112, %c128] : memref<32x1920xf32, #tpu.memory_space<vmem>>, vector<32x32xf32>
    %c0_113 = arith.constant 0 : index
    %c160 = arith.constant 160 : index
    %152 = vector.load %arg6[%c0_113, %c160] : memref<32x1920xf32, #tpu.memory_space<vmem>>, vector<32x32xf32>
    %c1_114 = arith.constant 1 : index
    %c0_115 = arith.constant 0 : index
    %153 = vector.load %arg7[%c1_114, %c0_115] : memref<32x128xf32, #tpu.memory_space<vmem>>, vector<1x32xf32>
    %c1_116 = arith.constant 1 : index
    %c32_117 = arith.constant 32 : index
    %154 = vector.load %arg7[%c1_116, %c32_117] : memref<32x128xf32, #tpu.memory_space<vmem>>, vector<1x32xf32>
    %cst_118 = arith.constant dense<0.000000e+00> : vector<16x32xf32>
    %155 = tpu.matmul %150, %151, %cst_118 {dimension_numbers = #tpu.dot_dimension_numbers<[1], [0], [0], [1], [0, 0, 1, 1], [], []>} : vector<16x32xf32>, vector<32x32xf32>, vector<16x32xf32> -> vector<16x32xf32>
    %156 = vector.broadcast %153 : vector<1x32xf32> to vector<16x32xf32>
    %157 = arith.addf %155, %156 : vector<16x32xf32>
    %cst_119 = arith.constant 5.000000e-01 : f32
    %158 = vector.broadcast %cst_119 : f32 to vector<16x32xf32>
    %159 = arith.mulf %158, %157 : vector<16x32xf32>
    %cst_120 = arith.constant 0.707106769 : f32
    %160 = vector.broadcast %cst_120 : f32 to vector<16x32xf32>
    %161 = arith.mulf %157, %160 : vector<16x32xf32>
    %cst_121 = arith.constant 0.000000e+00 : f32
    %162 = vector.broadcast %cst_121 : f32 to vector<16x32xf32>
    %163 = arith.cmpf oge, %161, %162 : vector<16x32xf32>
    %cst_122 = arith.constant 1.000000e+00 : f32
    %cst_123 = arith.constant -1.000000e+00 : f32
    %164 = vector.broadcast %cst_122 : f32 to vector<16x32xf32>
    %165 = vector.broadcast %cst_123 : f32 to vector<16x32xf32>
    %166 = arith.select %163, %164, %165 : vector<16x32xi1>, vector<16x32xf32>
    %167 = math.absf %161 : vector<16x32xf32>
    %cst_124 = arith.constant 0.327591091 : f32
    %168 = vector.broadcast %cst_124 : f32 to vector<16x32xf32>
    %169 = arith.mulf %168, %167 : vector<16x32xf32>
    %cst_125 = arith.constant 1.000000e+00 : f32
    %170 = vector.broadcast %cst_125 : f32 to vector<16x32xf32>
    %171 = arith.addf %170, %169 : vector<16x32xf32>
    %cst_126 = arith.constant 1.000000e+00 : f32
    %172 = vector.broadcast %cst_126 : f32 to vector<16x32xf32>
    %173 = arith.divf %172, %171 : vector<16x32xf32>
    %cst_127 = arith.constant 1.06140542 : f32
    %174 = vector.broadcast %cst_127 : f32 to vector<16x32xf32>
    %175 = arith.mulf %173, %174 : vector<16x32xf32>
    %cst_128 = arith.constant -1.45315206 : f32
    %176 = vector.broadcast %cst_128 : f32 to vector<16x32xf32>
    %177 = arith.addf %176, %175 : vector<16x32xf32>
    %178 = arith.mulf %173, %177 : vector<16x32xf32>
    %cst_129 = arith.constant 1.42141378 : f32
    %179 = vector.broadcast %cst_129 : f32 to vector<16x32xf32>
    %180 = arith.addf %179, %178 : vector<16x32xf32>
    %181 = arith.mulf %173, %180 : vector<16x32xf32>
    %cst_130 = arith.constant -0.284496725 : f32
    %182 = vector.broadcast %cst_130 : f32 to vector<16x32xf32>
    %183 = arith.addf %182, %181 : vector<16x32xf32>
    %184 = arith.mulf %173, %183 : vector<16x32xf32>
    %cst_131 = arith.constant 0.254829586 : f32
    %185 = vector.broadcast %cst_131 : f32 to vector<16x32xf32>
    %186 = arith.addf %185, %184 : vector<16x32xf32>
    %187 = arith.mulf %173, %186 : vector<16x32xf32>
    %cst_132 = arith.constant 0.000000e+00 : f32
    %188 = vector.broadcast %cst_132 : f32 to vector<16x32xf32>
    %189 = arith.subf %188, %167 : vector<16x32xf32>
    %190 = arith.mulf %189, %167 : vector<16x32xf32>
    %191 = math.exp %190 : vector<16x32xf32>
    %192 = arith.mulf %187, %191 : vector<16x32xf32>
    %cst_133 = arith.constant 1.000000e+00 : f32
    %193 = vector.broadcast %cst_133 : f32 to vector<16x32xf32>
    %194 = arith.subf %193, %192 : vector<16x32xf32>
    %195 = arith.mulf %166, %194 : vector<16x32xf32>
    %cst_134 = arith.constant 1.000000e+00 : f32
    %196 = vector.broadcast %cst_134 : f32 to vector<16x32xf32>
    %197 = arith.addf %196, %195 : vector<16x32xf32>
    %198 = arith.mulf %159, %197 : vector<16x32xf32>
    %cst_135 = arith.constant dense<0.000000e+00> : vector<16x32xf32>
    %199 = tpu.matmul %198, %152, %cst_135 {dimension_numbers = #tpu.dot_dimension_numbers<[1], [0], [0], [1], [0, 0, 1, 1], [], []>} : vector<16x32xf32>, vector<32x32xf32>, vector<16x32xf32> -> vector<16x32xf32>
    %200 = vector.broadcast %154 : vector<1x32xf32> to vector<16x32xf32>
    %201 = arith.addf %199, %200 : vector<16x32xf32>
    %202 = arith.addf %150, %201 : vector<16x32xf32>
    %c3 = arith.constant 3 : index
    %c0_136 = arith.constant 0 : index
    %203 = vector.load %arg7[%c3, %c0_136] : memref<32x128xf32, #tpu.memory_space<vmem>>, vector<1x32xf32>
    %c3_137 = arith.constant 3 : index
    %c32_138 = arith.constant 32 : index
    %204 = vector.load %arg7[%c3_137, %c32_138] : memref<32x128xf32, #tpu.memory_space<vmem>>, vector<1x32xf32>
    %cst_139 = arith.constant dense<0.000000e+00> : vector<16xf32>
    %205 = vector.multi_reduction <add>, %202, %cst_139 [1] : vector<16x32xf32> to vector<16xf32>
    %206 = vector.shape_cast %205 : vector<16xf32> to vector<16x1xf32>
    %cst_140 = arith.constant 3.200000e+01 : f32
    %207 = vector.broadcast %cst_140 : f32 to vector<16x1xf32>
    %208 = arith.divf %206, %207 : vector<16x1xf32>
    %209 = vector.broadcast %208 : vector<16x1xf32> to vector<16x32xf32>
    %210 = arith.subf %202, %209 : vector<16x32xf32>
    %211 = arith.mulf %210, %210 : vector<16x32xf32>
    %cst_141 = arith.constant dense<0.000000e+00> : vector<16xf32>
    %212 = vector.multi_reduction <add>, %211, %cst_141 [1] : vector<16x32xf32> to vector<16xf32>
    %213 = vector.shape_cast %212 : vector<16xf32> to vector<16x1xf32>
    %cst_142 = arith.constant 3.200000e+01 : f32
    %214 = vector.broadcast %cst_142 : f32 to vector<16x1xf32>
    %215 = arith.divf %213, %214 : vector<16x1xf32>
    %cst_143 = arith.constant 9.99999974E-6 : f32
    %216 = vector.broadcast %cst_143 : f32 to vector<16x1xf32>
    %217 = arith.addf %215, %216 : vector<16x1xf32>
    %218 = math.rsqrt %217 : vector<16x1xf32>
    %219 = vector.broadcast %218 : vector<16x1xf32> to vector<16x32xf32>
    %220 = arith.mulf %210, %219 : vector<16x32xf32>
    %221 = vector.broadcast %203 : vector<1x32xf32> to vector<16x32xf32>
    %222 = arith.mulf %220, %221 : vector<16x32xf32>
    %223 = vector.broadcast %204 : vector<1x32xf32> to vector<16x32xf32>
    %224 = arith.addf %222, %223 : vector<16x32xf32>
    %c1_144 = arith.constant 1 : index
    %c0_145 = arith.constant 0 : index
    %225 = vector.load %arg9[%c1_144, %c0_145] : memref<18x96xf32, #tpu.memory_space<vmem>>, vector<16x32xf32>
    tpu.vector_store %arg9[%c1_144, %c0_145], %224 {strides = array<i32>} : memref<18x96xf32, #tpu.memory_space<vmem>>, vector<16x32xf32>,
    %c16_146 = arith.constant 16 : index
    %c0_147 = arith.constant 0 : index
    %226 = vector.load %arg9[%c16_146, %c0_147] : memref<18x96xf32, #tpu.memory_space<vmem>>, vector<1x32xf32>
    %c0_148 = arith.constant 0 : index
    %c0_149 = arith.constant 0 : index
    %227 = vector.load %arg9[%c0_148, %c0_149] : memref<18x96xf32, #tpu.memory_space<vmem>>, vector<1x32xf32>
    tpu.vector_store %arg9[%c0_148, %c0_149], %226 {strides = array<i32>} : memref<18x96xf32, #tpu.memory_space<vmem>>, vector<1x32xf32>,
    %c1_150 = arith.constant 1 : index
    %c0_151 = arith.constant 0 : index
    %228 = vector.load %arg9[%c1_150, %c0_151] : memref<18x96xf32, #tpu.memory_space<vmem>>, vector<1x32xf32>
    %c17_152 = arith.constant 17 : index
    %c0_153 = arith.constant 0 : index
    %229 = vector.load %arg9[%c17_152, %c0_153] : memref<18x96xf32, #tpu.memory_space<vmem>>, vector<1x32xf32>
    tpu.vector_store %arg9[%c17_152, %c0_153], %228 {strides = array<i32>} : memref<18x96xf32, #tpu.memory_space<vmem>>, vector<1x32xf32>,
    %c0_154 = arith.constant 0 : index
    %c0_155 = arith.constant 0 : index
    %230 = vector.load %arg9[%c0_154, %c0_155] : memref<18x96xf32, #tpu.memory_space<vmem>>, vector<16x32xf32>
    %c2_156 = arith.constant 2 : index
    %c0_157 = arith.constant 0 : index
    %231 = vector.load %arg9[%c2_156, %c0_157] : memref<18x96xf32, #tpu.memory_space<vmem>>, vector<16x32xf32>
    %c0_158 = arith.constant 0 : index
    %c768 = arith.constant 768 : index
    %232 = vector.load %arg6[%c0_158, %c768] : memref<32x1920xf32, #tpu.memory_space<vmem>>, vector<32x32xf32>
    %cst_159 = arith.constant dense<0.000000e+00> : vector<16x32xf32>
    %233 = tpu.matmul %230, %232, %cst_159 {dimension_numbers = #tpu.dot_dimension_numbers<[1], [0], [0], [1], [0, 0, 1, 1], [], []>} : vector<16x32xf32>, vector<32x32xf32>, vector<16x32xf32> -> vector<16x32xf32>
    %c0_160 = arith.constant 0 : index
    %c800 = arith.constant 800 : index
    %234 = vector.load %arg6[%c0_160, %c800] : memref<32x1920xf32, #tpu.memory_space<vmem>>, vector<32x32xf32>
    %cst_161 = arith.constant dense<0.000000e+00> : vector<16x32xf32>
    %235 = tpu.matmul %224, %234, %cst_161 {dimension_numbers = #tpu.dot_dimension_numbers<[1], [0], [0], [1], [0, 0, 1, 1], [], []>} : vector<16x32xf32>, vector<32x32xf32>, vector<16x32xf32> -> vector<16x32xf32>
    %236 = arith.addf %233, %235 : vector<16x32xf32>
    %c0_162 = arith.constant 0 : index
    %c832 = arith.constant 832 : index
    %237 = vector.load %arg6[%c0_162, %c832] : memref<32x1920xf32, #tpu.memory_space<vmem>>, vector<32x32xf32>
    %cst_163 = arith.constant dense<0.000000e+00> : vector<16x32xf32>
    %238 = tpu.matmul %231, %237, %cst_163 {dimension_numbers = #tpu.dot_dimension_numbers<[1], [0], [0], [1], [0, 0, 1, 1], [], []>} : vector<16x32xf32>, vector<32x32xf32>, vector<16x32xf32> -> vector<16x32xf32>
    %239 = arith.addf %236, %238 : vector<16x32xf32>
    %c13 = arith.constant 13 : index
    %c0_164 = arith.constant 0 : index
    %240 = vector.load %arg7[%c13, %c0_164] : memref<32x128xf32, #tpu.memory_space<vmem>>, vector<1x32xf32>
    %241 = vector.broadcast %240 : vector<1x32xf32> to vector<16x32xf32>
    %242 = arith.addf %239, %241 : vector<16x32xf32>
    %cst_165 = arith.constant 0.999994993 : f32
    %243 = vector.broadcast %cst_165 : f32 to vector<16x32xf32>
    %244 = arith.mulf %242, %243 : vector<16x32xf32>
    %cst_166 = arith.constant 0.000000e+00 : f32
    %245 = vector.broadcast %cst_166 : f32 to vector<16x32xf32>
    %246 = arith.cmpf ogt, %244, %245 : vector<16x32xf32>
    %cst_167 = arith.constant 0.000000e+00 : f32
    %247 = vector.broadcast %cst_167 : f32 to vector<16x32xf32>
    %248 = arith.minimumf %244, %247 : vector<16x32xf32>
    %249 = math.exp %248 : vector<16x32xf32>
    %cst_168 = arith.constant 1.000000e+00 : f32
    %250 = vector.broadcast %cst_168 : f32 to vector<16x32xf32>
    %251 = arith.subf %249, %250 : vector<16x32xf32>
    %252 = arith.select %246, %244, %251 : vector<16x32xi1>, vector<16x32xf32>
    %cst_169 = arith.constant -3.000000e+38 : f32
    %253 = vector.broadcast %cst_169 : f32 to vector<1x32xf32>
    %c1_170 = arith.constant 1 : index
    %c0_171 = arith.constant 0 : index
    %254 = vector.load %arg9[%c1_170, %c0_171] : memref<18x96xf32, #tpu.memory_space<vmem>>, vector<16x32xf32>
    tpu.vector_store %arg9[%c1_170, %c0_171], %252 {strides = array<i32>} : memref<18x96xf32, #tpu.memory_space<vmem>>, vector<16x32xf32>,
    %c0_172 = arith.constant 0 : index
    %c0_173 = arith.constant 0 : index
    %255 = vector.load %arg9[%c0_172, %c0_173] : memref<18x96xf32, #tpu.memory_space<vmem>>, vector<1x32xf32>
    tpu.vector_store %arg9[%c0_172, %c0_173], %253 {strides = array<i32>} : memref<18x96xf32, #tpu.memory_space<vmem>>, vector<1x32xf32>,
    %c17_174 = arith.constant 17 : index
    %c0_175 = arith.constant 0 : index
    %256 = vector.load %arg9[%c17_174, %c0_175] : memref<18x96xf32, #tpu.memory_space<vmem>>, vector<1x32xf32>
    tpu.vector_store %arg9[%c17_174, %c0_175], %253 {strides = array<i32>} : memref<18x96xf32, #tpu.memory_space<vmem>>, vector<1x32xf32>,
    %c0_176 = arith.constant 0 : index
    %c0_177 = arith.constant 0 : index
    %257 = vector.load %arg9[%c0_176, %c0_177] : memref<18x96xf32, #tpu.memory_space<vmem>>, vector<16x32xf32>
    %258 = arith.maximumf %257, %252 : vector<16x32xf32>
    %c2_178 = arith.constant 2 : index
    %c0_179 = arith.constant 0 : index
    %259 = vector.load %arg9[%c2_178, %c0_179] : memref<18x96xf32, #tpu.memory_space<vmem>>, vector<16x32xf32>
    %260 = arith.maximumf %258, %259 : vector<16x32xf32>
    %c0_180 = arith.constant 0 : index
    %c0_181 = arith.constant 0 : index
    %261 = vector.load %arg9[%c0_180, %c0_181] : memref<18x96xf32, #tpu.memory_space<vmem>>, vector<16x32xf32>
    tpu.vector_store %arg9[%c0_180, %c0_181], %260 {strides = array<i32>} : memref<18x96xf32, #tpu.memory_space<vmem>>, vector<16x32xf32>,
    %c0_182 = arith.constant 0 : index
    %c0_183 = arith.constant 0 : index
    %262 = tpu.strided_load %arg9[%c0_182, %c0_183] {strides = array<i32: 2, 1>} : memref<18x96xf32, #tpu.memory_space<vmem>>, vector<8x32xf32>
    %c0_184 = arith.constant 0 : index
    %c256 = arith.constant 256 : index
    %263 = vector.load %arg6[%c0_184, %c256] : memref<32x1920xf32, #tpu.memory_space<vmem>>, vector<32x96xf32>
    %c4_185 = arith.constant 4 : index
    %c0_186 = arith.constant 0 : index
    %264 = vector.load %arg7[%c4_185, %c0_186] : memref<32x128xf32, #tpu.memory_space<vmem>>, vector<1x96xf32>
    %cst_187 = arith.constant dense<0.000000e+00> : vector<8x96xf32>
    %265 = tpu.matmul %262, %263, %cst_187 {dimension_numbers = #tpu.dot_dimension_numbers<[1], [0], [0], [1], [0, 0, 1, 1], [], []>} : vector<8x32xf32>, vector<32x96xf32>, vector<8x96xf32> -> vector<8x96xf32>
    %266 = vector.broadcast %264 : vector<1x96xf32> to vector<8x96xf32>
    %267 = arith.addf %265, %266 : vector<8x96xf32>
    %c0_188 = arith.constant 0 : index
    %c0_189 = arith.constant 0 : index
    %268 = vector.load %arg9[%c0_188, %c0_189] : memref<18x96xf32, #tpu.memory_space<vmem>>, vector<8x96xf32>
    tpu.vector_store %arg9[%c0_188, %c0_189], %267 {strides = array<i32>} : memref<18x96xf32, #tpu.memory_space<vmem>>, vector<8x96xf32>,
    %c0_190 = arith.constant 0 : index
    %c0_191 = arith.constant 0 : index
    %269 = vector.load %arg9[%c0_190, %c0_191] : memref<18x96xf32, #tpu.memory_space<vmem>>, vector<8x8xf32>
    %c0_192 = arith.constant 0 : index
    %c32_193 = arith.constant 32 : index
    %270 = vector.load %arg9[%c0_192, %c32_193] : memref<18x96xf32, #tpu.memory_space<vmem>>, vector<8x8xf32>
    %c0_194 = arith.constant 0 : index
    %c64_195 = arith.constant 64 : index
    %271 = vector.load %arg9[%c0_194, %c64_195] : memref<18x96xf32, #tpu.memory_space<vmem>>, vector<8x8xf32>
    %cst_196 = arith.constant dense<0.000000e+00> : vector<8x8xf32>
    %272 = tpu.matmul %269, %270, %cst_196 {dimension_numbers = #tpu.dot_dimension_numbers<[1], [1], [0], [0], [0, 0, 1, 0], [], []>} : vector<8x8xf32>, vector<8x8xf32>, vector<8x8xf32> -> vector<8x8xf32>
    %cst_197 = arith.constant 0.353553385 : f32
    %273 = vector.broadcast %cst_197 : f32 to vector<8x8xf32>
    %274 = arith.mulf %272, %273 : vector<8x8xf32>
    %cst_198 = arith.constant dense<0xFF800000> : vector<8xf32>
    %275 = vector.multi_reduction <maximumf>, %274, %cst_198 [1] : vector<8x8xf32> to vector<8xf32>
    %276 = vector.shape_cast %275 : vector<8xf32> to vector<8x1xf32>
    %277 = vector.broadcast %276 : vector<8x1xf32> to vector<8x8xf32>
    %278 = arith.subf %274, %277 : vector<8x8xf32>
    %279 = math.exp %278 : vector<8x8xf32>
    %cst_199 = arith.constant dense<0.000000e+00> : vector<8xf32>
    %280 = vector.multi_reduction <add>, %279, %cst_199 [1] : vector<8x8xf32> to vector<8xf32>
    %281 = vector.shape_cast %280 : vector<8xf32> to vector<8x1xf32>
    %282 = tpu.reciprocal %281 : vector<8x1xf32> -> vector<8x1xf32>
    %283 = vector.broadcast %282 : vector<8x1xf32> to vector<8x8xf32>
    %284 = arith.mulf %279, %283 : vector<8x8xf32>
    %cst_200 = arith.constant dense<0.000000e+00> : vector<8x8xf32>
    %285 = tpu.matmul %284, %271, %cst_200 {dimension_numbers = #tpu.dot_dimension_numbers<[1], [0], [0], [1], [0, 0, 1, 1], [], []>} : vector<8x8xf32>, vector<8x8xf32>, vector<8x8xf32> -> vector<8x8xf32>
    %c0_201 = arith.constant 0 : index
    %c352 = arith.constant 352 : index
    %286 = vector.load %arg6[%c0_201, %c352] : memref<32x1920xf32, #tpu.memory_space<vmem>>, vector<8x32xf32>
    %cst_202 = arith.constant dense<0.000000e+00> : vector<8x32xf32>
    %287 = tpu.matmul %285, %286, %cst_202 {dimension_numbers = #tpu.dot_dimension_numbers<[1], [0], [0], [1], [0, 0, 1, 1], [], []>} : vector<8x8xf32>, vector<8x32xf32>, vector<8x32xf32> -> vector<8x32xf32>
    %c0_203 = arith.constant 0 : index
    %c8_204 = arith.constant 8 : index
    %288 = vector.load %arg9[%c0_203, %c8_204] : memref<18x96xf32, #tpu.memory_space<vmem>>, vector<8x8xf32>
    %c0_205 = arith.constant 0 : index
    %c40_206 = arith.constant 40 : index
    %289 = vector.load %arg9[%c0_205, %c40_206] : memref<18x96xf32, #tpu.memory_space<vmem>>, vector<8x8xf32>
    %c0_207 = arith.constant 0 : index
    %c72_208 = arith.constant 72 : index
    %290 = vector.load %arg9[%c0_207, %c72_208] : memref<18x96xf32, #tpu.memory_space<vmem>>, vector<8x8xf32>
    %cst_209 = arith.constant dense<0.000000e+00> : vector<8x8xf32>
    %291 = tpu.matmul %288, %289, %cst_209 {dimension_numbers = #tpu.dot_dimension_numbers<[1], [1], [0], [0], [0, 0, 1, 0], [], []>} : vector<8x8xf32>, vector<8x8xf32>, vector<8x8xf32> -> vector<8x8xf32>
    %cst_210 = arith.constant 0.353553385 : f32
    %292 = vector.broadcast %cst_210 : f32 to vector<8x8xf32>
    %293 = arith.mulf %291, %292 : vector<8x8xf32>
    %cst_211 = arith.constant dense<0xFF800000> : vector<8xf32>
    %294 = vector.multi_reduction <maximumf>, %293, %cst_211 [1] : vector<8x8xf32> to vector<8xf32>
    %295 = vector.shape_cast %294 : vector<8xf32> to vector<8x1xf32>
    %296 = vector.broadcast %295 : vector<8x1xf32> to vector<8x8xf32>
    %297 = arith.subf %293, %296 : vector<8x8xf32>
    %298 = math.exp %297 : vector<8x8xf32>
    %cst_212 = arith.constant dense<0.000000e+00> : vector<8xf32>
    %299 = vector.multi_reduction <add>, %298, %cst_212 [1] : vector<8x8xf32> to vector<8xf32>
    %300 = vector.shape_cast %299 : vector<8xf32> to vector<8x1xf32>
    %301 = tpu.reciprocal %300 : vector<8x1xf32> -> vector<8x1xf32>
    %302 = vector.broadcast %301 : vector<8x1xf32> to vector<8x8xf32>
    %303 = arith.mulf %298, %302 : vector<8x8xf32>
    %cst_213 = arith.constant dense<0.000000e+00> : vector<8x8xf32>
    %304 = tpu.matmul %303, %290, %cst_213 {dimension_numbers = #tpu.dot_dimension_numbers<[1], [0], [0], [1], [0, 0, 1, 1], [], []>} : vector<8x8xf32>, vector<8x8xf32>, vector<8x8xf32> -> vector<8x8xf32>
    %c8_214 = arith.constant 8 : index
    %c352_215 = arith.constant 352 : index
    %305 = vector.load %arg6[%c8_214, %c352_215] : memref<32x1920xf32, #tpu.memory_space<vmem>>, vector<8x32xf32>
    %cst_216 = arith.constant dense<0.000000e+00> : vector<8x32xf32>
    %306 = tpu.matmul %304, %305, %cst_216 {dimension_numbers = #tpu.dot_dimension_numbers<[1], [0], [0], [1], [0, 0, 1, 1], [], []>} : vector<8x8xf32>, vector<8x32xf32>, vector<8x32xf32> -> vector<8x32xf32>
    %307 = arith.addf %287, %306 : vector<8x32xf32>
    %c0_217 = arith.constant 0 : index
    %c16_218 = arith.constant 16 : index
    %308 = vector.load %arg9[%c0_217, %c16_218] : memref<18x96xf32, #tpu.memory_space<vmem>>, vector<8x8xf32>
    %c0_219 = arith.constant 0 : index
    %c48_220 = arith.constant 48 : index
    %309 = vector.load %arg9[%c0_219, %c48_220] : memref<18x96xf32, #tpu.memory_space<vmem>>, vector<8x8xf32>
    %c0_221 = arith.constant 0 : index
    %c80_222 = arith.constant 80 : index
    %310 = vector.load %arg9[%c0_221, %c80_222] : memref<18x96xf32, #tpu.memory_space<vmem>>, vector<8x8xf32>
    %cst_223 = arith.constant dense<0.000000e+00> : vector<8x8xf32>
    %311 = tpu.matmul %308, %309, %cst_223 {dimension_numbers = #tpu.dot_dimension_numbers<[1], [1], [0], [0], [0, 0, 1, 0], [], []>} : vector<8x8xf32>, vector<8x8xf32>, vector<8x8xf32> -> vector<8x8xf32>
    %cst_224 = arith.constant 0.353553385 : f32
    %312 = vector.broadcast %cst_224 : f32 to vector<8x8xf32>
    %313 = arith.mulf %311, %312 : vector<8x8xf32>
    %cst_225 = arith.constant dense<0xFF800000> : vector<8xf32>
    %314 = vector.multi_reduction <maximumf>, %313, %cst_225 [1] : vector<8x8xf32> to vector<8xf32>
    %315 = vector.shape_cast %314 : vector<8xf32> to vector<8x1xf32>
    %316 = vector.broadcast %315 : vector<8x1xf32> to vector<8x8xf32>
    %317 = arith.subf %313, %316 : vector<8x8xf32>
    %318 = math.exp %317 : vector<8x8xf32>
    %cst_226 = arith.constant dense<0.000000e+00> : vector<8xf32>
    %319 = vector.multi_reduction <add>, %318, %cst_226 [1] : vector<8x8xf32> to vector<8xf32>
    %320 = vector.shape_cast %319 : vector<8xf32> to vector<8x1xf32>
    %321 = tpu.reciprocal %320 : vector<8x1xf32> -> vector<8x1xf32>
    %322 = vector.broadcast %321 : vector<8x1xf32> to vector<8x8xf32>
    %323 = arith.mulf %318, %322 : vector<8x8xf32>
    %cst_227 = arith.constant dense<0.000000e+00> : vector<8x8xf32>
    %324 = tpu.matmul %323, %310, %cst_227 {dimension_numbers = #tpu.dot_dimension_numbers<[1], [0], [0], [1], [0, 0, 1, 1], [], []>} : vector<8x8xf32>, vector<8x8xf32>, vector<8x8xf32> -> vector<8x8xf32>
    %c16_228 = arith.constant 16 : index
    %c352_229 = arith.constant 352 : index
    %325 = vector.load %arg6[%c16_228, %c352_229] : memref<32x1920xf32, #tpu.memory_space<vmem>>, vector<8x32xf32>
    %cst_230 = arith.constant dense<0.000000e+00> : vector<8x32xf32>
    %326 = tpu.matmul %324, %325, %cst_230 {dimension_numbers = #tpu.dot_dimension_numbers<[1], [0], [0], [1], [0, 0, 1, 1], [], []>} : vector<8x8xf32>, vector<8x32xf32>, vector<8x32xf32> -> vector<8x32xf32>
    %327 = arith.addf %307, %326 : vector<8x32xf32>
    %c0_231 = arith.constant 0 : index
    %c24_232 = arith.constant 24 : index
    %328 = vector.load %arg9[%c0_231, %c24_232] : memref<18x96xf32, #tpu.memory_space<vmem>>, vector<8x8xf32>
    %c0_233 = arith.constant 0 : index
    %c56_234 = arith.constant 56 : index
    %329 = vector.load %arg9[%c0_233, %c56_234] : memref<18x96xf32, #tpu.memory_space<vmem>>, vector<8x8xf32>
    %c0_235 = arith.constant 0 : index
    %c88_236 = arith.constant 88 : index
    %330 = vector.load %arg9[%c0_235, %c88_236] : memref<18x96xf32, #tpu.memory_space<vmem>>, vector<8x8xf32>
    %cst_237 = arith.constant dense<0.000000e+00> : vector<8x8xf32>
    %331 = tpu.matmul %328, %329, %cst_237 {dimension_numbers = #tpu.dot_dimension_numbers<[1], [1], [0], [0], [0, 0, 1, 0], [], []>} : vector<8x8xf32>, vector<8x8xf32>, vector<8x8xf32> -> vector<8x8xf32>
    %cst_238 = arith.constant 0.353553385 : f32
    %332 = vector.broadcast %cst_238 : f32 to vector<8x8xf32>
    %333 = arith.mulf %331, %332 : vector<8x8xf32>
    %cst_239 = arith.constant dense<0xFF800000> : vector<8xf32>
    %334 = vector.multi_reduction <maximumf>, %333, %cst_239 [1] : vector<8x8xf32> to vector<8xf32>
    %335 = vector.shape_cast %334 : vector<8xf32> to vector<8x1xf32>
    %336 = vector.broadcast %335 : vector<8x1xf32> to vector<8x8xf32>
    %337 = arith.subf %333, %336 : vector<8x8xf32>
    %338 = math.exp %337 : vector<8x8xf32>
    %cst_240 = arith.constant dense<0.000000e+00> : vector<8xf32>
    %339 = vector.multi_reduction <add>, %338, %cst_240 [1] : vector<8x8xf32> to vector<8xf32>
    %340 = vector.shape_cast %339 : vector<8xf32> to vector<8x1xf32>
    %341 = tpu.reciprocal %340 : vector<8x1xf32> -> vector<8x1xf32>
    %342 = vector.broadcast %341 : vector<8x1xf32> to vector<8x8xf32>
    %343 = arith.mulf %338, %342 : vector<8x8xf32>
    %cst_241 = arith.constant dense<0.000000e+00> : vector<8x8xf32>
    %344 = tpu.matmul %343, %330, %cst_241 {dimension_numbers = #tpu.dot_dimension_numbers<[1], [0], [0], [1], [0, 0, 1, 1], [], []>} : vector<8x8xf32>, vector<8x8xf32>, vector<8x8xf32> -> vector<8x8xf32>
    %c24_242 = arith.constant 24 : index
    %c352_243 = arith.constant 352 : index
    %345 = vector.load %arg6[%c24_242, %c352_243] : memref<32x1920xf32, #tpu.memory_space<vmem>>, vector<8x32xf32>
    %cst_244 = arith.constant dense<0.000000e+00> : vector<8x32xf32>
    %346 = tpu.matmul %344, %345, %cst_244 {dimension_numbers = #tpu.dot_dimension_numbers<[1], [0], [0], [1], [0, 0, 1, 1], [], []>} : vector<8x8xf32>, vector<8x32xf32>, vector<8x32xf32> -> vector<8x32xf32>
    %347 = arith.addf %327, %346 : vector<8x32xf32>
    %c4_245 = arith.constant 4 : index
    %c96_246 = arith.constant 96 : index
    %348 = vector.load %arg7[%c4_245, %c96_246] : memref<32x128xf32, #tpu.memory_space<vmem>>, vector<1x32xf32>
    %349 = vector.broadcast %348 : vector<1x32xf32> to vector<8x32xf32>
    %350 = arith.addf %347, %349 : vector<8x32xf32>
    %351 = arith.addf %262, %350 : vector<8x32xf32>
    %c6 = arith.constant 6 : index
    %c0_247 = arith.constant 0 : index
    %352 = vector.load %arg7[%c6, %c0_247] : memref<32x128xf32, #tpu.memory_space<vmem>>, vector<1x32xf32>
    %c6_248 = arith.constant 6 : index
    %c32_249 = arith.constant 32 : index
    %353 = vector.load %arg7[%c6_248, %c32_249] : memref<32x128xf32, #tpu.memory_space<vmem>>, vector<1x32xf32>
    %cst_250 = arith.constant dense<0.000000e+00> : vector<8xf32>
    %354 = vector.multi_reduction <add>, %351, %cst_250 [1] : vector<8x32xf32> to vector<8xf32>
    %355 = vector.shape_cast %354 : vector<8xf32> to vector<8x1xf32>
    %cst_251 = arith.constant 3.200000e+01 : f32
    %356 = vector.broadcast %cst_251 : f32 to vector<8x1xf32>
    %357 = arith.divf %355, %356 : vector<8x1xf32>
    %358 = vector.broadcast %357 : vector<8x1xf32> to vector<8x32xf32>
    %359 = arith.subf %351, %358 : vector<8x32xf32>
    %360 = arith.mulf %359, %359 : vector<8x32xf32>
    %cst_252 = arith.constant dense<0.000000e+00> : vector<8xf32>
    %361 = vector.multi_reduction <add>, %360, %cst_252 [1] : vector<8x32xf32> to vector<8xf32>
    %362 = vector.shape_cast %361 : vector<8xf32> to vector<8x1xf32>
    %cst_253 = arith.constant 3.200000e+01 : f32
    %363 = vector.broadcast %cst_253 : f32 to vector<8x1xf32>
    %364 = arith.divf %362, %363 : vector<8x1xf32>
    %cst_254 = arith.constant 9.99999974E-6 : f32
    %365 = vector.broadcast %cst_254 : f32 to vector<8x1xf32>
    %366 = arith.addf %364, %365 : vector<8x1xf32>
    %367 = math.rsqrt %366 : vector<8x1xf32>
    %368 = vector.broadcast %367 : vector<8x1xf32> to vector<8x32xf32>
    %369 = arith.mulf %359, %368 : vector<8x32xf32>
    %370 = vector.broadcast %352 : vector<1x32xf32> to vector<8x32xf32>
    %371 = arith.mulf %369, %370 : vector<8x32xf32>
    %372 = vector.broadcast %353 : vector<1x32xf32> to vector<8x32xf32>
    %373 = arith.addf %371, %372 : vector<8x32xf32>
    %c0_255 = arith.constant 0 : index
    %c384 = arith.constant 384 : index
    %374 = vector.load %arg6[%c0_255, %c384] : memref<32x1920xf32, #tpu.memory_space<vmem>>, vector<32x32xf32>
    %c0_256 = arith.constant 0 : index
    %c416 = arith.constant 416 : index
    %375 = vector.load %arg6[%c0_256, %c416] : memref<32x1920xf32, #tpu.memory_space<vmem>>, vector<32x32xf32>
    %c5 = arith.constant 5 : index
    %c0_257 = arith.constant 0 : index
    %376 = vector.load %arg7[%c5, %c0_257] : memref<32x128xf32, #tpu.memory_space<vmem>>, vector<1x32xf32>
    %c5_258 = arith.constant 5 : index
    %c32_259 = arith.constant 32 : index
    %377 = vector.load %arg7[%c5_258, %c32_259] : memref<32x128xf32, #tpu.memory_space<vmem>>, vector<1x32xf32>
    %cst_260 = arith.constant dense<0.000000e+00> : vector<8x32xf32>
    %378 = tpu.matmul %373, %374, %cst_260 {dimension_numbers = #tpu.dot_dimension_numbers<[1], [0], [0], [1], [0, 0, 1, 1], [], []>} : vector<8x32xf32>, vector<32x32xf32>, vector<8x32xf32> -> vector<8x32xf32>
    %379 = vector.broadcast %376 : vector<1x32xf32> to vector<8x32xf32>
    %380 = arith.addf %378, %379 : vector<8x32xf32>
    %cst_261 = arith.constant 5.000000e-01 : f32
    %381 = vector.broadcast %cst_261 : f32 to vector<8x32xf32>
    %382 = arith.mulf %381, %380 : vector<8x32xf32>
    %cst_262 = arith.constant 0.707106769 : f32
    %383 = vector.broadcast %cst_262 : f32 to vector<8x32xf32>
    %384 = arith.mulf %380, %383 : vector<8x32xf32>
    %cst_263 = arith.constant 0.000000e+00 : f32
    %385 = vector.broadcast %cst_263 : f32 to vector<8x32xf32>
    %386 = arith.cmpf oge, %384, %385 : vector<8x32xf32>
    %cst_264 = arith.constant 1.000000e+00 : f32
    %cst_265 = arith.constant -1.000000e+00 : f32
    %387 = vector.broadcast %cst_264 : f32 to vector<8x32xf32>
    %388 = vector.broadcast %cst_265 : f32 to vector<8x32xf32>
    %389 = arith.select %386, %387, %388 : vector<8x32xi1>, vector<8x32xf32>
    %390 = math.absf %384 : vector<8x32xf32>
    %cst_266 = arith.constant 0.327591091 : f32
    %391 = vector.broadcast %cst_266 : f32 to vector<8x32xf32>
    %392 = arith.mulf %391, %390 : vector<8x32xf32>
    %cst_267 = arith.constant 1.000000e+00 : f32
    %393 = vector.broadcast %cst_267 : f32 to vector<8x32xf32>
    %394 = arith.addf %393, %392 : vector<8x32xf32>
    %cst_268 = arith.constant 1.000000e+00 : f32
    %395 = vector.broadcast %cst_268 : f32 to vector<8x32xf32>
    %396 = arith.divf %395, %394 : vector<8x32xf32>
    %cst_269 = arith.constant 1.06140542 : f32
    %397 = vector.broadcast %cst_269 : f32 to vector<8x32xf32>
    %398 = arith.mulf %396, %397 : vector<8x32xf32>
    %cst_270 = arith.constant -1.45315206 : f32
    %399 = vector.broadcast %cst_270 : f32 to vector<8x32xf32>
    %400 = arith.addf %399, %398 : vector<8x32xf32>
    %401 = arith.mulf %396, %400 : vector<8x32xf32>
    %cst_271 = arith.constant 1.42141378 : f32
    %402 = vector.broadcast %cst_271 : f32 to vector<8x32xf32>
    %403 = arith.addf %402, %401 : vector<8x32xf32>
    %404 = arith.mulf %396, %403 : vector<8x32xf32>
    %cst_272 = arith.constant -0.284496725 : f32
    %405 = vector.broadcast %cst_272 : f32 to vector<8x32xf32>
    %406 = arith.addf %405, %404 : vector<8x32xf32>
    %407 = arith.mulf %396, %406 : vector<8x32xf32>
    %cst_273 = arith.constant 0.254829586 : f32
    %408 = vector.broadcast %cst_273 : f32 to vector<8x32xf32>
    %409 = arith.addf %408, %407 : vector<8x32xf32>
    %410 = arith.mulf %396, %409 : vector<8x32xf32>
    %cst_274 = arith.constant 0.000000e+00 : f32
    %411 = vector.broadcast %cst_274 : f32 to vector<8x32xf32>
    %412 = arith.subf %411, %390 : vector<8x32xf32>
    %413 = arith.mulf %412, %390 : vector<8x32xf32>
    %414 = math.exp %413 : vector<8x32xf32>
    %415 = arith.mulf %410, %414 : vector<8x32xf32>
    %cst_275 = arith.constant 1.000000e+00 : f32
    %416 = vector.broadcast %cst_275 : f32 to vector<8x32xf32>
    %417 = arith.subf %416, %415 : vector<8x32xf32>
    %418 = arith.mulf %389, %417 : vector<8x32xf32>
    %cst_276 = arith.constant 1.000000e+00 : f32
    %419 = vector.broadcast %cst_276 : f32 to vector<8x32xf32>
    %420 = arith.addf %419, %418 : vector<8x32xf32>
    %421 = arith.mulf %382, %420 : vector<8x32xf32>
    %cst_277 = arith.constant dense<0.000000e+00> : vector<8x32xf32>
    %422 = tpu.matmul %421, %375, %cst_277 {dimension_numbers = #tpu.dot_dimension_numbers<[1], [0], [0], [1], [0, 0, 1, 1], [], []>} : vector<8x32xf32>, vector<32x32xf32>, vector<8x32xf32> -> vector<8x32xf32>
    %423 = vector.broadcast %377 : vector<1x32xf32> to vector<8x32xf32>
    %424 = arith.addf %422, %423 : vector<8x32xf32>
    %425 = arith.addf %373, %424 : vector<8x32xf32>
    %c7 = arith.constant 7 : index
    %c0_278 = arith.constant 0 : index
    %426 = vector.load %arg7[%c7, %c0_278] : memref<32x128xf32, #tpu.memory_space<vmem>>, vector<1x32xf32>
    %c7_279 = arith.constant 7 : index
    %c32_280 = arith.constant 32 : index
    %427 = vector.load %arg7[%c7_279, %c32_280] : memref<32x128xf32, #tpu.memory_space<vmem>>, vector<1x32xf32>
    %cst_281 = arith.constant dense<0.000000e+00> : vector<8xf32>
    %428 = vector.multi_reduction <add>, %425, %cst_281 [1] : vector<8x32xf32> to vector<8xf32>
    %429 = vector.shape_cast %428 : vector<8xf32> to vector<8x1xf32>
    %cst_282 = arith.constant 3.200000e+01 : f32
    %430 = vector.broadcast %cst_282 : f32 to vector<8x1xf32>
    %431 = arith.divf %429, %430 : vector<8x1xf32>
    %432 = vector.broadcast %431 : vector<8x1xf32> to vector<8x32xf32>
    %433 = arith.subf %425, %432 : vector<8x32xf32>
    %434 = arith.mulf %433, %433 : vector<8x32xf32>
    %cst_283 = arith.constant dense<0.000000e+00> : vector<8xf32>
    %435 = vector.multi_reduction <add>, %434, %cst_283 [1] : vector<8x32xf32> to vector<8xf32>
    %436 = vector.shape_cast %435 : vector<8xf32> to vector<8x1xf32>
    %cst_284 = arith.constant 3.200000e+01 : f32
    %437 = vector.broadcast %cst_284 : f32 to vector<8x1xf32>
    %438 = arith.divf %436, %437 : vector<8x1xf32>
    %cst_285 = arith.constant 9.99999974E-6 : f32
    %439 = vector.broadcast %cst_285 : f32 to vector<8x1xf32>
    %440 = arith.addf %438, %439 : vector<8x1xf32>
    %441 = math.rsqrt %440 : vector<8x1xf32>
    %442 = vector.broadcast %441 : vector<8x1xf32> to vector<8x32xf32>
    %443 = arith.mulf %433, %442 : vector<8x32xf32>
    %444 = vector.broadcast %426 : vector<1x32xf32> to vector<8x32xf32>
    %445 = arith.mulf %443, %444 : vector<8x32xf32>
    %446 = vector.broadcast %427 : vector<1x32xf32> to vector<8x32xf32>
    %447 = arith.addf %445, %446 : vector<8x32xf32>
    %c1_286 = arith.constant 1 : index
    %c0_287 = arith.constant 0 : index
    %448 = vector.load %arg9[%c1_286, %c0_287] : memref<18x96xf32, #tpu.memory_space<vmem>>, vector<8x32xf32>
    tpu.vector_store %arg9[%c1_286, %c0_287], %447 {strides = array<i32>} : memref<18x96xf32, #tpu.memory_space<vmem>>, vector<8x32xf32>,
    %c8_288 = arith.constant 8 : index
    %c0_289 = arith.constant 0 : index
    %449 = vector.load %arg9[%c8_288, %c0_289] : memref<18x96xf32, #tpu.memory_space<vmem>>, vector<1x32xf32>
    %c0_290 = arith.constant 0 : index
    %c0_291 = arith.constant 0 : index
    %450 = vector.load %arg9[%c0_290, %c0_291] : memref<18x96xf32, #tpu.memory_space<vmem>>, vector<1x32xf32>
    tpu.vector_store %arg9[%c0_290, %c0_291], %449 {strides = array<i32>} : memref<18x96xf32, #tpu.memory_space<vmem>>, vector<1x32xf32>,
    %c1_292 = arith.constant 1 : index
    %c0_293 = arith.constant 0 : index
    %451 = vector.load %arg9[%c1_292, %c0_293] : memref<18x96xf32, #tpu.memory_space<vmem>>, vector<1x32xf32>
    %c9 = arith.constant 9 : index
    %c0_294 = arith.constant 0 : index
    %452 = vector.load %arg9[%c9, %c0_294] : memref<18x96xf32, #tpu.memory_space<vmem>>, vector<1x32xf32>
    tpu.vector_store %arg9[%c9, %c0_294], %451 {strides = array<i32>} : memref<18x96xf32, #tpu.memory_space<vmem>>, vector<1x32xf32>,
    %c0_295 = arith.constant 0 : index
    %c0_296 = arith.constant 0 : index
    %453 = vector.load %arg9[%c0_295, %c0_296] : memref<18x96xf32, #tpu.memory_space<vmem>>, vector<8x32xf32>
    %c2_297 = arith.constant 2 : index
    %c0_298 = arith.constant 0 : index
    %454 = vector.load %arg9[%c2_297, %c0_298] : memref<18x96xf32, #tpu.memory_space<vmem>>, vector<8x32xf32>
    %c0_299 = arith.constant 0 : index
    %c896 = arith.constant 896 : index
    %455 = vector.load %arg6[%c0_299, %c896] : memref<32x1920xf32, #tpu.memory_space<vmem>>, vector<32x32xf32>
    %cst_300 = arith.constant dense<0.000000e+00> : vector<8x32xf32>
    %456 = tpu.matmul %453, %455, %cst_300 {dimension_numbers = #tpu.dot_dimension_numbers<[1], [0], [0], [1], [0, 0, 1, 1], [], []>} : vector<8x32xf32>, vector<32x32xf32>, vector<8x32xf32> -> vector<8x32xf32>
    %c0_301 = arith.constant 0 : index
    %c928 = arith.constant 928 : index
    %457 = vector.load %arg6[%c0_301, %c928] : memref<32x1920xf32, #tpu.memory_space<vmem>>, vector<32x32xf32>
    %cst_302 = arith.constant dense<0.000000e+00> : vector<8x32xf32>
    %458 = tpu.matmul %447, %457, %cst_302 {dimension_numbers = #tpu.dot_dimension_numbers<[1], [0], [0], [1], [0, 0, 1, 1], [], []>} : vector<8x32xf32>, vector<32x32xf32>, vector<8x32xf32> -> vector<8x32xf32>
    %459 = arith.addf %456, %458 : vector<8x32xf32>
    %c0_303 = arith.constant 0 : index
    %c960 = arith.constant 960 : index
    %460 = vector.load %arg6[%c0_303, %c960] : memref<32x1920xf32, #tpu.memory_space<vmem>>, vector<32x32xf32>
    %cst_304 = arith.constant dense<0.000000e+00> : vector<8x32xf32>
    %461 = tpu.matmul %454, %460, %cst_304 {dimension_numbers = #tpu.dot_dimension_numbers<[1], [0], [0], [1], [0, 0, 1, 1], [], []>} : vector<8x32xf32>, vector<32x32xf32>, vector<8x32xf32> -> vector<8x32xf32>
    %462 = arith.addf %459, %461 : vector<8x32xf32>
    %c14 = arith.constant 14 : index
    %c0_305 = arith.constant 0 : index
    %463 = vector.load %arg7[%c14, %c0_305] : memref<32x128xf32, #tpu.memory_space<vmem>>, vector<1x32xf32>
    %464 = vector.broadcast %463 : vector<1x32xf32> to vector<8x32xf32>
    %465 = arith.addf %462, %464 : vector<8x32xf32>
    %cst_306 = arith.constant 0.999994993 : f32
    %466 = vector.broadcast %cst_306 : f32 to vector<8x32xf32>
    %467 = arith.mulf %465, %466 : vector<8x32xf32>
    %cst_307 = arith.constant 0.000000e+00 : f32
    %468 = vector.broadcast %cst_307 : f32 to vector<8x32xf32>
    %469 = arith.cmpf ogt, %467, %468 : vector<8x32xf32>
    %cst_308 = arith.constant 0.000000e+00 : f32
    %470 = vector.broadcast %cst_308 : f32 to vector<8x32xf32>
    %471 = arith.minimumf %467, %470 : vector<8x32xf32>
    %472 = math.exp %471 : vector<8x32xf32>
    %cst_309 = arith.constant 1.000000e+00 : f32
    %473 = vector.broadcast %cst_309 : f32 to vector<8x32xf32>
    %474 = arith.subf %472, %473 : vector<8x32xf32>
    %475 = arith.select %469, %467, %474 : vector<8x32xi1>, vector<8x32xf32>
    %cst_310 = arith.constant -3.000000e+38 : f32
    %476 = vector.broadcast %cst_310 : f32 to vector<1x32xf32>
    %c1_311 = arith.constant 1 : index
    %c0_312 = arith.constant 0 : index
    %477 = vector.load %arg9[%c1_311, %c0_312] : memref<18x96xf32, #tpu.memory_space<vmem>>, vector<8x32xf32>
    tpu.vector_store %arg9[%c1_311, %c0_312], %475 {strides = array<i32>} : memref<18x96xf32, #tpu.memory_space<vmem>>, vector<8x32xf32>,
    %c0_313 = arith.constant 0 : index
    %c0_314 = arith.constant 0 : index
    %478 = vector.load %arg9[%c0_313, %c0_314] : memref<18x96xf32, #tpu.memory_space<vmem>>, vector<1x32xf32>
    tpu.vector_store %arg9[%c0_313, %c0_314], %476 {strides = array<i32>} : memref<18x96xf32, #tpu.memory_space<vmem>>, vector<1x32xf32>,
    %c9_315 = arith.constant 9 : index
    %c0_316 = arith.constant 0 : index
    %479 = vector.load %arg9[%c9_315, %c0_316] : memref<18x96xf32, #tpu.memory_space<vmem>>, vector<1x32xf32>
    tpu.vector_store %arg9[%c9_315, %c0_316], %476 {strides = array<i32>} : memref<18x96xf32, #tpu.memory_space<vmem>>, vector<1x32xf32>,
    %c0_317 = arith.constant 0 : index
    %c0_318 = arith.constant 0 : index
    %480 = vector.load %arg9[%c0_317, %c0_318] : memref<18x96xf32, #tpu.memory_space<vmem>>, vector<8x32xf32>
    %481 = arith.maximumf %480, %475 : vector<8x32xf32>
    %c2_319 = arith.constant 2 : index
    %c0_320 = arith.constant 0 : index
    %482 = vector.load %arg9[%c2_319, %c0_320] : memref<18x96xf32, #tpu.memory_space<vmem>>, vector<8x32xf32>
    %483 = arith.maximumf %481, %482 : vector<8x32xf32>
    %c0_321 = arith.constant 0 : index
    %c0_322 = arith.constant 0 : index
    %484 = vector.load %arg9[%c0_321, %c0_322] : memref<18x96xf32, #tpu.memory_space<vmem>>, vector<8x32xf32>
    tpu.vector_store %arg9[%c0_321, %c0_322], %483 {strides = array<i32>} : memref<18x96xf32, #tpu.memory_space<vmem>>, vector<8x32xf32>,
    %c0_323 = arith.constant 0 : index
    %c0_324 = arith.constant 0 : index
    %485 = tpu.strided_load %arg9[%c0_323, %c0_324] {strides = array<i32: 2, 1>} : memref<18x96xf32, #tpu.memory_space<vmem>>, vector<4x32xf32>
    %c0_325 = arith.constant 0 : index
    %c512 = arith.constant 512 : index
    %486 = vector.load %arg6[%c0_325, %c512] : memref<32x1920xf32, #tpu.memory_space<vmem>>, vector<32x96xf32>
    %c8_326 = arith.constant 8 : index
    %c0_327 = arith.constant 0 : index
    %487 = vector.load %arg7[%c8_326, %c0_327] : memref<32x128xf32, #tpu.memory_space<vmem>>, vector<1x96xf32>
    %cst_328 = arith.constant dense<0.000000e+00> : vector<4x96xf32>
    %488 = tpu.matmul %485, %486, %cst_328 {dimension_numbers = #tpu.dot_dimension_numbers<[1], [0], [0], [1], [0, 0, 1, 1], [], []>} : vector<4x32xf32>, vector<32x96xf32>, vector<4x96xf32> -> vector<4x96xf32>
    %489 = vector.broadcast %487 : vector<1x96xf32> to vector<4x96xf32>
    %490 = arith.addf %488, %489 : vector<4x96xf32>
    %c0_329 = arith.constant 0 : index
    %c0_330 = arith.constant 0 : index
    %491 = vector.load %arg9[%c0_329, %c0_330] : memref<18x96xf32, #tpu.memory_space<vmem>>, vector<4x96xf32>
    tpu.vector_store %arg9[%c0_329, %c0_330], %490 {strides = array<i32>} : memref<18x96xf32, #tpu.memory_space<vmem>>, vector<4x96xf32>,
    %c0_331 = arith.constant 0 : index
    %c0_332 = arith.constant 0 : index
    %492 = vector.load %arg9[%c0_331, %c0_332] : memref<18x96xf32, #tpu.memory_space<vmem>>, vector<4x8xf32>
    %c0_333 = arith.constant 0 : index
    %c32_334 = arith.constant 32 : index
    %493 = vector.load %arg9[%c0_333, %c32_334] : memref<18x96xf32, #tpu.memory_space<vmem>>, vector<4x8xf32>
    %c0_335 = arith.constant 0 : index
    %c64_336 = arith.constant 64 : index
    %494 = vector.load %arg9[%c0_335, %c64_336] : memref<18x96xf32, #tpu.memory_space<vmem>>, vector<4x8xf32>
    %cst_337 = arith.constant dense<0.000000e+00> : vector<4x4xf32>
    %495 = tpu.matmul %492, %493, %cst_337 {dimension_numbers = #tpu.dot_dimension_numbers<[1], [1], [0], [0], [0, 0, 1, 0], [], []>} : vector<4x8xf32>, vector<4x8xf32>, vector<4x4xf32> -> vector<4x4xf32>
    %cst_338 = arith.constant 0.353553385 : f32
    %496 = vector.broadcast %cst_338 : f32 to vector<4x4xf32>
    %497 = arith.mulf %495, %496 : vector<4x4xf32>
    %cst_339 = arith.constant dense<0xFF800000> : vector<4xf32>
    %498 = vector.multi_reduction <maximumf>, %497, %cst_339 [1] : vector<4x4xf32> to vector<4xf32>
    %499 = vector.shape_cast %498 : vector<4xf32> to vector<4x1xf32>
    %500 = vector.broadcast %499 : vector<4x1xf32> to vector<4x4xf32>
    %501 = arith.subf %497, %500 : vector<4x4xf32>
    %502 = math.exp %501 : vector<4x4xf32>
    %cst_340 = arith.constant dense<0.000000e+00> : vector<4xf32>
    %503 = vector.multi_reduction <add>, %502, %cst_340 [1] : vector<4x4xf32> to vector<4xf32>
    %504 = vector.shape_cast %503 : vector<4xf32> to vector<4x1xf32>
    %505 = tpu.reciprocal %504 : vector<4x1xf32> -> vector<4x1xf32>
    %506 = vector.broadcast %505 : vector<4x1xf32> to vector<4x4xf32>
    %507 = arith.mulf %502, %506 : vector<4x4xf32>
    %cst_341 = arith.constant dense<0.000000e+00> : vector<4x8xf32>
    %508 = tpu.matmul %507, %494, %cst_341 {dimension_numbers = #tpu.dot_dimension_numbers<[1], [0], [0], [1], [0, 0, 1, 1], [], []>} : vector<4x4xf32>, vector<4x8xf32>, vector<4x8xf32> -> vector<4x8xf32>
    %c0_342 = arith.constant 0 : index
    %c608 = arith.constant 608 : index
    %509 = vector.load %arg6[%c0_342, %c608] : memref<32x1920xf32, #tpu.memory_space<vmem>>, vector<8x32xf32>
    %cst_343 = arith.constant dense<0.000000e+00> : vector<4x32xf32>
    %510 = tpu.matmul %508, %509, %cst_343 {dimension_numbers = #tpu.dot_dimension_numbers<[1], [0], [0], [1], [0, 0, 1, 1], [], []>} : vector<4x8xf32>, vector<8x32xf32>, vector<4x32xf32> -> vector<4x32xf32>
    %c0_344 = arith.constant 0 : index
    %c8_345 = arith.constant 8 : index
    %511 = vector.load %arg9[%c0_344, %c8_345] : memref<18x96xf32, #tpu.memory_space<vmem>>, vector<4x8xf32>
    %c0_346 = arith.constant 0 : index
    %c40_347 = arith.constant 40 : index
    %512 = vector.load %arg9[%c0_346, %c40_347] : memref<18x96xf32, #tpu.memory_space<vmem>>, vector<4x8xf32>
    %c0_348 = arith.constant 0 : index
    %c72_349 = arith.constant 72 : index
    %513 = vector.load %arg9[%c0_348, %c72_349] : memref<18x96xf32, #tpu.memory_space<vmem>>, vector<4x8xf32>
    %cst_350 = arith.constant dense<0.000000e+00> : vector<4x4xf32>
    %514 = tpu.matmul %511, %512, %cst_350 {dimension_numbers = #tpu.dot_dimension_numbers<[1], [1], [0], [0], [0, 0, 1, 0], [], []>} : vector<4x8xf32>, vector<4x8xf32>, vector<4x4xf32> -> vector<4x4xf32>
    %cst_351 = arith.constant 0.353553385 : f32
    %515 = vector.broadcast %cst_351 : f32 to vector<4x4xf32>
    %516 = arith.mulf %514, %515 : vector<4x4xf32>
    %cst_352 = arith.constant dense<0xFF800000> : vector<4xf32>
    %517 = vector.multi_reduction <maximumf>, %516, %cst_352 [1] : vector<4x4xf32> to vector<4xf32>
    %518 = vector.shape_cast %517 : vector<4xf32> to vector<4x1xf32>
    %519 = vector.broadcast %518 : vector<4x1xf32> to vector<4x4xf32>
    %520 = arith.subf %516, %519 : vector<4x4xf32>
    %521 = math.exp %520 : vector<4x4xf32>
    %cst_353 = arith.constant dense<0.000000e+00> : vector<4xf32>
    %522 = vector.multi_reduction <add>, %521, %cst_353 [1] : vector<4x4xf32> to vector<4xf32>
    %523 = vector.shape_cast %522 : vector<4xf32> to vector<4x1xf32>
    %524 = tpu.reciprocal %523 : vector<4x1xf32> -> vector<4x1xf32>
    %525 = vector.broadcast %524 : vector<4x1xf32> to vector<4x4xf32>
    %526 = arith.mulf %521, %525 : vector<4x4xf32>
    %cst_354 = arith.constant dense<0.000000e+00> : vector<4x8xf32>
    %527 = tpu.matmul %526, %513, %cst_354 {dimension_numbers = #tpu.dot_dimension_numbers<[1], [0], [0], [1], [0, 0, 1, 1], [], []>} : vector<4x4xf32>, vector<4x8xf32>, vector<4x8xf32> -> vector<4x8xf32>
    %c8_355 = arith.constant 8 : index
    %c608_356 = arith.constant 608 : index
    %528 = vector.load %arg6[%c8_355, %c608_356] : memref<32x1920xf32, #tpu.memory_space<vmem>>, vector<8x32xf32>
    %cst_357 = arith.constant dense<0.000000e+00> : vector<4x32xf32>
    %529 = tpu.matmul %527, %528, %cst_357 {dimension_numbers = #tpu.dot_dimension_numbers<[1], [0], [0], [1], [0, 0, 1, 1], [], []>} : vector<4x8xf32>, vector<8x32xf32>, vector<4x32xf32> -> vector<4x32xf32>
    %530 = arith.addf %510, %529 : vector<4x32xf32>
    %c0_358 = arith.constant 0 : index
    %c16_359 = arith.constant 16 : index
    %531 = vector.load %arg9[%c0_358, %c16_359] : memref<18x96xf32, #tpu.memory_space<vmem>>, vector<4x8xf32>
    %c0_360 = arith.constant 0 : index
    %c48_361 = arith.constant 48 : index
    %532 = vector.load %arg9[%c0_360, %c48_361] : memref<18x96xf32, #tpu.memory_space<vmem>>, vector<4x8xf32>
    %c0_362 = arith.constant 0 : index
    %c80_363 = arith.constant 80 : index
    %533 = vector.load %arg9[%c0_362, %c80_363] : memref<18x96xf32, #tpu.memory_space<vmem>>, vector<4x8xf32>
    %cst_364 = arith.constant dense<0.000000e+00> : vector<4x4xf32>
    %534 = tpu.matmul %531, %532, %cst_364 {dimension_numbers = #tpu.dot_dimension_numbers<[1], [1], [0], [0], [0, 0, 1, 0], [], []>} : vector<4x8xf32>, vector<4x8xf32>, vector<4x4xf32> -> vector<4x4xf32>
    %cst_365 = arith.constant 0.353553385 : f32
    %535 = vector.broadcast %cst_365 : f32 to vector<4x4xf32>
    %536 = arith.mulf %534, %535 : vector<4x4xf32>
    %cst_366 = arith.constant dense<0xFF800000> : vector<4xf32>
    %537 = vector.multi_reduction <maximumf>, %536, %cst_366 [1] : vector<4x4xf32> to vector<4xf32>
    %538 = vector.shape_cast %537 : vector<4xf32> to vector<4x1xf32>
    %539 = vector.broadcast %538 : vector<4x1xf32> to vector<4x4xf32>
    %540 = arith.subf %536, %539 : vector<4x4xf32>
    %541 = math.exp %540 : vector<4x4xf32>
    %cst_367 = arith.constant dense<0.000000e+00> : vector<4xf32>
    %542 = vector.multi_reduction <add>, %541, %cst_367 [1] : vector<4x4xf32> to vector<4xf32>
    %543 = vector.shape_cast %542 : vector<4xf32> to vector<4x1xf32>
    %544 = tpu.reciprocal %543 : vector<4x1xf32> -> vector<4x1xf32>
    %545 = vector.broadcast %544 : vector<4x1xf32> to vector<4x4xf32>
    %546 = arith.mulf %541, %545 : vector<4x4xf32>
    %cst_368 = arith.constant dense<0.000000e+00> : vector<4x8xf32>
    %547 = tpu.matmul %546, %533, %cst_368 {dimension_numbers = #tpu.dot_dimension_numbers<[1], [0], [0], [1], [0, 0, 1, 1], [], []>} : vector<4x4xf32>, vector<4x8xf32>, vector<4x8xf32> -> vector<4x8xf32>
    %c16_369 = arith.constant 16 : index
    %c608_370 = arith.constant 608 : index
    %548 = vector.load %arg6[%c16_369, %c608_370] : memref<32x1920xf32, #tpu.memory_space<vmem>>, vector<8x32xf32>
    %cst_371 = arith.constant dense<0.000000e+00> : vector<4x32xf32>
    %549 = tpu.matmul %547, %548, %cst_371 {dimension_numbers = #tpu.dot_dimension_numbers<[1], [0], [0], [1], [0, 0, 1, 1], [], []>} : vector<4x8xf32>, vector<8x32xf32>, vector<4x32xf32> -> vector<4x32xf32>
    %550 = arith.addf %530, %549 : vector<4x32xf32>
    %c0_372 = arith.constant 0 : index
    %c24_373 = arith.constant 24 : index
    %551 = vector.load %arg9[%c0_372, %c24_373] : memref<18x96xf32, #tpu.memory_space<vmem>>, vector<4x8xf32>
    %c0_374 = arith.constant 0 : index
    %c56_375 = arith.constant 56 : index
    %552 = vector.load %arg9[%c0_374, %c56_375] : memref<18x96xf32, #tpu.memory_space<vmem>>, vector<4x8xf32>
    %c0_376 = arith.constant 0 : index
    %c88_377 = arith.constant 88 : index
    %553 = vector.load %arg9[%c0_376, %c88_377] : memref<18x96xf32, #tpu.memory_space<vmem>>, vector<4x8xf32>
    %cst_378 = arith.constant dense<0.000000e+00> : vector<4x4xf32>
    %554 = tpu.matmul %551, %552, %cst_378 {dimension_numbers = #tpu.dot_dimension_numbers<[1], [1], [0], [0], [0, 0, 1, 0], [], []>} : vector<4x8xf32>, vector<4x8xf32>, vector<4x4xf32> -> vector<4x4xf32>
    %cst_379 = arith.constant 0.353553385 : f32
    %555 = vector.broadcast %cst_379 : f32 to vector<4x4xf32>
    %556 = arith.mulf %554, %555 : vector<4x4xf32>
    %cst_380 = arith.constant dense<0xFF800000> : vector<4xf32>
    %557 = vector.multi_reduction <maximumf>, %556, %cst_380 [1] : vector<4x4xf32> to vector<4xf32>
    %558 = vector.shape_cast %557 : vector<4xf32> to vector<4x1xf32>
    %559 = vector.broadcast %558 : vector<4x1xf32> to vector<4x4xf32>
    %560 = arith.subf %556, %559 : vector<4x4xf32>
    %561 = math.exp %560 : vector<4x4xf32>
    %cst_381 = arith.constant dense<0.000000e+00> : vector<4xf32>
    %562 = vector.multi_reduction <add>, %561, %cst_381 [1] : vector<4x4xf32> to vector<4xf32>
    %563 = vector.shape_cast %562 : vector<4xf32> to vector<4x1xf32>
    %564 = tpu.reciprocal %563 : vector<4x1xf32> -> vector<4x1xf32>
    %565 = vector.broadcast %564 : vector<4x1xf32> to vector<4x4xf32>
    %566 = arith.mulf %561, %565 : vector<4x4xf32>
    %cst_382 = arith.constant dense<0.000000e+00> : vector<4x8xf32>
    %567 = tpu.matmul %566, %553, %cst_382 {dimension_numbers = #tpu.dot_dimension_numbers<[1], [0], [0], [1], [0, 0, 1, 1], [], []>} : vector<4x4xf32>, vector<4x8xf32>, vector<4x8xf32> -> vector<4x8xf32>
    %c24_383 = arith.constant 24 : index
    %c608_384 = arith.constant 608 : index
    %568 = vector.load %arg6[%c24_383, %c608_384] : memref<32x1920xf32, #tpu.memory_space<vmem>>, vector<8x32xf32>
    %cst_385 = arith.constant dense<0.000000e+00> : vector<4x32xf32>
    %569 = tpu.matmul %567, %568, %cst_385 {dimension_numbers = #tpu.dot_dimension_numbers<[1], [0], [0], [1], [0, 0, 1, 1], [], []>} : vector<4x8xf32>, vector<8x32xf32>, vector<4x32xf32> -> vector<4x32xf32>
    %570 = arith.addf %550, %569 : vector<4x32xf32>
    %c8_386 = arith.constant 8 : index
    %c96_387 = arith.constant 96 : index
    %571 = vector.load %arg7[%c8_386, %c96_387] : memref<32x128xf32, #tpu.memory_space<vmem>>, vector<1x32xf32>
    %572 = vector.broadcast %571 : vector<1x32xf32> to vector<4x32xf32>
    %573 = arith.addf %570, %572 : vector<4x32xf32>
    %574 = arith.addf %485, %573 : vector<4x32xf32>
    %c10 = arith.constant 10 : index
    %c0_388 = arith.constant 0 : index
    %575 = vector.load %arg7[%c10, %c0_388] : memref<32x128xf32, #tpu.memory_space<vmem>>, vector<1x32xf32>
    %c10_389 = arith.constant 10 : index
    %c32_390 = arith.constant 32 : index
    %576 = vector.load %arg7[%c10_389, %c32_390] : memref<32x128xf32, #tpu.memory_space<vmem>>, vector<1x32xf32>
    %cst_391 = arith.constant dense<0.000000e+00> : vector<4xf32>
    %577 = vector.multi_reduction <add>, %574, %cst_391 [1] : vector<4x32xf32> to vector<4xf32>
    %578 = vector.shape_cast %577 : vector<4xf32> to vector<4x1xf32>
    %cst_392 = arith.constant 3.200000e+01 : f32
    %579 = vector.broadcast %cst_392 : f32 to vector<4x1xf32>
    %580 = arith.divf %578, %579 : vector<4x1xf32>
    %581 = vector.broadcast %580 : vector<4x1xf32> to vector<4x32xf32>
    %582 = arith.subf %574, %581 : vector<4x32xf32>
    %583 = arith.mulf %582, %582 : vector<4x32xf32>
    %cst_393 = arith.constant dense<0.000000e+00> : vector<4xf32>
    %584 = vector.multi_reduction <add>, %583, %cst_393 [1] : vector<4x32xf32> to vector<4xf32>
    %585 = vector.shape_cast %584 : vector<4xf32> to vector<4x1xf32>
    %cst_394 = arith.constant 3.200000e+01 : f32
    %586 = vector.broadcast %cst_394 : f32 to vector<4x1xf32>
    %587 = arith.divf %585, %586 : vector<4x1xf32>
    %cst_395 = arith.constant 9.99999974E-6 : f32
    %588 = vector.broadcast %cst_395 : f32 to vector<4x1xf32>
    %589 = arith.addf %587, %588 : vector<4x1xf32>
    %590 = math.rsqrt %589 : vector<4x1xf32>
    %591 = vector.broadcast %590 : vector<4x1xf32> to vector<4x32xf32>
    %592 = arith.mulf %582, %591 : vector<4x32xf32>
    %593 = vector.broadcast %575 : vector<1x32xf32> to vector<4x32xf32>
    %594 = arith.mulf %592, %593 : vector<4x32xf32>
    %595 = vector.broadcast %576 : vector<1x32xf32> to vector<4x32xf32>
    %596 = arith.addf %594, %595 : vector<4x32xf32>
    %c0_396 = arith.constant 0 : index
    %c640 = arith.constant 640 : index
    %597 = vector.load %arg6[%c0_396, %c640] : memref<32x1920xf32, #tpu.memory_space<vmem>>, vector<32x32xf32>
    %c0_397 = arith.constant 0 : index
    %c672 = arith.constant 672 : index
    %598 = vector.load %arg6[%c0_397, %c672] : memref<32x1920xf32, #tpu.memory_space<vmem>>, vector<32x32xf32>
    %c9_398 = arith.constant 9 : index
    %c0_399 = arith.constant 0 : index
    %599 = vector.load %arg7[%c9_398, %c0_399] : memref<32x128xf32, #tpu.memory_space<vmem>>, vector<1x32xf32>
    %c9_400 = arith.constant 9 : index
    %c32_401 = arith.constant 32 : index
    %600 = vector.load %arg7[%c9_400, %c32_401] : memref<32x128xf32, #tpu.memory_space<vmem>>, vector<1x32xf32>
    %cst_402 = arith.constant dense<0.000000e+00> : vector<4x32xf32>
    %601 = tpu.matmul %596, %597, %cst_402 {dimension_numbers = #tpu.dot_dimension_numbers<[1], [0], [0], [1], [0, 0, 1, 1], [], []>} : vector<4x32xf32>, vector<32x32xf32>, vector<4x32xf32> -> vector<4x32xf32>
    %602 = vector.broadcast %599 : vector<1x32xf32> to vector<4x32xf32>
    %603 = arith.addf %601, %602 : vector<4x32xf32>
    %cst_403 = arith.constant 5.000000e-01 : f32
    %604 = vector.broadcast %cst_403 : f32 to vector<4x32xf32>
    %605 = arith.mulf %604, %603 : vector<4x32xf32>
    %cst_404 = arith.constant 0.707106769 : f32
    %606 = vector.broadcast %cst_404 : f32 to vector<4x32xf32>
    %607 = arith.mulf %603, %606 : vector<4x32xf32>
    %cst_405 = arith.constant 0.000000e+00 : f32
    %608 = vector.broadcast %cst_405 : f32 to vector<4x32xf32>
    %609 = arith.cmpf oge, %607, %608 : vector<4x32xf32>
    %cst_406 = arith.constant 1.000000e+00 : f32
    %cst_407 = arith.constant -1.000000e+00 : f32
    %610 = vector.broadcast %cst_406 : f32 to vector<4x32xf32>
    %611 = vector.broadcast %cst_407 : f32 to vector<4x32xf32>
    %612 = arith.select %609, %610, %611 : vector<4x32xi1>, vector<4x32xf32>
    %613 = math.absf %607 : vector<4x32xf32>
    %cst_408 = arith.constant 0.327591091 : f32
    %614 = vector.broadcast %cst_408 : f32 to vector<4x32xf32>
    %615 = arith.mulf %614, %613 : vector<4x32xf32>
    %cst_409 = arith.constant 1.000000e+00 : f32
    %616 = vector.broadcast %cst_409 : f32 to vector<4x32xf32>
    %617 = arith.addf %616, %615 : vector<4x32xf32>
    %cst_410 = arith.constant 1.000000e+00 : f32
    %618 = vector.broadcast %cst_410 : f32 to vector<4x32xf32>
    %619 = arith.divf %618, %617 : vector<4x32xf32>
    %cst_411 = arith.constant 1.06140542 : f32
    %620 = vector.broadcast %cst_411 : f32 to vector<4x32xf32>
    %621 = arith.mulf %619, %620 : vector<4x32xf32>
    %cst_412 = arith.constant -1.45315206 : f32
    %622 = vector.broadcast %cst_412 : f32 to vector<4x32xf32>
    %623 = arith.addf %622, %621 : vector<4x32xf32>
    %624 = arith.mulf %619, %623 : vector<4x32xf32>
    %cst_413 = arith.constant 1.42141378 : f32
    %625 = vector.broadcast %cst_413 : f32 to vector<4x32xf32>
    %626 = arith.addf %625, %624 : vector<4x32xf32>
    %627 = arith.mulf %619, %626 : vector<4x32xf32>
    %cst_414 = arith.constant -0.284496725 : f32
    %628 = vector.broadcast %cst_414 : f32 to vector<4x32xf32>
    %629 = arith.addf %628, %627 : vector<4x32xf32>
    %630 = arith.mulf %619, %629 : vector<4x32xf32>
    %cst_415 = arith.constant 0.254829586 : f32
    %631 = vector.broadcast %cst_415 : f32 to vector<4x32xf32>
    %632 = arith.addf %631, %630 : vector<4x32xf32>
    %633 = arith.mulf %619, %632 : vector<4x32xf32>
    %cst_416 = arith.constant 0.000000e+00 : f32
    %634 = vector.broadcast %cst_416 : f32 to vector<4x32xf32>
    %635 = arith.subf %634, %613 : vector<4x32xf32>
    %636 = arith.mulf %635, %613 : vector<4x32xf32>
    %637 = math.exp %636 : vector<4x32xf32>
    %638 = arith.mulf %633, %637 : vector<4x32xf32>
    %cst_417 = arith.constant 1.000000e+00 : f32
    %639 = vector.broadcast %cst_417 : f32 to vector<4x32xf32>
    %640 = arith.subf %639, %638 : vector<4x32xf32>
    %641 = arith.mulf %612, %640 : vector<4x32xf32>
    %cst_418 = arith.constant 1.000000e+00 : f32
    %642 = vector.broadcast %cst_418 : f32 to vector<4x32xf32>
    %643 = arith.addf %642, %641 : vector<4x32xf32>
    %644 = arith.mulf %605, %643 : vector<4x32xf32>
    %cst_419 = arith.constant dense<0.000000e+00> : vector<4x32xf32>
    %645 = tpu.matmul %644, %598, %cst_419 {dimension_numbers = #tpu.dot_dimension_numbers<[1], [0], [0], [1], [0, 0, 1, 1], [], []>} : vector<4x32xf32>, vector<32x32xf32>, vector<4x32xf32> -> vector<4x32xf32>
    %646 = vector.broadcast %600 : vector<1x32xf32> to vector<4x32xf32>
    %647 = arith.addf %645, %646 : vector<4x32xf32>
    %648 = arith.addf %596, %647 : vector<4x32xf32>
    %c11 = arith.constant 11 : index
    %c0_420 = arith.constant 0 : index
    %649 = vector.load %arg7[%c11, %c0_420] : memref<32x128xf32, #tpu.memory_space<vmem>>, vector<1x32xf32>
    %c11_421 = arith.constant 11 : index
    %c32_422 = arith.constant 32 : index
    %650 = vector.load %arg7[%c11_421, %c32_422] : memref<32x128xf32, #tpu.memory_space<vmem>>, vector<1x32xf32>
    %cst_423 = arith.constant dense<0.000000e+00> : vector<4xf32>
    %651 = vector.multi_reduction <add>, %648, %cst_423 [1] : vector<4x32xf32> to vector<4xf32>
    %652 = vector.shape_cast %651 : vector<4xf32> to vector<4x1xf32>
    %cst_424 = arith.constant 3.200000e+01 : f32
    %653 = vector.broadcast %cst_424 : f32 to vector<4x1xf32>
    %654 = arith.divf %652, %653 : vector<4x1xf32>
    %655 = vector.broadcast %654 : vector<4x1xf32> to vector<4x32xf32>
    %656 = arith.subf %648, %655 : vector<4x32xf32>
    %657 = arith.mulf %656, %656 : vector<4x32xf32>
    %cst_425 = arith.constant dense<0.000000e+00> : vector<4xf32>
    %658 = vector.multi_reduction <add>, %657, %cst_425 [1] : vector<4x32xf32> to vector<4xf32>
    %659 = vector.shape_cast %658 : vector<4xf32> to vector<4x1xf32>
    %cst_426 = arith.constant 3.200000e+01 : f32
    %660 = vector.broadcast %cst_426 : f32 to vector<4x1xf32>
    %661 = arith.divf %659, %660 : vector<4x1xf32>
    %cst_427 = arith.constant 9.99999974E-6 : f32
    %662 = vector.broadcast %cst_427 : f32 to vector<4x1xf32>
    %663 = arith.addf %661, %662 : vector<4x1xf32>
    %664 = math.rsqrt %663 : vector<4x1xf32>
    %665 = vector.broadcast %664 : vector<4x1xf32> to vector<4x32xf32>
    %666 = arith.mulf %656, %665 : vector<4x32xf32>
    %667 = vector.broadcast %649 : vector<1x32xf32> to vector<4x32xf32>
    %668 = arith.mulf %666, %667 : vector<4x32xf32>
    %669 = vector.broadcast %650 : vector<1x32xf32> to vector<4x32xf32>
    %670 = arith.addf %668, %669 : vector<4x32xf32>
    %c12_428 = arith.constant 12 : index
    %c0_429 = arith.constant 0 : index
    %671 = vector.load %arg7[%c12_428, %c0_429] : memref<32x128xf32, #tpu.memory_space<vmem>>, vector<1x32xf32>
    %c12_430 = arith.constant 12 : index
    %c32_431 = arith.constant 32 : index
    %672 = vector.load %arg7[%c12_430, %c32_431] : memref<32x128xf32, #tpu.memory_space<vmem>>, vector<1x32xf32>
    %cst_432 = arith.constant dense<0.000000e+00> : vector<4xf32>
    %673 = vector.multi_reduction <add>, %670, %cst_432 [1] : vector<4x32xf32> to vector<4xf32>
    %674 = vector.shape_cast %673 : vector<4xf32> to vector<4x1xf32>
    %cst_433 = arith.constant 3.200000e+01 : f32
    %675 = vector.broadcast %cst_433 : f32 to vector<4x1xf32>
    %676 = arith.divf %674, %675 : vector<4x1xf32>
    %677 = vector.broadcast %676 : vector<4x1xf32> to vector<4x32xf32>
    %678 = arith.subf %670, %677 : vector<4x32xf32>
    %679 = arith.mulf %678, %678 : vector<4x32xf32>
    %cst_434 = arith.constant dense<0.000000e+00> : vector<4xf32>
    %680 = vector.multi_reduction <add>, %679, %cst_434 [1] : vector<4x32xf32> to vector<4xf32>
    %681 = vector.shape_cast %680 : vector<4xf32> to vector<4x1xf32>
    %cst_435 = arith.constant 3.200000e+01 : f32
    %682 = vector.broadcast %cst_435 : f32 to vector<4x1xf32>
    %683 = arith.divf %681, %682 : vector<4x1xf32>
    %cst_436 = arith.constant 9.99999974E-6 : f32
    %684 = vector.broadcast %cst_436 : f32 to vector<4x1xf32>
    %685 = arith.addf %683, %684 : vector<4x1xf32>
    %686 = math.rsqrt %685 : vector<4x1xf32>
    %687 = vector.broadcast %686 : vector<4x1xf32> to vector<4x32xf32>
    %688 = arith.mulf %678, %687 : vector<4x32xf32>
    %689 = vector.broadcast %671 : vector<1x32xf32> to vector<4x32xf32>
    %690 = arith.mulf %688, %689 : vector<4x32xf32>
    %691 = vector.broadcast %672 : vector<1x32xf32> to vector<4x32xf32>
    %692 = arith.addf %690, %691 : vector<4x32xf32>
    %c0_437 = arith.constant 0 : index
    %c1024 = arith.constant 1024 : index
    %693 = vector.load %arg6[%c0_437, %c1024] : memref<32x1920xf32, #tpu.memory_space<vmem>>, vector<32x96xf32>
    %c15 = arith.constant 15 : index
    %c0_438 = arith.constant 0 : index
    %694 = vector.load %arg7[%c15, %c0_438] : memref<32x128xf32, #tpu.memory_space<vmem>>, vector<1x96xf32>
    %cst_439 = arith.constant dense<0.000000e+00> : vector<16x96xf32>
    %695 = tpu.matmul %39, %693, %cst_439 {dimension_numbers = #tpu.dot_dimension_numbers<[1], [0], [0], [1], [0, 0, 1, 1], [], []>} : vector<16x32xf32>, vector<32x96xf32>, vector<16x96xf32> -> vector<16x96xf32>
    %696 = vector.broadcast %694 : vector<1x96xf32> to vector<16x96xf32>
    %697 = arith.addf %695, %696 : vector<16x96xf32>
    %c0_440 = arith.constant 0 : index
    %c0_441 = arith.constant 0 : index
    %698 = vector.load %arg9[%c0_440, %c0_441] : memref<18x96xf32, #tpu.memory_space<vmem>>, vector<16x96xf32>
    tpu.vector_store %arg9[%c0_440, %c0_441], %697 {strides = array<i32>} : memref<18x96xf32, #tpu.memory_space<vmem>>, vector<16x96xf32>,
    %699 = tpu.iota {dimensions = array<i32: 0>} : vector<16x16xi32>
    %700 = tpu.iota {dimensions = array<i32: 1>} : vector<16x16xi32>
    %701 = arith.cmpi sle, %700, %699 : vector<16x16xi32>
    %cst_442 = arith.constant 0.000000e+00 : f32
    %cst_443 = arith.constant -1.000000e+30 : f32
    %702 = vector.broadcast %cst_442 : f32 to vector<16x16xf32>
    %703 = vector.broadcast %cst_443 : f32 to vector<16x16xf32>
    %704 = arith.select %701, %702, %703 : vector<16x16xi1>, vector<16x16xf32>
    %c0_444 = arith.constant 0 : index
    %c0_445 = arith.constant 0 : index
    %705 = vector.load %arg9[%c0_444, %c0_445] : memref<18x96xf32, #tpu.memory_space<vmem>>, vector<16x8xf32>
    %c0_446 = arith.constant 0 : index
    %c32_447 = arith.constant 32 : index
    %706 = vector.load %arg9[%c0_446, %c32_447] : memref<18x96xf32, #tpu.memory_space<vmem>>, vector<16x8xf32>
    %c0_448 = arith.constant 0 : index
    %c64_449 = arith.constant 64 : index
    %707 = vector.load %arg9[%c0_448, %c64_449] : memref<18x96xf32, #tpu.memory_space<vmem>>, vector<16x8xf32>
    %cst_450 = arith.constant dense<0.000000e+00> : vector<16x16xf32>
    %708 = tpu.matmul %705, %706, %cst_450 {dimension_numbers = #tpu.dot_dimension_numbers<[1], [1], [0], [0], [0, 0, 1, 0], [], []>} : vector<16x8xf32>, vector<16x8xf32>, vector<16x16xf32> -> vector<16x16xf32>
    %cst_451 = arith.constant 0.353553385 : f32
    %709 = vector.broadcast %cst_451 : f32 to vector<16x16xf32>
    %710 = arith.mulf %708, %709 : vector<16x16xf32>
    %711 = arith.addf %710, %704 : vector<16x16xf32>
    %cst_452 = arith.constant dense<0xFF800000> : vector<16xf32>
    %712 = vector.multi_reduction <maximumf>, %711, %cst_452 [1] : vector<16x16xf32> to vector<16xf32>
    %713 = vector.shape_cast %712 : vector<16xf32> to vector<16x1xf32>
    %714 = vector.broadcast %713 : vector<16x1xf32> to vector<16x16xf32>
    %715 = arith.subf %711, %714 : vector<16x16xf32>
    %716 = math.exp %715 : vector<16x16xf32>
    %cst_453 = arith.constant dense<0.000000e+00> : vector<16xf32>
    %717 = vector.multi_reduction <add>, %716, %cst_453 [1] : vector<16x16xf32> to vector<16xf32>
    %718 = vector.shape_cast %717 : vector<16xf32> to vector<16x1xf32>
    %719 = tpu.reciprocal %718 : vector<16x1xf32> -> vector<16x1xf32>
    %720 = vector.broadcast %719 : vector<16x1xf32> to vector<16x16xf32>
    %721 = arith.mulf %716, %720 : vector<16x16xf32>
    %cst_454 = arith.constant dense<0.000000e+00> : vector<16x8xf32>
    %722 = tpu.matmul %721, %707, %cst_454 {dimension_numbers = #tpu.dot_dimension_numbers<[1], [0], [0], [1], [0, 0, 1, 1], [], []>} : vector<16x16xf32>, vector<16x8xf32>, vector<16x8xf32> -> vector<16x8xf32>
    %c0_455 = arith.constant 0 : index
    %c1120 = arith.constant 1120 : index
    %723 = vector.load %arg6[%c0_455, %c1120] : memref<32x1920xf32, #tpu.memory_space<vmem>>, vector<8x32xf32>
    %cst_456 = arith.constant dense<0.000000e+00> : vector<16x32xf32>
    %724 = tpu.matmul %722, %723, %cst_456 {dimension_numbers = #tpu.dot_dimension_numbers<[1], [0], [0], [1], [0, 0, 1, 1], [], []>} : vector<16x8xf32>, vector<8x32xf32>, vector<16x32xf32> -> vector<16x32xf32>
    %c0_457 = arith.constant 0 : index
    %c8_458 = arith.constant 8 : index
    %725 = vector.load %arg9[%c0_457, %c8_458] : memref<18x96xf32, #tpu.memory_space<vmem>>, vector<16x8xf32>
    %c0_459 = arith.constant 0 : index
    %c40_460 = arith.constant 40 : index
    %726 = vector.load %arg9[%c0_459, %c40_460] : memref<18x96xf32, #tpu.memory_space<vmem>>, vector<16x8xf32>
    %c0_461 = arith.constant 0 : index
    %c72_462 = arith.constant 72 : index
    %727 = vector.load %arg9[%c0_461, %c72_462] : memref<18x96xf32, #tpu.memory_space<vmem>>, vector<16x8xf32>
    %cst_463 = arith.constant dense<0.000000e+00> : vector<16x16xf32>
    %728 = tpu.matmul %725, %726, %cst_463 {dimension_numbers = #tpu.dot_dimension_numbers<[1], [1], [0], [0], [0, 0, 1, 0], [], []>} : vector<16x8xf32>, vector<16x8xf32>, vector<16x16xf32> -> vector<16x16xf32>
    %cst_464 = arith.constant 0.353553385 : f32
    %729 = vector.broadcast %cst_464 : f32 to vector<16x16xf32>
    %730 = arith.mulf %728, %729 : vector<16x16xf32>
    %731 = arith.addf %730, %704 : vector<16x16xf32>
    %cst_465 = arith.constant dense<0xFF800000> : vector<16xf32>
    %732 = vector.multi_reduction <maximumf>, %731, %cst_465 [1] : vector<16x16xf32> to vector<16xf32>
    %733 = vector.shape_cast %732 : vector<16xf32> to vector<16x1xf32>
    %734 = vector.broadcast %733 : vector<16x1xf32> to vector<16x16xf32>
    %735 = arith.subf %731, %734 : vector<16x16xf32>
    %736 = math.exp %735 : vector<16x16xf32>
    %cst_466 = arith.constant dense<0.000000e+00> : vector<16xf32>
    %737 = vector.multi_reduction <add>, %736, %cst_466 [1] : vector<16x16xf32> to vector<16xf32>
    %738 = vector.shape_cast %737 : vector<16xf32> to vector<16x1xf32>
    %739 = tpu.reciprocal %738 : vector<16x1xf32> -> vector<16x1xf32>
    %740 = vector.broadcast %739 : vector<16x1xf32> to vector<16x16xf32>
    %741 = arith.mulf %736, %740 : vector<16x16xf32>
    %cst_467 = arith.constant dense<0.000000e+00> : vector<16x8xf32>
    %742 = tpu.matmul %741, %727, %cst_467 {dimension_numbers = #tpu.dot_dimension_numbers<[1], [0], [0], [1], [0, 0, 1, 1], [], []>} : vector<16x16xf32>, vector<16x8xf32>, vector<16x8xf32> -> vector<16x8xf32>
    %c8_468 = arith.constant 8 : index
    %c1120_469 = arith.constant 1120 : index
    %743 = vector.load %arg6[%c8_468, %c1120_469] : memref<32x1920xf32, #tpu.memory_space<vmem>>, vector<8x32xf32>
    %cst_470 = arith.constant dense<0.000000e+00> : vector<16x32xf32>
    %744 = tpu.matmul %742, %743, %cst_470 {dimension_numbers = #tpu.dot_dimension_numbers<[1], [0], [0], [1], [0, 0, 1, 1], [], []>} : vector<16x8xf32>, vector<8x32xf32>, vector<16x32xf32> -> vector<16x32xf32>
    %745 = arith.addf %724, %744 : vector<16x32xf32>
    %c0_471 = arith.constant 0 : index
    %c16_472 = arith.constant 16 : index
    %746 = vector.load %arg9[%c0_471, %c16_472] : memref<18x96xf32, #tpu.memory_space<vmem>>, vector<16x8xf32>
    %c0_473 = arith.constant 0 : index
    %c48_474 = arith.constant 48 : index
    %747 = vector.load %arg9[%c0_473, %c48_474] : memref<18x96xf32, #tpu.memory_space<vmem>>, vector<16x8xf32>
    %c0_475 = arith.constant 0 : index
    %c80_476 = arith.constant 80 : index
    %748 = vector.load %arg9[%c0_475, %c80_476] : memref<18x96xf32, #tpu.memory_space<vmem>>, vector<16x8xf32>
    %cst_477 = arith.constant dense<0.000000e+00> : vector<16x16xf32>
    %749 = tpu.matmul %746, %747, %cst_477 {dimension_numbers = #tpu.dot_dimension_numbers<[1], [1], [0], [0], [0, 0, 1, 0], [], []>} : vector<16x8xf32>, vector<16x8xf32>, vector<16x16xf32> -> vector<16x16xf32>
    %cst_478 = arith.constant 0.353553385 : f32
    %750 = vector.broadcast %cst_478 : f32 to vector<16x16xf32>
    %751 = arith.mulf %749, %750 : vector<16x16xf32>
    %752 = arith.addf %751, %704 : vector<16x16xf32>
    %cst_479 = arith.constant dense<0xFF800000> : vector<16xf32>
    %753 = vector.multi_reduction <maximumf>, %752, %cst_479 [1] : vector<16x16xf32> to vector<16xf32>
    %754 = vector.shape_cast %753 : vector<16xf32> to vector<16x1xf32>
    %755 = vector.broadcast %754 : vector<16x1xf32> to vector<16x16xf32>
    %756 = arith.subf %752, %755 : vector<16x16xf32>
    %757 = math.exp %756 : vector<16x16xf32>
    %cst_480 = arith.constant dense<0.000000e+00> : vector<16xf32>
    %758 = vector.multi_reduction <add>, %757, %cst_480 [1] : vector<16x16xf32> to vector<16xf32>
    %759 = vector.shape_cast %758 : vector<16xf32> to vector<16x1xf32>
    %760 = tpu.reciprocal %759 : vector<16x1xf32> -> vector<16x1xf32>
    %761 = vector.broadcast %760 : vector<16x1xf32> to vector<16x16xf32>
    %762 = arith.mulf %757, %761 : vector<16x16xf32>
    %cst_481 = arith.constant dense<0.000000e+00> : vector<16x8xf32>
    %763 = tpu.matmul %762, %748, %cst_481 {dimension_numbers = #tpu.dot_dimension_numbers<[1], [0], [0], [1], [0, 0, 1, 1], [], []>} : vector<16x16xf32>, vector<16x8xf32>, vector<16x8xf32> -> vector<16x8xf32>
    %c16_482 = arith.constant 16 : index
    %c1120_483 = arith.constant 1120 : index
    %764 = vector.load %arg6[%c16_482, %c1120_483] : memref<32x1920xf32, #tpu.memory_space<vmem>>, vector<8x32xf32>
    %cst_484 = arith.constant dense<0.000000e+00> : vector<16x32xf32>
    %765 = tpu.matmul %763, %764, %cst_484 {dimension_numbers = #tpu.dot_dimension_numbers<[1], [0], [0], [1], [0, 0, 1, 1], [], []>} : vector<16x8xf32>, vector<8x32xf32>, vector<16x32xf32> -> vector<16x32xf32>
    %766 = arith.addf %745, %765 : vector<16x32xf32>
    %c0_485 = arith.constant 0 : index
    %c24_486 = arith.constant 24 : index
    %767 = vector.load %arg9[%c0_485, %c24_486] : memref<18x96xf32, #tpu.memory_space<vmem>>, vector<16x8xf32>
    %c0_487 = arith.constant 0 : index
    %c56_488 = arith.constant 56 : index
    %768 = vector.load %arg9[%c0_487, %c56_488] : memref<18x96xf32, #tpu.memory_space<vmem>>, vector<16x8xf32>
    %c0_489 = arith.constant 0 : index
    %c88_490 = arith.constant 88 : index
    %769 = vector.load %arg9[%c0_489, %c88_490] : memref<18x96xf32, #tpu.memory_space<vmem>>, vector<16x8xf32>
    %cst_491 = arith.constant dense<0.000000e+00> : vector<16x16xf32>
    %770 = tpu.matmul %767, %768, %cst_491 {dimension_numbers = #tpu.dot_dimension_numbers<[1], [1], [0], [0], [0, 0, 1, 0], [], []>} : vector<16x8xf32>, vector<16x8xf32>, vector<16x16xf32> -> vector<16x16xf32>
    %cst_492 = arith.constant 0.353553385 : f32
    %771 = vector.broadcast %cst_492 : f32 to vector<16x16xf32>
    %772 = arith.mulf %770, %771 : vector<16x16xf32>
    %773 = arith.addf %772, %704 : vector<16x16xf32>
    %cst_493 = arith.constant dense<0xFF800000> : vector<16xf32>
    %774 = vector.multi_reduction <maximumf>, %773, %cst_493 [1] : vector<16x16xf32> to vector<16xf32>
    %775 = vector.shape_cast %774 : vector<16xf32> to vector<16x1xf32>
    %776 = vector.broadcast %775 : vector<16x1xf32> to vector<16x16xf32>
    %777 = arith.subf %773, %776 : vector<16x16xf32>
    %778 = math.exp %777 : vector<16x16xf32>
    %cst_494 = arith.constant dense<0.000000e+00> : vector<16xf32>
    %779 = vector.multi_reduction <add>, %778, %cst_494 [1] : vector<16x16xf32> to vector<16xf32>
    %780 = vector.shape_cast %779 : vector<16xf32> to vector<16x1xf32>
    %781 = tpu.reciprocal %780 : vector<16x1xf32> -> vector<16x1xf32>
    %782 = vector.broadcast %781 : vector<16x1xf32> to vector<16x16xf32>
    %783 = arith.mulf %778, %782 : vector<16x16xf32>
    %cst_495 = arith.constant dense<0.000000e+00> : vector<16x8xf32>
    %784 = tpu.matmul %783, %769, %cst_495 {dimension_numbers = #tpu.dot_dimension_numbers<[1], [0], [0], [1], [0, 0, 1, 1], [], []>} : vector<16x16xf32>, vector<16x8xf32>, vector<16x8xf32> -> vector<16x8xf32>
    %c24_496 = arith.constant 24 : index
    %c1120_497 = arith.constant 1120 : index
    %785 = vector.load %arg6[%c24_496, %c1120_497] : memref<32x1920xf32, #tpu.memory_space<vmem>>, vector<8x32xf32>
    %cst_498 = arith.constant dense<0.000000e+00> : vector<16x32xf32>
    %786 = tpu.matmul %784, %785, %cst_498 {dimension_numbers = #tpu.dot_dimension_numbers<[1], [0], [0], [1], [0, 0, 1, 1], [], []>} : vector<16x8xf32>, vector<8x32xf32>, vector<16x32xf32> -> vector<16x32xf32>
    %787 = arith.addf %766, %786 : vector<16x32xf32>
    %c15_499 = arith.constant 15 : index
    %c96_500 = arith.constant 96 : index
    %788 = vector.load %arg7[%c15_499, %c96_500] : memref<32x128xf32, #tpu.memory_space<vmem>>, vector<1x32xf32>
    %789 = vector.broadcast %788 : vector<1x32xf32> to vector<16x32xf32>
    %790 = arith.addf %787, %789 : vector<16x32xf32>
    %791 = arith.addf %39, %790 : vector<16x32xf32>
    %c18 = arith.constant 18 : index
    %c0_501 = arith.constant 0 : index
    %792 = vector.load %arg7[%c18, %c0_501] : memref<32x128xf32, #tpu.memory_space<vmem>>, vector<1x32xf32>
    %c18_502 = arith.constant 18 : index
    %c32_503 = arith.constant 32 : index
    %793 = vector.load %arg7[%c18_502, %c32_503] : memref<32x128xf32, #tpu.memory_space<vmem>>, vector<1x32xf32>
    %cst_504 = arith.constant dense<0.000000e+00> : vector<16xf32>
    %794 = vector.multi_reduction <add>, %791, %cst_504 [1] : vector<16x32xf32> to vector<16xf32>
    %795 = vector.shape_cast %794 : vector<16xf32> to vector<16x1xf32>
    %cst_505 = arith.constant 3.200000e+01 : f32
    %796 = vector.broadcast %cst_505 : f32 to vector<16x1xf32>
    %797 = arith.divf %795, %796 : vector<16x1xf32>
    %798 = vector.broadcast %797 : vector<16x1xf32> to vector<16x32xf32>
    %799 = arith.subf %791, %798 : vector<16x32xf32>
    %800 = arith.mulf %799, %799 : vector<16x32xf32>
    %cst_506 = arith.constant dense<0.000000e+00> : vector<16xf32>
    %801 = vector.multi_reduction <add>, %800, %cst_506 [1] : vector<16x32xf32> to vector<16xf32>
    %802 = vector.shape_cast %801 : vector<16xf32> to vector<16x1xf32>
    %cst_507 = arith.constant 3.200000e+01 : f32
    %803 = vector.broadcast %cst_507 : f32 to vector<16x1xf32>
    %804 = arith.divf %802, %803 : vector<16x1xf32>
    %cst_508 = arith.constant 9.99999974E-6 : f32
    %805 = vector.broadcast %cst_508 : f32 to vector<16x1xf32>
    %806 = arith.addf %804, %805 : vector<16x1xf32>
    %807 = math.rsqrt %806 : vector<16x1xf32>
    %808 = vector.broadcast %807 : vector<16x1xf32> to vector<16x32xf32>
    %809 = arith.mulf %799, %808 : vector<16x32xf32>
    %810 = vector.broadcast %792 : vector<1x32xf32> to vector<16x32xf32>
    %811 = arith.mulf %809, %810 : vector<16x32xf32>
    %812 = vector.broadcast %793 : vector<1x32xf32> to vector<16x32xf32>
    %813 = arith.addf %811, %812 : vector<16x32xf32>
    %c0_509 = arith.constant 0 : index
    %c1152 = arith.constant 1152 : index
    %814 = vector.load %arg6[%c0_509, %c1152] : memref<32x1920xf32, #tpu.memory_space<vmem>>, vector<32x32xf32>
    %c0_510 = arith.constant 0 : index
    %c1184 = arith.constant 1184 : index
    %815 = vector.load %arg6[%c0_510, %c1184] : memref<32x1920xf32, #tpu.memory_space<vmem>>, vector<32x64xf32>
    %c16_511 = arith.constant 16 : index
    %c0_512 = arith.constant 0 : index
    %816 = vector.load %arg7[%c16_511, %c0_512] : memref<32x128xf32, #tpu.memory_space<vmem>>, vector<1x32xf32>
    %c16_513 = arith.constant 16 : index
    %c32_514 = arith.constant 32 : index
    %817 = vector.load %arg7[%c16_513, %c32_514] : memref<32x128xf32, #tpu.memory_space<vmem>>, vector<1x64xf32>
    %cst_515 = arith.constant dense<0.000000e+00> : vector<16x32xf32>
    %818 = tpu.matmul %813, %814, %cst_515 {dimension_numbers = #tpu.dot_dimension_numbers<[1], [0], [0], [1], [0, 0, 1, 1], [], []>} : vector<16x32xf32>, vector<32x32xf32>, vector<16x32xf32> -> vector<16x32xf32>
    %819 = vector.broadcast %816 : vector<1x32xf32> to vector<16x32xf32>
    %820 = arith.addf %818, %819 : vector<16x32xf32>
    %c0_516 = arith.constant 0 : index
    %c0_517 = arith.constant 0 : index
    %821 = vector.load %arg9[%c0_516, %c0_517] : memref<18x96xf32, #tpu.memory_space<vmem>>, vector<16x32xf32>
    tpu.vector_store %arg9[%c0_516, %c0_517], %820 {strides = array<i32>} : memref<18x96xf32, #tpu.memory_space<vmem>>, vector<16x32xf32>,
    %cst_518 = arith.constant dense<0.000000e+00> : vector<4x64xf32>
    %822 = tpu.matmul %692, %815, %cst_518 {dimension_numbers = #tpu.dot_dimension_numbers<[1], [0], [0], [1], [0, 0, 1, 1], [], []>} : vector<4x32xf32>, vector<32x64xf32>, vector<4x64xf32> -> vector<4x64xf32>
    %823 = vector.broadcast %817 : vector<1x64xf32> to vector<4x64xf32>
    %824 = arith.addf %822, %823 : vector<4x64xf32>
    %c0_519 = arith.constant 0 : index
    %c32_520 = arith.constant 32 : index
    %825 = vector.load %arg9[%c0_519, %c32_520] : memref<18x96xf32, #tpu.memory_space<vmem>>, vector<4x64xf32>
    tpu.vector_store %arg9[%c0_519, %c32_520], %824 {strides = array<i32>} : memref<18x96xf32, #tpu.memory_space<vmem>>, vector<4x64xf32>,
    %c0_521 = arith.constant 0 : index
    %c0_522 = arith.constant 0 : index
    %826 = vector.load %arg9[%c0_521, %c0_522] : memref<18x96xf32, #tpu.memory_space<vmem>>, vector<16x8xf32>
    %c0_523 = arith.constant 0 : index
    %c32_524 = arith.constant 32 : index
    %827 = vector.load %arg9[%c0_523, %c32_524] : memref<18x96xf32, #tpu.memory_space<vmem>>, vector<4x8xf32>
    %c0_525 = arith.constant 0 : index
    %c64_526 = arith.constant 64 : index
    %828 = vector.load %arg9[%c0_525, %c64_526] : memref<18x96xf32, #tpu.memory_space<vmem>>, vector<4x8xf32>
    %cst_527 = arith.constant dense<0.000000e+00> : vector<16x4xf32>
    %829 = tpu.matmul %826, %827, %cst_527 {dimension_numbers = #tpu.dot_dimension_numbers<[1], [1], [0], [0], [0, 0, 1, 0], [], []>} : vector<16x8xf32>, vector<4x8xf32>, vector<16x4xf32> -> vector<16x4xf32>
    %cst_528 = arith.constant 0.353553385 : f32
    %830 = vector.broadcast %cst_528 : f32 to vector<16x4xf32>
    %831 = arith.mulf %829, %830 : vector<16x4xf32>
    %cst_529 = arith.constant dense<0xFF800000> : vector<16xf32>
    %832 = vector.multi_reduction <maximumf>, %831, %cst_529 [1] : vector<16x4xf32> to vector<16xf32>
    %833 = vector.shape_cast %832 : vector<16xf32> to vector<16x1xf32>
    %834 = vector.broadcast %833 : vector<16x1xf32> to vector<16x4xf32>
    %835 = arith.subf %831, %834 : vector<16x4xf32>
    %836 = math.exp %835 : vector<16x4xf32>
    %cst_530 = arith.constant dense<0.000000e+00> : vector<16xf32>
    %837 = vector.multi_reduction <add>, %836, %cst_530 [1] : vector<16x4xf32> to vector<16xf32>
    %838 = vector.shape_cast %837 : vector<16xf32> to vector<16x1xf32>
    %839 = tpu.reciprocal %838 : vector<16x1xf32> -> vector<16x1xf32>
    %840 = vector.broadcast %839 : vector<16x1xf32> to vector<16x4xf32>
    %841 = arith.mulf %836, %840 : vector<16x4xf32>
    %cst_531 = arith.constant dense<0.000000e+00> : vector<16x8xf32>
    %842 = tpu.matmul %841, %828, %cst_531 {dimension_numbers = #tpu.dot_dimension_numbers<[1], [0], [0], [1], [0, 0, 1, 1], [], []>} : vector<16x4xf32>, vector<4x8xf32>, vector<16x8xf32> -> vector<16x8xf32>
    %c0_532 = arith.constant 0 : index
    %c1248 = arith.constant 1248 : index
    %843 = vector.load %arg6[%c0_532, %c1248] : memref<32x1920xf32, #tpu.memory_space<vmem>>, vector<8x32xf32>
    %cst_533 = arith.constant dense<0.000000e+00> : vector<16x32xf32>
    %844 = tpu.matmul %842, %843, %cst_533 {dimension_numbers = #tpu.dot_dimension_numbers<[1], [0], [0], [1], [0, 0, 1, 1], [], []>} : vector<16x8xf32>, vector<8x32xf32>, vector<16x32xf32> -> vector<16x32xf32>
    %c0_534 = arith.constant 0 : index
    %c8_535 = arith.constant 8 : index
    %845 = vector.load %arg9[%c0_534, %c8_535] : memref<18x96xf32, #tpu.memory_space<vmem>>, vector<16x8xf32>
    %c0_536 = arith.constant 0 : index
    %c40_537 = arith.constant 40 : index
    %846 = vector.load %arg9[%c0_536, %c40_537] : memref<18x96xf32, #tpu.memory_space<vmem>>, vector<4x8xf32>
    %c0_538 = arith.constant 0 : index
    %c72_539 = arith.constant 72 : index
    %847 = vector.load %arg9[%c0_538, %c72_539] : memref<18x96xf32, #tpu.memory_space<vmem>>, vector<4x8xf32>
    %cst_540 = arith.constant dense<0.000000e+00> : vector<16x4xf32>
    %848 = tpu.matmul %845, %846, %cst_540 {dimension_numbers = #tpu.dot_dimension_numbers<[1], [1], [0], [0], [0, 0, 1, 0], [], []>} : vector<16x8xf32>, vector<4x8xf32>, vector<16x4xf32> -> vector<16x4xf32>
    %cst_541 = arith.constant 0.353553385 : f32
    %849 = vector.broadcast %cst_541 : f32 to vector<16x4xf32>
    %850 = arith.mulf %848, %849 : vector<16x4xf32>
    %cst_542 = arith.constant dense<0xFF800000> : vector<16xf32>
    %851 = vector.multi_reduction <maximumf>, %850, %cst_542 [1] : vector<16x4xf32> to vector<16xf32>
    %852 = vector.shape_cast %851 : vector<16xf32> to vector<16x1xf32>
    %853 = vector.broadcast %852 : vector<16x1xf32> to vector<16x4xf32>
    %854 = arith.subf %850, %853 : vector<16x4xf32>
    %855 = math.exp %854 : vector<16x4xf32>
    %cst_543 = arith.constant dense<0.000000e+00> : vector<16xf32>
    %856 = vector.multi_reduction <add>, %855, %cst_543 [1] : vector<16x4xf32> to vector<16xf32>
    %857 = vector.shape_cast %856 : vector<16xf32> to vector<16x1xf32>
    %858 = tpu.reciprocal %857 : vector<16x1xf32> -> vector<16x1xf32>
    %859 = vector.broadcast %858 : vector<16x1xf32> to vector<16x4xf32>
    %860 = arith.mulf %855, %859 : vector<16x4xf32>
    %cst_544 = arith.constant dense<0.000000e+00> : vector<16x8xf32>
    %861 = tpu.matmul %860, %847, %cst_544 {dimension_numbers = #tpu.dot_dimension_numbers<[1], [0], [0], [1], [0, 0, 1, 1], [], []>} : vector<16x4xf32>, vector<4x8xf32>, vector<16x8xf32> -> vector<16x8xf32>
    %c8_545 = arith.constant 8 : index
    %c1248_546 = arith.constant 1248 : index
    %862 = vector.load %arg6[%c8_545, %c1248_546] : memref<32x1920xf32, #tpu.memory_space<vmem>>, vector<8x32xf32>
    %cst_547 = arith.constant dense<0.000000e+00> : vector<16x32xf32>
    %863 = tpu.matmul %861, %862, %cst_547 {dimension_numbers = #tpu.dot_dimension_numbers<[1], [0], [0], [1], [0, 0, 1, 1], [], []>} : vector<16x8xf32>, vector<8x32xf32>, vector<16x32xf32> -> vector<16x32xf32>
    %864 = arith.addf %844, %863 : vector<16x32xf32>
    %c0_548 = arith.constant 0 : index
    %c16_549 = arith.constant 16 : index
    %865 = vector.load %arg9[%c0_548, %c16_549] : memref<18x96xf32, #tpu.memory_space<vmem>>, vector<16x8xf32>
    %c0_550 = arith.constant 0 : index
    %c48_551 = arith.constant 48 : index
    %866 = vector.load %arg9[%c0_550, %c48_551] : memref<18x96xf32, #tpu.memory_space<vmem>>, vector<4x8xf32>
    %c0_552 = arith.constant 0 : index
    %c80_553 = arith.constant 80 : index
    %867 = vector.load %arg9[%c0_552, %c80_553] : memref<18x96xf32, #tpu.memory_space<vmem>>, vector<4x8xf32>
    %cst_554 = arith.constant dense<0.000000e+00> : vector<16x4xf32>
    %868 = tpu.matmul %865, %866, %cst_554 {dimension_numbers = #tpu.dot_dimension_numbers<[1], [1], [0], [0], [0, 0, 1, 0], [], []>} : vector<16x8xf32>, vector<4x8xf32>, vector<16x4xf32> -> vector<16x4xf32>
    %cst_555 = arith.constant 0.353553385 : f32
    %869 = vector.broadcast %cst_555 : f32 to vector<16x4xf32>
    %870 = arith.mulf %868, %869 : vector<16x4xf32>
    %cst_556 = arith.constant dense<0xFF800000> : vector<16xf32>
    %871 = vector.multi_reduction <maximumf>, %870, %cst_556 [1] : vector<16x4xf32> to vector<16xf32>
    %872 = vector.shape_cast %871 : vector<16xf32> to vector<16x1xf32>
    %873 = vector.broadcast %872 : vector<16x1xf32> to vector<16x4xf32>
    %874 = arith.subf %870, %873 : vector<16x4xf32>
    %875 = math.exp %874 : vector<16x4xf32>
    %cst_557 = arith.constant dense<0.000000e+00> : vector<16xf32>
    %876 = vector.multi_reduction <add>, %875, %cst_557 [1] : vector<16x4xf32> to vector<16xf32>
    %877 = vector.shape_cast %876 : vector<16xf32> to vector<16x1xf32>
    %878 = tpu.reciprocal %877 : vector<16x1xf32> -> vector<16x1xf32>
    %879 = vector.broadcast %878 : vector<16x1xf32> to vector<16x4xf32>
    %880 = arith.mulf %875, %879 : vector<16x4xf32>
    %cst_558 = arith.constant dense<0.000000e+00> : vector<16x8xf32>
    %881 = tpu.matmul %880, %867, %cst_558 {dimension_numbers = #tpu.dot_dimension_numbers<[1], [0], [0], [1], [0, 0, 1, 1], [], []>} : vector<16x4xf32>, vector<4x8xf32>, vector<16x8xf32> -> vector<16x8xf32>
    %c16_559 = arith.constant 16 : index
    %c1248_560 = arith.constant 1248 : index
    %882 = vector.load %arg6[%c16_559, %c1248_560] : memref<32x1920xf32, #tpu.memory_space<vmem>>, vector<8x32xf32>
    %cst_561 = arith.constant dense<0.000000e+00> : vector<16x32xf32>
    %883 = tpu.matmul %881, %882, %cst_561 {dimension_numbers = #tpu.dot_dimension_numbers<[1], [0], [0], [1], [0, 0, 1, 1], [], []>} : vector<16x8xf32>, vector<8x32xf32>, vector<16x32xf32> -> vector<16x32xf32>
    %884 = arith.addf %864, %883 : vector<16x32xf32>
    %c0_562 = arith.constant 0 : index
    %c24_563 = arith.constant 24 : index
    %885 = vector.load %arg9[%c0_562, %c24_563] : memref<18x96xf32, #tpu.memory_space<vmem>>, vector<16x8xf32>
    %c0_564 = arith.constant 0 : index
    %c56_565 = arith.constant 56 : index
    %886 = vector.load %arg9[%c0_564, %c56_565] : memref<18x96xf32, #tpu.memory_space<vmem>>, vector<4x8xf32>
    %c0_566 = arith.constant 0 : index
    %c88_567 = arith.constant 88 : index
    %887 = vector.load %arg9[%c0_566, %c88_567] : memref<18x96xf32, #tpu.memory_space<vmem>>, vector<4x8xf32>
    %cst_568 = arith.constant dense<0.000000e+00> : vector<16x4xf32>
    %888 = tpu.matmul %885, %886, %cst_568 {dimension_numbers = #tpu.dot_dimension_numbers<[1], [1], [0], [0], [0, 0, 1, 0], [], []>} : vector<16x8xf32>, vector<4x8xf32>, vector<16x4xf32> -> vector<16x4xf32>
    %cst_569 = arith.constant 0.353553385 : f32
    %889 = vector.broadcast %cst_569 : f32 to vector<16x4xf32>
    %890 = arith.mulf %888, %889 : vector<16x4xf32>
    %cst_570 = arith.constant dense<0xFF800000> : vector<16xf32>
    %891 = vector.multi_reduction <maximumf>, %890, %cst_570 [1] : vector<16x4xf32> to vector<16xf32>
    %892 = vector.shape_cast %891 : vector<16xf32> to vector<16x1xf32>
    %893 = vector.broadcast %892 : vector<16x1xf32> to vector<16x4xf32>
    %894 = arith.subf %890, %893 : vector<16x4xf32>
    %895 = math.exp %894 : vector<16x4xf32>
    %cst_571 = arith.constant dense<0.000000e+00> : vector<16xf32>
    %896 = vector.multi_reduction <add>, %895, %cst_571 [1] : vector<16x4xf32> to vector<16xf32>
    %897 = vector.shape_cast %896 : vector<16xf32> to vector<16x1xf32>
    %898 = tpu.reciprocal %897 : vector<16x1xf32> -> vector<16x1xf32>
    %899 = vector.broadcast %898 : vector<16x1xf32> to vector<16x4xf32>
    %900 = arith.mulf %895, %899 : vector<16x4xf32>
    %cst_572 = arith.constant dense<0.000000e+00> : vector<16x8xf32>
    %901 = tpu.matmul %900, %887, %cst_572 {dimension_numbers = #tpu.dot_dimension_numbers<[1], [0], [0], [1], [0, 0, 1, 1], [], []>} : vector<16x4xf32>, vector<4x8xf32>, vector<16x8xf32> -> vector<16x8xf32>
    %c24_573 = arith.constant 24 : index
    %c1248_574 = arith.constant 1248 : index
    %902 = vector.load %arg6[%c24_573, %c1248_574] : memref<32x1920xf32, #tpu.memory_space<vmem>>, vector<8x32xf32>
    %cst_575 = arith.constant dense<0.000000e+00> : vector<16x32xf32>
    %903 = tpu.matmul %901, %902, %cst_575 {dimension_numbers = #tpu.dot_dimension_numbers<[1], [0], [0], [1], [0, 0, 1, 1], [], []>} : vector<16x8xf32>, vector<8x32xf32>, vector<16x32xf32> -> vector<16x32xf32>
    %904 = arith.addf %884, %903 : vector<16x32xf32>
    %c16_576 = arith.constant 16 : index
    %c96_577 = arith.constant 96 : index
    %905 = vector.load %arg7[%c16_576, %c96_577] : memref<32x128xf32, #tpu.memory_space<vmem>>, vector<1x32xf32>
    %906 = vector.broadcast %905 : vector<1x32xf32> to vector<16x32xf32>
    %907 = arith.addf %904, %906 : vector<16x32xf32>
    %908 = arith.addf %813, %907 : vector<16x32xf32>
    %c19 = arith.constant 19 : index
    %c0_578 = arith.constant 0 : index
    %909 = vector.load %arg7[%c19, %c0_578] : memref<32x128xf32, #tpu.memory_space<vmem>>, vector<1x32xf32>
    %c19_579 = arith.constant 19 : index
    %c32_580 = arith.constant 32 : index
    %910 = vector.load %arg7[%c19_579, %c32_580] : memref<32x128xf32, #tpu.memory_space<vmem>>, vector<1x32xf32>
    %cst_581 = arith.constant dense<0.000000e+00> : vector<16xf32>
    %911 = vector.multi_reduction <add>, %908, %cst_581 [1] : vector<16x32xf32> to vector<16xf32>
    %912 = vector.shape_cast %911 : vector<16xf32> to vector<16x1xf32>
    %cst_582 = arith.constant 3.200000e+01 : f32
    %913 = vector.broadcast %cst_582 : f32 to vector<16x1xf32>
    %914 = arith.divf %912, %913 : vector<16x1xf32>
    %915 = vector.broadcast %914 : vector<16x1xf32> to vector<16x32xf32>
    %916 = arith.subf %908, %915 : vector<16x32xf32>
    %917 = arith.mulf %916, %916 : vector<16x32xf32>
    %cst_583 = arith.constant dense<0.000000e+00> : vector<16xf32>
    %918 = vector.multi_reduction <add>, %917, %cst_583 [1] : vector<16x32xf32> to vector<16xf32>
    %919 = vector.shape_cast %918 : vector<16xf32> to vector<16x1xf32>
    %cst_584 = arith.constant 3.200000e+01 : f32
    %920 = vector.broadcast %cst_584 : f32 to vector<16x1xf32>
    %921 = arith.divf %919, %920 : vector<16x1xf32>
    %cst_585 = arith.constant 9.99999974E-6 : f32
    %922 = vector.broadcast %cst_585 : f32 to vector<16x1xf32>
    %923 = arith.addf %921, %922 : vector<16x1xf32>
    %924 = math.rsqrt %923 : vector<16x1xf32>
    %925 = vector.broadcast %924 : vector<16x1xf32> to vector<16x32xf32>
    %926 = arith.mulf %916, %925 : vector<16x32xf32>
    %927 = vector.broadcast %909 : vector<1x32xf32> to vector<16x32xf32>
    %928 = arith.mulf %926, %927 : vector<16x32xf32>
    %929 = vector.broadcast %910 : vector<1x32xf32> to vector<16x32xf32>
    %930 = arith.addf %928, %929 : vector<16x32xf32>
    %c0_586 = arith.constant 0 : index
    %c1280 = arith.constant 1280 : index
    %931 = vector.load %arg6[%c0_586, %c1280] : memref<32x1920xf32, #tpu.memory_space<vmem>>, vector<32x32xf32>
    %c0_587 = arith.constant 0 : index
    %c1312 = arith.constant 1312 : index
    %932 = vector.load %arg6[%c0_587, %c1312] : memref<32x1920xf32, #tpu.memory_space<vmem>>, vector<32x32xf32>
    %c17_588 = arith.constant 17 : index
    %c0_589 = arith.constant 0 : index
    %933 = vector.load %arg7[%c17_588, %c0_589] : memref<32x128xf32, #tpu.memory_space<vmem>>, vector<1x32xf32>
    %c17_590 = arith.constant 17 : index
    %c32_591 = arith.constant 32 : index
    %934 = vector.load %arg7[%c17_590, %c32_591] : memref<32x128xf32, #tpu.memory_space<vmem>>, vector<1x32xf32>
    %cst_592 = arith.constant dense<0.000000e+00> : vector<16x32xf32>
    %935 = tpu.matmul %930, %931, %cst_592 {dimension_numbers = #tpu.dot_dimension_numbers<[1], [0], [0], [1], [0, 0, 1, 1], [], []>} : vector<16x32xf32>, vector<32x32xf32>, vector<16x32xf32> -> vector<16x32xf32>
    %936 = vector.broadcast %933 : vector<1x32xf32> to vector<16x32xf32>
    %937 = arith.addf %935, %936 : vector<16x32xf32>
    %cst_593 = arith.constant 5.000000e-01 : f32
    %938 = vector.broadcast %cst_593 : f32 to vector<16x32xf32>
    %939 = arith.mulf %938, %937 : vector<16x32xf32>
    %cst_594 = arith.constant 0.707106769 : f32
    %940 = vector.broadcast %cst_594 : f32 to vector<16x32xf32>
    %941 = arith.mulf %937, %940 : vector<16x32xf32>
    %cst_595 = arith.constant 0.000000e+00 : f32
    %942 = vector.broadcast %cst_595 : f32 to vector<16x32xf32>
    %943 = arith.cmpf oge, %941, %942 : vector<16x32xf32>
    %cst_596 = arith.constant 1.000000e+00 : f32
    %cst_597 = arith.constant -1.000000e+00 : f32
    %944 = vector.broadcast %cst_596 : f32 to vector<16x32xf32>
    %945 = vector.broadcast %cst_597 : f32 to vector<16x32xf32>
    %946 = arith.select %943, %944, %945 : vector<16x32xi1>, vector<16x32xf32>
    %947 = math.absf %941 : vector<16x32xf32>
    %cst_598 = arith.constant 0.327591091 : f32
    %948 = vector.broadcast %cst_598 : f32 to vector<16x32xf32>
    %949 = arith.mulf %948, %947 : vector<16x32xf32>
    %cst_599 = arith.constant 1.000000e+00 : f32
    %950 = vector.broadcast %cst_599 : f32 to vector<16x32xf32>
    %951 = arith.addf %950, %949 : vector<16x32xf32>
    %cst_600 = arith.constant 1.000000e+00 : f32
    %952 = vector.broadcast %cst_600 : f32 to vector<16x32xf32>
    %953 = arith.divf %952, %951 : vector<16x32xf32>
    %cst_601 = arith.constant 1.06140542 : f32
    %954 = vector.broadcast %cst_601 : f32 to vector<16x32xf32>
    %955 = arith.mulf %953, %954 : vector<16x32xf32>
    %cst_602 = arith.constant -1.45315206 : f32
    %956 = vector.broadcast %cst_602 : f32 to vector<16x32xf32>
    %957 = arith.addf %956, %955 : vector<16x32xf32>
    %958 = arith.mulf %953, %957 : vector<16x32xf32>
    %cst_603 = arith.constant 1.42141378 : f32
    %959 = vector.broadcast %cst_603 : f32 to vector<16x32xf32>
    %960 = arith.addf %959, %958 : vector<16x32xf32>
    %961 = arith.mulf %953, %960 : vector<16x32xf32>
    %cst_604 = arith.constant -0.284496725 : f32
    %962 = vector.broadcast %cst_604 : f32 to vector<16x32xf32>
    %963 = arith.addf %962, %961 : vector<16x32xf32>
    %964 = arith.mulf %953, %963 : vector<16x32xf32>
    %cst_605 = arith.constant 0.254829586 : f32
    %965 = vector.broadcast %cst_605 : f32 to vector<16x32xf32>
    %966 = arith.addf %965, %964 : vector<16x32xf32>
    %967 = arith.mulf %953, %966 : vector<16x32xf32>
    %cst_606 = arith.constant 0.000000e+00 : f32
    %968 = vector.broadcast %cst_606 : f32 to vector<16x32xf32>
    %969 = arith.subf %968, %947 : vector<16x32xf32>
    %970 = arith.mulf %969, %947 : vector<16x32xf32>
    %971 = math.exp %970 : vector<16x32xf32>
    %972 = arith.mulf %967, %971 : vector<16x32xf32>
    %cst_607 = arith.constant 1.000000e+00 : f32
    %973 = vector.broadcast %cst_607 : f32 to vector<16x32xf32>
    %974 = arith.subf %973, %972 : vector<16x32xf32>
    %975 = arith.mulf %946, %974 : vector<16x32xf32>
    %cst_608 = arith.constant 1.000000e+00 : f32
    %976 = vector.broadcast %cst_608 : f32 to vector<16x32xf32>
    %977 = arith.addf %976, %975 : vector<16x32xf32>
    %978 = arith.mulf %939, %977 : vector<16x32xf32>
    %cst_609 = arith.constant dense<0.000000e+00> : vector<16x32xf32>
    %979 = tpu.matmul %978, %932, %cst_609 {dimension_numbers = #tpu.dot_dimension_numbers<[1], [0], [0], [1], [0, 0, 1, 1], [], []>} : vector<16x32xf32>, vector<32x32xf32>, vector<16x32xf32> -> vector<16x32xf32>
    %980 = vector.broadcast %934 : vector<1x32xf32> to vector<16x32xf32>
    %981 = arith.addf %979, %980 : vector<16x32xf32>
    %982 = arith.addf %930, %981 : vector<16x32xf32>
    %c20_610 = arith.constant 20 : index
    %c0_611 = arith.constant 0 : index
    %983 = vector.load %arg7[%c20_610, %c0_611] : memref<32x128xf32, #tpu.memory_space<vmem>>, vector<1x32xf32>
    %c20_612 = arith.constant 20 : index
    %c32_613 = arith.constant 32 : index
    %984 = vector.load %arg7[%c20_612, %c32_613] : memref<32x128xf32, #tpu.memory_space<vmem>>, vector<1x32xf32>
    %cst_614 = arith.constant dense<0.000000e+00> : vector<16xf32>
    %985 = vector.multi_reduction <add>, %982, %cst_614 [1] : vector<16x32xf32> to vector<16xf32>
    %986 = vector.shape_cast %985 : vector<16xf32> to vector<16x1xf32>
    %cst_615 = arith.constant 3.200000e+01 : f32
    %987 = vector.broadcast %cst_615 : f32 to vector<16x1xf32>
    %988 = arith.divf %986, %987 : vector<16x1xf32>
    %989 = vector.broadcast %988 : vector<16x1xf32> to vector<16x32xf32>
    %990 = arith.subf %982, %989 : vector<16x32xf32>
    %991 = arith.mulf %990, %990 : vector<16x32xf32>
    %cst_616 = arith.constant dense<0.000000e+00> : vector<16xf32>
    %992 = vector.multi_reduction <add>, %991, %cst_616 [1] : vector<16x32xf32> to vector<16xf32>
    %993 = vector.shape_cast %992 : vector<16xf32> to vector<16x1xf32>
    %cst_617 = arith.constant 3.200000e+01 : f32
    %994 = vector.broadcast %cst_617 : f32 to vector<16x1xf32>
    %995 = arith.divf %993, %994 : vector<16x1xf32>
    %cst_618 = arith.constant 9.99999974E-6 : f32
    %996 = vector.broadcast %cst_618 : f32 to vector<16x1xf32>
    %997 = arith.addf %995, %996 : vector<16x1xf32>
    %998 = math.rsqrt %997 : vector<16x1xf32>
    %999 = vector.broadcast %998 : vector<16x1xf32> to vector<16x32xf32>
    %1000 = arith.mulf %990, %999 : vector<16x32xf32>
    %1001 = vector.broadcast %983 : vector<1x32xf32> to vector<16x32xf32>
    %1002 = arith.mulf %1000, %1001 : vector<16x32xf32>
    %1003 = vector.broadcast %984 : vector<1x32xf32> to vector<16x32xf32>
    %1004 = arith.addf %1002, %1003 : vector<16x32xf32>
    %c0_619 = arith.constant 0 : index
    %c1408 = arith.constant 1408 : index
    %1005 = vector.load %arg6[%c0_619, %c1408] : memref<32x1920xf32, #tpu.memory_space<vmem>>, vector<32x96xf32>
    %c21 = arith.constant 21 : index
    %c0_620 = arith.constant 0 : index
    %1006 = vector.load %arg7[%c21, %c0_620] : memref<32x128xf32, #tpu.memory_space<vmem>>, vector<1x96xf32>
    %cst_621 = arith.constant dense<0.000000e+00> : vector<16x96xf32>
    %1007 = tpu.matmul %1004, %1005, %cst_621 {dimension_numbers = #tpu.dot_dimension_numbers<[1], [0], [0], [1], [0, 0, 1, 1], [], []>} : vector<16x32xf32>, vector<32x96xf32>, vector<16x96xf32> -> vector<16x96xf32>
    %1008 = vector.broadcast %1006 : vector<1x96xf32> to vector<16x96xf32>
    %1009 = arith.addf %1007, %1008 : vector<16x96xf32>
    %c0_622 = arith.constant 0 : index
    %c0_623 = arith.constant 0 : index
    %1010 = vector.load %arg9[%c0_622, %c0_623] : memref<18x96xf32, #tpu.memory_space<vmem>>, vector<16x96xf32>
    tpu.vector_store %arg9[%c0_622, %c0_623], %1009 {strides = array<i32>} : memref<18x96xf32, #tpu.memory_space<vmem>>, vector<16x96xf32>,
    %1011 = tpu.iota {dimensions = array<i32: 0>} : vector<16x16xi32>
    %1012 = tpu.iota {dimensions = array<i32: 1>} : vector<16x16xi32>
    %1013 = arith.cmpi sle, %1012, %1011 : vector<16x16xi32>
    %cst_624 = arith.constant 0.000000e+00 : f32
    %cst_625 = arith.constant -1.000000e+30 : f32
    %1014 = vector.broadcast %cst_624 : f32 to vector<16x16xf32>
    %1015 = vector.broadcast %cst_625 : f32 to vector<16x16xf32>
    %1016 = arith.select %1013, %1014, %1015 : vector<16x16xi1>, vector<16x16xf32>
    %c0_626 = arith.constant 0 : index
    %c0_627 = arith.constant 0 : index
    %1017 = vector.load %arg9[%c0_626, %c0_627] : memref<18x96xf32, #tpu.memory_space<vmem>>, vector<16x8xf32>
    %c0_628 = arith.constant 0 : index
    %c32_629 = arith.constant 32 : index
    %1018 = vector.load %arg9[%c0_628, %c32_629] : memref<18x96xf32, #tpu.memory_space<vmem>>, vector<16x8xf32>
    %c0_630 = arith.constant 0 : index
    %c64_631 = arith.constant 64 : index
    %1019 = vector.load %arg9[%c0_630, %c64_631] : memref<18x96xf32, #tpu.memory_space<vmem>>, vector<16x8xf32>
    %cst_632 = arith.constant dense<0.000000e+00> : vector<16x16xf32>
    %1020 = tpu.matmul %1017, %1018, %cst_632 {dimension_numbers = #tpu.dot_dimension_numbers<[1], [1], [0], [0], [0, 0, 1, 0], [], []>} : vector<16x8xf32>, vector<16x8xf32>, vector<16x16xf32> -> vector<16x16xf32>
    %cst_633 = arith.constant 0.353553385 : f32
    %1021 = vector.broadcast %cst_633 : f32 to vector<16x16xf32>
    %1022 = arith.mulf %1020, %1021 : vector<16x16xf32>
    %1023 = arith.addf %1022, %1016 : vector<16x16xf32>
    %cst_634 = arith.constant dense<0xFF800000> : vector<16xf32>
    %1024 = vector.multi_reduction <maximumf>, %1023, %cst_634 [1] : vector<16x16xf32> to vector<16xf32>
    %1025 = vector.shape_cast %1024 : vector<16xf32> to vector<16x1xf32>
    %1026 = vector.broadcast %1025 : vector<16x1xf32> to vector<16x16xf32>
    %1027 = arith.subf %1023, %1026 : vector<16x16xf32>
    %1028 = math.exp %1027 : vector<16x16xf32>
    %cst_635 = arith.constant dense<0.000000e+00> : vector<16xf32>
    %1029 = vector.multi_reduction <add>, %1028, %cst_635 [1] : vector<16x16xf32> to vector<16xf32>
    %1030 = vector.shape_cast %1029 : vector<16xf32> to vector<16x1xf32>
    %1031 = tpu.reciprocal %1030 : vector<16x1xf32> -> vector<16x1xf32>
    %1032 = vector.broadcast %1031 : vector<16x1xf32> to vector<16x16xf32>
    %1033 = arith.mulf %1028, %1032 : vector<16x16xf32>
    %cst_636 = arith.constant dense<0.000000e+00> : vector<16x8xf32>
    %1034 = tpu.matmul %1033, %1019, %cst_636 {dimension_numbers = #tpu.dot_dimension_numbers<[1], [0], [0], [1], [0, 0, 1, 1], [], []>} : vector<16x16xf32>, vector<16x8xf32>, vector<16x8xf32> -> vector<16x8xf32>
    %c0_637 = arith.constant 0 : index
    %c1504 = arith.constant 1504 : index
    %1035 = vector.load %arg6[%c0_637, %c1504] : memref<32x1920xf32, #tpu.memory_space<vmem>>, vector<8x32xf32>
    %cst_638 = arith.constant dense<0.000000e+00> : vector<16x32xf32>
    %1036 = tpu.matmul %1034, %1035, %cst_638 {dimension_numbers = #tpu.dot_dimension_numbers<[1], [0], [0], [1], [0, 0, 1, 1], [], []>} : vector<16x8xf32>, vector<8x32xf32>, vector<16x32xf32> -> vector<16x32xf32>
    %c0_639 = arith.constant 0 : index
    %c8_640 = arith.constant 8 : index
    %1037 = vector.load %arg9[%c0_639, %c8_640] : memref<18x96xf32, #tpu.memory_space<vmem>>, vector<16x8xf32>
    %c0_641 = arith.constant 0 : index
    %c40_642 = arith.constant 40 : index
    %1038 = vector.load %arg9[%c0_641, %c40_642] : memref<18x96xf32, #tpu.memory_space<vmem>>, vector<16x8xf32>
    %c0_643 = arith.constant 0 : index
    %c72_644 = arith.constant 72 : index
    %1039 = vector.load %arg9[%c0_643, %c72_644] : memref<18x96xf32, #tpu.memory_space<vmem>>, vector<16x8xf32>
    %cst_645 = arith.constant dense<0.000000e+00> : vector<16x16xf32>
    %1040 = tpu.matmul %1037, %1038, %cst_645 {dimension_numbers = #tpu.dot_dimension_numbers<[1], [1], [0], [0], [0, 0, 1, 0], [], []>} : vector<16x8xf32>, vector<16x8xf32>, vector<16x16xf32> -> vector<16x16xf32>
    %cst_646 = arith.constant 0.353553385 : f32
    %1041 = vector.broadcast %cst_646 : f32 to vector<16x16xf32>
    %1042 = arith.mulf %1040, %1041 : vector<16x16xf32>
    %1043 = arith.addf %1042, %1016 : vector<16x16xf32>
    %cst_647 = arith.constant dense<0xFF800000> : vector<16xf32>
    %1044 = vector.multi_reduction <maximumf>, %1043, %cst_647 [1] : vector<16x16xf32> to vector<16xf32>
    %1045 = vector.shape_cast %1044 : vector<16xf32> to vector<16x1xf32>
    %1046 = vector.broadcast %1045 : vector<16x1xf32> to vector<16x16xf32>
    %1047 = arith.subf %1043, %1046 : vector<16x16xf32>
    %1048 = math.exp %1047 : vector<16x16xf32>
    %cst_648 = arith.constant dense<0.000000e+00> : vector<16xf32>
    %1049 = vector.multi_reduction <add>, %1048, %cst_648 [1] : vector<16x16xf32> to vector<16xf32>
    %1050 = vector.shape_cast %1049 : vector<16xf32> to vector<16x1xf32>
    %1051 = tpu.reciprocal %1050 : vector<16x1xf32> -> vector<16x1xf32>
    %1052 = vector.broadcast %1051 : vector<16x1xf32> to vector<16x16xf32>
    %1053 = arith.mulf %1048, %1052 : vector<16x16xf32>
    %cst_649 = arith.constant dense<0.000000e+00> : vector<16x8xf32>
    %1054 = tpu.matmul %1053, %1039, %cst_649 {dimension_numbers = #tpu.dot_dimension_numbers<[1], [0], [0], [1], [0, 0, 1, 1], [], []>} : vector<16x16xf32>, vector<16x8xf32>, vector<16x8xf32> -> vector<16x8xf32>
    %c8_650 = arith.constant 8 : index
    %c1504_651 = arith.constant 1504 : index
    %1055 = vector.load %arg6[%c8_650, %c1504_651] : memref<32x1920xf32, #tpu.memory_space<vmem>>, vector<8x32xf32>
    %cst_652 = arith.constant dense<0.000000e+00> : vector<16x32xf32>
    %1056 = tpu.matmul %1054, %1055, %cst_652 {dimension_numbers = #tpu.dot_dimension_numbers<[1], [0], [0], [1], [0, 0, 1, 1], [], []>} : vector<16x8xf32>, vector<8x32xf32>, vector<16x32xf32> -> vector<16x32xf32>
    %1057 = arith.addf %1036, %1056 : vector<16x32xf32>
    %c0_653 = arith.constant 0 : index
    %c16_654 = arith.constant 16 : index
    %1058 = vector.load %arg9[%c0_653, %c16_654] : memref<18x96xf32, #tpu.memory_space<vmem>>, vector<16x8xf32>
    %c0_655 = arith.constant 0 : index
    %c48_656 = arith.constant 48 : index
    %1059 = vector.load %arg9[%c0_655, %c48_656] : memref<18x96xf32, #tpu.memory_space<vmem>>, vector<16x8xf32>
    %c0_657 = arith.constant 0 : index
    %c80_658 = arith.constant 80 : index
    %1060 = vector.load %arg9[%c0_657, %c80_658] : memref<18x96xf32, #tpu.memory_space<vmem>>, vector<16x8xf32>
    %cst_659 = arith.constant dense<0.000000e+00> : vector<16x16xf32>
    %1061 = tpu.matmul %1058, %1059, %cst_659 {dimension_numbers = #tpu.dot_dimension_numbers<[1], [1], [0], [0], [0, 0, 1, 0], [], []>} : vector<16x8xf32>, vector<16x8xf32>, vector<16x16xf32> -> vector<16x16xf32>
    %cst_660 = arith.constant 0.353553385 : f32
    %1062 = vector.broadcast %cst_660 : f32 to vector<16x16xf32>
    %1063 = arith.mulf %1061, %1062 : vector<16x16xf32>
    %1064 = arith.addf %1063, %1016 : vector<16x16xf32>
    %cst_661 = arith.constant dense<0xFF800000> : vector<16xf32>
    %1065 = vector.multi_reduction <maximumf>, %1064, %cst_661 [1] : vector<16x16xf32> to vector<16xf32>
    %1066 = vector.shape_cast %1065 : vector<16xf32> to vector<16x1xf32>
    %1067 = vector.broadcast %1066 : vector<16x1xf32> to vector<16x16xf32>
    %1068 = arith.subf %1064, %1067 : vector<16x16xf32>
    %1069 = math.exp %1068 : vector<16x16xf32>
    %cst_662 = arith.constant dense<0.000000e+00> : vector<16xf32>
    %1070 = vector.multi_reduction <add>, %1069, %cst_662 [1] : vector<16x16xf32> to vector<16xf32>
    %1071 = vector.shape_cast %1070 : vector<16xf32> to vector<16x1xf32>
    %1072 = tpu.reciprocal %1071 : vector<16x1xf32> -> vector<16x1xf32>
    %1073 = vector.broadcast %1072 : vector<16x1xf32> to vector<16x16xf32>
    %1074 = arith.mulf %1069, %1073 : vector<16x16xf32>
    %cst_663 = arith.constant dense<0.000000e+00> : vector<16x8xf32>
    %1075 = tpu.matmul %1074, %1060, %cst_663 {dimension_numbers = #tpu.dot_dimension_numbers<[1], [0], [0], [1], [0, 0, 1, 1], [], []>} : vector<16x16xf32>, vector<16x8xf32>, vector<16x8xf32> -> vector<16x8xf32>
    %c16_664 = arith.constant 16 : index
    %c1504_665 = arith.constant 1504 : index
    %1076 = vector.load %arg6[%c16_664, %c1504_665] : memref<32x1920xf32, #tpu.memory_space<vmem>>, vector<8x32xf32>
    %cst_666 = arith.constant dense<0.000000e+00> : vector<16x32xf32>
    %1077 = tpu.matmul %1075, %1076, %cst_666 {dimension_numbers = #tpu.dot_dimension_numbers<[1], [0], [0], [1], [0, 0, 1, 1], [], []>} : vector<16x8xf32>, vector<8x32xf32>, vector<16x32xf32> -> vector<16x32xf32>
    %1078 = arith.addf %1057, %1077 : vector<16x32xf32>
    %c0_667 = arith.constant 0 : index
    %c24_668 = arith.constant 24 : index
    %1079 = vector.load %arg9[%c0_667, %c24_668] : memref<18x96xf32, #tpu.memory_space<vmem>>, vector<16x8xf32>
    %c0_669 = arith.constant 0 : index
    %c56_670 = arith.constant 56 : index
    %1080 = vector.load %arg9[%c0_669, %c56_670] : memref<18x96xf32, #tpu.memory_space<vmem>>, vector<16x8xf32>
    %c0_671 = arith.constant 0 : index
    %c88_672 = arith.constant 88 : index
    %1081 = vector.load %arg9[%c0_671, %c88_672] : memref<18x96xf32, #tpu.memory_space<vmem>>, vector<16x8xf32>
    %cst_673 = arith.constant dense<0.000000e+00> : vector<16x16xf32>
    %1082 = tpu.matmul %1079, %1080, %cst_673 {dimension_numbers = #tpu.dot_dimension_numbers<[1], [1], [0], [0], [0, 0, 1, 0], [], []>} : vector<16x8xf32>, vector<16x8xf32>, vector<16x16xf32> -> vector<16x16xf32>
    %cst_674 = arith.constant 0.353553385 : f32
    %1083 = vector.broadcast %cst_674 : f32 to vector<16x16xf32>
    %1084 = arith.mulf %1082, %1083 : vector<16x16xf32>
    %1085 = arith.addf %1084, %1016 : vector<16x16xf32>
    %cst_675 = arith.constant dense<0xFF800000> : vector<16xf32>
    %1086 = vector.multi_reduction <maximumf>, %1085, %cst_675 [1] : vector<16x16xf32> to vector<16xf32>
    %1087 = vector.shape_cast %1086 : vector<16xf32> to vector<16x1xf32>
    %1088 = vector.broadcast %1087 : vector<16x1xf32> to vector<16x16xf32>
    %1089 = arith.subf %1085, %1088 : vector<16x16xf32>
    %1090 = math.exp %1089 : vector<16x16xf32>
    %cst_676 = arith.constant dense<0.000000e+00> : vector<16xf32>
    %1091 = vector.multi_reduction <add>, %1090, %cst_676 [1] : vector<16x16xf32> to vector<16xf32>
    %1092 = vector.shape_cast %1091 : vector<16xf32> to vector<16x1xf32>
    %1093 = tpu.reciprocal %1092 : vector<16x1xf32> -> vector<16x1xf32>
    %1094 = vector.broadcast %1093 : vector<16x1xf32> to vector<16x16xf32>
    %1095 = arith.mulf %1090, %1094 : vector<16x16xf32>
    %cst_677 = arith.constant dense<0.000000e+00> : vector<16x8xf32>
    %1096 = tpu.matmul %1095, %1081, %cst_677 {dimension_numbers = #tpu.dot_dimension_numbers<[1], [0], [0], [1], [0, 0, 1, 1], [], []>} : vector<16x16xf32>, vector<16x8xf32>, vector<16x8xf32> -> vector<16x8xf32>
    %c24_678 = arith.constant 24 : index
    %c1504_679 = arith.constant 1504 : index
    %1097 = vector.load %arg6[%c24_678, %c1504_679] : memref<32x1920xf32, #tpu.memory_space<vmem>>, vector<8x32xf32>
    %cst_680 = arith.constant dense<0.000000e+00> : vector<16x32xf32>
    %1098 = tpu.matmul %1096, %1097, %cst_680 {dimension_numbers = #tpu.dot_dimension_numbers<[1], [0], [0], [1], [0, 0, 1, 1], [], []>} : vector<16x8xf32>, vector<8x32xf32>, vector<16x32xf32> -> vector<16x32xf32>
    %1099 = arith.addf %1078, %1098 : vector<16x32xf32>
    %c21_681 = arith.constant 21 : index
    %c96_682 = arith.constant 96 : index
    %1100 = vector.load %arg7[%c21_681, %c96_682] : memref<32x128xf32, #tpu.memory_space<vmem>>, vector<1x32xf32>
    %1101 = vector.broadcast %1100 : vector<1x32xf32> to vector<16x32xf32>
    %1102 = arith.addf %1099, %1101 : vector<16x32xf32>
    %1103 = arith.addf %1004, %1102 : vector<16x32xf32>
    %c24_683 = arith.constant 24 : index
    %c0_684 = arith.constant 0 : index
    %1104 = vector.load %arg7[%c24_683, %c0_684] : memref<32x128xf32, #tpu.memory_space<vmem>>, vector<1x32xf32>
    %c24_685 = arith.constant 24 : index
    %c32_686 = arith.constant 32 : index
    %1105 = vector.load %arg7[%c24_685, %c32_686] : memref<32x128xf32, #tpu.memory_space<vmem>>, vector<1x32xf32>
    %cst_687 = arith.constant dense<0.000000e+00> : vector<16xf32>
    %1106 = vector.multi_reduction <add>, %1103, %cst_687 [1] : vector<16x32xf32> to vector<16xf32>
    %1107 = vector.shape_cast %1106 : vector<16xf32> to vector<16x1xf32>
    %cst_688 = arith.constant 3.200000e+01 : f32
    %1108 = vector.broadcast %cst_688 : f32 to vector<16x1xf32>
    %1109 = arith.divf %1107, %1108 : vector<16x1xf32>
    %1110 = vector.broadcast %1109 : vector<16x1xf32> to vector<16x32xf32>
    %1111 = arith.subf %1103, %1110 : vector<16x32xf32>
    %1112 = arith.mulf %1111, %1111 : vector<16x32xf32>
    %cst_689 = arith.constant dense<0.000000e+00> : vector<16xf32>
    %1113 = vector.multi_reduction <add>, %1112, %cst_689 [1] : vector<16x32xf32> to vector<16xf32>
    %1114 = vector.shape_cast %1113 : vector<16xf32> to vector<16x1xf32>
    %cst_690 = arith.constant 3.200000e+01 : f32
    %1115 = vector.broadcast %cst_690 : f32 to vector<16x1xf32>
    %1116 = arith.divf %1114, %1115 : vector<16x1xf32>
    %cst_691 = arith.constant 9.99999974E-6 : f32
    %1117 = vector.broadcast %cst_691 : f32 to vector<16x1xf32>
    %1118 = arith.addf %1116, %1117 : vector<16x1xf32>
    %1119 = math.rsqrt %1118 : vector<16x1xf32>
    %1120 = vector.broadcast %1119 : vector<16x1xf32> to vector<16x32xf32>
    %1121 = arith.mulf %1111, %1120 : vector<16x32xf32>
    %1122 = vector.broadcast %1104 : vector<1x32xf32> to vector<16x32xf32>
    %1123 = arith.mulf %1121, %1122 : vector<16x32xf32>
    %1124 = vector.broadcast %1105 : vector<1x32xf32> to vector<16x32xf32>
    %1125 = arith.addf %1123, %1124 : vector<16x32xf32>
    %c0_692 = arith.constant 0 : index
    %c1536 = arith.constant 1536 : index
    %1126 = vector.load %arg6[%c0_692, %c1536] : memref<32x1920xf32, #tpu.memory_space<vmem>>, vector<32x32xf32>
    %c0_693 = arith.constant 0 : index
    %c1568 = arith.constant 1568 : index
    %1127 = vector.load %arg6[%c0_693, %c1568] : memref<32x1920xf32, #tpu.memory_space<vmem>>, vector<32x64xf32>
    %c22 = arith.constant 22 : index
    %c0_694 = arith.constant 0 : index
    %1128 = vector.load %arg7[%c22, %c0_694] : memref<32x128xf32, #tpu.memory_space<vmem>>, vector<1x32xf32>
    %c22_695 = arith.constant 22 : index
    %c32_696 = arith.constant 32 : index
    %1129 = vector.load %arg7[%c22_695, %c32_696] : memref<32x128xf32, #tpu.memory_space<vmem>>, vector<1x64xf32>
    %cst_697 = arith.constant dense<0.000000e+00> : vector<16x32xf32>
    %1130 = tpu.matmul %1125, %1126, %cst_697 {dimension_numbers = #tpu.dot_dimension_numbers<[1], [0], [0], [1], [0, 0, 1, 1], [], []>} : vector<16x32xf32>, vector<32x32xf32>, vector<16x32xf32> -> vector<16x32xf32>
    %1131 = vector.broadcast %1128 : vector<1x32xf32> to vector<16x32xf32>
    %1132 = arith.addf %1130, %1131 : vector<16x32xf32>
    %c0_698 = arith.constant 0 : index
    %c0_699 = arith.constant 0 : index
    %1133 = vector.load %arg9[%c0_698, %c0_699] : memref<18x96xf32, #tpu.memory_space<vmem>>, vector<16x32xf32>
    tpu.vector_store %arg9[%c0_698, %c0_699], %1132 {strides = array<i32>} : memref<18x96xf32, #tpu.memory_space<vmem>>, vector<16x32xf32>,
    %cst_700 = arith.constant dense<0.000000e+00> : vector<4x64xf32>
    %1134 = tpu.matmul %692, %1127, %cst_700 {dimension_numbers = #tpu.dot_dimension_numbers<[1], [0], [0], [1], [0, 0, 1, 1], [], []>} : vector<4x32xf32>, vector<32x64xf32>, vector<4x64xf32> -> vector<4x64xf32>
    %1135 = vector.broadcast %1129 : vector<1x64xf32> to vector<4x64xf32>
    %1136 = arith.addf %1134, %1135 : vector<4x64xf32>
    %c0_701 = arith.constant 0 : index
    %c32_702 = arith.constant 32 : index
    %1137 = vector.load %arg9[%c0_701, %c32_702] : memref<18x96xf32, #tpu.memory_space<vmem>>, vector<4x64xf32>
    tpu.vector_store %arg9[%c0_701, %c32_702], %1136 {strides = array<i32>} : memref<18x96xf32, #tpu.memory_space<vmem>>, vector<4x64xf32>,
    %c0_703 = arith.constant 0 : index
    %c0_704 = arith.constant 0 : index
    %1138 = vector.load %arg9[%c0_703, %c0_704] : memref<18x96xf32, #tpu.memory_space<vmem>>, vector<16x8xf32>
    %c0_705 = arith.constant 0 : index
    %c32_706 = arith.constant 32 : index
    %1139 = vector.load %arg9[%c0_705, %c32_706] : memref<18x96xf32, #tpu.memory_space<vmem>>, vector<4x8xf32>
    %c0_707 = arith.constant 0 : index
    %c64_708 = arith.constant 64 : index
    %1140 = vector.load %arg9[%c0_707, %c64_708] : memref<18x96xf32, #tpu.memory_space<vmem>>, vector<4x8xf32>
    %cst_709 = arith.constant dense<0.000000e+00> : vector<16x4xf32>
    %1141 = tpu.matmul %1138, %1139, %cst_709 {dimension_numbers = #tpu.dot_dimension_numbers<[1], [1], [0], [0], [0, 0, 1, 0], [], []>} : vector<16x8xf32>, vector<4x8xf32>, vector<16x4xf32> -> vector<16x4xf32>
    %cst_710 = arith.constant 0.353553385 : f32
    %1142 = vector.broadcast %cst_710 : f32 to vector<16x4xf32>
    %1143 = arith.mulf %1141, %1142 : vector<16x4xf32>
    %cst_711 = arith.constant dense<0xFF800000> : vector<16xf32>
    %1144 = vector.multi_reduction <maximumf>, %1143, %cst_711 [1] : vector<16x4xf32> to vector<16xf32>
    %1145 = vector.shape_cast %1144 : vector<16xf32> to vector<16x1xf32>
    %1146 = vector.broadcast %1145 : vector<16x1xf32> to vector<16x4xf32>
    %1147 = arith.subf %1143, %1146 : vector<16x4xf32>
    %1148 = math.exp %1147 : vector<16x4xf32>
    %cst_712 = arith.constant dense<0.000000e+00> : vector<16xf32>
    %1149 = vector.multi_reduction <add>, %1148, %cst_712 [1] : vector<16x4xf32> to vector<16xf32>
    %1150 = vector.shape_cast %1149 : vector<16xf32> to vector<16x1xf32>
    %1151 = tpu.reciprocal %1150 : vector<16x1xf32> -> vector<16x1xf32>
    %1152 = vector.broadcast %1151 : vector<16x1xf32> to vector<16x4xf32>
    %1153 = arith.mulf %1148, %1152 : vector<16x4xf32>
    %cst_713 = arith.constant dense<0.000000e+00> : vector<16x8xf32>
    %1154 = tpu.matmul %1153, %1140, %cst_713 {dimension_numbers = #tpu.dot_dimension_numbers<[1], [0], [0], [1], [0, 0, 1, 1], [], []>} : vector<16x4xf32>, vector<4x8xf32>, vector<16x8xf32> -> vector<16x8xf32>
    %c0_714 = arith.constant 0 : index
    %c1632 = arith.constant 1632 : index
    %1155 = vector.load %arg6[%c0_714, %c1632] : memref<32x1920xf32, #tpu.memory_space<vmem>>, vector<8x32xf32>
    %cst_715 = arith.constant dense<0.000000e+00> : vector<16x32xf32>
    %1156 = tpu.matmul %1154, %1155, %cst_715 {dimension_numbers = #tpu.dot_dimension_numbers<[1], [0], [0], [1], [0, 0, 1, 1], [], []>} : vector<16x8xf32>, vector<8x32xf32>, vector<16x32xf32> -> vector<16x32xf32>
    %c0_716 = arith.constant 0 : index
    %c8_717 = arith.constant 8 : index
    %1157 = vector.load %arg9[%c0_716, %c8_717] : memref<18x96xf32, #tpu.memory_space<vmem>>, vector<16x8xf32>
    %c0_718 = arith.constant 0 : index
    %c40_719 = arith.constant 40 : index
    %1158 = vector.load %arg9[%c0_718, %c40_719] : memref<18x96xf32, #tpu.memory_space<vmem>>, vector<4x8xf32>
    %c0_720 = arith.constant 0 : index
    %c72_721 = arith.constant 72 : index
    %1159 = vector.load %arg9[%c0_720, %c72_721] : memref<18x96xf32, #tpu.memory_space<vmem>>, vector<4x8xf32>
    %cst_722 = arith.constant dense<0.000000e+00> : vector<16x4xf32>
    %1160 = tpu.matmul %1157, %1158, %cst_722 {dimension_numbers = #tpu.dot_dimension_numbers<[1], [1], [0], [0], [0, 0, 1, 0], [], []>} : vector<16x8xf32>, vector<4x8xf32>, vector<16x4xf32> -> vector<16x4xf32>
    %cst_723 = arith.constant 0.353553385 : f32
    %1161 = vector.broadcast %cst_723 : f32 to vector<16x4xf32>
    %1162 = arith.mulf %1160, %1161 : vector<16x4xf32>
    %cst_724 = arith.constant dense<0xFF800000> : vector<16xf32>
    %1163 = vector.multi_reduction <maximumf>, %1162, %cst_724 [1] : vector<16x4xf32> to vector<16xf32>
    %1164 = vector.shape_cast %1163 : vector<16xf32> to vector<16x1xf32>
    %1165 = vector.broadcast %1164 : vector<16x1xf32> to vector<16x4xf32>
    %1166 = arith.subf %1162, %1165 : vector<16x4xf32>
    %1167 = math.exp %1166 : vector<16x4xf32>
    %cst_725 = arith.constant dense<0.000000e+00> : vector<16xf32>
    %1168 = vector.multi_reduction <add>, %1167, %cst_725 [1] : vector<16x4xf32> to vector<16xf32>
    %1169 = vector.shape_cast %1168 : vector<16xf32> to vector<16x1xf32>
    %1170 = tpu.reciprocal %1169 : vector<16x1xf32> -> vector<16x1xf32>
    %1171 = vector.broadcast %1170 : vector<16x1xf32> to vector<16x4xf32>
    %1172 = arith.mulf %1167, %1171 : vector<16x4xf32>
    %cst_726 = arith.constant dense<0.000000e+00> : vector<16x8xf32>
    %1173 = tpu.matmul %1172, %1159, %cst_726 {dimension_numbers = #tpu.dot_dimension_numbers<[1], [0], [0], [1], [0, 0, 1, 1], [], []>} : vector<16x4xf32>, vector<4x8xf32>, vector<16x8xf32> -> vector<16x8xf32>
    %c8_727 = arith.constant 8 : index
    %c1632_728 = arith.constant 1632 : index
    %1174 = vector.load %arg6[%c8_727, %c1632_728] : memref<32x1920xf32, #tpu.memory_space<vmem>>, vector<8x32xf32>
    %cst_729 = arith.constant dense<0.000000e+00> : vector<16x32xf32>
    %1175 = tpu.matmul %1173, %1174, %cst_729 {dimension_numbers = #tpu.dot_dimension_numbers<[1], [0], [0], [1], [0, 0, 1, 1], [], []>} : vector<16x8xf32>, vector<8x32xf32>, vector<16x32xf32> -> vector<16x32xf32>
    %1176 = arith.addf %1156, %1175 : vector<16x32xf32>
    %c0_730 = arith.constant 0 : index
    %c16_731 = arith.constant 16 : index
    %1177 = vector.load %arg9[%c0_730, %c16_731] : memref<18x96xf32, #tpu.memory_space<vmem>>, vector<16x8xf32>
    %c0_732 = arith.constant 0 : index
    %c48_733 = arith.constant 48 : index
    %1178 = vector.load %arg9[%c0_732, %c48_733] : memref<18x96xf32, #tpu.memory_space<vmem>>, vector<4x8xf32>
    %c0_734 = arith.constant 0 : index
    %c80_735 = arith.constant 80 : index
    %1179 = vector.load %arg9[%c0_734, %c80_735] : memref<18x96xf32, #tpu.memory_space<vmem>>, vector<4x8xf32>
    %cst_736 = arith.constant dense<0.000000e+00> : vector<16x4xf32>
    %1180 = tpu.matmul %1177, %1178, %cst_736 {dimension_numbers = #tpu.dot_dimension_numbers<[1], [1], [0], [0], [0, 0, 1, 0], [], []>} : vector<16x8xf32>, vector<4x8xf32>, vector<16x4xf32> -> vector<16x4xf32>
    %cst_737 = arith.constant 0.353553385 : f32
    %1181 = vector.broadcast %cst_737 : f32 to vector<16x4xf32>
    %1182 = arith.mulf %1180, %1181 : vector<16x4xf32>
    %cst_738 = arith.constant dense<0xFF800000> : vector<16xf32>
    %1183 = vector.multi_reduction <maximumf>, %1182, %cst_738 [1] : vector<16x4xf32> to vector<16xf32>
    %1184 = vector.shape_cast %1183 : vector<16xf32> to vector<16x1xf32>
    %1185 = vector.broadcast %1184 : vector<16x1xf32> to vector<16x4xf32>
    %1186 = arith.subf %1182, %1185 : vector<16x4xf32>
    %1187 = math.exp %1186 : vector<16x4xf32>
    %cst_739 = arith.constant dense<0.000000e+00> : vector<16xf32>
    %1188 = vector.multi_reduction <add>, %1187, %cst_739 [1] : vector<16x4xf32> to vector<16xf32>
    %1189 = vector.shape_cast %1188 : vector<16xf32> to vector<16x1xf32>
    %1190 = tpu.reciprocal %1189 : vector<16x1xf32> -> vector<16x1xf32>
    %1191 = vector.broadcast %1190 : vector<16x1xf32> to vector<16x4xf32>
    %1192 = arith.mulf %1187, %1191 : vector<16x4xf32>
    %cst_740 = arith.constant dense<0.000000e+00> : vector<16x8xf32>
    %1193 = tpu.matmul %1192, %1179, %cst_740 {dimension_numbers = #tpu.dot_dimension_numbers<[1], [0], [0], [1], [0, 0, 1, 1], [], []>} : vector<16x4xf32>, vector<4x8xf32>, vector<16x8xf32> -> vector<16x8xf32>
    %c16_741 = arith.constant 16 : index
    %c1632_742 = arith.constant 1632 : index
    %1194 = vector.load %arg6[%c16_741, %c1632_742] : memref<32x1920xf32, #tpu.memory_space<vmem>>, vector<8x32xf32>
    %cst_743 = arith.constant dense<0.000000e+00> : vector<16x32xf32>
    %1195 = tpu.matmul %1193, %1194, %cst_743 {dimension_numbers = #tpu.dot_dimension_numbers<[1], [0], [0], [1], [0, 0, 1, 1], [], []>} : vector<16x8xf32>, vector<8x32xf32>, vector<16x32xf32> -> vector<16x32xf32>
    %1196 = arith.addf %1176, %1195 : vector<16x32xf32>
    %c0_744 = arith.constant 0 : index
    %c24_745 = arith.constant 24 : index
    %1197 = vector.load %arg9[%c0_744, %c24_745] : memref<18x96xf32, #tpu.memory_space<vmem>>, vector<16x8xf32>
    %c0_746 = arith.constant 0 : index
    %c56_747 = arith.constant 56 : index
    %1198 = vector.load %arg9[%c0_746, %c56_747] : memref<18x96xf32, #tpu.memory_space<vmem>>, vector<4x8xf32>
    %c0_748 = arith.constant 0 : index
    %c88_749 = arith.constant 88 : index
    %1199 = vector.load %arg9[%c0_748, %c88_749] : memref<18x96xf32, #tpu.memory_space<vmem>>, vector<4x8xf32>
    %cst_750 = arith.constant dense<0.000000e+00> : vector<16x4xf32>
    %1200 = tpu.matmul %1197, %1198, %cst_750 {dimension_numbers = #tpu.dot_dimension_numbers<[1], [1], [0], [0], [0, 0, 1, 0], [], []>} : vector<16x8xf32>, vector<4x8xf32>, vector<16x4xf32> -> vector<16x4xf32>
    %cst_751 = arith.constant 0.353553385 : f32
    %1201 = vector.broadcast %cst_751 : f32 to vector<16x4xf32>
    %1202 = arith.mulf %1200, %1201 : vector<16x4xf32>
    %cst_752 = arith.constant dense<0xFF800000> : vector<16xf32>
    %1203 = vector.multi_reduction <maximumf>, %1202, %cst_752 [1] : vector<16x4xf32> to vector<16xf32>
    %1204 = vector.shape_cast %1203 : vector<16xf32> to vector<16x1xf32>
    %1205 = vector.broadcast %1204 : vector<16x1xf32> to vector<16x4xf32>
    %1206 = arith.subf %1202, %1205 : vector<16x4xf32>
    %1207 = math.exp %1206 : vector<16x4xf32>
    %cst_753 = arith.constant dense<0.000000e+00> : vector<16xf32>
    %1208 = vector.multi_reduction <add>, %1207, %cst_753 [1] : vector<16x4xf32> to vector<16xf32>
    %1209 = vector.shape_cast %1208 : vector<16xf32> to vector<16x1xf32>
    %1210 = tpu.reciprocal %1209 : vector<16x1xf32> -> vector<16x1xf32>
    %1211 = vector.broadcast %1210 : vector<16x1xf32> to vector<16x4xf32>
    %1212 = arith.mulf %1207, %1211 : vector<16x4xf32>
    %cst_754 = arith.constant dense<0.000000e+00> : vector<16x8xf32>
    %1213 = tpu.matmul %1212, %1199, %cst_754 {dimension_numbers = #tpu.dot_dimension_numbers<[1], [0], [0], [1], [0, 0, 1, 1], [], []>} : vector<16x4xf32>, vector<4x8xf32>, vector<16x8xf32> -> vector<16x8xf32>
    %c24_755 = arith.constant 24 : index
    %c1632_756 = arith.constant 1632 : index
    %1214 = vector.load %arg6[%c24_755, %c1632_756] : memref<32x1920xf32, #tpu.memory_space<vmem>>, vector<8x32xf32>
    %cst_757 = arith.constant dense<0.000000e+00> : vector<16x32xf32>
    %1215 = tpu.matmul %1213, %1214, %cst_757 {dimension_numbers = #tpu.dot_dimension_numbers<[1], [0], [0], [1], [0, 0, 1, 1], [], []>} : vector<16x8xf32>, vector<8x32xf32>, vector<16x32xf32> -> vector<16x32xf32>
    %1216 = arith.addf %1196, %1215 : vector<16x32xf32>
    %c22_758 = arith.constant 22 : index
    %c96_759 = arith.constant 96 : index
    %1217 = vector.load %arg7[%c22_758, %c96_759] : memref<32x128xf32, #tpu.memory_space<vmem>>, vector<1x32xf32>
    %1218 = vector.broadcast %1217 : vector<1x32xf32> to vector<16x32xf32>
    %1219 = arith.addf %1216, %1218 : vector<16x32xf32>
    %1220 = arith.addf %1125, %1219 : vector<16x32xf32>
    %c25 = arith.constant 25 : index
    %c0_760 = arith.constant 0 : index
    %1221 = vector.load %arg7[%c25, %c0_760] : memref<32x128xf32, #tpu.memory_space<vmem>>, vector<1x32xf32>
    %c25_761 = arith.constant 25 : index
    %c32_762 = arith.constant 32 : index
    %1222 = vector.load %arg7[%c25_761, %c32_762] : memref<32x128xf32, #tpu.memory_space<vmem>>, vector<1x32xf32>
    %cst_763 = arith.constant dense<0.000000e+00> : vector<16xf32>
    %1223 = vector.multi_reduction <add>, %1220, %cst_763 [1] : vector<16x32xf32> to vector<16xf32>
    %1224 = vector.shape_cast %1223 : vector<16xf32> to vector<16x1xf32>
    %cst_764 = arith.constant 3.200000e+01 : f32
    %1225 = vector.broadcast %cst_764 : f32 to vector<16x1xf32>
    %1226 = arith.divf %1224, %1225 : vector<16x1xf32>
    %1227 = vector.broadcast %1226 : vector<16x1xf32> to vector<16x32xf32>
    %1228 = arith.subf %1220, %1227 : vector<16x32xf32>
    %1229 = arith.mulf %1228, %1228 : vector<16x32xf32>
    %cst_765 = arith.constant dense<0.000000e+00> : vector<16xf32>
    %1230 = vector.multi_reduction <add>, %1229, %cst_765 [1] : vector<16x32xf32> to vector<16xf32>
    %1231 = vector.shape_cast %1230 : vector<16xf32> to vector<16x1xf32>
    %cst_766 = arith.constant 3.200000e+01 : f32
    %1232 = vector.broadcast %cst_766 : f32 to vector<16x1xf32>
    %1233 = arith.divf %1231, %1232 : vector<16x1xf32>
    %cst_767 = arith.constant 9.99999974E-6 : f32
    %1234 = vector.broadcast %cst_767 : f32 to vector<16x1xf32>
    %1235 = arith.addf %1233, %1234 : vector<16x1xf32>
    %1236 = math.rsqrt %1235 : vector<16x1xf32>
    %1237 = vector.broadcast %1236 : vector<16x1xf32> to vector<16x32xf32>
    %1238 = arith.mulf %1228, %1237 : vector<16x32xf32>
    %1239 = vector.broadcast %1221 : vector<1x32xf32> to vector<16x32xf32>
    %1240 = arith.mulf %1238, %1239 : vector<16x32xf32>
    %1241 = vector.broadcast %1222 : vector<1x32xf32> to vector<16x32xf32>
    %1242 = arith.addf %1240, %1241 : vector<16x32xf32>
    %c0_768 = arith.constant 0 : index
    %c1664 = arith.constant 1664 : index
    %1243 = vector.load %arg6[%c0_768, %c1664] : memref<32x1920xf32, #tpu.memory_space<vmem>>, vector<32x32xf32>
    %c0_769 = arith.constant 0 : index
    %c1696 = arith.constant 1696 : index
    %1244 = vector.load %arg6[%c0_769, %c1696] : memref<32x1920xf32, #tpu.memory_space<vmem>>, vector<32x32xf32>
    %c23 = arith.constant 23 : index
    %c0_770 = arith.constant 0 : index
    %1245 = vector.load %arg7[%c23, %c0_770] : memref<32x128xf32, #tpu.memory_space<vmem>>, vector<1x32xf32>
    %c23_771 = arith.constant 23 : index
    %c32_772 = arith.constant 32 : index
    %1246 = vector.load %arg7[%c23_771, %c32_772] : memref<32x128xf32, #tpu.memory_space<vmem>>, vector<1x32xf32>
    %cst_773 = arith.constant dense<0.000000e+00> : vector<16x32xf32>
    %1247 = tpu.matmul %1242, %1243, %cst_773 {dimension_numbers = #tpu.dot_dimension_numbers<[1], [0], [0], [1], [0, 0, 1, 1], [], []>} : vector<16x32xf32>, vector<32x32xf32>, vector<16x32xf32> -> vector<16x32xf32>
    %1248 = vector.broadcast %1245 : vector<1x32xf32> to vector<16x32xf32>
    %1249 = arith.addf %1247, %1248 : vector<16x32xf32>
    %cst_774 = arith.constant 5.000000e-01 : f32
    %1250 = vector.broadcast %cst_774 : f32 to vector<16x32xf32>
    %1251 = arith.mulf %1250, %1249 : vector<16x32xf32>
    %cst_775 = arith.constant 0.707106769 : f32
    %1252 = vector.broadcast %cst_775 : f32 to vector<16x32xf32>
    %1253 = arith.mulf %1249, %1252 : vector<16x32xf32>
    %cst_776 = arith.constant 0.000000e+00 : f32
    %1254 = vector.broadcast %cst_776 : f32 to vector<16x32xf32>
    %1255 = arith.cmpf oge, %1253, %1254 : vector<16x32xf32>
    %cst_777 = arith.constant 1.000000e+00 : f32
    %cst_778 = arith.constant -1.000000e+00 : f32
    %1256 = vector.broadcast %cst_777 : f32 to vector<16x32xf32>
    %1257 = vector.broadcast %cst_778 : f32 to vector<16x32xf32>
    %1258 = arith.select %1255, %1256, %1257 : vector<16x32xi1>, vector<16x32xf32>
    %1259 = math.absf %1253 : vector<16x32xf32>
    %cst_779 = arith.constant 0.327591091 : f32
    %1260 = vector.broadcast %cst_779 : f32 to vector<16x32xf32>
    %1261 = arith.mulf %1260, %1259 : vector<16x32xf32>
    %cst_780 = arith.constant 1.000000e+00 : f32
    %1262 = vector.broadcast %cst_780 : f32 to vector<16x32xf32>
    %1263 = arith.addf %1262, %1261 : vector<16x32xf32>
    %cst_781 = arith.constant 1.000000e+00 : f32
    %1264 = vector.broadcast %cst_781 : f32 to vector<16x32xf32>
    %1265 = arith.divf %1264, %1263 : vector<16x32xf32>
    %cst_782 = arith.constant 1.06140542 : f32
    %1266 = vector.broadcast %cst_782 : f32 to vector<16x32xf32>
    %1267 = arith.mulf %1265, %1266 : vector<16x32xf32>
    %cst_783 = arith.constant -1.45315206 : f32
    %1268 = vector.broadcast %cst_783 : f32 to vector<16x32xf32>
    %1269 = arith.addf %1268, %1267 : vector<16x32xf32>
    %1270 = arith.mulf %1265, %1269 : vector<16x32xf32>
    %cst_784 = arith.constant 1.42141378 : f32
    %1271 = vector.broadcast %cst_784 : f32 to vector<16x32xf32>
    %1272 = arith.addf %1271, %1270 : vector<16x32xf32>
    %1273 = arith.mulf %1265, %1272 : vector<16x32xf32>
    %cst_785 = arith.constant -0.284496725 : f32
    %1274 = vector.broadcast %cst_785 : f32 to vector<16x32xf32>
    %1275 = arith.addf %1274, %1273 : vector<16x32xf32>
    %1276 = arith.mulf %1265, %1275 : vector<16x32xf32>
    %cst_786 = arith.constant 0.254829586 : f32
    %1277 = vector.broadcast %cst_786 : f32 to vector<16x32xf32>
    %1278 = arith.addf %1277, %1276 : vector<16x32xf32>
    %1279 = arith.mulf %1265, %1278 : vector<16x32xf32>
    %cst_787 = arith.constant 0.000000e+00 : f32
    %1280 = vector.broadcast %cst_787 : f32 to vector<16x32xf32>
    %1281 = arith.subf %1280, %1259 : vector<16x32xf32>
    %1282 = arith.mulf %1281, %1259 : vector<16x32xf32>
    %1283 = math.exp %1282 : vector<16x32xf32>
    %1284 = arith.mulf %1279, %1283 : vector<16x32xf32>
    %cst_788 = arith.constant 1.000000e+00 : f32
    %1285 = vector.broadcast %cst_788 : f32 to vector<16x32xf32>
    %1286 = arith.subf %1285, %1284 : vector<16x32xf32>
    %1287 = arith.mulf %1258, %1286 : vector<16x32xf32>
    %cst_789 = arith.constant 1.000000e+00 : f32
    %1288 = vector.broadcast %cst_789 : f32 to vector<16x32xf32>
    %1289 = arith.addf %1288, %1287 : vector<16x32xf32>
    %1290 = arith.mulf %1251, %1289 : vector<16x32xf32>
    %cst_790 = arith.constant dense<0.000000e+00> : vector<16x32xf32>
    %1291 = tpu.matmul %1290, %1244, %cst_790 {dimension_numbers = #tpu.dot_dimension_numbers<[1], [0], [0], [1], [0, 0, 1, 1], [], []>} : vector<16x32xf32>, vector<32x32xf32>, vector<16x32xf32> -> vector<16x32xf32>
    %1292 = vector.broadcast %1246 : vector<1x32xf32> to vector<16x32xf32>
    %1293 = arith.addf %1291, %1292 : vector<16x32xf32>
    %1294 = arith.addf %1242, %1293 : vector<16x32xf32>
    %c26 = arith.constant 26 : index
    %c0_791 = arith.constant 0 : index
    %1295 = vector.load %arg7[%c26, %c0_791] : memref<32x128xf32, #tpu.memory_space<vmem>>, vector<1x32xf32>
    %c26_792 = arith.constant 26 : index
    %c32_793 = arith.constant 32 : index
    %1296 = vector.load %arg7[%c26_792, %c32_793] : memref<32x128xf32, #tpu.memory_space<vmem>>, vector<1x32xf32>
    %cst_794 = arith.constant dense<0.000000e+00> : vector<16xf32>
    %1297 = vector.multi_reduction <add>, %1294, %cst_794 [1] : vector<16x32xf32> to vector<16xf32>
    %1298 = vector.shape_cast %1297 : vector<16xf32> to vector<16x1xf32>
    %cst_795 = arith.constant 3.200000e+01 : f32
    %1299 = vector.broadcast %cst_795 : f32 to vector<16x1xf32>
    %1300 = arith.divf %1298, %1299 : vector<16x1xf32>
    %1301 = vector.broadcast %1300 : vector<16x1xf32> to vector<16x32xf32>
    %1302 = arith.subf %1294, %1301 : vector<16x32xf32>
    %1303 = arith.mulf %1302, %1302 : vector<16x32xf32>
    %cst_796 = arith.constant dense<0.000000e+00> : vector<16xf32>
    %1304 = vector.multi_reduction <add>, %1303, %cst_796 [1] : vector<16x32xf32> to vector<16xf32>
    %1305 = vector.shape_cast %1304 : vector<16xf32> to vector<16x1xf32>
    %cst_797 = arith.constant 3.200000e+01 : f32
    %1306 = vector.broadcast %cst_797 : f32 to vector<16x1xf32>
    %1307 = arith.divf %1305, %1306 : vector<16x1xf32>
    %cst_798 = arith.constant 9.99999974E-6 : f32
    %1308 = vector.broadcast %cst_798 : f32 to vector<16x1xf32>
    %1309 = arith.addf %1307, %1308 : vector<16x1xf32>
    %1310 = math.rsqrt %1309 : vector<16x1xf32>
    %1311 = vector.broadcast %1310 : vector<16x1xf32> to vector<16x32xf32>
    %1312 = arith.mulf %1302, %1311 : vector<16x32xf32>
    %1313 = vector.broadcast %1295 : vector<1x32xf32> to vector<16x32xf32>
    %1314 = arith.mulf %1312, %1313 : vector<16x32xf32>
    %1315 = vector.broadcast %1296 : vector<1x32xf32> to vector<16x32xf32>
    %1316 = arith.addf %1314, %1315 : vector<16x32xf32>
    %c27 = arith.constant 27 : index
    %c0_799 = arith.constant 0 : index
    %1317 = vector.load %arg7[%c27, %c0_799] : memref<32x128xf32, #tpu.memory_space<vmem>>, vector<1x32xf32>
    %c27_800 = arith.constant 27 : index
    %c32_801 = arith.constant 32 : index
    %1318 = vector.load %arg7[%c27_800, %c32_801] : memref<32x128xf32, #tpu.memory_space<vmem>>, vector<1x32xf32>
    %cst_802 = arith.constant dense<0.000000e+00> : vector<16xf32>
    %1319 = vector.multi_reduction <add>, %1316, %cst_802 [1] : vector<16x32xf32> to vector<16xf32>
    %1320 = vector.shape_cast %1319 : vector<16xf32> to vector<16x1xf32>
    %cst_803 = arith.constant 3.200000e+01 : f32
    %1321 = vector.broadcast %cst_803 : f32 to vector<16x1xf32>
    %1322 = arith.divf %1320, %1321 : vector<16x1xf32>
    %1323 = vector.broadcast %1322 : vector<16x1xf32> to vector<16x32xf32>
    %1324 = arith.subf %1316, %1323 : vector<16x32xf32>
    %1325 = arith.mulf %1324, %1324 : vector<16x32xf32>
    %cst_804 = arith.constant dense<0.000000e+00> : vector<16xf32>
    %1326 = vector.multi_reduction <add>, %1325, %cst_804 [1] : vector<16x32xf32> to vector<16xf32>
    %1327 = vector.shape_cast %1326 : vector<16xf32> to vector<16x1xf32>
    %cst_805 = arith.constant 3.200000e+01 : f32
    %1328 = vector.broadcast %cst_805 : f32 to vector<16x1xf32>
    %1329 = arith.divf %1327, %1328 : vector<16x1xf32>
    %cst_806 = arith.constant 9.99999974E-6 : f32
    %1330 = vector.broadcast %cst_806 : f32 to vector<16x1xf32>
    %1331 = arith.addf %1329, %1330 : vector<16x1xf32>
    %1332 = math.rsqrt %1331 : vector<16x1xf32>
    %1333 = vector.broadcast %1332 : vector<16x1xf32> to vector<16x32xf32>
    %1334 = arith.mulf %1324, %1333 : vector<16x32xf32>
    %1335 = vector.broadcast %1317 : vector<1x32xf32> to vector<16x32xf32>
    %1336 = arith.mulf %1334, %1335 : vector<16x32xf32>
    %1337 = vector.broadcast %1318 : vector<1x32xf32> to vector<16x32xf32>
    %1338 = arith.addf %1336, %1337 : vector<16x32xf32>
    %1339 = vector.extract_strided_slice %1338 {offsets = [8, 0], sizes = [8, 32], strides = [1, 1]} : vector<16x32xf32> to vector<8x32xf32>
    %c0_807 = arith.constant 0 : index
    %c1792 = arith.constant 1792 : index
    %1340 = vector.load %arg6[%c0_807, %c1792] : memref<32x1920xf32, #tpu.memory_space<vmem>>, vector<32x4xf32>
    %c28 = arith.constant 28 : index
    %c0_808 = arith.constant 0 : index
    %1341 = vector.load %arg7[%c28, %c0_808] : memref<32x128xf32, #tpu.memory_space<vmem>>, vector<1x4xf32>
    %cst_809 = arith.constant dense<0.000000e+00> : vector<8x4xf32>
    %1342 = tpu.matmul %1339, %1340, %cst_809 {dimension_numbers = #tpu.dot_dimension_numbers<[1], [0], [0], [1], [0, 0, 1, 1], [], []>} : vector<8x32xf32>, vector<32x4xf32>, vector<8x4xf32> -> vector<8x4xf32>
    %1343 = vector.broadcast %1341 : vector<1x4xf32> to vector<8x4xf32>
    %1344 = arith.addf %1342, %1343 : vector<8x4xf32>
    %c0_810 = arith.constant 0 : index
    %c0_811 = arith.constant 0 : index
    %c0_812 = arith.constant 0 : index
    %1345 = vector.load %arg8[%c0_810, %c0_811, %c0_812] : memref<1x8x4xf32, #tpu.memory_space<vmem>>, vector<1x8x4xf32>
    %1346 = vector.shape_cast %1345 : vector<1x8x4xf32> to vector<8x4xf32>
    %1347 = vector.shape_cast %1344 : vector<8x4xf32> to vector<1x8x4xf32>
    tpu.vector_store %arg8[%c0_810, %c0_811, %c0_812], %1347 {strides = array<i32>} : memref<1x8x4xf32, #tpu.memory_space<vmem>>, vector<1x8x4xf32>,
    return
  }
  func.func @transform_0(%arg0: i32) -> (i32, i32, i32) {
    %c0_i32 = arith.constant 0 : i32
    %c0_i32_0 = arith.constant 0 : i32
    %c0_i32_1 = arith.constant 0 : i32
    return %arg0, %c0_i32, %c0_i32_0 : i32, i32, i32
  }
  func.func @transform_1(%arg0: i32) -> (i32, i32, i32) {
    %c0_i32 = arith.constant 0 : i32
    %c0_i32_0 = arith.constant 0 : i32
    %c0_i32_1 = arith.constant 0 : i32
    return %arg0, %c0_i32, %c0_i32_0 : i32, i32, i32
  }
  func.func @transform_2(%arg0: i32) -> (i32, i32, i32) {
    %c0_i32 = arith.constant 0 : i32
    %c0_i32_0 = arith.constant 0 : i32
    %c0_i32_1 = arith.constant 0 : i32
    return %arg0, %c0_i32, %c0_i32_0 : i32, i32, i32
  }
  func.func @transform_3(%arg0: i32) -> (i32, i32, i32) {
    %c0_i32 = arith.constant 0 : i32
    %c0_i32_0 = arith.constant 0 : i32
    %c0_i32_1 = arith.constant 0 : i32
    return %arg0, %c0_i32, %c0_i32_0 : i32, i32, i32
  }
  func.func @transform_4(%arg0: i32) -> (i32, i32) {
    %c0_i32 = arith.constant 0 : i32
    %c0_i32_0 = arith.constant 0 : i32
    %c0_i32_1 = arith.constant 0 : i32
    return %c0_i32, %c0_i32_0 : i32, i32
  }
  func.func @transform_5(%arg0: i32) -> (i32, i32) {
    %c0_i32 = arith.constant 0 : i32
    %c0_i32_0 = arith.constant 0 : i32
    %c0_i32_1 = arith.constant 0 : i32
    return %c0_i32, %c0_i32_0 : i32, i32
  }
  func.func @transform_6(%arg0: i32) -> (i32, i32) {
    %c0_i32 = arith.constant 0 : i32
    %c0_i32_0 = arith.constant 0 : i32
    %c0_i32_1 = arith.constant 0 : i32
    return %c0_i32, %c0_i32_0 : i32, i32
  }
  func.func @transform_7(%arg0: i32) -> (i32, i32, i32) {
    %c0_i32 = arith.constant 0 : i32
    %c0_i32_0 = arith.constant 0 : i32
    %c0_i32_1 = arith.constant 0 : i32
    return %arg0, %c0_i32, %c0_i32_0 : i32, i32, i32
  }
}

</mosaic_0001>

<bundles_post_ra>
// kernel: informer_forward.1
= control target key start
LH: loop header
LB: loop body
LE: loop exit
PB: predicated region body
PF: predicated region fallthrough
CT: control target
= control target key end

     0   :  { %s14336_s24 = smov 0   ;;  %s15883_s0 = inlined_call_operand.vmem [shape: f32[2,16,4], index: 0, kind: input, shape index: {}]   ;;  %s15884_s1 = inlined_call_operand.vmem [shape: f32[2,16,32], index: 1, kind: input, shape index: {}]   ;;  %s15885_s2 = inlined_call_operand.vmem [shape: f32[2,16,4], index: 2, kind: input, shape index: {}]   ;;  %s15886_s3 = inlined_call_operand.vmem [shape: f32[2,16,32], index: 3, kind: input, shape index: {}]   ;;  %s15887_s4 = inlined_call_operand.vmem [shape: f32[24,32], index: 4, kind: input, shape index: {}]   ;;  %s15888_s5 = inlined_call_operand.vmem [shape: f32[32,1920], index: 5, kind: input, shape index: {}]   ;;  %s15889_s6 = inlined_call_operand.vmem [shape: f32[32,128], index: 6, kind: input, shape index: {}]   ;;  %s15890_s7 = inlined_call_operand.vmem [shape: f32[2,8,4], index: 7, kind: output, shape index: {}]  }
   0x1 LB: > { %s11885_s25 = sadd.s32 4294967295, %s14276_s24   ;;  %p11889_p0 = scmp.ge.s32.totalorder %s14276_s24, 1  ;;  %s14276_s24 = sphi %s14336_s24, %s17_s24  }
   0x2   : > { %p267_p1 = scmp.lt.s32.totalorder %s14276_s24, 3 }
   0x4   : > { %p268_p2 = pnand %p11889_p0, %p267_p1 }
   0x5   : > { %v352_v0 = vld [vmem:[%s15887_s4 + $0x4] sm:$0xf] (!%p268_p2)  ;;  %vm359_vm0 = vcmask (!%p268_p2), 1043456   ;;  %p313_p3 = scmp.lt.s32.totalorder (!%p268_p2), %s11885_s25, 1  ;;  %v351_v1 = vld [vmem:[%s15887_s4] sm:$0xf] (!%p268_p2) }
   0x6   : > { %271 = sbr.rel (%p268_p2) target bundleno = 23385 (0x5b59), region = 48  ;;  %12612 = vmatprep.subr.msk.mxu0 (!%p268_p2), %vm359_vm0, %v352_v0  ;;  %vm339_vm1 = vcmask (!%p268_p2), 31744   ;;  %v522_v4 = vld [vmem:[%s15887_s4 + $0x8] sm:$0xf] (!%p268_p2)  ;;  %vm343_vm2 = vcmask (!%p268_p2), 24576   ;;  %v14376_v7 = vld [vmem:[%s15888_s5] sm:$0xff] (!%p268_p2) }
   0x7   : > { %12613 = vmatpush3.msk.msra.mxu0 (!%p268_p2), %vm359_vm0, %v352_v0  ;;  %v14381_v8 = vld [vmem:[%s15888_s5 + $0x78] sm:$0xff] (!%p268_p2)  ;;  %v14393_v14 = vld [vmem:[%s15888_s5 + $0xf0] sm:$0xff] (!%p268_p2)  ;;  %v14398_v15 = vld [vmem:[%s15888_s5 + $0x168] sm:$0xff] (!%p268_p2)  ;;  %vm895_vm3 = vcmask (!%p268_p2), 261120   ;;  %vm977_vm4 = vcmask (!%p268_p2), 785408   ;;  %vm988_vm5 = vcmask (!%p268_p2), 64512  }
   0x8   : > { %12617 = vmatprep.subr.msk.mxu0 (!%p268_p2), %vm359_vm0, %v351_v1  ;;  %v13396_v12 = vpack.c.bf16 (!%p268_p2), %v14381_v8, %v14376_v7  ;;  %v13400_v16 = vpack.c.bf16 (!%p268_p2), %v14398_v15, %v14393_v14  ;;  %v626_v17 = vld [vmem:[%s15887_s4 + $0x10] sm:$0xf] (!%p268_p2)  ;;  %v625_v28 = vld [vmem:[%s15887_s4 + $0xc] sm:$0xf] (!%p268_p2)  ;;  %v795_v32 = vld [vmem:[%s15887_s4 + $0x14] sm:$0xf] (!%p268_p2) }
   0x9   : > { %12627 = vmatprep.subr.msk.mxu1 (!%p268_p2), %vm359_vm0, %v626_v17  ;;  %v14446_v34 = vld [vmem:[%s15889_s6] ss:$0 sm:$0xff] (!%p268_p2)  ;;  %s14278_s15 = smov (!%p268_p2), 120   ;;  %s14279_s16 = smov (!%p268_p2), 96   ;;  %vm14482_vm6 = vmpackc.low (!%p268_p2), %vm988_vm5, %vm988_vm5  ;;  %vm1074_vm7 = vcmask (!%p268_p2), 130048   ;;  %vm2480_vm10 = vcmask (!%p268_p2), 253952  }
   0xa   : > { %12628 = vmatpush3.msk.msra.mxu1 (!%p268_p2), %vm359_vm0, %v626_v17  ;;  %s14280_s17 = smov (!%p268_p2), 88   ;;  %s14281_s18 = smov (!%p268_p2), 112   ;;  %vm14293_vm11 = vmmov (!%p268_p2), 0  }
   0xb   : > { %12632 = vmatprep.subr.msk.mxu1 (!%p268_p2), %vm359_vm0, %v625_v28  ;;  %s14282_s19 = smov (!%p268_p2), 80   ;;  %s14283_s20 = smov (!%p268_p2), 56  }
   0xc   : > { %s14284_s21 = smov (!%p268_p2), 72   ;;  %s14285_s22 = smov (!%p268_p2), 64  }
   0xd   : > { %s15903_s25 = smov (!%p313_p3, %s11885_s25), 1  ;;  %s14286_s23 = smov 104  }
   0xe   : > { %s14356_s30 = sshll.u32 %s15903_s25, 4  ;;  %s15895_s26 = smov 32  }
   0xf   : > { %s317_s10 = scalar_lea.vmem %s15883_s0, %s14356_s30  ;;  %s327_s27 = scalar_lea.vmem %s15885_s2, %s14356_s30 }
  0x10   : > { %v337_v2 = vld [vmem:[%s317_s10] sm:$0xff]  ;;  %v338_v3 = vld [vmem:[%s317_s10 + $0x8] sm:$0xff]  ;;  %s322_s8 = scalar_lea.vmem %s15884_s1, %s14356_s30  ;;  %s15891_s28 = smov 40  }
  0x11   : > { %340 = vst.msk [vmem:[#allocation2 + $0x1] sm:$0xff] %vm339_vm1, %v337_v2  ;;  %341 = vst.msk [vmem:[#allocation2 + $0x9] sm:$0xff] %vm339_vm1, %v338_v3  ;;  %12614 = vmatprep.mubr.msk.f32.mxu0 %vm339_vm1, %v337_v2  ;;  %v613_v18 = vld [vmem:[%s327_s27] sm:$0xff]  ;;  %v614_v19 = vld [vmem:[%s327_s27 + $0x8] sm:$0xff]  ;;  %s15893_s27 = smov 48   ;;  %s15899_s13 = smov 40  }
  0x12   : > { %12615 = vmatmul.mubr.msk.f32.vlgmr.msra.gmra.mrb[0].mxu0 %vm339_vm1, %v338_v3  ;;  %12629 = vmatprep.mubr.msk.f32.mxu1 %vm339_vm1, %v613_v18  ;;  %v609_v20 = vld [vmem:[%s322_s8] sm:$0xff]  ;;  %v610_v22 = vld [vmem:[%s322_s8 + $0x8] sm:$0xff]  ;;  %s332_s11 = scalar_lea.vmem %s15886_s3, %s14356_s30 }
  0x13   : > { %12618 = vmatpush3.msk.msra.mxu0 %vm359_vm0, %v351_v1  ;;  %12630 = vmatmul.mubr.msk.f32.vlgmr.msra.gmra.mrb[0].mxu1 %vm339_vm1, %v614_v19 }
  0x14   : > { %12622 = vmatprep.subr.msk.mxu0 %vm359_vm0, %v522_v4  ;;  %12633 = vmatpush3.msk.msra.mxu1 %vm359_vm0, %v625_v28 }
  0x15   : > { %12637 = vmatprep.subr.msk.mxu1 %vm359_vm0, %v795_v32 }
  0x18   : > { %v342_v5 = vld [vmem:[#allocation2 + $0x10] sm:$0x1]  ;;  %v345_v6 = vld [vmem:[#allocation2 + $0x1] sm:$0x1]  ;;  %v348_v9 = vld [vmem:[#allocation2 + $0x8] sm:$0xff] }
  0x19   : > { %346 = vst.msk [vmem:[#allocation2 + $0x11] sm:$0x1] %vm343_vm2, %v345_v6  ;;  %344 = vst.msk [vmem:[#allocation2] sm:$0x1] %vm343_vm2, %v342_v5  ;;  %v349_v10 = vld [vmem:[#allocation2 + $0x2] sm:$0xff] }
  0x20   : > { %v347_v11 = vld [vmem:[#allocation2] sm:$0xff]  ;;  %v350_v13 = vld [vmem:[#allocation2 + $0xa] sm:$0xff] }
  0x21   : > { %12619 = vmatprep.mubr.msk.f32.mxu0 %vm339_vm1, %v347_v11  ;;  %615 = vst.msk [vmem:[#allocation2 + $0x1] sm:$0xff] %vm339_vm1, %v613_v18  ;;  %616 = vst.msk [vmem:[#allocation2 + $0x9] sm:$0xff] %vm339_vm1, %v614_v19 }
  0x22   : > { %12620 = vmatmul.mubr.msk.f32.vlgmr.msra.gmra.mrb[0].mxu0 %vm339_vm1, %v348_v9 }
  0x23   : > { %12623 = vmatpush3.msk.msra.mxu0 %vm359_vm0, %v522_v4  ;;  %12624 = vmatprep.mubr.msk.f32.mxu0 %vm339_vm1, %v349_v10 }
  0x24   : > { %13397 = vmatprep.subr.bf16.mxu0 %v13396_v12 }
  0x28   : > { %v617_v26 = vld [vmem:[#allocation2 + $0x10] sm:$0x1]  ;;  %v619_v27 = vld [vmem:[#allocation2 + $0x1] sm:$0x1]  ;;  %v622_v30 = vld [vmem:[#allocation2 + $0x8] sm:$0xff] }
  0x29   : > { %618 = vst.msk [vmem:[#allocation2] sm:$0x1] %vm343_vm2, %v617_v26  ;;  %620 = vst.msk [vmem:[#allocation2 + $0x11] sm:$0x1] %vm343_vm2, %v619_v27  ;;  %v623_v31 = vld [vmem:[#allocation2 + $0x2] sm:$0xff]  ;;  %vm4487_vm2 = vcmask 781312  }
  0x2a   : > { %12625 = vmatmul.mubr.msk.f32.vlgmr.msra.gmra.mrb[0].mxu0 %vm339_vm1, %v350_v13 }
  0x2b   : > { %13399 = vmatpush3.bf16.msra.mxu0 %v13396_v12 }
  0x2c   : > { %13401 = vmatprep.subr.bf16.mxu0 %v13400_v16 }
  0x2f   : > { %13403 = vmatpush3.bf16.msra.mxu0 %v13400_v16 }
  0x30   : > { %v621_v29 = vld [vmem:[#allocation2] sm:$0xff]  ;;  %v624_v33 = vld [vmem:[#allocation2 + $0xa] sm:$0xff] }
  0x31   : > { %12634 = vmatprep.mubr.msk.f32.mxu1 %vm339_vm1, %v621_v29 }
  0x32   : > { %12635 = vmatmul.mubr.msk.f32.vlgmr.msra.gmra.mrb[0].mxu1 %vm339_vm1, %v622_v30 }
  0x33   : > { %12639 = vmatprep.mubr.msk.f32.mxu1 %vm339_vm1, %v623_v31  ;;  %12638 = vmatpush3.msk.msra.mxu1 %vm359_vm0, %v795_v32 }
  0x3a   : > { %12640 = vmatmul.mubr.msk.f32.vlgmr.msra.gmra.mrb[0].mxu1 %vm339_vm1, %v624_v33 }
  0xfd   : > { %v12626_v21 = vpop.f32.mrb[0].mxu0 }
  0xfe   : > { %v598_v23 = vpop.f32.mrb[1].mxu0  ;;  %v14421_v25 = vadd.f32 %v12626_v21, %v610_v22 }
  0xff   : > { %v14419_v24 = vadd.f32 %v609_v20, %v598_v23 }
 0x101   : > { %12650 = vmatprep.mubr.msk.f32.mxu0 %vm895_vm3, %v14419_v24 }
 0x102   : > { %12651 = vmatmul.mubr.msk.f32.vlgmr.msra.gmra.mrb[2].mxu0 %vm895_vm3, %v14421_v25 }
 0x10d   : > { %v14476_v42 = vpop.f32.mrb[0].mxu1 }
 0x10e   : > { %v14478_v43 = vpop.f32.mrb[1].mxu1 }
 0x1d5   : > { %v12652_v35 = vpop.f32.mrb[2].mxu0 }
 0x1d6   : > { %v974_v36 = vadd.f32 %v12652_v35, %v14446_v34  ;;  %v968_v37 = vpop.f32.mrb[3].mxu0 }
 0x1d7   : > { %v969_v38 = vadd.f32 %v14446_v34, %v968_v37 }
 0x1d8   : > { %979 = vst.msk [vmem:[#allocation2 + $0x8] sm:$0xff] %vm977_vm4, %v974_v36 }
 0x1d9   : > { %978 = vst.msk [vmem:[#allocation2] sm:$0xff] %vm977_vm4, %v969_v38 }
 0x1df   : > { %v14452_v39 = vld [vmem:[#allocation2 + $0x8] sm:$0xff] }
 0x1e0   : > { %v14454_v40 = vld [vmem:[#allocation2] sm:$0xff] }
 0x1e1   : > { %1185 = vrot.lane.b32.xlu1 %v14454_v40, %s14278_s15  ;;  %12657 = vmatprep.mubr.msk.f32.mxu1 %vm988_vm5, %v14454_v40  ;;  %v14462_v41 = vpack.i.bf16 %v14452_v39, %v14454_v40 }
 0x1e3   : > { %13769 = vrot.lane.b32.xlu0 %v14462_v41, %s14279_s16 }
 0x1e5   : > { %1187 = vrot.lane.b32.xlu1 %v14452_v39, %s14278_s15 }
 0x1e7   : > { %13774 = vrot.lane.b32.xlu0 %v14462_v41, %s14280_s17 }
 0x1e9   : > { %1558 = vrot.lane.b32.xlu1 %v14454_v40, %s14281_s18 }
 0x1eb   : > { %13779 = vrot.lane.b32.xlu0 %v14462_v41, %s14282_s19 }
 0x1ef   : > { %1560 = vrot.lane.b32.xlu0 %v14452_v39, %s14281_s18 }
 0x253   : > { %v1186_v54 = vpop.permute.xlu1 %1185 }
 0x255   : > { %v13770_v44 = vpop.permute.xlu0 %13769 }
 0x256   : > { %v13772_v45 = vunpack.i.h.bf16 %v13770_v44  ;;  %v13771_v46 = vunpack.i.l.bf16 %v13770_v44 }
 0x257   : > { %v1188_v58 = vpop.permute.xlu1 %1187 }
 0x258   : > { %v13404_v48 = vpack.c.bf16 %v13772_v45, %v13771_v46 }
 0x259   : > { %v13775_v49 = vpop.permute.xlu0 %13774 }
 0x25a   : > { %v13777_v50 = vunpack.i.h.bf16 %v13775_v49  ;;  %v13776_v51 = vunpack.i.l.bf16 %v13775_v49  ;;  %13406 = vmatprep.subr.msk.bf16.mxu1 %vm14482_vm6, %v13404_v48 }
 0x25b   : > { %13409 = vmatpush3.bf16.xpose.msk.msra.mxu1 %vm14482_vm6, %v13404_v48  ;;  %v1559_v59 = vpop.permute.xlu1 %1558 }
 0x25c   : > { %v13414_v52 = vpack.c.bf16 %v13777_v50, %v13776_v51 }
 0x25d   : > { %v13780_v53 = vpop.permute.xlu0 %13779 }
 0x25e   : > { %v13782_v55 = vunpack.i.h.bf16 %v13780_v53  ;;  %v13781_v56 = vunpack.i.l.bf16 %v13780_v53  ;;  %13416 = vmatprep.subr.msk.bf16.mxu1 %vm14482_vm6, %v13414_v52 }
 0x260   : > { %v13424_v57 = vpack.c.bf16 %v13782_v55, %v13781_v56 }
 0x261   : > { %v1561_v60 = vpop.permute.xlu0 %1560 }
 0x262   : > { %12658 = vmatmul.mubr.msk.f32.vlgmr.msra.gmra.mrb[2].mxu1 %vm988_vm5, %v14452_v39 }
 0x263   : > { %13419 = vmatpush3.bf16.xpose.msk.msra.mxu1 %vm14482_vm6, %v13414_v52  ;;  %12671 = vmatprep.mubr.msk.f32.mxu1 %vm988_vm5, %v1186_v54 }
 0x264   : > { %13426 = vmatprep.subr.msk.bf16.mxu1 %vm14482_vm6, %v13424_v57 }
 0x26a   : > { %12672 = vmatmul.mubr.msk.f32.vlgmr.msra.gmra.mrb[4].mxu1 %vm988_vm5, %v1188_v58 }
 0x26b   : > { %13429 = vmatpush3.bf16.xpose.msk.msra.mxu1 %vm14482_vm6, %v13424_v57  ;;  %12695 = vmatprep.mubr.msk.f32.mxu1 %vm988_vm5, %v1559_v59 }
 0x272   : > { %12696 = vmatmul.mubr.msk.f32.vlgmr.msra.gmra.mrb[6].mxu1 %vm988_vm5, %v1561_v60 }
 0x335   : > { %v12659_v61 = vpop.f32.mrb[2].mxu1 }
 0x336   : > { %v1073_v62 = vmul.f32 0.35355338, %v12659_v61  ;;  %v1063_v63 = vpop.f32.mrb[3].mxu1 }
 0x337   : > { %v1072_v0 = vmul.f32 0.35355338, %v1063_v63 }
 0x338   : > { %v1078_v1 = vsel %vm1074_vm7, %v1073_v62, -inf }
 0x339   : > { %1079 = vmax.xlane.f32.xlu0 %v1078_v1  ;;  %v1075_v2 = vsel %vm1074_vm7, %v1072_v0, -inf }
 0x33a   : > { %1076 = vmax.xlane.f32.xlu1 %v1075_v2 }
 0x33d   : > { %v12673_v3 = vpop.f32.mrb[4].mxu1 }
 0x33e   : > { %v1277_v4 = vmul.f32 0.35355338, %v12673_v3  ;;  %v1267_v5 = vpop.f32.mrb[5].mxu1 }
 0x33f   : > { %v1276_v6 = vmul.f32 0.35355338, %v1267_v5 }
 0x340   : > { %v1281_v9 = vsel %vm1074_vm7, %v1277_v4, -inf }
 0x341   : > { %1282 = vmax.xlane.f32.xlu1 %v1281_v9  ;;  %v1278_v10 = vsel %vm1074_vm7, %v1276_v6, -inf }
 0x342   : > { %1279 = vmax.xlane.f32.xlu0 %v1278_v10 }
 0x345   : > { %v12697_v11 = vpop.f32.mrb[6].mxu1 }
 0x346   : > { %v1640_v12 = vpop.f32.mrb[7].mxu1  ;;  %v1650_v44 = vmul.f32 0.35355338, %v12697_v11 }
 0x347   : > { %v1649_v38 = vmul.f32 0.35355338, %v1640_v12 }
 0x348   : > { %v1654_v46 = vsel %vm1074_vm7, %v1650_v44, -inf }
 0x349   : > { %v1651_v45 = vsel %vm1074_vm7, %v1649_v38, -inf }
 0x3c6   : > { %v1080_v13 = vpop.xlane.xlu0 %1079 }
 0x3c7   : > { %v1082_v16 = vsub.f32 %v1073_v62, %v1080_v13  ;;  %v1077_v17 = vpop.xlane.xlu1 %1076 }
 0x3c8   : > { %v1081_v18 = vsub.f32 %v1072_v0, %v1077_v17 }
 0x3c9   : > { %v1085_v19 = vmul.f32 1.442695, %v1082_v16 }
 0x3ca   : > { %v1083_v20 = vmul.f32 1.442695, %v1081_v18 }
 0x3cb   : > { %13998 = vpow2.f32 %v1085_v19 }
 0x3cc   : > { %14000 = vpow2.f32 %v1083_v20 }
 0x3ce   : > { %v1283_v21 = vpop.xlane.xlu1 %1282 }
 0x3cf   : > { %v1285_v22 = vsub.f32 %v1277_v4, %v1283_v21  ;;  %v1280_v23 = vpop.xlane.xlu0 %1279 }
 0x3d0   : > { %v1284_v26 = vsub.f32 %v1276_v6, %v1280_v23 }
 0x3d1   : > { %v1288_v27 = vmul.f32 1.442695, %v1285_v22 }
 0x3d2   : > { %v1286_v28 = vmul.f32 1.442695, %v1284_v26 }
 0x3d3   : > { %14002 = vpow2.f32 %v1288_v27 }
 0x3d4   : > { %14004 = vpow2.f32 %v1286_v28 }
 0x3d5   : > { %v13999_v29 = vpop.eup %13998 }
 0x3d6   : > { %v14001_v30 = vpop.eup %14000  ;;  %v1090_v31 = vsel %vm1074_vm7, %v13999_v29, 0.0 }
 0x3d7   : > { %1091 = vadd.xlane.f32.xlu1 %v1090_v31  ;;  %v1087_v32 = vsel %vm1074_vm7, %v14001_v30, 0.0 }
 0x3d8   : > { %1088 = vadd.xlane.f32.xlu0 %v1087_v32 }
 0x3dd   : > { %v14510_v33 = vpop.eup %14002 }
 0x3de   : > { %v14005_v35 = vpop.eup %14004  ;;  %v1293_v36 = vsel %vm1074_vm7, %v14510_v33, 0.0 }
 0x3df   : > { %1294 = vadd.xlane.f32.xlu1 %v1293_v36  ;;  %v1290_v37 = vsel %vm1074_vm7, %v14005_v35, 0.0 }
 0x3e0   : > { %1291 = vadd.xlane.f32.xlu0 %v1290_v37 }
 0x3f0   : > { %13789 = vrot.lane.b32.xlu1 %v14462_v41, %s14283_s20 }
 0x3f4   : > { %13794 = vrot.lane.b32.xlu1 %v14462_v41, %s14284_s21 }
 0x3f6   : > { %13784 = vrot.lane.b32.xlu0 %v14462_v41, %s14285_s22 }
 0x3f8   : > { %1850 = vrot.lane.b32.xlu1 %v14452_v39, %s14286_s23 }
 0x3fa   : > { %1848 = vrot.lane.b32.xlu0 %v14454_v40, %s14286_s23 }
 0x419   : > { %1652 = vmax.xlane.f32.xlu0 %v1651_v45 }
 0x41c   : > { %1655 = vmax.xlane.f32.xlu1 %v1654_v46 }
 0x42d   : > { %1389 = vrot.lane.b32.xlu1 %v14381_v8, %s15895_s26 }
 0x431   : > { %13799 = vrot.lane.b32.xlu1 %v14462_v41, %s15893_s27 }
 0x464   : > { %v1092_v48 = vpop.xlane.xlu1 %1091 }
 0x465   : > { %v1089_v39 = vpop.xlane.xlu0 %1088 }
 0x466   : > { %14006 = vrcp.f32 %v1089_v39 }
 0x467   : > { %14008 = vrcp.f32 %v1092_v48 }
 0x46c   : > { %v1295_v40 = vpop.xlane.xlu1 %1294 }
 0x46d   : > { %v1292_v49 = vpop.xlane.xlu0 %1291 }
 0x46e   : > { %14010 = vrcp.f32 %v1292_v49 }
 0x46f   : > { %14012 = vrcp.f32 %v1295_v40 }
 0x470   : > { %v14007_v50 = vpop.eup %14006  ;;  %v13790_v51 = vpop.permute.xlu1 %13789 }
 0x471   : > { %v13785_v52 = vpop.permute.xlu0 %13784  ;;  %v1095_v53 = vmul.f32 %v14007_v50, %v14001_v30  ;;  %v13792_v54 = vunpack.i.h.bf16 %v13790_v51  ;;  %v13791_v55 = vunpack.i.l.bf16 %v13790_v51  ;;  %v14009_v59 = vpop.eup %14008 }
 0x472   : > { %v13787_v56 = vunpack.i.h.bf16 %v13785_v52  ;;  %v13786_v8 = vunpack.i.l.bf16 %v13785_v52  ;;  %v1096_v2 = vmul.f32 %v14009_v59, %v13999_v29 }
 0x473   : > { %12664 = vmatprep.mubr.msk.f32.mxu0 %vm1074_vm7, %v1095_v53  ;;  %v13420_v63 = vpack.c.bf16 %v13792_v54, %v13791_v55 }
 0x474   : > { %v13795_v57 = vpop.permute.xlu1 %13794  ;;  %v13410_v58 = vpack.c.bf16 %v13787_v56, %v13786_v8 }
 0x475   : > { %v13797_v60 = vunpack.i.h.bf16 %v13795_v57  ;;  %v13796_v61 = vunpack.i.l.bf16 %v13795_v57  ;;  %v1849_v62 = vpop.permute.xlu0 %1848 }
 0x476   : > { %13411 = vmatprep.subr.bf16.mxu0 %v13410_v58  ;;  %12714 = vmatprep.mubr.msk.f32.mxu1 %vm988_vm5, %v1849_v62 }
 0x477   : > { %v13434_v0 = vpack.c.bf16 %v13797_v60, %v13796_v61  ;;  %13413 = vmatpush3.bf16.msra.mxu0 %v13410_v58 }
 0x478   : > { %v14011_v1 = vpop.eup %14010  ;;  %13421 = vmatprep.subr.bf16.mxu0 %v13420_v63  ;;  %v1851_v6 = vpop.permute.xlu1 %1850 }
 0x479   : > { %v14013_v3 = vpop.eup %14012  ;;  %13436 = vmatprep.subr.msk.bf16.mxu1 %vm14482_vm6, %v13434_v0  ;;  %v1298_v4 = vmul.f32 %v14011_v1, %v14005_v35 }
 0x47a   : > { %12665 = vmatmul.mubr.msk.f32.vlgmr.msra.gmra.mrb[4].mxu0 %vm1074_vm7, %v1096_v2  ;;  %13439 = vmatpush3.bf16.xpose.msk.msra.mxu1 %vm14482_vm6, %v13434_v0  ;;  %v1299_v5 = vmul.f32 %v14013_v3, %v14510_v33 }
 0x47b   : > { %13423 = vmatpush3.bf16.msra.mxu0 %v13420_v63  ;;  %12678 = vmatprep.mubr.msk.f32.mxu0 %vm1074_vm7, %v1298_v4 }
 0x47e   : > { %12679 = vmatmul.mubr.msk.f32.vlgmr.msra.gmra.mrb[6].mxu0 %vm1074_vm7, %v1299_v5 }
 0x481   : > { %12715 = vmatmul.mubr.msk.f32.vlgmr.msra.gmra.mrb[8].mxu1 %vm988_vm5, %v1851_v6 }
 0x4a6   : > { %v1653_v9 = vpop.xlane.xlu0 %1652 }
 0x4a7   : > { %v1657_v10 = vsub.f32 %v1649_v38, %v1653_v9 }
 0x4a9   : > { %v1656_v11 = vpop.xlane.xlu1 %1655  ;;  %v1659_v13 = vmul.f32 1.442695, %v1657_v10 }
 0x4aa   : > { %v1658_v12 = vsub.f32 %v1650_v44, %v1656_v11 }
 0x4ac   : > { %v1661_v16 = vmul.f32 1.442695, %v1658_v12 }
 0x4ad   : > { %v1390_v17 = vpop.permute.xlu1 %1389 }
 0x4ae   : > { %14014 = vpow2.f32 %v1661_v16  ;;  %12681 = vmatprep.subr.mxu0 %v1390_v17 }
 0x4af   : > { %12682 = vmatpush3.msra.mxu0 %v1390_v17  ;;  %14016 = vpow2.f32 %v1659_v13 }
 0x4b1   : > { %v13800_v26 = vpop.permute.xlu1 %13799 }
 0x4b2   : > { %v13802_v30 = vunpack.i.h.bf16 %v13800_v26  ;;  %v13801_v31 = vunpack.i.l.bf16 %v13800_v26 }
 0x4b4   : > { %v13430_v36 = vpack.c.bf16 %v13802_v30, %v13801_v31  ;;  %v2192_v30 = vld [vmem:[%s15888_s5 + $0x80] sm:$0xff] }
 0x4b5   : > { %v11953_v31 = vld [vmem:[%s15889_s6 + $0x2] ss:$0 sm:$0xff] }
 0x4b8   : > { %v14015_v18 = vpop.eup %14014 }
 0x4b9   : > { %v1666_v19 = vsel %vm1074_vm7, %v14015_v18, 0.0  ;;  %v14017_v20 = vpop.eup %14016 }
 0x4ba   : > { %1667 = vadd.xlane.f32.xlu0 %v1666_v19  ;;  %v1663_v21 = vsel %vm1074_vm7, %v14017_v20, 0.0 }
 0x4be   : > { %1664 = vadd.xlane.f32.xlu0 %v1663_v21 }
 0x4d4   : > { %1474 = vrot.lane.b32.xlu0 %v14376_v7, %s15895_s26 }
 0x547   : > { %v1668_v22 = vpop.xlane.xlu0 %1667 }
 0x54b   : > { %v1665_v23 = vpop.xlane.xlu0 %1664 }
 0x54c   : > { %14018 = vrcp.f32 %v1665_v23 }
 0x54d   : > { %v12666_v27 = vpop.f32.mrb[4].mxu0  ;;  %14020 = vrcp.f32 %v1668_v22 }
 0x54e   : > { %v1175_v28 = vpop.f32.mrb[5].mxu0 }
 0x54f   : > { %v1475_v29 = vpop.permute.xlu0 %1474 }
 0x550   : > { %12686 = vmatprep.subr.mxu0 %v1475_v29 }
 0x551   : > { %v12680_v32 = vpop.f32.mrb[6].mxu0 }
 0x552   : > { %v1378_v33 = vpop.f32.mrb[7].mxu0 }
 0x553   : > { %12683 = vmatprep.mubr.msk.f32.mxu0 %vm988_vm5, %v1378_v33  ;;  %v2193_v33 = vld [vmem:[%s15888_s5 + $0xf8] sm:$0xff] }
 0x554   : > { %12684 = vmatmul.mubr.msk.f32.vlgmr.msra.gmra.mrb[8].mxu0 %vm988_vm5, %v12680_v32  ;;  %v12716_v35 = vpop.f32.mrb[8].mxu1 }
 0x555   : > { %12687 = vmatpush3.msra.mxu0 %v1475_v29  ;;  %v1940_v7 = vmul.f32 0.35355338, %v12716_v35  ;;  %12688 = vmatprep.mubr.msk.f32.mxu0 %vm988_vm5, %v1175_v28  ;;  %v1930_v37 = vpop.f32.mrb[9].mxu1  ;;  %v2194_v35 = vld [vmem:[%s15888_s5 + $0x170] sm:$0xff] }
 0x556   : > { %13431 = vmatprep.subr.bf16.mxu0 %v13430_v36  ;;  %v1939_v38 = vmul.f32 0.35355338, %v1930_v37  ;;  %v14019_v45 = vpop.eup %14018  ;;  %v13813_v37 = vpack.i.bf16 %v2194_v35, %v2193_v33 }
 0x557   : > { %v1944_v44 = vsel %vm1074_vm7, %v1940_v7, -inf  ;;  %v14021_v39 = vpop.eup %14020  ;;  %v1671_v48 = vmul.f32 %v14019_v45, %v14017_v20 }
 0x558   : > { %1945 = vmax.xlane.f32.xlu0 %v1944_v44  ;;  %v1941_v46 = vsel %vm1074_vm7, %v1939_v38, -inf  ;;  %v1672_v40 = vmul.f32 %v14021_v39, %v14015_v18 }
 0x559   : > { %1942 = vmax.xlane.f32.xlu1 %v1941_v46 }
 0x55c   : > { %12689 = vmatmul.mubr.msk.f32.vlgmr.msra.gmra.mrb[8].mxu0 %vm988_vm5, %v12666_v27 }
 0x55d   : > { %13433 = vmatpush3.bf16.msra.mxu0 %v13430_v36  ;;  %12702 = vmatprep.mubr.msk.f32.mxu0 %vm1074_vm7, %v1671_v48  ;;  %v13448_v36 = vpack.c.bf16 %v2194_v35, %v2193_v33 }
 0x560   : > { %12703 = vmatmul.mubr.msk.f32.vlgmr.msra.gmra.mrb[10].mxu0 %vm1074_vm7, %v1672_v40 }
 0x5e5   : > { %v1946_v49 = vpop.xlane.xlu0 %1945 }
 0x5e6   : > { %v1948_v50 = vsub.f32 %v1940_v7, %v1946_v49  ;;  %v1943_v51 = vpop.xlane.xlu1 %1942 }
 0x5e7   : > { %v1947_v52 = vsub.f32 %v1939_v38, %v1943_v51 }
 0x5e8   : > { %v1951_v53 = vmul.f32 1.442695, %v1948_v50 }
 0x5e9   : > { %v1949_v54 = vmul.f32 1.442695, %v1947_v52 }
 0x5ea   : > { %14022 = vpow2.f32 %v1951_v53 }
 0x5eb   : > { %14024 = vpow2.f32 %v1949_v54 }
 0x5f4   : > { %v14023_v55 = vpop.eup %14022 }
 0x5f5   : > { %v14025_v56 = vpop.eup %14024  ;;  %v1956_v8 = vsel %vm1074_vm7, %v14023_v55, 0.0 }
 0x5f6   : > { %1957 = vadd.xlane.f32.xlu1 %v1956_v8  ;;  %v1953_v57 = vsel %vm1074_vm7, %v14025_v56, 0.0  ;;  %v11954_v8 = vld [vmem:[%s15889_s6 + $0x1] ss:$0 sm:$0xff] }
 0x5f7   : > { %1954 = vadd.xlane.f32.xlu0 %v1953_v57 }
 0x607   : > { %13804 = vrot.lane.b32.xlu1 %v14462_v41, %s15891_s28 }
 0x60b   : > { %2052 = vrot.lane.b32.xlu1 %v14398_v15, %s15895_s26 }
 0x60d   : > { %1762 = vrot.lane.b32.xlu0 %v14393_v14, %s15895_s26 }
 0x611   : > { %2144 = vrot.lane.b32.xlu0 %v14446_v34, %s15895_s26 }
 0x633   : > { %v12704_v58 = vpop.f32.mrb[10].mxu0 }
 0x634   : > { %v1751_v59 = vpop.f32.mrb[11].mxu0 }
 0x635   : > { %12707 = vmatprep.mubr.msk.f32.mxu0 %vm988_vm5, %v1751_v59 }
 0x683   : > { %v1958_v60 = vpop.xlane.xlu1 %1957 }
 0x684   : > { %14026 = vrcp.f32 %v1958_v60  ;;  %v1955_v61 = vpop.xlane.xlu0 %1954 }
 0x685   : > { %14028 = vrcp.f32 %v1955_v61 }
 0x687   : > { %v13805_v62 = vpop.permute.xlu1 %13804 }
 0x688   : > { %v13807_v63 = vunpack.i.h.bf16 %v13805_v62  ;;  %v13806_v41 = vunpack.i.l.bf16 %v13805_v62  ;;  %v1763_v0 = vpop.permute.xlu0 %1762 }
 0x689   : > { %12705 = vmatprep.subr.mxu0 %v1763_v0 }
 0x68a   : > { %12706 = vmatpush3.msra.mxu0 %v1763_v0  ;;  %v13440_v15 = vpack.c.bf16 %v13807_v63, %v13806_v41 }
 0x68b   : > { %12708 = vmatmul.mubr.msk.f32.vlgmr.msra.gmra.mrb[8].mxu0 %vm988_vm5, %v12704_v58  ;;  %v2053_v14 = vpop.permute.xlu1 %2052 }
 0x68c   : > { %13441 = vmatprep.subr.bf16.mxu0 %v13440_v15  ;;  %v2145_v6 = vpop.permute.xlu0 %2144 }
 0x68d   : > { %13443 = vmatpush3.bf16.msra.mxu0 %v13440_v15 }
 0x68e   : > { %v14027_v34 = vpop.eup %14026  ;;  %12724 = vmatprep.subr.mxu0 %v2053_v14 }
 0x68f   : > { %v14029_v1 = vpop.eup %14028  ;;  %v1962_v3 = vmul.f32 %v14027_v34, %v14023_v55 }
 0x690   : > { %v1961_v2 = vmul.f32 %v14029_v1, %v14025_v56 }
 0x692   : > { %12721 = vmatprep.mubr.msk.f32.mxu0 %vm1074_vm7, %v1961_v2 }
 0x693   : > { %12722 = vmatmul.mubr.msk.f32.vlgmr.msra.gmra.mrb[12].mxu0 %vm1074_vm7, %v1962_v3 }
 0x694   : > { %12725 = vmatpush3.msra.mxu0 %v2053_v14 }
 0x766   : > { %v12723_v4 = vpop.f32.mrb[12].mxu0 }
 0x767   : > { %v2041_v5 = vpop.f32.mrb[13].mxu0 }
 0x768   : > { %12726 = vmatprep.mubr.msk.f32.mxu0 %vm988_vm5, %v2041_v5 }
 0x769   : > { %12727 = vmatmul.mubr.msk.f32.vlgmr.msra.gmra.mrb[8].mxu0 %vm988_vm5, %v12723_v4 }
 0x83c   : > { %v12728_v9 = vpop.f32.mrb[8].mxu0 }
 0x83d   : > { %v2148_v10 = vadd.f32 %v12728_v9, %v2145_v6  ;;  %v2127_v11 = vpop.f32.mrb[9].mxu0 }
 0x83e   : > { %v2147_v12 = vadd.f32 %v2145_v6, %v2127_v11 }
 0x83f   : > { %v2150_v13 = vadd.f32 %v2148_v10, %v14421_v25 }
 0x840   : > { %v2149_v16 = vadd.f32 %v2147_v12, %v14419_v24  ;;  %v2191_v24 = vld [vmem:[%s15888_s5 + $0x8] sm:$0xff] }
 0x841   : > { %v2155_v17 = vsel %vm895_vm3, %v2150_v13, 0.0  ;;  %v13444_v32 = vpack.c.bf16 %v2192_v30, %v2191_v24  ;;  %v13808_v7 = vpack.i.bf16 %v2192_v30, %v2191_v24 }
 0x842   : > { %2156 = vadd.xlane.f32.xlu0 %v2155_v17  ;;  %v2152_v18 = vsel %vm895_vm3, %v2149_v16, 0.0 }
 0x843   : > { %2153 = vadd.xlane.f32.xlu1 %v2152_v18  ;;  %13445 = vmatprep.subr.bf16.mxu1 %v13444_v32 }
 0x844   : > { %13447 = vmatpush3.bf16.msra.mxu1 %v13444_v32 }
 0x845   : > { %13449 = vmatprep.subr.bf16.mxu1 %v13448_v36 }
 0x848   : > { %13451 = vmatpush3.bf16.msra.mxu1 %v13448_v36 }
 0x8cf   : > { %v2157_v19 = vpop.xlane.xlu0 %2156 }
 0x8d0   : > { %v2160_v20 = vmul.f32 0.03125, %v2157_v19  ;;  %v2154_v21 = vpop.xlane.xlu1 %2153 }
 0x8d1   : > { %v2159_v22 = vmul.f32 0.03125, %v2154_v21 }
 0x8d2   : > { %v2162_v23 = vsub.f32 %v2150_v13, %v2160_v20 }
 0x8d3   : > { %v2161_v26 = vsub.f32 %v2149_v16, %v2159_v22 }
 0x8d4   : > { %v2164_v27 = vmul.f32 %v2162_v23, %v2162_v23 }
 0x8d5   : > { %v2163_v28 = vmul.f32 %v2161_v26, %v2161_v26 }
 0x8d6   : > { %v2168_v29 = vsel %vm895_vm3, %v2164_v27, 0.0 }
 0x8d7   : > { %2169 = vadd.xlane.f32.xlu1 %v2168_v29  ;;  %v2165_v25 = vsel %vm895_vm3, %v2163_v28, 0.0 }
 0x8d8   : > { %2166 = vadd.xlane.f32.xlu0 %v2165_v25 }
 0x8e8   : > { %13809 = vrot.lane.b32.xlu1 %v13808_v7, %s14279_s16 }
 0x8ec   : > { %13814 = vrot.lane.b32.xlu1 %v13813_v37, %s14279_s16 }
 0x8ee   : > { %2186 = vrot.lane.b32.xlu0 %v11953_v31, %s14279_s16 }
 0x8f2   : > { %2352 = vrot.lane.b32.xlu0 %v11954_v8, %s14279_s16 }
 0x964   : > { %v2170_v38 = vpop.xlane.xlu1 %2169 }
 0x965   : > { %v2172_v44 = vmul.f32 0.03125, %v2170_v38  ;;  %v2167_v45 = vpop.xlane.xlu0 %2166 }
 0x966   : > { %v2171_v46 = vmul.f32 0.03125, %v2167_v45 }
 0x967   : > { %v2174_v39 = vadd.f32 1e-05, %v2172_v44 }
 0x968   : > { %v2173_v48 = vadd.f32 1e-05, %v2171_v46  ;;  %v13810_v57 = vpop.permute.xlu1 %13809 }
 0x969   : > { %14030 = vrsqrt.f32 %v2174_v39  ;;  %v2187_v52 = vpop.permute.xlu0 %2186  ;;  %v13812_v58 = vunpack.i.h.bf16 %v13810_v57  ;;  %v13811_v59 = vunpack.i.l.bf16 %v13810_v57 }
 0x96a   : > { %14032 = vrsqrt.f32 %v2173_v48 }
 0x96b   : > { %v13452_v60 = vpack.c.bf16 %v13812_v58, %v13811_v59 }
 0x96c   : > { %v13815_v61 = vpop.permute.xlu1 %13814 }
 0x96d   : > { %v13817_v62 = vunpack.i.h.bf16 %v13815_v61  ;;  %v13816_v63 = vunpack.i.l.bf16 %v13815_v61  ;;  %13453 = vmatprep.subr.bf16.mxu0 %v13452_v60  ;;  %v2353_v61 = vpop.permute.xlu0 %2352 }
 0x96e   : > { %13455 = vmatpush3.bf16.msra.mxu0 %v13452_v60 }
 0x96f   : > { %v13456_v41 = vpack.c.bf16 %v13817_v62, %v13816_v63 }
 0x971   : > { %13457 = vmatprep.subr.bf16.mxu0 %v13456_v41 }
 0x972   : > { %13459 = vmatpush3.bf16.msra.mxu0 %v13456_v41 }
 0x973   : > { %v14031_v40 = vpop.eup %14030 }
 0x974   : > { %v14033_v49 = vpop.eup %14032  ;;  %v2178_v50 = vmul.f32 %v14031_v40, %v2162_v23  ;;  %v14290_v40 = vmov -1.0  }
 0x975   : > { %v2177_v51 = vmul.f32 %v14033_v49, %v2161_v26 }
 0x976   : > { %v2184_v53 = vmul.f32 %v11953_v31, %v2178_v50 }
 0x977   : > { %v2183_v54 = vmul.f32 %v11953_v31, %v2177_v51 }
 0x978   : > { %v14596_v56 = vadd.f32 %v2187_v52, %v2184_v53 }
 0x979   : > { %v14594_v55 = vadd.f32 %v2187_v52, %v2183_v54 }
 0x97b   : > { %12737 = vmatprep.mubr.msk.f32.mxu1 %vm895_vm3, %v14594_v55 }
 0x97c   : > { %12738 = vmatmul.mubr.msk.f32.vlgmr.msra.gmra.mrb[10].mxu1 %vm895_vm3, %v14596_v56 }
 0xa4f   : > { %v12739_v0 = vpop.f32.mrb[10].mxu1 }
 0xa50   : > { %v2278_v15 = vadd.f32 %v12739_v0, %v11954_v8  ;;  %v2272_v14 = vpop.f32.mrb[11].mxu1 }
 0xa51   : > { %v2273_v34 = vadd.f32 %v11954_v8, %v2272_v14 }
 0xa52   : > { %v2284_v1 = vmul.f32 0.70710677, %v2278_v15  ;;  %v2282_v58 = vmul.f32 0.5, %v2278_v15 }
 0xa53   : > { %v2283_v2 = vmul.f32 0.70710677, %v2273_v34  ;;  %v2281_v8 = vmul.f32 0.5, %v2273_v34  ;;  %v2488_v34 = vld [vmem:[%s15888_s5 + $0x30] sm:$0xff] }
 0xa54   : > { %v2290_v3 = vand.u32 2147483647, %v2284_v1  ;;  %vm2286_vm8 = vcmp.ge.f32.partialorder %v2284_v1, 0.0 }
 0xa55   : > { %v2289_v4 = vand.u32 2147483647, %v2283_v2  ;;  %vm2285_vm9 = vcmp.ge.f32.partialorder %v2283_v2, 0.0  ;;  %v2288_v49 = vsel %vm2286_vm8, 1.0, %v14290_v40  ;;  %vm4568_vm8 = vcmask 27648  }
 0xa56   : > { %v2292_v5 = vmul.f32 0.3275911, %v2290_v3  ;;  %v2318_v11 = vsub.f32 0.0, %v2290_v3  ;;  %v2287_v52 = vsel %vm2285_vm9, 1.0, %v14290_v40  ;;  %vm5484_vm9 = vcmask 257024  }
 0xa57   : > { %v2291_v6 = vmul.f32 0.3275911, %v2289_v4  ;;  %v2317_v12 = vsub.f32 0.0, %v2289_v4 }
 0xa58   : > { %v2294_v9 = vadd.f32 1.0, %v2292_v5  ;;  %v2320_v16 = vmul.f32 %v2318_v11, %v2290_v3  ;;  %v2489_v3 = vld [vmem:[%s15888_s5 + $0xa8] sm:$0xff] }
 0xa59   : > { %v2293_v10 = vadd.f32 1.0, %v2291_v6  ;;  %v2319_v19 = vmul.f32 %v2317_v12, %v2289_v4  ;;  %v13818_v4 = vpack.i.bf16 %v2489_v3, %v2488_v34 }
 0xa5a   : > { %14034 = vrcp.f32 %v2294_v9  ;;  %v2323_v22 = vmul.f32 1.442695, %v2320_v16 }
 0xa5b   : > { %14036 = vrcp.f32 %v2293_v10  ;;  %v2321_v27 = vmul.f32 1.442695, %v2319_v19 }
 0xa5c   : > { %14038 = vpow2.f32 %v2323_v22  ;;  %v2491_v22 = vld [vmem:[%s15888_s5 + $0x198] sm:$0xff] }
 0xa5d   : > { %14040 = vpow2.f32 %v2321_v27 }
 0xa64   : > { %v14035_v13 = vpop.eup %14034 }
 0xa65   : > { %v14037_v17 = vpop.eup %14036  ;;  %v2300_v18 = vmul.f32 1.0614054, %v14035_v13 }
 0xa66   : > { %v2299_v20 = vmul.f32 1.0614054, %v14037_v17  ;;  %v14039_v38 = vpop.eup %14038 }
 0xa67   : > { %v2302_v21 = vadd.f32 -1.4531521, %v2300_v18  ;;  %v14041_v45 = vpop.eup %14040 }
 0xa68   : > { %v2301_v23 = vadd.f32 -1.4531521, %v2299_v20 }
 0xa69   : > { %v2304_v26 = vmul.f32 %v14035_v13, %v2302_v21  ;;  %v2490_v21 = vld [vmem:[%s15888_s5 + $0x120] sm:$0xff] }
 0xa6a   : > { %v2303_v28 = vmul.f32 %v14037_v17, %v2301_v23  ;;  %v13823_v23 = vpack.i.bf16 %v2491_v22, %v2490_v21 }
 0xa6b   : > { %v2306_v29 = vadd.f32 1.4214138, %v2304_v26  ;;  %v11959_v26 = vld [vmem:[%s15889_s6 + $0x3] ss:$0 sm:$0xff] }
 0xa6c   : > { %v2305_v25 = vadd.f32 1.4214138, %v2303_v28 }
 0xa6d   : > { %v2308_v24 = vmul.f32 %v14035_v13, %v2306_v29 }
 0xa6e   : > { %v2307_v30 = vmul.f32 %v14037_v17, %v2305_v25 }
 0xa6f   : > { %v2310_v31 = vadd.f32 -0.28449672, %v2308_v24 }
 0xa70   : > { %v2309_v32 = vadd.f32 -0.28449672, %v2307_v30 }
 0xa71   : > { %v2312_v33 = vmul.f32 %v14035_v13, %v2310_v31 }
 0xa72   : > { %v2311_v35 = vmul.f32 %v14037_v17, %v2309_v32 }
 0xa73   : > { %v2314_v36 = vadd.f32 0.2548296, %v2312_v33 }
 0xa74   : > { %v2313_v7 = vadd.f32 0.2548296, %v2311_v35 }
 0xa75   : > { %v2316_v37 = vmul.f32 %v14035_v13, %v2314_v36  ;;  %v13468_v36 = vpack.c.bf16 %v2489_v3, %v2488_v34  ;;  %v14292_v34 = vmov 0.0|0.0   ;;  %v14667_v3 = vld [vmem:[%s15888_s5 + $0x100] sm:$0xff] }
 0xa76   : > { %v2315_v44 = vmul.f32 %v14037_v17, %v2313_v7  ;;  %13484 = vmatprep.subr.bf16.mxu0 %v14292_v34 }
 0xa77   : > { %v2326_v46 = vmul.f32 %v14039_v38, %v2316_v37 }
 0xa78   : > { %v2325_v39 = vmul.f32 %v14041_v45, %v2315_v44 }
 0xa79   : > { %v2328_v48 = vsub.f32 1.0, %v2326_v46 }
 0xa7a   : > { %v2327_v50 = vsub.f32 1.0, %v2325_v39 }
 0xa7b   : > { %v2330_v51 = vmul.f32 %v2328_v48, %v2288_v49 }
 0xa7c   : > { %v2329_v53 = vmul.f32 %v2327_v50, %v2287_v52 }
 0xa7d   : > { %v2332_v54 = vadd.f32 1.0, %v2330_v51 }
 0xa7e   : > { %v2331_v57 = vadd.f32 1.0, %v2329_v53  ;;  %v13472_v53 = vpack.c.bf16 %v2491_v22, %v2490_v21 }
 0xa7f   : > { %v2334_v60 = vmul.f32 %v2332_v54, %v2282_v58 }
 0xa80   : > { %v2333_v59 = vmul.f32 %v2331_v57, %v2281_v8 }
 0xa82   : > { %12748 = vmatprep.mubr.msk.f32.mxu0 %vm895_vm3, %v2333_v59 }
 0xa83   : > { %12749 = vmatmul.mubr.msk.f32.vlgmr.msra.gmra.mrb[14].mxu0 %vm895_vm3, %v2334_v60 }
 0xb56   : > { %v12750_v62 = vpop.f32.mrb[14].mxu0 }
 0xb57   : > { %v2433_v63 = vadd.f32 %v12750_v62, %v2353_v61  ;;  %v2427_v41 = vpop.f32.mrb[15].mxu0 }
 0xb58   : > { %v2428_v0 = vadd.f32 %v2427_v41, %v2353_v61 }
 0xb59   : > { %v2437_v14 = vadd.f32 %v2433_v63, %v14596_v56  ;;  %v14291_v63 = vmov -3e+38  }
 0xb5a   : > { %v2436_v1 = vadd.f32 %v2428_v0, %v14594_v55 }
 0xb5b   : > { %v2442_v2 = vsel %vm895_vm3, %v2437_v14, 0.0 }
 0xb5c   : > { %2443 = vadd.xlane.f32.xlu1 %v2442_v2  ;;  %v2439_v15 = vsel %vm895_vm3, %v2436_v1, 0.0  ;;  %v14658_v2 = vld [vmem:[%s15888_s5 + $0x88] sm:$0xff] }
 0xb5d   : > { %2440 = vadd.xlane.f32.xlu0 %v2439_v15 }
 0xb6d   : > { %13819 = vrot.lane.b32.xlu1 %v13818_v4, %s14279_s16 }
 0xbe9   : > { %v2444_v56 = vpop.xlane.xlu1 %2443 }
 0xbea   : > { %v2446_v5 = vmul.f32 0.03125, %v2444_v56  ;;  %v2441_v55 = vpop.xlane.xlu0 %2440 }
 0xbeb   : > { %v2445_v6 = vmul.f32 0.03125, %v2441_v55  ;;  %v11966_v55 = vld [vmem:[%s15889_s6 + $0xd] ss:$0 sm:$0xff] }
 0xbec   : > { %v2448_v9 = vsub.f32 %v2437_v14, %v2446_v5  ;;  %v14294_v5 = vmov 0.0  }
 0xbed   : > { %v2447_v10 = vsub.f32 %v2436_v1, %v2445_v6  ;;  %v13820_v11 = vpop.permute.xlu1 %13819  ;;  %v14653_v1 = vld [vmem:[%s15888_s5 + $0x10] sm:$0xff]  ;;  %12792 = vmatprep.mubr.msk.f32.mxu0 %vm14293_vm11, %v14294_v5 }
 0xbee   : > { %v2450_v12 = vmul.f32 %v2448_v9, %v2448_v9  ;;  %v13822_v13 = vunpack.i.h.bf16 %v13820_v11  ;;  %v13821_v16 = vunpack.i.l.bf16 %v13820_v11  ;;  %v13485_v15 = vpack.c.bf16 %v14658_v2, %v14653_v1 }
 0xbef   : > { %v2449_v17 = vmul.f32 %v2447_v10, %v2447_v10 }
 0xbf0   : > { %v2454_v18 = vsel %vm895_vm3, %v2450_v12, 0.0  ;;  %v13460_v19 = vpack.c.bf16 %v13822_v13, %v13821_v16  ;;  %13486 = vmatpush3.bf16.msra.mxu0 %v13485_v15 }
 0xbf1   : > { %2455 = vadd.xlane.f32.xlu0 %v2454_v18  ;;  %v2451_v20 = vsel %vm895_vm3, %v2449_v17, 0.0  ;;  %13487 = vmatprep.subr.bf16.mxu0 %v14292_v34 }
 0xbf2   : > { %2452 = vadd.xlane.f32.xlu1 %v2451_v20  ;;  %13461 = vmatprep.subr.bf16.mxu1 %v13460_v19 }
 0xbf3   : > { %13463 = vmatpush3.bf16.msra.mxu1 %v13460_v19 }
 0xc03   : > { %13824 = vrot.lane.b32.xlu1 %v13823_v23, %s14279_s16 }
 0xc07   : > { %2472 = vrot.lane.b32.xlu0 %v11959_v26, %s14279_s16  ;;  %13834 = vrot.lane.b32.xlu1 %v13823_v23, %s14285_s22 }
 0xc0b   : > { %13829 = vrot.lane.b32.xlu0 %v13818_v4, %s14285_s22  ;;  %v14672_v4 = vld [vmem:[%s15888_s5 + $0x178] sm:$0xff] }
 0xc0c   : > { %v13488_v56 = vpack.c.bf16 %v14672_v4, %v14667_v3 }
 0xc0e   : > { %13489 = vmatpush3.bf16.msra.mxu0 %v13488_v56 }
 0xc0f   : > { %12795 = vmatprep.subr.mxu0 %v14294_v5 }
 0xc7e   : > { %v2456_v27 = vpop.xlane.xlu0 %2455 }
 0xc7f   : > { %v2458_v28 = vmul.f32 0.03125, %v2456_v27  ;;  %v2453_v29 = vpop.xlane.xlu1 %2452 }
 0xc80   : > { %v2457_v25 = vmul.f32 0.03125, %v2453_v29 }
 0xc81   : > { %v2460_v24 = vadd.f32 1e-05, %v2458_v28 }
 0xc82   : > { %v2459_v30 = vadd.f32 1e-05, %v2457_v25  ;;  %v2473_v37 = vpop.permute.xlu0 %2472 }
 0xc83   : > { %14042 = vrsqrt.f32 %v2460_v24  ;;  %v13825_v31 = vpop.permute.xlu1 %13824 }
 0xc84   : > { %14044 = vrsqrt.f32 %v2459_v30  ;;  %v13827_v32 = vunpack.i.h.bf16 %v13825_v31  ;;  %v13826_v33 = vunpack.i.l.bf16 %v13825_v31 }
 0xc86   : > { %v13464_v35 = vpack.c.bf16 %v13827_v32, %v13826_v33  ;;  %v13830_v48 = vpop.permute.xlu0 %13829 }
 0xc87   : > { %v13832_v51 = vunpack.i.h.bf16 %v13830_v48  ;;  %v13831_v52 = vunpack.i.l.bf16 %v13830_v48  ;;  %v13835_v57 = vpop.permute.xlu1 %13834 }
 0xc88   : > { %13465 = vmatprep.subr.bf16.mxu1 %v13464_v35  ;;  %v13837_v59 = vunpack.i.h.bf16 %v13835_v57  ;;  %v13836_v60 = vunpack.i.l.bf16 %v13835_v57 }
 0xc89   : > { %13467 = vmatpush3.bf16.msra.mxu1 %v13464_v35  ;;  %v13476_v54 = vpack.c.bf16 %v13832_v51, %v13831_v52 }
 0xc8a   : > { %13469 = vmatprep.subr.bf16.mxu1 %v13468_v36  ;;  %v13480_v62 = vpack.c.bf16 %v13837_v59, %v13836_v60 }
 0xc8d   : > { %v14043_v7 = vpop.eup %14042 }
 0xc8e   : > { %v14045_v38 = vpop.eup %14044  ;;  %v2464_v44 = vmul.f32 %v14043_v7, %v2448_v9 }
 0xc8f   : > { %v2463_v45 = vmul.f32 %v14045_v38, %v2447_v10 }
 0xc90   : > { %v2470_v46 = vmul.f32 %v11959_v26, %v2464_v44 }
 0xc91   : > { %v2469_v39 = vmul.f32 %v11959_v26, %v2463_v45 }
 0xc92   : > { %v2476_v49 = vadd.f32 %v2473_v37, %v2470_v46 }
 0xc93   : > { %v2475_v50 = vadd.f32 %v2473_v37, %v2469_v39 }
 0xc94   : > { %2478 = vst.msk [vmem:[#allocation2 + $0x9] sm:$0xff] %vm895_vm3, %v2476_v49 }
 0xc95   : > { %2477 = vst.msk [vmem:[#allocation2 + $0x1] sm:$0xff] %vm895_vm3, %v2475_v50  ;;  %12759 = vmatprep.mubr.msk.f32.mxu1 %vm895_vm3, %v2475_v50 }
 0xc96   : > { %12760 = vmatmul.mubr.msk.f32.vlgmr.msra.gmra.mrb[12].mxu1 %vm895_vm3, %v2476_v49 }
 0xc97   : > { %13471 = vmatpush3.bf16.msra.mxu1 %v13468_v36  ;;  %v14698_v36 = vld [vmem:[%s15889_s6 + $0x4] ss:$0 sm:$0xff] }
 0xc98   : > { %13473 = vmatprep.subr.bf16.mxu1 %v13472_v53 }
 0xc9b   : > { %13475 = vmatpush3.bf16.msra.mxu1 %v13472_v53  ;;  %v2479_v8 = vld [vmem:[#allocation2 + $0x10] sm:$0x1] }
 0xc9c   : > { %2481 = vst.msk [vmem:[#allocation2] sm:$0x1] %vm2480_vm10, %v2479_v8  ;;  %13477 = vmatprep.subr.bf16.mxu1 %v13476_v54  ;;  %v2482_v58 = vld [vmem:[#allocation2 + $0x1] sm:$0x1]  ;;  %v2485_v41 = vld [vmem:[#allocation2 + $0x8] sm:$0xff] }
 0xc9d   : > { %2483 = vst.msk [vmem:[#allocation2 + $0x11] sm:$0x1] %vm2480_vm10, %v2482_v58  ;;  %v2486_v14 = vld [vmem:[#allocation2 + $0x2] sm:$0xff] }
 0xca3   : > { %v2484_v61 = vld [vmem:[#allocation2] sm:$0xff] }
 0xca4   : > { %12770 = vmatprep.mubr.msk.f32.mxu1 %vm895_vm3, %v2484_v61  ;;  %2788 = vst.msk [vmem:[#allocation2] sm:$0x1] %vm2480_vm10, %v14291_v63  ;;  %v2487_v0 = vld [vmem:[#allocation2 + $0xa] sm:$0xff] }
 0xca5   : > { %12771 = vmatmul.mubr.msk.f32.vlgmr.msra.gmra.mrb[12].mxu1 %vm895_vm3, %v2485_v41  ;;  %2789 = vst.msk [vmem:[#allocation2 + $0x11] sm:$0x1] %vm2480_vm10, %v14291_v63 }
 0xca6   : > { %13479 = vmatpush3.bf16.msra.mxu1 %v13476_v54  ;;  %12781 = vmatprep.mubr.msk.f32.mxu1 %vm895_vm3, %v2486_v14 }
 0xca7   : > { %13481 = vmatprep.subr.bf16.mxu1 %v13480_v62 }
 0xcaa   : > { %13483 = vmatpush3.bf16.msra.mxu1 %v13480_v62 }
 0xcab   : > { %12810 = vmatprep.subr.mxu1 %v14294_v5 }
 0xcad   : > { %12782 = vmatmul.mubr.msk.f32.vlgmr.msra.gmra.mrb[12].mxu1 %vm895_vm3, %v2487_v0 }
 0xcae   : > { %12812 = vmatprep.mubr.msk.f32.mxu1 %vm14293_vm11, %v14294_v5 }
 0xd80   : > { %v12783_v6 = vpop.f32.mrb[12].mxu1 }
 0xd81   : > { %v2771_v9 = vadd.f32 %v12783_v6, %v11966_v55  ;;  %v2754_v10 = vpop.f32.mrb[13].mxu1 }
 0xd82   : > { %v2770_v11 = vadd.f32 %v11966_v55, %v2754_v10 }
 0xd83   : > { %v2773_v12 = vmul.f32 0.999995, %v2771_v9 }
 0xd84   : > { %v2772_v13 = vmul.f32 0.999995, %v2770_v11 }
 0xd85   : > { %v2777_v16 = vmin.f32 %v2773_v12, 0.0  ;;  %vm2775_vm12 = vcmp.gt.f32.partialorder %v2773_v12, 0.0 }
 0xd86   : > { %v2776_v17 = vmin.f32 %v2772_v13, 0.0  ;;  %vm2774_vm13 = vcmp.gt.f32.partialorder %v2772_v13, 0.0 }
 0xd87   : > { %v2780_v18 = vmul.f32 1.442695, %v2777_v16 }
 0xd88   : > { %v2778_v19 = vmul.f32 1.442695, %v2776_v17 }
 0xd89   : > { %14046 = vpow2.f32 %v2780_v18 }
 0xd8a   : > { %14048 = vpow2.f32 %v2778_v19 }
 0xd93   : > { %v14047_v20 = vpop.eup %14046 }
 0xd94   : > { %v14049_v21 = vpop.eup %14048  ;;  %v11968_v22 = vadd.f32 -1.0, %v14047_v20 }
 0xd95   : > { %v11967_v23 = vadd.f32 -1.0, %v14049_v21 }
 0xd96   : > { %v2785_v26 = vsel %vm2775_vm12, %v2773_v12, %v11968_v22 }
 0xd97   : > { %2787 = vst.msk [vmem:[#allocation2 + $0x9] sm:$0xff] %vm895_vm3, %v2785_v26  ;;  %v2784_v27 = vsel %vm2774_vm13, %v2772_v13, %v11967_v23 }
 0xd98   : > { %2786 = vst.msk [vmem:[#allocation2 + $0x1] sm:$0xff] %vm895_vm3, %v2784_v27 }
 0xd9e   : > { %v2795_v31 = vld [vmem:[#allocation2 + $0xa] sm:$0xff] }
 0xd9f   : > { %v2790_v28 = vld [vmem:[#allocation2] sm:$0xff]  ;;  %v2791_v29 = vld [vmem:[#allocation2 + $0x8] sm:$0xff] }
 0xda0   : > { %v2792_v25 = vmax.f32 %v2790_v28, %v2784_v27  ;;  %v2793_v24 = vmax.f32 %v2791_v29, %v2785_v26  ;;  %v2794_v30 = vld [vmem:[#allocation2 + $0x2] sm:$0xff] }
 0xda2   : > { %v2796_v32 = vmax.f32 %v2792_v25, %v2794_v30  ;;  %v2797_v33 = vmax.f32 %v2793_v24, %v2795_v31 }
 0xda4   : > { %2798 = vst.msk [vmem:[#allocation2] sm:$0xff] %vm895_vm3, %v2796_v32  ;;  %2799 = vst.msk [vmem:[#allocation2 + $0x8] sm:$0xff] %vm895_vm3, %v2797_v33 }
 0xdab   : > { %v14689_v35 = vld [vmem:[#allocation2] ss:$2 sm:$0xff] }
 0xdac   : > { %12793 = vmatmul.mubr.msk.f32.vlgmr.msra.gmra.mrb[16].mxu0 %vm895_vm3, %v14689_v35 }
 0xdad   : > { %12797 = vmatprep.mubr.msk.f32.mxu0 %vm14293_vm11, %v14294_v5 }
 0xe7f   : > { %v2879_v7 = vpop.f32.mrb[16].mxu0 }
 0xe80   : > { %v2880_v37 = vadd.f32 %v14698_v36, %v2879_v7  ;;  %v12794_v38 = vpop.f32.mrb[17].mxu0 }
 0xe82   : > { %2883 = vst.msk [vmem:[#allocation2] sm:$0xff] %vm977_vm4, %v2880_v37 }
 0xe89   : > { %v14702_v44 = vld [vmem:[#allocation2] sm:$0xff] }
 0xe8a   : > { %2886 = vrot.lane.b32.xlu0 %v14702_v44, %s14279_s16 }
 0xefc   : > { %v2887_v45 = vpop.permute.xlu0 %2886 }
 0xefd   : > { %12796 = vmatpush3.xpose.msk.msra.mxu0 %vm988_vm5, %v2887_v45 }
 0xefe   : > { %12800 = vmatprep.subr.mxu0 %v14294_v5 }
 0xf00   : > { %12798 = vmatmul.mubr.msk.f32.vlgmr.msra.gmra.mrb[18].mxu0 %vm988_vm5, %v14702_v44 }
 0xf01   : > { %12802 = vmatprep.mubr.msk.f32.mxu0 %vm14293_vm11, %v14294_v5 }
 0xfd3   : > { %v2958_v46 = vpop.f32.mrb[18].mxu0 }
 0xfd4   : > { %v2962_v39 = vmul.f32 0.35355338, %v2958_v46  ;;  %v12799_v48 = vpop.f32.mrb[19].mxu0 }
 0xfd6   : > { %v2963_v49 = vsel %vm988_vm5, %v2962_v39, -inf }
 0xfd7   : > { %2964 = vmax.xlane.f32.xlu1 %v2963_v49 }
 0xfe8   : > { %3053 = vrot.lane.b32.xlu1 %v14702_v44, %s14280_s17 }
 0xfec   : > { %3051 = vrot.lane.b32.xlu1 %v14702_v44, %s14278_s15 }
0x1064   : > { %v2965_v50 = vpop.xlane.xlu1 %2964 }
0x1065   : > { %v2966_v51 = vsub.f32 %v2962_v39, %v2965_v50 }
0x1067   : > { %v2967_v52 = vmul.f32 1.442695, %v2966_v51 }
0x1068   : > { %v3054_v59 = vpop.permute.xlu1 %3053 }
0x1069   : > { %14050 = vpow2.f32 %v2967_v52 }
0x106c   : > { %v3052_v61 = vpop.permute.xlu1 %3051 }
0x1073   : > { %v14051_v53 = vpop.eup %14050 }
0x1074   : > { %v2969_v54 = vsel %vm988_vm5, %v14051_v53, 0.0 }
0x1075   : > { %2970 = vadd.xlane.f32.xlu0 %v2969_v54 }
0x108b   : > { %2974 = vrot.lane.b32.xlu0 %v14702_v44, %s14285_s22 }
0x1102   : > { %v2971_v8 = vpop.xlane.xlu0 %2970 }
0x1103   : > { %14052 = vrcp.f32 %v2971_v8 }
0x1106   : > { %v2975_v57 = vpop.permute.xlu0 %2974 }
0x1107   : > { %12801 = vmatpush3.msra.mxu0 %v2975_v57 }
0x1108   : > { %12805 = vmatprep.subr.mxu0 %v14294_v5 }
0x110d   : > { %v14053_v58 = vpop.eup %14052 }
0x110e   : > { %v2973_v60 = vmul.f32 %v14053_v58, %v14051_v53 }
0x1110   : > { %12803 = vmatmul.mubr.msk.f32.vlgmr.msra.gmra.mrb[20].mxu0 %vm988_vm5, %v2973_v60 }
0x1111   : > { %12806 = vmatpush3.xpose.msk.msra.mxu0 %vm988_vm5, %v3054_v59  ;;  %12807 = vmatprep.mubr.msk.f32.mxu0 %vm14293_vm11, %v14294_v5 }
0x1112   : > { %12815 = vmatprep.subr.mxu0 %v14294_v5 }
0x1114   : > { %12808 = vmatmul.mubr.msk.f32.vlgmr.msra.gmra.mrb[22].mxu0 %vm988_vm5, %v3052_v61 }
0x1115   : > { %12817 = vmatprep.mubr.msk.f32.mxu0 %vm14293_vm11, %v14294_v5 }
0x11e3   : > { %v3046_v62 = vpop.f32.mrb[20].mxu0 }
0x11e4   : > { %v12804_v41 = vpop.f32.mrb[21].mxu0 }
0x11e7   : > { %v3125_v0 = vpop.f32.mrb[22].mxu0 }
0x11e8   : > { %v3129_v14 = vmul.f32 0.35355338, %v3125_v0  ;;  %v12809_v15 = vpop.f32.mrb[23].mxu0 }
0x11ea   : > { %v3130_v56 = vsel %vm988_vm5, %v3129_v14, -inf }
0x11eb   : > { %3131 = vmax.xlane.f32.xlu0 %v3130_v56 }
0x1201   : > { %3141 = vrot.lane.b32.xlu0 %v14702_v44, %s14283_s20 }
0x1205   : > { %3374 = vrot.lane.b32.xlu0 %v14702_v44, %s14282_s19 }
0x1278   : > { %v3132_v55 = vpop.xlane.xlu0 %3131 }
0x1279   : > { %v3133_v6 = vsub.f32 %v3129_v14, %v3132_v55 }
0x127b   : > { %v3134_v9 = vmul.f32 1.442695, %v3133_v6 }
0x127c   : > { %v3142_v10 = vpop.permute.xlu0 %3141 }
0x127d   : > { %14054 = vpow2.f32 %v3134_v9  ;;  %12811 = vmatpush3.msra.mxu1 %v3142_v10 }
0x127e   : > { %12820 = vmatprep.subr.mxu1 %v14294_v5 }
0x1280   : > { %v3375_v19 = vpop.permute.xlu0 %3374 }
0x1287   : > { %v14055_v11 = vpop.eup %14054 }
0x1288   : > { %v3136_v12 = vsel %vm988_vm5, %v14055_v11, 0.0 }
0x1289   : > { %3137 = vadd.xlane.f32.xlu1 %v3136_v12 }
0x129a   : > { %3219 = vrot.lane.b32.xlu1 %v14658_v2, %s15895_s26 }
0x129e   : > { %3372 = vrot.lane.b32.xlu1 %v14702_v44, %s14281_s18 }
0x12a2   : > { %3462 = vrot.lane.b32.xlu1 %v14702_v44, %s15893_s27 }
0x1316   : > { %v3138_v13 = vpop.xlane.xlu1 %3137 }
0x1317   : > { %14056 = vrcp.f32 %v3138_v13 }
0x131a   : > { %v3220_v16 = vpop.permute.xlu1 %3219 }
0x131b   : > { %12816 = vmatpush3.msra.mxu0 %v3220_v16 }
0x131c   : > { %12825 = vmatprep.subr.mxu0 %v14294_v5 }
0x131e   : > { %v3373_v21 = vpop.permute.xlu1 %3372 }
0x1321   : > { %v14057_v17 = vpop.eup %14056 }
0x1322   : > { %v3140_v18 = vmul.f32 %v14057_v17, %v14055_v11  ;;  %v3463_v32 = vpop.permute.xlu1 %3462  ;;  %v11988_v17 = vld [vmem:[%s15889_s6 + $0x6] ss:$0 sm:$0xff] }
0x1324   : > { %12813 = vmatmul.mubr.msk.f32.vlgmr.msra.gmra.mrb[14].mxu1 %vm988_vm5, %v3140_v18 }
0x1325   : > { %12822 = vmatprep.mubr.msk.f32.mxu1 %vm14293_vm11, %v14294_v5 }
0x13f7   : > { %v3213_v2 = vpop.f32.mrb[14].mxu1 }
0x13f8   : > { %v12814_v20 = vpop.f32.mrb[15].mxu1  ;;  %12818 = vmatmul.mubr.msk.f32.vlgmr.msra.gmra.mrb[24].mxu0 %vm988_vm5, %v3213_v2 }
0x13f9   : > { %12826 = vmatpush3.xpose.msk.msra.mxu0 %vm988_vm5, %v3375_v19  ;;  %12827 = vmatprep.mubr.msk.f32.mxu0 %vm14293_vm11, %v14294_v5 }
0x13fa   : > { %12835 = vmatprep.subr.mxu0 %v14294_v5 }
0x13fc   : > { %12828 = vmatmul.mubr.msk.f32.vlgmr.msra.gmra.mrb[26].mxu0 %vm988_vm5, %v3373_v21 }
0x13fd   : > { %12837 = vmatprep.mubr.msk.f32.mxu0 %vm14293_vm11, %v14294_v5 }
0x14cb   : > { %v3291_v22 = vpop.f32.mrb[24].mxu0 }
0x14cc   : > { %v12819_v23 = vpop.f32.mrb[25].mxu0 }
0x14cd   : > { %v3899_v23 = vld [vmem:[%s15888_s5 + $0x108] sm:$0xff] }
0x14cf   : > { %v3446_v26 = vpop.f32.mrb[26].mxu0 }
0x14d0   : > { %v3450_v27 = vmul.f32 0.35355338, %v3446_v26  ;;  %v12829_v28 = vpop.f32.mrb[27].mxu0 }
0x14d2   : > { %v3451_v29 = vsel %vm988_vm5, %v3450_v27, -inf }
0x14d3   : > { %3452 = vmax.xlane.f32.xlu0 %v3451_v29 }
0x14e9   : > { %3296 = vrot.lane.b32.xlu0 %v14653_v1, %s15895_s26 }
0x14ed   : > { %3619 = vrot.lane.b32.xlu0 %v14702_v44, %s14284_s21 }
0x1560   : > { %v3453_v25 = vpop.xlane.xlu0 %3452 }
0x1561   : > { %v3454_v24 = vsub.f32 %v3450_v27, %v3453_v25  ;;  %v3900_v27 = vld [vmem:[%s15888_s5 + $0x180] sm:$0xff] }
0x1562   : > { %v13494_v28 = vpack.c.bf16 %v3900_v27, %v3899_v23  ;;  %v13843_v25 = vpack.i.bf16 %v3900_v27, %v3899_v23  ;;  %v11992_v23 = vld [vmem:[%s15889_s6 + $0x7] ss:$0 sm:$0xff] }
0x1563   : > { %v3455_v30 = vmul.f32 1.442695, %v3454_v24  ;;  %v11989_v24 = vld [vmem:[%s15889_s6 + $0x5] ss:$0 sm:$0xff] }
0x1564   : > { %v3297_v31 = vpop.permute.xlu0 %3296  ;;  %v4134_v27 = vld [vmem:[%s15888_s5 + $0x1a0] sm:$0xff] }
0x1565   : > { %14058 = vpow2.f32 %v3455_v30  ;;  %12821 = vmatpush3.msra.mxu1 %v3297_v31 }
0x1566   : > { %12823 = vmatmul.mubr.msk.f32.vlgmr.msra.gmra.mrb[16].mxu1 %vm988_vm5, %v3046_v62  ;;  %12830 = vmatprep.subr.mxu1 %v14294_v5 }
0x1567   : > { %12831 = vmatpush3.msra.mxu1 %v3463_v32  ;;  %12832 = vmatprep.mubr.msk.f32.mxu1 %vm14293_vm11, %v14294_v5 }
0x1568   : > { %12840 = vmatprep.subr.mxu1 %v14294_v5  ;;  %v3620_v45 = vpop.permute.xlu0 %3619 }
0x156f   : > { %v14059_v1 = vpop.eup %14058 }
0x1570   : > { %v3457_v33 = vsel %vm988_vm5, %v14059_v1, 0.0 }
0x1571   : > { %3458 = vadd.xlane.f32.xlu1 %v3457_v33 }
0x1582   : > { %3617 = vrot.lane.b32.xlu1 %v14702_v44, %s14286_s23 }
0x15fe   : > { %v3459_v7 = vpop.xlane.xlu1 %3458 }
0x15ff   : > { %14060 = vrcp.f32 %v3459_v7 }
0x1602   : > { %v3618_v46 = vpop.permute.xlu1 %3617 }
0x1609   : > { %v14061_v37 = vpop.eup %14060 }
0x160a   : > { %v3461_v38 = vmul.f32 %v14061_v37, %v14059_v1 }
0x160c   : > { %12833 = vmatmul.mubr.msk.f32.vlgmr.msra.gmra.mrb[18].mxu1 %vm988_vm5, %v3461_v38 }
0x160d   : > { %12841 = vmatpush3.xpose.msk.msra.mxu1 %vm988_vm5, %v3620_v45  ;;  %12842 = vmatprep.mubr.msk.f32.mxu1 %vm14293_vm11, %v14294_v5 }
0x160e   : > { %12850 = vmatprep.subr.mxu1 %v14294_v5 }
0x1610   : > { %12843 = vmatmul.mubr.msk.f32.vlgmr.msra.gmra.mrb[20].mxu1 %vm988_vm5, %v3618_v46 }
0x1611   : > { %12852 = vmatprep.mubr.msk.f32.mxu1 %vm14293_vm11, %v14294_v5 }
0x1639   : > { %v3368_v39 = vpop.f32.mrb[16].mxu1 }
0x163a   : > { %v3369_v48 = vadd.f32 %v3368_v39, %v3291_v22  ;;  %v12824_v49 = vpop.f32.mrb[17].mxu1  ;;  %v3898_v22 = vld [vmem:[%s15888_s5 + $0x90] sm:$0xff] }
0x16df   : > { %v3534_v50 = vpop.f32.mrb[18].mxu1 }
0x16e0   : > { %v12834_v51 = vpop.f32.mrb[19].mxu1 }
0x16e3   : > { %v3691_v52 = vpop.f32.mrb[20].mxu1 }
0x16e4   : > { %v3695_v53 = vmul.f32 0.35355338, %v3691_v52  ;;  %v12844_v54 = vpop.f32.mrb[21].mxu1 }
0x16e6   : > { %v3696_v8 = vsel %vm988_vm5, %v3695_v53, -inf }
0x16e7   : > { %3697 = vmax.xlane.f32.xlu0 %v3696_v8 }
0x16fd   : > { %3540 = vrot.lane.b32.xlu0 %v14667_v3, %s15895_s26 }
0x1701   : > { %3785 = vrot.lane.b32.xlu0 %v14672_v4, %s15895_s26 }
0x1774   : > { %v3698_v57 = vpop.xlane.xlu0 %3697 }
0x1775   : > { %v3699_v58 = vsub.f32 %v3695_v53, %v3698_v57 }
0x1777   : > { %v3700_v59 = vmul.f32 1.442695, %v3699_v58 }
0x1778   : > { %v3541_v60 = vpop.permute.xlu0 %3540 }
0x1779   : > { %14062 = vpow2.f32 %v3700_v59  ;;  %12836 = vmatpush3.msra.mxu0 %v3541_v60 }
0x177a   : > { %12838 = vmatmul.mubr.msk.f32.vlgmr.msra.gmra.mrb[28].mxu0 %vm988_vm5, %v3534_v50  ;;  %12845 = vmatprep.subr.mxu0 %v14294_v5 }
0x177b   : > { %12847 = vmatprep.mubr.msk.f32.mxu0 %vm14293_vm11, %v14294_v5 }
0x177c   : > { %v3786_v3 = vpop.permute.xlu0 %3785 }
0x177d   : > { %12851 = vmatpush3.msra.mxu1 %v3786_v3 }
0x177e   : > { %13496 = vmatprep.subr.bf16.mxu1 %v14292_v34 }
0x1783   : > { %v14063_v61 = vpop.eup %14062 }
0x1784   : > { %v3702_v62 = vsel %vm988_vm5, %v14063_v61, 0.0 }
0x1785   : > { %3703 = vadd.xlane.f32.xlu1 %v3702_v62 }
0x1796   : > { %3707 = vrot.lane.b32.xlu1 %v14702_v44, %s15899_s13 }
0x179a   : > { %3868 = vrot.lane.b32.xlu1 %v14698_v36, %s15895_s26 }
0x1812   : > { %v3704_v4 = vpop.xlane.xlu1 %3703 }
0x1813   : > { %14064 = vrcp.f32 %v3704_v4 }
0x1816   : > { %v3708_v41 = vpop.permute.xlu1 %3707 }
0x1817   : > { %12846 = vmatpush3.msra.mxu0 %v3708_v41 }
0x1818   : > { %13490 = vmatprep.subr.bf16.mxu0 %v14292_v34 }
0x181a   : > { %v3869_v9 = vpop.permute.xlu1 %3868 }
0x181d   : > { %v14065_v0 = vpop.eup %14064 }
0x181e   : > { %v3706_v14 = vmul.f32 %v14065_v0, %v14063_v61 }
0x1820   : > { %12848 = vmatmul.mubr.msk.f32.vlgmr.msra.gmra.mrb[30].mxu0 %vm988_vm5, %v3706_v14 }
0x1821   : > { %12863 = vmatprep.mubr.msk.f32.mxu0 %vm14293_vm11, %v14294_v5 }
0x184d   : > { %v3612_v44 = vpop.f32.mrb[28].mxu0 }
0x184e   : > { %v3616_v15 = vadd.f32 %v3612_v44, %v3369_v48  ;;  %v12839_v36 = vpop.f32.mrb[29].mxu0 }
0x18f3   : > { %v3779_v56 = vpop.f32.mrb[30].mxu0 }
0x18f4   : > { %v12849_v55 = vpop.f32.mrb[31].mxu0  ;;  %12853 = vmatmul.mubr.msk.f32.vlgmr.msra.gmra.mrb[22].mxu1 %vm988_vm5, %v3779_v56 }
0x18f5   : > { %12874 = vmatprep.mubr.msk.f32.mxu1 %vm14293_vm11, %v14294_v5 }
0x19c7   : > { %v3857_v6 = vpop.f32.mrb[22].mxu1 }
0x19c8   : > { %v3861_v10 = vadd.f32 %v3857_v6, %v3616_v15  ;;  %v12854_v11 = vpop.f32.mrb[23].mxu1 }
0x19ca   : > { %v3871_v12 = vadd.f32 %v3869_v9, %v3861_v10 }
0x19cc   : > { %v3872_v13 = vadd.f32 %v3871_v12, %v14689_v35  ;;  %v3897_v35 = vld [vmem:[%s15888_s5 + $0x18] sm:$0xff] }
0x19cd   : > { %v13491_v26 = vpack.c.bf16 %v3898_v22, %v3897_v35  ;;  %v13838_v29 = vpack.i.bf16 %v3898_v22, %v3897_v35 }
0x19ce   : > { %v3874_v16 = vsel %vm895_vm3, %v3872_v13, 0.0 }
0x19cf   : > { %3875 = vadd.xlane.f32.xlu0 %v3874_v16  ;;  %13492 = vmatpush3.bf16.msra.mxu0 %v13491_v26  ;;  %v4133_v26 = vld [vmem:[%s15888_s5 + $0x128] sm:$0xff] }
0x19d0   : > { %13493 = vmatprep.subr.bf16.mxu0 %v14292_v34 }
0x19d3   : > { %13495 = vmatpush3.bf16.msra.mxu0 %v13494_v28  ;;  %v13853_v28 = vpack.i.bf16 %v4134_v27, %v4133_v26 }
0x19d4   : > { %13502 = vmatprep.subr.bf16.mxu0 %v14292_v34 }
0x19e5   : > { %3893 = vrot.lane.b32.xlu0 %v11988_v17, %s14279_s16 }
0x19e9   : > { %13844 = vrot.lane.b32.xlu0 %v13843_v25, %s14279_s16 }
0x1a5c   : > { %v3876_v18 = vpop.xlane.xlu0 %3875 }
0x1a5d   : > { %v3877_v2 = vmul.f32 0.03125, %v3876_v18 }
0x1a5f   : > { %v3878_v19 = vsub.f32 %v3872_v13, %v3877_v2 }
0x1a60   : > { %v3894_v7 = vpop.permute.xlu0 %3893 }
0x1a61   : > { %v3879_v20 = vmul.f32 %v3878_v19, %v3878_v19 }
0x1a63   : > { %v3880_v21 = vsel %vm895_vm3, %v3879_v20, 0.0 }
0x1a64   : > { %3881 = vadd.xlane.f32.xlu1 %v3880_v21  ;;  %v13845_v49 = vpop.permute.xlu0 %13844 }
0x1a65   : > { %v13847_v50 = vunpack.i.h.bf16 %v13845_v49  ;;  %v13846_v51 = vunpack.i.l.bf16 %v13845_v49 }
0x1a67   : > { %v13500_v52 = vpack.c.bf16 %v13847_v50, %v13846_v51 }
0x1a75   : > { %13839 = vrot.lane.b32.xlu1 %v13838_v29, %s14279_s16 }
0x1a79   : > { %4023 = vrot.lane.b32.xlu1 %v11989_v24, %s14279_s16 }
0x1af1   : > { %v3882_v30 = vpop.xlane.xlu1 %3881 }
0x1af2   : > { %v3883_v31 = vmul.f32 0.03125, %v3882_v30 }
0x1af4   : > { %v3884_v32 = vadd.f32 1e-05, %v3883_v31 }
0x1af5   : > { %v13840_v45 = vpop.permute.xlu1 %13839 }
0x1af6   : > { %14066 = vrsqrt.f32 %v3884_v32  ;;  %v13842_v46 = vunpack.i.h.bf16 %v13840_v45  ;;  %v13841_v39 = vunpack.i.l.bf16 %v13840_v45  ;;  %v4131_v32 = vld [vmem:[%s15888_s5 + $0x38] sm:$0xff] }
0x1af8   : > { %v13497_v48 = vpack.c.bf16 %v13842_v46, %v13841_v39 }
0x1af9   : > { %v4024_v2 = vpop.permute.xlu1 %4023 }
0x1afa   : > { %13498 = vmatpush3.bf16.msra.mxu1 %v13497_v48 }
0x1afb   : > { %13499 = vmatprep.subr.bf16.mxu1 %v14292_v34 }
0x1afe   : > { %13501 = vmatpush3.bf16.msra.mxu1 %v13500_v52 }
0x1aff   : > { %13508 = vmatprep.subr.bf16.mxu1 %v14292_v34 }
0x1b00   : > { %v14067_v1 = vpop.eup %14066 }
0x1b01   : > { %v3886_v33 = vmul.f32 %v14067_v1, %v3878_v19  ;;  %v4132_v1 = vld [vmem:[%s15888_s5 + $0xb0] sm:$0xff] }
0x1b03   : > { %v3891_v37 = vmul.f32 %v11988_v17, %v3886_v33  ;;  %v13848_v33 = vpack.i.bf16 %v4132_v1, %v4131_v32 }
0x1b05   : > { %v3896_v38 = vadd.f32 %v3894_v7, %v3891_v37  ;;  %v13509_v7 = vpack.c.bf16 %v4132_v1, %v4131_v32  ;;  %v13512_v37 = vpack.c.bf16 %v4134_v27, %v4133_v26 }
0x1b07   : > { %12864 = vmatmul.mubr.msk.f32.vlgmr.msra.gmra.mrb[32].mxu0 %vm895_vm3, %v3896_v38 }
0x1b08   : > { %12885 = vmatprep.mubr.msk.f32.mxu0 %vm14293_vm11, %v14294_v5 }
0x1bda   : > { %v3975_v53 = vpop.f32.mrb[32].mxu0 }
0x1bdb   : > { %v3976_v54 = vadd.f32 %v11989_v24, %v3975_v53  ;;  %v12865_v8 = vpop.f32.mrb[33].mxu0 }
0x1bdd   : > { %v3980_v57 = vmul.f32 0.70710677, %v3976_v54  ;;  %v3979_v16 = vmul.f32 0.5, %v3976_v54 }
0x1bdf   : > { %v3983_v58 = vand.u32 2147483647, %v3980_v57  ;;  %vm3981_vm14 = vcmp.ge.f32.partialorder %v3980_v57, 0.0 }
0x1be0   : > { %v3982_v12 = vsel %vm3981_vm14, 1.0, %v14290_v40  ;;  %vm7265_vm14 = vcmask 781568  }
0x1be1   : > { %v3984_v59 = vmul.f32 0.3275911, %v3983_v58  ;;  %v3997_v61 = vsub.f32 0.0, %v3983_v58 }
0x1be3   : > { %v3985_v60 = vadd.f32 1.0, %v3984_v59  ;;  %v3998_v3 = vmul.f32 %v3997_v61, %v3983_v58 }
0x1be5   : > { %14068 = vrcp.f32 %v3985_v60  ;;  %v3999_v0 = vmul.f32 1.442695, %v3998_v3 }
0x1be7   : > { %14070 = vpow2.f32 %v3999_v0 }
0x1bef   : > { %v14069_v62 = vpop.eup %14068 }
0x1bf0   : > { %v3988_v4 = vmul.f32 1.0614054, %v14069_v62 }
0x1bf1   : > { %v14071_v9 = vpop.eup %14070 }
0x1bf2   : > { %v3989_v41 = vadd.f32 -1.4531521, %v3988_v4 }
0x1bf4   : > { %v3990_v14 = vmul.f32 %v14069_v62, %v3989_v41 }
0x1bf6   : > { %v3991_v44 = vadd.f32 1.4214138, %v3990_v14 }
0x1bf8   : > { %v3992_v15 = vmul.f32 %v14069_v62, %v3991_v44 }
0x1bfa   : > { %v3993_v36 = vadd.f32 -0.28449672, %v3992_v15 }
0x1bfc   : > { %v3994_v56 = vmul.f32 %v14069_v62, %v3993_v36 }
0x1bfe   : > { %v3995_v55 = vadd.f32 0.2548296, %v3994_v56 }
0x1c00   : > { %v3996_v6 = vmul.f32 %v14069_v62, %v3995_v55 }
0x1c02   : > { %v4001_v10 = vmul.f32 %v14071_v9, %v3996_v6  ;;  %v14880_v6 = vld [vmem:[%s15888_s5 + $0x20] sm:$0xff]  ;;  %v14885_v9 = vld [vmem:[%s15888_s5 + $0x98] sm:$0xff] }
0x1c04   : > { %v4002_v11 = vsub.f32 1.0, %v4001_v10  ;;  %v13521_v10 = vpack.c.bf16 %v14885_v9, %v14880_v6 }
0x1c06   : > { %v4003_v13 = vmul.f32 %v4002_v11, %v3982_v12  ;;  %v14897_v11 = vld [vmem:[%s15888_s5 + $0x188] sm:$0xff] }
0x1c08   : > { %v4004_v17 = vadd.f32 1.0, %v4003_v13 }
0x1c0a   : > { %v4005_v18 = vmul.f32 %v4004_v17, %v3979_v16 }
0x1c0c   : > { %12875 = vmatmul.mubr.msk.f32.vlgmr.msra.gmra.mrb[24].mxu1 %vm895_vm3, %v4005_v18 }
0x1c0d   : > { %12896 = vmatprep.mubr.msk.f32.mxu1 %vm14293_vm11, %v14294_v5  ;;  %13510 = vmatpush3.bf16.msra.mxu1 %v13509_v7 }
0x1c0e   : > { %13511 = vmatprep.subr.bf16.mxu1 %v14292_v34 }
0x1c11   : > { %13513 = vmatpush3.bf16.msra.mxu1 %v13512_v37 }
0x1c12   : > { %13520 = vmatprep.subr.bf16.mxu1 %v14292_v34 }
0x1cdf   : > { %v4095_v19 = vpop.f32.mrb[24].mxu1 }
0x1ce0   : > { %v4096_v20 = vadd.f32 %v4095_v19, %v4024_v2  ;;  %v12876_v21 = vpop.f32.mrb[25].mxu1 }
0x1ce1   : > { %v11996_v21 = vld [vmem:[%s15889_s6 + $0xe] ss:$0 sm:$0xff] }
0x1ce2   : > { %v4099_v35 = vadd.f32 %v4096_v20, %v3896_v38 }
0x1ce4   : > { %v4101_v22 = vsel %vm895_vm3, %v4099_v35, 0.0 }
0x1ce5   : > { %4102 = vadd.xlane.f32.xlu0 %v4101_v22 }
0x1cfb   : > { %4120 = vrot.lane.b32.xlu0 %v11992_v23, %s14279_s16 }
0x1cff   : > { %13854 = vrot.lane.b32.xlu0 %v13853_v28, %s14279_s16 }
0x1d03   : > { %13864 = vrot.lane.b32.xlu0 %v13853_v28, %s14285_s22 }
0x1d72   : > { %v4103_v29 = vpop.xlane.xlu0 %4102 }
0x1d73   : > { %v4104_v25 = vmul.f32 0.03125, %v4103_v29 }
0x1d75   : > { %v4105_v24 = vsub.f32 %v4099_v35, %v4104_v25 }
0x1d76   : > { %v4121_v38 = vpop.permute.xlu0 %4120 }
0x1d77   : > { %v4106_v30 = vmul.f32 %v4105_v24, %v4105_v24 }
0x1d79   : > { %v4107_v31 = vsel %vm895_vm3, %v4106_v30, 0.0 }
0x1d7a   : > { %4108 = vadd.xlane.f32.xlu1 %v4107_v31  ;;  %v13855_v39 = vpop.permute.xlu0 %13854 }
0x1d7b   : > { %v13857_v50 = vunpack.i.h.bf16 %v13855_v39  ;;  %v13856_v53 = vunpack.i.l.bf16 %v13855_v39 }
0x1d7d   : > { %v13506_v8 = vpack.c.bf16 %v13857_v50, %v13856_v53 }
0x1d7e   : > { %v13865_v62 = vpop.permute.xlu0 %13864 }
0x1d7f   : > { %v13867_v41 = vunpack.i.h.bf16 %v13865_v62  ;;  %v13866_v0 = vunpack.i.l.bf16 %v13865_v62 }
0x1d81   : > { %v13518_v44 = vpack.c.bf16 %v13867_v41, %v13866_v0 }
0x1d8b   : > { %13849 = vrot.lane.b32.xlu1 %v13848_v33, %s14279_s16 }
0x1d8f   : > { %13859 = vrot.lane.b32.xlu1 %v13848_v33, %s14285_s22  ;;  %v14917_v33 = vld [vmem:[%s15889_s6 + $0x8] ss:$0 sm:$0xff] }
0x1e07   : > { %v4109_v45 = vpop.xlane.xlu1 %4108 }
0x1e08   : > { %v4110_v46 = vmul.f32 0.03125, %v4109_v45 }
0x1e0a   : > { %v4111_v48 = vadd.f32 1e-05, %v4110_v46 }
0x1e0b   : > { %v13850_v49 = vpop.permute.xlu1 %13849 }
0x1e0c   : > { %14072 = vrsqrt.f32 %v4111_v48  ;;  %v13852_v51 = vunpack.i.h.bf16 %v13850_v49  ;;  %v13851_v52 = vunpack.i.l.bf16 %v13850_v49 }
0x1e0e   : > { %v13503_v54 = vpack.c.bf16 %v13852_v51, %v13851_v52 }
0x1e0f   : > { %v13860_v57 = vpop.permute.xlu1 %13859 }
0x1e10   : > { %13504 = vmatpush3.bf16.msra.mxu0 %v13503_v54  ;;  %v13862_v59 = vunpack.i.h.bf16 %v13860_v57  ;;  %v13861_v60 = vunpack.i.l.bf16 %v13860_v57 }
0x1e11   : > { %13505 = vmatprep.subr.bf16.mxu0 %v14292_v34 }
0x1e12   : > { %v13515_v4 = vpack.c.bf16 %v13862_v59, %v13861_v60 }
0x1e14   : > { %13507 = vmatpush3.bf16.msra.mxu0 %v13506_v8 }
0x1e15   : > { %13514 = vmatprep.subr.bf16.mxu0 %v14292_v34 }
0x1e16   : > { %v14073_v58 = vpop.eup %14072 }
0x1e17   : > { %v4113_v61 = vmul.f32 %v14073_v58, %v4105_v24 }
0x1e19   : > { %v4118_v3 = vmul.f32 %v11992_v23, %v4113_v61 }
0x1e1b   : > { %v4123_v14 = vadd.f32 %v4121_v38, %v4118_v3 }
0x1e1d   : > { %4124 = vst.msk [vmem:[#allocation2 + $0x1] sm:$0xff] %vm895_vm3, %v4123_v14  ;;  %12886 = vmatmul.mubr.msk.f32.vlgmr.msra.gmra.mrb[34].mxu0 %vm895_vm3, %v4123_v14 }
0x1e1e   : > { %13516 = vmatpush3.bf16.msra.mxu0 %v13515_v4  ;;  %12907 = vmatprep.mubr.msk.f32.mxu0 %vm14293_vm11, %v14294_v5 }
0x1e1f   : > { %13517 = vmatprep.subr.bf16.mxu0 %v14292_v34 }
0x1e22   : > { %13519 = vmatpush3.bf16.msra.mxu0 %v13518_v44 }
0x1e23   : > { %12921 = vmatprep.subr.mxu0 %v14294_v5 }
0x1e24   : > { %v4125_v15 = vld [vmem:[#allocation2 + $0x8] sm:$0x1]  ;;  %v4127_v36 = vld [vmem:[#allocation2 + $0x1] sm:$0x1] }
0x1e25   : > { %4126 = vst.msk [vmem:[#allocation2] sm:$0x1] %vm2480_vm10, %v4125_v15  ;;  %4128 = vst.msk [vmem:[#allocation2 + $0x9] sm:$0x1] %vm2480_vm10, %v4127_v36 }
0x1e2c   : > { %v4129_v56 = vld [vmem:[#allocation2] sm:$0xff] }
0x1e2d   : > { %v4130_v55 = vld [vmem:[#allocation2 + $0x2] sm:$0xff]  ;;  %12897 = vmatmul.mubr.msk.f32.vlgmr.msra.gmra.mrb[26].mxu1 %vm895_vm3, %v4129_v56  ;;  %4397 = vst.msk [vmem:[#allocation2] sm:$0x1] %vm2480_vm10, %v14291_v63 }
0x1e2e   : > { %12908 = vmatmul.mubr.msk.f32.vlgmr.msra.gmra.mrb[36].mxu0 %vm895_vm3, %v4130_v55  ;;  %4398 = vst.msk [vmem:[#allocation2 + $0x9] sm:$0x1] %vm2480_vm10, %v14291_v63  ;;  %12918 = vmatprep.mubr.msk.f32.mxu1 %vm14293_vm11, %v14294_v5  ;;  %v14890_v63 = vld [vmem:[%s15888_s5 + $0x110] sm:$0xff] }
0x1e2f   : > { %12923 = vmatprep.mubr.msk.f32.mxu0 %vm14293_vm11, %v14294_v5  ;;  %13522 = vmatpush3.bf16.msra.mxu1 %v13521_v10  ;;  %v13524_v12 = vpack.c.bf16 %v14897_v11, %v14890_v63 }
0x1e30   : > { %13523 = vmatprep.subr.bf16.mxu1 %v14292_v34 }
0x1e33   : > { %13525 = vmatpush3.bf16.msra.mxu1 %v13524_v12 }
0x1e34   : > { %12926 = vmatprep.subr.mxu1 %v14294_v5 }
0x1ef0   : > { %v4220_v13 = vpop.f32.mrb[34].mxu0 }
0x1ef1   : > { %v12887_v16 = vpop.f32.mrb[35].mxu0 }
0x1f00   : > { %v4293_v17 = vpop.f32.mrb[26].mxu1 }
0x1f01   : > { %v4378_v18 = vpop.f32.mrb[36].mxu0  ;;  %v4294_v2 = vadd.f32 %v4293_v17, %v4220_v13  ;;  %v12898_v19 = vpop.f32.mrb[27].mxu1 }
0x1f02   : > { %v12909_v20 = vpop.f32.mrb[37].mxu0 }
0x1f03   : > { %v4382_v35 = vadd.f32 %v4378_v18, %v4294_v2 }
0x1f05   : > { %v4388_v22 = vadd.f32 %v11996_v21, %v4382_v35 }
0x1f07   : > { %v4389_v23 = vmul.f32 0.999995, %v4388_v22 }
0x1f09   : > { %v4391_v26 = vmin.f32 %v4389_v23, 0.0  ;;  %vm4390_vm15 = vcmp.gt.f32.partialorder %v4389_v23, 0.0 }
0x1f0b   : > { %v4392_v27 = vmul.f32 1.442695, %v4391_v26 }
0x1f0d   : > { %14074 = vpow2.f32 %v4392_v27 }
0x1f17   : > { %v14075_v28 = vpop.eup %14074 }
0x1f18   : > { %v11997_v29 = vadd.f32 -1.0, %v14075_v28 }
0x1f1a   : > { %v4395_v25 = vsel %vm4390_vm15, %v4389_v23, %v11997_v29 }
0x1f1b   : > { %4396 = vst.msk [vmem:[#allocation2 + $0x1] sm:$0xff] %vm895_vm3, %v4395_v25 }
0x1f22   : > { %v4399_v24 = vld [vmem:[#allocation2] sm:$0xff] }
0x1f23   : > { %v4400_v30 = vmax.f32 %v4399_v24, %v4395_v25  ;;  %v4401_v31 = vld [vmem:[#allocation2 + $0x2] sm:$0xff] }
0x1f25   : > { %v4402_v32 = vmax.f32 %v4400_v30, %v4401_v31 }
0x1f27   : > { %4403 = vst.msk [vmem:[#allocation2] sm:$0xff] %vm895_vm3, %v4402_v32 }
0x1f2e   : > { %v14908_v1 = vld [vmem:[#allocation2] ss:$2 sm:$0xf] }
0x1f2f   : > { %12919 = vmatmul.mubr.msk.f32.vlgmr.msra.gmra.mrb[28].mxu1 %vm895_vm3, %v14908_v1 }
0x1f30   : > { %12928 = vmatprep.mubr.msk.f32.mxu1 %vm14293_vm11, %v14294_v5 }
0x2002   : > { %v4483_v7 = vpop.f32.mrb[28].mxu1 }
0x2003   : > { %v4484_v37 = vadd.f32 %v14917_v33, %v4483_v7  ;;  %v12920_v38 = vpop.f32.mrb[29].mxu1 }
0x2005   : > { %4488 = vst.msk [vmem:[#allocation2] sm:$0xf] %vm4487_vm2, %v4484_v37 }
0x200c   : > { %v14920_v45 = vld [vmem:[#allocation2] sm:$0xf] }
0x200d   : > { %4660 = vrot.lane.b32.xlu0 %v14920_v45, %s14280_s17  ;;  %4491 = vrot.lane.b32.xlu1 %v14920_v45, %s14279_s16 }
0x2011   : > { %4658 = vrot.lane.b32.xlu1 %v14920_v45, %s14278_s15 }
0x207f   : > { %v4492_v46 = vpop.permute.xlu1 %4491  ;;  %v4661_v39 = vpop.permute.xlu0 %4660 }
0x2080   : > { %12922 = vmatpush3.xpose.msk.msra.mxu0 %vm988_vm5, %v4492_v46 }
0x2081   : > { %12931 = vmatprep.subr.mxu0 %v14294_v5 }
0x2083   : > { %12924 = vmatmul.mubr.msk.f32.vlgmr.msra.gmra.mrb[38].mxu0 %vm988_vm5, %v14920_v45  ;;  %v4659_v48 = vpop.permute.xlu1 %4658 }
0x2084   : > { %12932 = vmatpush3.xpose.msk.msra.mxu0 %vm988_vm5, %v4661_v39  ;;  %12933 = vmatprep.mubr.msk.f32.mxu0 %vm14293_vm11, %v14294_v5 }
0x2085   : > { %12941 = vmatprep.subr.mxu0 %v14294_v5 }
0x2087   : > { %12934 = vmatmul.mubr.msk.f32.vlgmr.msra.gmra.mrb[40].mxu0 %vm988_vm5, %v4659_v48 }
0x2088   : > { %12943 = vmatprep.mubr.msk.f32.mxu0 %vm14293_vm11, %v14294_v5 }
0x2156   : > { %v4563_v49 = vpop.f32.mrb[38].mxu0 }
0x2157   : > { %v4567_v50 = vmul.f32 0.35355338, %v4563_v49  ;;  %v12925_v51 = vpop.f32.mrb[39].mxu0 }
0x2159   : > { %v4569_v52 = vsel %vm4568_vm8, %v4567_v50, -inf }
0x215a   : > { %4570 = vmax.xlane.f32.xlu0 %v4569_v52  ;;  %v4732_v53 = vpop.f32.mrb[40].mxu0 }
0x215b   : > { %v4736_v54 = vmul.f32 0.35355338, %v4732_v53  ;;  %v12935_v8 = vpop.f32.mrb[41].mxu0 }
0x215d   : > { %v4737_v57 = vsel %vm4568_vm8, %v4736_v54, -inf }
0x215e   : > { %4738 = vmax.xlane.f32.xlu1 %v4737_v57 }
0x216f   : > { %4580 = vrot.lane.b32.xlu1 %v14920_v45, %s14285_s22 }
0x2173   : > { %4827 = vrot.lane.b32.xlu1 %v14885_v9, %s15895_s26 }
0x2177   : > { %4982 = vrot.lane.b32.xlu1 %v14920_v45, %s14282_s19 }
0x21e7   : > { %v4571_v58 = vpop.xlane.xlu0 %4570 }
0x21e8   : > { %v4572_v59 = vsub.f32 %v4567_v50, %v4571_v58 }
0x21ea   : > { %v4573_v60 = vmul.f32 1.442695, %v4572_v59 }
0x21eb   : > { %v4739_v61 = vpop.xlane.xlu1 %4738 }
0x21ec   : > { %14076 = vpow2.f32 %v4573_v60  ;;  %v4740_v62 = vsub.f32 %v4736_v54, %v4739_v61 }
0x21ee   : > { %v4741_v3 = vmul.f32 1.442695, %v4740_v62 }
0x21ef   : > { %v4581_v4 = vpop.permute.xlu1 %4580 }
0x21f0   : > { %14078 = vpow2.f32 %v4741_v3  ;;  %12927 = vmatpush3.msk.msra.mxu1 %vm359_vm0, %v4581_v4 }
0x21f1   : > { %12936 = vmatprep.subr.mxu1 %v14294_v5 }
0x21f3   : > { %v4828_v41 = vpop.permute.xlu1 %4827 }
0x21f4   : > { %12942 = vmatpush3.msra.mxu0 %v4828_v41 }
0x21f5   : > { %12951 = vmatprep.subr.mxu0 %v14294_v5 }
0x21f6   : > { %v14077_v0 = vpop.eup %14076 }
0x21f7   : > { %v4575_v14 = vsel %vm4568_vm8, %v14077_v0, 0.0  ;;  %v4983_v19 = vpop.permute.xlu1 %4982 }
0x21f8   : > { %4576 = vadd.xlane.f32.xlu0 %v4575_v14 }
0x21fa   : > { %v14079_v44 = vpop.eup %14078 }
0x21fb   : > { %v4743_v15 = vsel %vm4568_vm8, %v14079_v44, 0.0 }
0x21fc   : > { %4744 = vadd.xlane.f32.xlu0 %v4743_v15 }
0x2212   : > { %4748 = vrot.lane.b32.xlu0 %v14920_v45, %s14283_s20 }
0x2216   : > { %4980 = vrot.lane.b32.xlu0 %v14920_v45, %s14281_s18 }
0x221a   : > { %4904 = vrot.lane.b32.xlu0 %v14880_v6, %s15895_s26 }
0x2285   : > { %v4577_v36 = vpop.xlane.xlu0 %4576 }
0x2286   : > { %14080 = vrcp.f32 %v4577_v36 }
0x2289   : > { %v4745_v56 = vpop.xlane.xlu0 %4744 }
0x228a   : > { %14082 = vrcp.f32 %v4745_v56 }
0x228d   : > { %v4749_v55 = vpop.permute.xlu0 %4748 }
0x2290   : > { %v14081_v9 = vpop.eup %14080 }
0x2291   : > { %v4981_v10 = vpop.permute.xlu0 %4980  ;;  %v4579_v12 = vmul.f32 %v14081_v9, %v14077_v0 }
0x2293   : > { %12929 = vmatmul.mubr.msk.f32.vlgmr.msra.gmra.mrb[30].mxu1 %vm339_vm1, %v4579_v12 }
0x2294   : > { %v14083_v13 = vpop.eup %14082  ;;  %12937 = vmatpush3.msk.msra.mxu1 %vm359_vm0, %v4749_v55  ;;  %12938 = vmatprep.mubr.msk.f32.mxu1 %vm14293_vm11, %v14294_v5 }
0x2295   : > { %v4747_v16 = vmul.f32 %v14083_v13, %v14079_v44  ;;  %v4905_v17 = vpop.permute.xlu0 %4904  ;;  %12946 = vmatprep.subr.mxu1 %v14294_v5 }
0x2297   : > { %12939 = vmatmul.mubr.msk.f32.vlgmr.msra.gmra.mrb[32].mxu1 %vm339_vm1, %v4747_v16 }
0x2298   : > { %12947 = vmatpush3.msra.mxu1 %v4905_v17  ;;  %12948 = vmatprep.mubr.msk.f32.mxu1 %vm14293_vm11, %v14294_v5 }
0x2299   : > { %12956 = vmatprep.subr.mxu1 %v14294_v5 }
0x2366   : > { %v4653_v6 = vpop.f32.mrb[30].mxu1 }
0x2367   : > { %v12930_v18 = vpop.f32.mrb[31].mxu1  ;;  %12949 = vmatmul.mubr.msk.f32.vlgmr.msra.gmra.mrb[34].mxu1 %vm988_vm5, %v4653_v6 }
0x2368   : > { %12958 = vmatprep.mubr.msk.f32.mxu1 %vm14293_vm11, %v14294_v5 }
0x236a   : > { %v4821_v2 = vpop.f32.mrb[32].mxu1 }
0x236b   : > { %v12940_v20 = vpop.f32.mrb[33].mxu1  ;;  %12944 = vmatmul.mubr.msk.f32.vlgmr.msra.gmra.mrb[42].mxu0 %vm988_vm5, %v4821_v2  ;;  %v5508_v2 = vld [vmem:[%s15888_s5 + $0x28] sm:$0xff] }
0x236c   : > { %12952 = vmatpush3.xpose.msk.msra.mxu0 %vm988_vm5, %v4983_v19  ;;  %12953 = vmatprep.mubr.msk.f32.mxu0 %vm14293_vm11, %v14294_v5  ;;  %v5509_v19 = vld [vmem:[%s15888_s5 + $0xa0] sm:$0xff]  ;;  %v12021_v20 = vld [vmem:[%s15889_s6 + $0xa] ss:$0 sm:$0xff] }
0x236d   : > { %12961 = vmatprep.subr.mxu0 %v14294_v5 }
0x236f   : > { %12954 = vmatmul.mubr.msk.f32.vlgmr.msra.gmra.mrb[44].mxu0 %vm988_vm5, %v4981_v10 }
0x2370   : > { %12963 = vmatprep.mubr.msk.f32.mxu0 %vm14293_vm11, %v14294_v5 }
0x243a   : > { %v4976_v21 = vpop.f32.mrb[34].mxu1 }
0x243b   : > { %v12950_v35 = vpop.f32.mrb[35].mxu1 }
0x243c   : > { %v5511_v35 = vld [vmem:[%s15888_s5 + $0x190] sm:$0xff] }
0x243e   : > { %v4899_v22 = vpop.f32.mrb[42].mxu0 }
0x243f   : > { %v14978_v23 = vadd.f32 %v4976_v21, %v4899_v22  ;;  %v12945_v26 = vpop.f32.mrb[43].mxu0  ;;  %v13527_v21 = vpack.c.bf16 %v5509_v19, %v5508_v2 }
0x2440   : > { %v15050_v26 = vld [vmem:[%s15888_s5 + $0xb8] sm:$0xff] }
0x2442   : > { %v5054_v27 = vpop.f32.mrb[44].mxu0 }
0x2443   : > { %v5058_v28 = vmul.f32 0.35355338, %v5054_v27  ;;  %v12955_v29 = vpop.f32.mrb[45].mxu0 }
0x2445   : > { %v5059_v25 = vsel %vm4568_vm8, %v5058_v28, -inf }
0x2446   : > { %5060 = vmax.xlane.f32.xlu1 %v5059_v25 }
0x2457   : > { %5070 = vrot.lane.b32.xlu1 %v14920_v45, %s15893_s27  ;;  %s15901_s27 = smov 48  }
0x245b   : > { %5228 = vrot.lane.b32.xlu1 %v14920_v45, %s14284_s21 }
0x24d3   : > { %v5061_v24 = vpop.xlane.xlu1 %5060 }
0x24d4   : > { %v5062_v30 = vsub.f32 %v5058_v28, %v5061_v24  ;;  %v13868_v28 = vpack.i.bf16 %v5509_v19, %v5508_v2 }
0x24d6   : > { %v5063_v31 = vmul.f32 1.442695, %v5062_v30 }
0x24d7   : > { %v5071_v32 = vpop.permute.xlu1 %5070 }
0x24d8   : > { %14084 = vpow2.f32 %v5063_v31  ;;  %12957 = vmatpush3.msk.msra.mxu1 %vm359_vm0, %v5071_v32 }
0x24d9   : > { %12966 = vmatprep.subr.mxu1 %v14294_v5 }
0x24db   : > { %v5229_v48 = vpop.permute.xlu1 %5228 }
0x24e2   : > { %v14085_v7 = vpop.eup %14084 }
0x24e3   : > { %v5065_v37 = vsel %vm4568_vm8, %v14085_v7, 0.0 }
0x24e4   : > { %5066 = vadd.xlane.f32.xlu0 %v5065_v37  ;;  %v15063_v37 = vld [vmem:[%s15888_s5 + $0x130] sm:$0xff] }
0x24fa   : > { %5226 = vrot.lane.b32.xlu0 %v14920_v45, %s14286_s23 }
0x2571   : > { %v5067_v38 = vpop.xlane.xlu0 %5066 }
0x2572   : > { %14086 = vrcp.f32 %v5067_v38  ;;  %v15068_v38 = vld [vmem:[%s15888_s5 + $0x1a8] sm:$0xff] }
0x2575   : > { %v5227_v49 = vpop.permute.xlu0 %5226 }
0x257c   : > { %v14087_v46 = vpop.eup %14086 }
0x257d   : > { %v5069_v39 = vmul.f32 %v14087_v46, %v14085_v7  ;;  %v882_v46 = vld [vmem:[%s332_s11] sm:$0xff] }
0x257f   : > { %12959 = vmatmul.mubr.msk.f32.vlgmr.msra.gmra.mrb[36].mxu1 %vm339_vm1, %v5069_v39 }
0x2580   : > { %12967 = vmatpush3.xpose.msk.msra.mxu1 %vm988_vm5, %v5229_v48  ;;  %12968 = vmatprep.mubr.msk.f32.mxu1 %vm14293_vm11, %v14294_v5 }
0x2581   : > { %12976 = vmatprep.subr.mxu1 %v14294_v5 }
0x2583   : > { %12969 = vmatmul.mubr.msk.f32.vlgmr.msra.gmra.mrb[38].mxu1 %vm988_vm5, %v5227_v49  ;;  %v13542_v49 = vpack.c.bf16 %v15068_v38, %v15063_v37 }
0x2584   : > { %12978 = vmatprep.mubr.msk.f32.mxu1 %vm14293_vm11, %v14294_v5 }
0x2652   : > { %v5143_v50 = vpop.f32.mrb[36].mxu1 }
0x2653   : > { %v12960_v51 = vpop.f32.mrb[37].mxu1 }
0x2654   : > { %v883_v51 = vld [vmem:[%s332_s11 + $0x8] sm:$0xff] }
0x2656   : > { %v5300_v52 = vpop.f32.mrb[38].mxu1 }
0x2657   : > { %v5304_v53 = vmul.f32 0.35355338, %v5300_v52  ;;  %v12970_v54 = vpop.f32.mrb[39].mxu1  ;;  %v15082_v52 = vadd.f32 %v14476_v42, %v883_v51  ;;  %v15090_v42 = vld [vmem:[%s15889_s6 + $0x9] ss:$0 sm:$0xff] }
0x2659   : > { %v5305_v8 = vsel %vm4568_vm8, %v5304_v53, -inf }
0x265a   : > { %5306 = vmax.xlane.f32.xlu1 %v5305_v8 }
0x266b   : > { %5316 = vrot.lane.b32.xlu1 %v14920_v45, %s15899_s13 }
0x266f   : > { %5395 = vrot.lane.b32.xlu1 %v14897_v11, %s15895_s26 }
0x26e7   : > { %v5307_v57 = vpop.xlane.xlu1 %5306 }
0x26e8   : > { %v5308_v58 = vsub.f32 %v5304_v53, %v5307_v57 }
0x26ea   : > { %v5309_v59 = vmul.f32 1.442695, %v5308_v58 }
0x26eb   : > { %v5317_v3 = vpop.permute.xlu1 %5316 }
0x26ec   : > { %14088 = vpow2.f32 %v5309_v59 }
0x26f6   : > { %v14089_v60 = vpop.eup %14088 }
0x26f7   : > { %v5311_v61 = vsel %vm4568_vm8, %v14089_v60, 0.0 }
0x26f8   : > { %5312 = vadd.xlane.f32.xlu0 %v5311_v61 }
0x270e   : > { %5149 = vrot.lane.b32.xlu0 %v14890_v63, %s15895_s26 }
0x2712   : > { %5478 = vrot.lane.b32.xlu0 %v14917_v33, %s15895_s26  ;;  %v5396_v33 = vpop.permute.xlu1 %5395  ;;  %s15900_s26 = smov 32  }
0x2713   : > { %12977 = vmatpush3.msra.mxu1 %v5396_v33 }
0x2714   : > { %13532 = vmatprep.subr.bf16.mxu1 %v14292_v34 }
0x2785   : > { %v5313_v62 = vpop.xlane.xlu0 %5312 }
0x2786   : > { %14090 = vrcp.f32 %v5313_v62 }
0x2789   : > { %v5150_v45 = vpop.permute.xlu0 %5149 }
0x278a   : > { %12962 = vmatpush3.msra.mxu0 %v5150_v45 }
0x278b   : > { %12964 = vmatmul.mubr.msk.f32.vlgmr.msra.gmra.mrb[46].mxu0 %vm988_vm5, %v5143_v50  ;;  %12971 = vmatprep.subr.mxu0 %v14294_v5  ;;  %v15075_v50 = vadd.f32 %v882_v46, %v14478_v43 }
0x278c   : > { %12972 = vmatpush3.msk.msra.mxu0 %vm359_vm0, %v5317_v3  ;;  %12973 = vmatprep.mubr.msk.f32.mxu0 %vm14293_vm11, %v14294_v5 }
0x278d   : > { %13526 = vmatprep.subr.bf16.mxu0 %v14292_v34  ;;  %v5479_v36 = vpop.permute.xlu0 %5478 }
0x2790   : > { %v14091_v63 = vpop.eup %14090 }
0x2791   : > { %v5315_v11 = vmul.f32 %v14091_v63, %v14089_v60 }
0x2793   : > { %12974 = vmatmul.mubr.msk.f32.vlgmr.msra.gmra.mrb[48].mxu0 %vm339_vm1, %v5315_v11  ;;  %v15096_v11 = vld [vmem:[%s15889_s6 + $0xf] ss:$0 sm:$0xff] }
0x2794   : > { %12989 = vmatprep.mubr.msk.f32.mxu0 %vm14293_vm11, %v14294_v5  ;;  %13528 = vmatpush3.bf16.msra.mxu0 %v13527_v21 }
0x2795   : > { %13529 = vmatprep.subr.bf16.mxu0 %v14292_v34 }
0x285e   : > { %v5221_v4 = vpop.f32.mrb[46].mxu0 }
0x285f   : > { %v5225_v41 = vadd.f32 %v5221_v4, %v14978_v23  ;;  %v12965_v0 = vpop.f32.mrb[47].mxu0  ;;  %v15045_v23 = vld [vmem:[%s15888_s5 + $0x40] sm:$0xff] }
0x2860   : > { %v13538_v27 = vpack.c.bf16 %v15050_v26, %v15045_v23 }
0x2866   : > { %v5389_v14 = vpop.f32.mrb[48].mxu0 }
0x2867   : > { %v12975_v44 = vpop.f32.mrb[49].mxu0  ;;  %12979 = vmatmul.mubr.msk.f32.vlgmr.msra.gmra.mrb[40].mxu1 %vm988_vm5, %v5389_v14 }
0x2868   : > { %13000 = vmatprep.mubr.msk.f32.mxu1 %vm14293_vm11, %v14294_v5 }
0x293a   : > { %v5467_v15 = vpop.f32.mrb[40].mxu1 }
0x293b   : > { %v5471_v56 = vadd.f32 %v5467_v15, %v5225_v41  ;;  %v12980_v55 = vpop.f32.mrb[41].mxu1 }
0x293d   : > { %v5481_v9 = vadd.f32 %v5479_v36, %v5471_v56 }
0x293f   : > { %v5482_v10 = vadd.f32 %v5481_v9, %v14908_v1  ;;  %v5510_v1 = vld [vmem:[%s15888_s5 + $0x118] sm:$0xff] }
0x2940   : > { %v13530_v22 = vpack.c.bf16 %v5511_v35, %v5510_v1  ;;  %v13873_v29 = vpack.i.bf16 %v5511_v35, %v5510_v1 }
0x2941   : > { %v5485_v12 = vsel %vm5484_vm9, %v5482_v10, 0.0 }
0x2942   : > { %5486 = vadd.xlane.f32.xlu1 %v5485_v12  ;;  %13531 = vmatpush3.bf16.msra.mxu0 %v13530_v22 }
0x2943   : > { %13539 = vmatprep.subr.bf16.mxu0 %v13538_v27 }
0x2953   : > { %13869 = vrot.lane.b32.xlu1 %v13868_v28, %s14279_s16 }
0x2957   : > { %13874 = vrot.lane.b32.xlu1 %v13873_v29, %s14279_s16 }
0x29cf   : > { %v5487_v13 = vpop.xlane.xlu1 %5486 }
0x29d0   : > { %v5488_v16 = vmul.f32 0.03125, %v5487_v13 }
0x29d2   : > { %v5489_v17 = vsub.f32 %v5482_v10, %v5488_v16 }
0x29d3   : > { %v13870_v53 = vpop.permute.xlu1 %13869 }
0x29d4   : > { %v5490_v6 = vmul.f32 %v5489_v17, %v5489_v17  ;;  %v13872_v54 = vunpack.i.h.bf16 %v13870_v53  ;;  %v13871_v43 = vunpack.i.l.bf16 %v13870_v53 }
0x29d6   : > { %v5491_v18 = vsel %vm5484_vm9, %v5490_v6, 0.0  ;;  %v13533_v8 = vpack.c.bf16 %v13872_v54, %v13871_v43 }
0x29d7   : > { %5492 = vadd.xlane.f32.xlu0 %v5491_v18  ;;  %v13875_v57 = vpop.permute.xlu1 %13874 }
0x29d8   : > { %v13877_v58 = vunpack.i.h.bf16 %v13875_v57  ;;  %v13876_v59 = vunpack.i.l.bf16 %v13875_v57  ;;  %13534 = vmatpush3.bf16.msra.mxu1 %v13533_v8 }
0x29d9   : > { %13535 = vmatprep.subr.bf16.mxu1 %v14292_v34 }
0x29da   : > { %v13536_v60 = vpack.c.bf16 %v13877_v58, %v13876_v59 }
0x29dc   : > { %13537 = vmatpush3.bf16.msra.mxu1 %v13536_v60 }
0x29ed   : > { %5504 = vrot.lane.b32.xlu0 %v12021_v20, %s14279_s16 }
0x2a64   : > { %v5493_v25 = vpop.xlane.xlu0 %5492 }
0x2a65   : > { %v5494_v24 = vmul.f32 0.03125, %v5493_v25 }
0x2a67   : > { %v5495_v30 = vadd.f32 1e-05, %v5494_v24 }
0x2a68   : > { %v5505_v7 = vpop.permute.xlu0 %5504 }
0x2a69   : > { %14092 = vrsqrt.f32 %v5495_v30 }
0x2a73   : > { %v14093_v31 = vpop.eup %14092 }
0x2a74   : > { %v5497_v32 = vmul.f32 %v14093_v31, %v5489_v17 }
0x2a76   : > { %v5502_v39 = vmul.f32 %v12021_v20, %v5497_v32 }
0x2a78   : > { %v15070_v48 = vadd.f32 %v5505_v7, %v5502_v39 }
0x2a7a   : > { %12990 = vmatmul.mubr.msk.f32.vlgmr.msra.gmra.mrb[50].mxu0 %vm895_vm3, %v15070_v48 }
0x2a7b   : > { %13541 = vmatpush3.bf16.msra.mxu0 %v13538_v27  ;;  %13011 = vmatprep.mubr.msk.f32.mxu0 %vm895_vm3, %v15075_v50 }
0x2a7c   : > { %13543 = vmatprep.subr.bf16.mxu0 %v13542_v49 }
0x2a7f   : > { %13545 = vmatpush3.bf16.msra.mxu0 %v13542_v49 }
0x2a82   : > { %13012 = vmatmul.mubr.msk.f32.vlgmr.msra.gmra.mrb[52].mxu0 %vm895_vm3, %v15082_v52 }
0x2b4d   : > { %v5586_v61 = vpop.f32.mrb[50].mxu0 }
0x2b4e   : > { %v5587_v62 = vadd.f32 %v15090_v42, %v5586_v61  ;;  %v12991_v45 = vpop.f32.mrb[51].mxu0 }
0x2b4f   : > { %v5851_v45 = vlaneseq }
0x2b50   : > { %v5591_v3 = vmul.f32 0.70710677, %v5587_v62  ;;  %v5590_v29 = vmul.f32 0.5, %v5587_v62 }
0x2b52   : > { %v5594_v63 = vand.u32 2147483647, %v5591_v3  ;;  %vm5592_vm10 = vcmp.ge.f32.partialorder %v5591_v3, 0.0  ;;  %v5852_v3 = vshrl.u32 %v5851_v45, 7 }
0x2b53   : > { %v5593_v27 = vsel %vm5592_vm10, 1.0, %v14290_v40 }
0x2b54   : > { %v5595_v33 = vmul.f32 0.3275911, %v5594_v63  ;;  %v5608_v15 = vsub.f32 0.0, %v5594_v63 }
0x2b55   : > { %v13013_v4 = vpop.f32.mrb[52].mxu0 }
0x2b56   : > { %v5596_v41 = vadd.f32 1.0, %v5595_v33  ;;  %v5846_v0 = vadd.f32 %v13013_v4, %v15096_v11  ;;  %v5840_v14 = vpop.f32.mrb[53].mxu0  ;;  %v5609_v10 = vmul.f32 %v5608_v15, %v5594_v63  ;;  %v5853_v63 = vadd.s32 8, %v5852_v3 }
0x2b57   : > { %v5841_v44 = vadd.f32 %v15096_v11, %v5840_v14  ;;  %v5855_v33 = vand.u32 127, %v5851_v45  ;;  %v14295_v4 = vmov -1e+30  }
0x2b58   : > { %14094 = vrcp.f32 %v5596_v41  ;;  %5850 = vst.msk [vmem:[#allocation2 + $0x8] sm:$0xff] %vm977_vm4, %v5846_v0  ;;  %v5610_v16 = vmul.f32 1.442695, %v5609_v10 }
0x2b59   : > { %5849 = vst.msk [vmem:[#allocation2] sm:$0xff] %vm977_vm4, %v5841_v44  ;;  %vm5857_vm12 = vcmp.le.s32.totalorder %v5855_v33, %v5853_v63  ;;  %vm5856_vm13 = vcmp.le.s32.totalorder %v5855_v33, %v5852_v3 }
0x2b5a   : > { %14096 = vpow2.f32 %v5610_v16  ;;  %v15148_v41 = vsel %vm5857_vm12, 0.0, %v14295_v4  ;;  %v15150_v44 = vsel %vm5856_vm13, 0.0, %v14295_v4 }
0x2b5f   : > { %v15102_v36 = vld [vmem:[#allocation2 + $0x8] sm:$0xff] }
0x2b60   : > { %v15104_v56 = vld [vmem:[#allocation2] sm:$0xff] }
0x2b61   : > { %v15108_v55 = vpack.i.bf16 %v15102_v36, %v15104_v56 }
0x2b62   : > { %v14095_v9 = vpop.eup %14094 }
0x2b63   : > { %v5599_v12 = vmul.f32 1.0614054, %v14095_v9  ;;  %13884 = vrot.lane.b32.xlu1 %v15108_v55, %s14280_s17  ;;  %13879 = vrot.lane.b32.xlu0 %v15108_v55, %s14279_s16 }
0x2b64   : > { %v14097_v21 = vpop.eup %14096 }
0x2b65   : > { %v5600_v13 = vadd.f32 -1.4531521, %v5599_v12 }
0x2b67   : > { %v5601_v17 = vmul.f32 %v14095_v9, %v5600_v13  ;;  %6067 = vrot.lane.b32.xlu1 %v15102_v36, %s14278_s15  ;;  %6065 = vrot.lane.b32.xlu0 %v15104_v56, %s14278_s15 }
0x2b69   : > { %v5602_v6 = vadd.f32 1.4214138, %v5601_v17 }
0x2b6b   : > { %v5603_v18 = vmul.f32 %v14095_v9, %v5602_v6  ;;  %6440 = vrot.lane.b32.xlu1 %v15104_v56, %s14281_s18  ;;  %13889 = vrot.lane.b32.xlu0 %v15108_v55, %s14282_s19 }
0x2b6d   : > { %v5604_v2 = vadd.f32 -0.28449672, %v5603_v18 }
0x2b6f   : > { %v5605_v19 = vmul.f32 %v14095_v9, %v5604_v2  ;;  %6442 = vrot.lane.b32.xlu0 %v15102_v36, %s14281_s18 }
0x2b71   : > { %v5606_v1 = vadd.f32 0.2548296, %v5605_v19 }
0x2b73   : > { %v5607_v20 = vmul.f32 %v14095_v9, %v5606_v1 }
0x2b75   : > { %v5612_v35 = vmul.f32 %v14097_v21, %v5607_v20 }
0x2b77   : > { %v5613_v22 = vsub.f32 1.0, %v5612_v35 }
0x2b79   : > { %v5614_v28 = vmul.f32 %v5613_v22, %v5593_v27 }
0x2b7b   : > { %v5615_v25 = vadd.f32 1.0, %v5614_v28 }
0x2b7d   : > { %v5616_v24 = vmul.f32 %v5615_v25, %v5590_v29 }
0x2b7f   : > { %13001 = vmatmul.mubr.msk.f32.vlgmr.msra.gmra.mrb[42].mxu1 %vm895_vm3, %v5616_v24 }
0x2b80   : > { %13018 = vmatprep.mubr.msk.f32.mxu1 %vm988_vm5, %v15104_v56 }
0x2bd5   : > { %v13885_v30 = vpop.permute.xlu1 %13884  ;;  %v13880_v31 = vpop.permute.xlu0 %13879 }
0x2bd6   : > { %v13887_v32 = vunpack.i.h.bf16 %v13885_v30  ;;  %v13886_v7 = vunpack.i.l.bf16 %v13885_v30  ;;  %v13882_v46 = vunpack.i.h.bf16 %v13880_v31  ;;  %v13881_v39 = vunpack.i.l.bf16 %v13880_v31 }
0x2bd8   : > { %v13546_v49 = vpack.c.bf16 %v13882_v46, %v13881_v39  ;;  %v13556_v53 = vpack.c.bf16 %v13887_v32, %v13886_v7 }
0x2bd9   : > { %v6066_v51 = vpop.permute.xlu0 %6065  ;;  %v6068_v58 = vpop.permute.xlu1 %6067 }
0x2bda   : > { %13548 = vmatprep.subr.msk.bf16.mxu1 %vm14482_vm6, %v13546_v49 }
0x2bdb   : > { %13551 = vmatpush3.bf16.xpose.msk.msra.mxu1 %vm14482_vm6, %v13546_v49 }
0x2bdc   : > { %13558 = vmatprep.subr.msk.bf16.mxu1 %vm14482_vm6, %v13556_v53 }
0x2bdd   : > { %v13890_v54 = vpop.permute.xlu0 %13889  ;;  %v6441_v59 = vpop.permute.xlu1 %6440 }
0x2bde   : > { %v13892_v43 = vunpack.i.h.bf16 %v13890_v54  ;;  %v13891_v8 = vunpack.i.l.bf16 %v13890_v54 }
0x2be0   : > { %v13566_v57 = vpack.c.bf16 %v13892_v43, %v13891_v8 }
0x2be1   : > { %v6443_v60 = vpop.permute.xlu0 %6442 }
0x2be2   : > { %13019 = vmatmul.mubr.msk.f32.vlgmr.msra.gmra.mrb[44].mxu1 %vm988_vm5, %v15102_v36 }
0x2be3   : > { %13561 = vmatpush3.bf16.xpose.msk.msra.mxu1 %vm14482_vm6, %v13556_v53  ;;  %13032 = vmatprep.mubr.msk.f32.mxu1 %vm988_vm5, %v6066_v51 }
0x2be4   : > { %13568 = vmatprep.subr.msk.bf16.mxu1 %vm14482_vm6, %v13566_v57 }
0x2bea   : > { %13033 = vmatmul.mubr.msk.f32.vlgmr.msra.gmra.mrb[46].mxu1 %vm988_vm5, %v6068_v58 }
0x2beb   : > { %13571 = vmatpush3.bf16.xpose.msk.msra.mxu1 %vm14482_vm6, %v13566_v57  ;;  %13056 = vmatprep.mubr.msk.f32.mxu1 %vm988_vm5, %v6441_v59 }
0x2bf2   : > { %13057 = vmatmul.mubr.msk.f32.vlgmr.msra.gmra.mrb[48].mxu1 %vm988_vm5, %v6443_v60 }
0x2c52   : > { %v15146_v61 = vpop.f32.mrb[42].mxu1 }
0x2c53   : > { %v13002_v62 = vpop.f32.mrb[43].mxu1 }
0x2cb5   : > { %v13020_v0 = vpop.f32.mrb[44].mxu1 }
0x2cb6   : > { %v5952_v14 = vmul.f32 0.35355338, %v13020_v0  ;;  %v5942_v15 = vpop.f32.mrb[45].mxu1 }
0x2cb7   : > { %v5951_v9 = vmul.f32 0.35355338, %v5942_v15 }
0x2cb8   : > { %v5954_v10 = vadd.f32 %v5952_v14, %v15148_v41 }
0x2cb9   : > { %v5953_v12 = vadd.f32 %v5951_v9, %v15150_v44 }
0x2cba   : > { %v5958_v13 = vsel %vm1074_vm7, %v5954_v10, -inf }
0x2cbb   : > { %5959 = vmax.xlane.f32.xlu0 %v5958_v13  ;;  %v5955_v16 = vsel %vm1074_vm7, %v5953_v12, -inf }
0x2cbc   : > { %5956 = vmax.xlane.f32.xlu1 %v5955_v16 }
0x2cbd   : > { %v13034_v17 = vpop.f32.mrb[46].mxu1 }
0x2cbe   : > { %v6157_v6 = vmul.f32 0.35355338, %v13034_v17  ;;  %v6147_v18 = vpop.f32.mrb[47].mxu1 }
0x2cbf   : > { %v6156_v2 = vmul.f32 0.35355338, %v6147_v18 }
0x2cc0   : > { %v6159_v19 = vadd.f32 %v6157_v6, %v15148_v41 }
0x2cc1   : > { %v6158_v1 = vadd.f32 %v6156_v2, %v15150_v44 }
0x2cc2   : > { %v6163_v20 = vsel %vm1074_vm7, %v6159_v19, -inf }
0x2cc3   : > { %6164 = vmax.xlane.f32.xlu1 %v6163_v20  ;;  %v6160_v21 = vsel %vm1074_vm7, %v6158_v1, -inf }
0x2cc4   : > { %6161 = vmax.xlane.f32.xlu0 %v6160_v21 }
0x2cc5   : > { %v13058_v35 = vpop.f32.mrb[48].mxu1 }
0x2cc6   : > { %v6522_v22 = vpop.f32.mrb[49].mxu1  ;;  %v6532_v62 = vmul.f32 0.35355338, %v13058_v35 }
0x2cc7   : > { %v6531_v60 = vmul.f32 0.35355338, %v6522_v22 }
0x2cc8   : > { %v6534_v3 = vadd.f32 %v6532_v62, %v15148_v41 }
0x2cc9   : > { %v6533_v45 = vadd.f32 %v6531_v60, %v15150_v44 }
0x2cca   : > { %v6538_v33 = vsel %vm1074_vm7, %v6534_v3, -inf }
0x2ccb   : > { %v6535_v63 = vsel %vm1074_vm7, %v6533_v45, -inf }
0x2d48   : > { %v5960_v27 = vpop.xlane.xlu0 %5959 }
0x2d49   : > { %v5962_v28 = vsub.f32 %v5954_v10, %v5960_v27  ;;  %v5957_v29 = vpop.xlane.xlu1 %5956 }
0x2d4a   : > { %v5961_v25 = vsub.f32 %v5953_v12, %v5957_v29 }
0x2d4b   : > { %v5965_v24 = vmul.f32 1.442695, %v5962_v28 }
0x2d4c   : > { %v5963_v30 = vmul.f32 1.442695, %v5961_v25 }
0x2d4d   : > { %14098 = vpow2.f32 %v5965_v24 }
0x2d4e   : > { %14100 = vpow2.f32 %v5963_v30 }
0x2d50   : > { %v6165_v31 = vpop.xlane.xlu1 %6164 }
0x2d51   : > { %v6167_v32 = vsub.f32 %v6159_v19, %v6165_v31  ;;  %v6162_v7 = vpop.xlane.xlu0 %6161 }
0x2d52   : > { %v6166_v46 = vsub.f32 %v6158_v1, %v6162_v7 }
0x2d53   : > { %v6170_v39 = vmul.f32 1.442695, %v6167_v32 }
0x2d54   : > { %v6168_v49 = vmul.f32 1.442695, %v6166_v46 }
0x2d55   : > { %14102 = vpow2.f32 %v6170_v39 }
0x2d56   : > { %14104 = vpow2.f32 %v6168_v49 }
0x2d57   : > { %v14099_v51 = vpop.eup %14098 }
0x2d58   : > { %v14101_v53 = vpop.eup %14100  ;;  %v5970_v54 = vsel %vm1074_vm7, %v14099_v51, 0.0 }
0x2d59   : > { %5971 = vadd.xlane.f32.xlu1 %v5970_v54  ;;  %v5967_v43 = vsel %vm1074_vm7, %v14101_v53, 0.0 }
0x2d5a   : > { %5968 = vadd.xlane.f32.xlu0 %v5967_v43 }
0x2d5f   : > { %v14103_v8 = vpop.eup %14102 }
0x2d60   : > { %v14105_v57 = vpop.eup %14104  ;;  %v6175_v58 = vsel %vm1074_vm7, %v14103_v8, 0.0 }
0x2d61   : > { %6176 = vadd.xlane.f32.xlu1 %v6175_v58  ;;  %v6172_v59 = vsel %vm1074_vm7, %v14105_v57, 0.0 }
0x2d62   : > { %6173 = vadd.xlane.f32.xlu0 %v6172_v59 }
0x2d72   : > { %13899 = vrot.lane.b32.xlu1 %v15108_v55, %s14283_s20 }
0x2d76   : > { %13904 = vrot.lane.b32.xlu1 %v15108_v55, %s14284_s21 }
0x2d78   : > { %13894 = vrot.lane.b32.xlu0 %v15108_v55, %s14285_s22 }
0x2d7a   : > { %6734 = vrot.lane.b32.xlu1 %v15102_v36, %s14286_s23 }
0x2d7c   : > { %6732 = vrot.lane.b32.xlu0 %v15104_v56, %s14286_s23 }
0x2d9b   : > { %6536 = vmax.xlane.f32.xlu0 %v6535_v63 }
0x2d9e   : > { %6539 = vmax.xlane.f32.xlu1 %v6538_v33 }
0x2daf   : > { %6271 = vrot.lane.b32.xlu1 %v15050_v26, %s15900_s26 }
0x2db3   : > { %13909 = vrot.lane.b32.xlu1 %v15108_v55, %s15901_s27 }
0x2de6   : > { %v5972_v56 = vpop.xlane.xlu1 %5971 }
0x2de7   : > { %v5969_v36 = vpop.xlane.xlu0 %5968 }
0x2de8   : > { %14106 = vrcp.f32 %v5969_v36 }
0x2de9   : > { %14108 = vrcp.f32 %v5972_v56 }
0x2dee   : > { %v6177_v4 = vpop.xlane.xlu1 %6176 }
0x2def   : > { %v6174_v0 = vpop.xlane.xlu0 %6173 }
0x2df0   : > { %14110 = vrcp.f32 %v6174_v0 }
0x2df1   : > { %14112 = vrcp.f32 %v6177_v4 }
0x2df2   : > { %v14107_v14 = vpop.eup %14106  ;;  %v13900_v15 = vpop.permute.xlu1 %13899 }
0x2df3   : > { %v13895_v9 = vpop.permute.xlu0 %13894  ;;  %v5975_v10 = vmul.f32 %v14107_v14, %v14101_v53  ;;  %v13902_v12 = vunpack.i.h.bf16 %v13900_v15  ;;  %v13901_v13 = vunpack.i.l.bf16 %v13900_v15  ;;  %v14109_v18 = vpop.eup %14108 }
0x2df4   : > { %v13897_v16 = vunpack.i.h.bf16 %v13895_v9  ;;  %v13896_v17 = vunpack.i.l.bf16 %v13895_v9  ;;  %v5976_v22 = vmul.f32 %v14109_v18, %v14099_v51 }
0x2df5   : > { %13025 = vmatprep.mubr.msk.f32.mxu0 %vm1074_vm7, %v5975_v10  ;;  %v13562_v20 = vpack.c.bf16 %v13902_v12, %v13901_v13 }
0x2df6   : > { %v13905_v26 = vpop.permute.xlu1 %13904  ;;  %v13552_v6 = vpack.c.bf16 %v13897_v16, %v13896_v17 }
0x2df7   : > { %v13907_v2 = vunpack.i.h.bf16 %v13905_v26  ;;  %v13906_v19 = vunpack.i.l.bf16 %v13905_v26  ;;  %v6733_v1 = vpop.permute.xlu0 %6732 }
0x2df8   : > { %13553 = vmatprep.subr.bf16.mxu0 %v13552_v6  ;;  %13075 = vmatprep.mubr.msk.f32.mxu1 %vm988_vm5, %v6733_v1 }
0x2df9   : > { %v13576_v21 = vpack.c.bf16 %v13907_v2, %v13906_v19  ;;  %13555 = vmatpush3.bf16.msra.mxu0 %v13552_v6 }
0x2dfa   : > { %v14111_v35 = vpop.eup %14110  ;;  %13563 = vmatprep.subr.bf16.mxu0 %v13562_v20  ;;  %v6735_v25 = vpop.permute.xlu1 %6734 }
0x2dfb   : > { %v14113_v27 = vpop.eup %14112  ;;  %13578 = vmatprep.subr.msk.bf16.mxu1 %vm14482_vm6, %v13576_v21  ;;  %v6180_v28 = vmul.f32 %v14111_v35, %v14105_v57 }
0x2dfc   : > { %13026 = vmatmul.mubr.msk.f32.vlgmr.msra.gmra.mrb[54].mxu0 %vm1074_vm7, %v5976_v22  ;;  %13581 = vmatpush3.bf16.xpose.msk.msra.mxu1 %vm14482_vm6, %v13576_v21  ;;  %v6181_v29 = vmul.f32 %v14113_v27, %v14103_v8 }
0x2dfd   : > { %13565 = vmatpush3.bf16.msra.mxu0 %v13562_v20  ;;  %13039 = vmatprep.mubr.msk.f32.mxu0 %vm1074_vm7, %v6180_v28 }
0x2e00   : > { %13040 = vmatmul.mubr.msk.f32.vlgmr.msra.gmra.mrb[56].mxu0 %vm1074_vm7, %v6181_v29 }
0x2e03   : > { %13076 = vmatmul.mubr.msk.f32.vlgmr.msra.gmra.mrb[50].mxu1 %vm988_vm5, %v6735_v25 }
0x2e28   : > { %v6537_v24 = vpop.xlane.xlu0 %6536 }
0x2e29   : > { %v6541_v30 = vsub.f32 %v6533_v45, %v6537_v24 }
0x2e2b   : > { %v6540_v31 = vpop.xlane.xlu1 %6539  ;;  %v6543_v7 = vmul.f32 1.442695, %v6541_v30 }
0x2e2c   : > { %v6542_v32 = vsub.f32 %v6534_v3, %v6540_v31 }
0x2e2e   : > { %v6545_v46 = vmul.f32 1.442695, %v6542_v32 }
0x2e2f   : > { %v6272_v39 = vpop.permute.xlu1 %6271 }
0x2e30   : > { %14114 = vpow2.f32 %v6545_v46  ;;  %13042 = vmatprep.subr.mxu0 %v6272_v39 }
0x2e31   : > { %13043 = vmatpush3.msra.mxu0 %v6272_v39  ;;  %14116 = vpow2.f32 %v6543_v7 }
0x2e33   : > { %v13910_v57 = vpop.permute.xlu1 %13909 }
0x2e34   : > { %v13912_v62 = vunpack.i.h.bf16 %v13910_v57  ;;  %v13911_v45 = vunpack.i.l.bf16 %v13910_v57 }
0x2e36   : > { %v13572_v36 = vpack.c.bf16 %v13912_v62, %v13911_v45 }
0x2e3a   : > { %v14115_v49 = vpop.eup %14114 }
0x2e3b   : > { %v6550_v51 = vsel %vm1074_vm7, %v14115_v49, 0.0  ;;  %v14117_v53 = vpop.eup %14116 }
0x2e3c   : > { %6551 = vadd.xlane.f32.xlu0 %v6550_v51  ;;  %v6547_v54 = vsel %vm1074_vm7, %v14117_v53, 0.0 }
0x2e40   : > { %6548 = vadd.xlane.f32.xlu0 %v6547_v54 }
0x2e56   : > { %6356 = vrot.lane.b32.xlu0 %v15045_v23, %s15900_s26 }
0x2ec9   : > { %v6552_v43 = vpop.xlane.xlu0 %6551 }
0x2ecd   : > { %v6549_v8 = vpop.xlane.xlu0 %6548 }
0x2ece   : > { %14118 = vrcp.f32 %v6549_v8  ;;  %v12025_v8 = vld [vmem:[%s15889_s6 + $0xb] ss:$0 sm:$0xff] }
0x2ecf   : > { %v13027_v58 = vpop.f32.mrb[54].mxu0  ;;  %14120 = vrcp.f32 %v6552_v43 }
0x2ed0   : > { %v6055_v59 = vpop.f32.mrb[55].mxu0 }
0x2ed1   : > { %v6357_v60 = vpop.permute.xlu0 %6356 }
0x2ed2   : > { %13047 = vmatprep.subr.mxu0 %v6357_v60 }
0x2ed3   : > { %v13041_v3 = vpop.f32.mrb[56].mxu0 }
0x2ed4   : > { %v6260_v63 = vpop.f32.mrb[57].mxu0 }
0x2ed5   : > { %13044 = vmatprep.mubr.msk.f32.mxu0 %vm988_vm5, %v6260_v63 }
0x2ed6   : > { %13045 = vmatmul.mubr.msk.f32.vlgmr.msra.gmra.mrb[58].mxu0 %vm988_vm5, %v13041_v3  ;;  %v13077_v33 = vpop.f32.mrb[50].mxu1 }
0x2ed7   : > { %13048 = vmatpush3.msra.mxu0 %v6357_v60  ;;  %v6824_v23 = vmul.f32 0.35355338, %v13077_v33  ;;  %13049 = vmatprep.mubr.msk.f32.mxu0 %vm988_vm5, %v6055_v59  ;;  %v6814_v56 = vpop.f32.mrb[51].mxu1 }
0x2ed8   : > { %13573 = vmatprep.subr.bf16.mxu0 %v13572_v36  ;;  %v6823_v4 = vmul.f32 0.35355338, %v6814_v56  ;;  %v14119_v14 = vpop.eup %14118 }
0x2ed9   : > { %v6826_v0 = vadd.f32 %v6824_v23, %v15148_v41  ;;  %v14121_v12 = vpop.eup %14120  ;;  %v6555_v13 = vmul.f32 %v14119_v14, %v14117_v53 }
0x2eda   : > { %v6825_v15 = vadd.f32 %v6823_v4, %v15150_v44  ;;  %v6556_v16 = vmul.f32 %v14121_v12, %v14115_v49 }
0x2edb   : > { %v6830_v9 = vsel %vm1074_vm7, %v6826_v0, -inf }
0x2edc   : > { %6831 = vmax.xlane.f32.xlu0 %v6830_v9  ;;  %v6827_v10 = vsel %vm1074_vm7, %v6825_v15, -inf }
0x2edd   : > { %6828 = vmax.xlane.f32.xlu1 %v6827_v10 }
0x2ede   : > { %13050 = vmatmul.mubr.msk.f32.vlgmr.msra.gmra.mrb[58].mxu0 %vm988_vm5, %v13027_v58 }
0x2edf   : > { %13575 = vmatpush3.bf16.msra.mxu0 %v13572_v36  ;;  %13063 = vmatprep.mubr.msk.f32.mxu0 %vm1074_vm7, %v6555_v13  ;;  %v15243_v13 = vld [vmem:[%s15888_s5 + $0x48] sm:$0xff] }
0x2ee2   : > { %13064 = vmatmul.mubr.msk.f32.vlgmr.msra.gmra.mrb[60].mxu0 %vm1074_vm7, %v6556_v16  ;;  %v15248_v16 = vld [vmem:[%s15888_s5 + $0xc0] sm:$0xff] }
0x2f69   : > { %v6832_v17 = vpop.xlane.xlu0 %6831 }
0x2f6a   : > { %v6834_v26 = vsub.f32 %v6826_v0, %v6832_v17  ;;  %v6829_v6 = vpop.xlane.xlu1 %6828 }
0x2f6b   : > { %v6833_v18 = vsub.f32 %v6825_v15, %v6829_v6 }
0x2f6c   : > { %v6837_v2 = vmul.f32 1.442695, %v6834_v26 }
0x2f6d   : > { %v6835_v19 = vmul.f32 1.442695, %v6833_v18 }
0x2f6e   : > { %14122 = vpow2.f32 %v6837_v2  ;;  %v15257_v2 = vld [vmem:[%s15888_s5 + $0x138] sm:$0xff] }
0x2f6f   : > { %14124 = vpow2.f32 %v6835_v19  ;;  %v15262_v19 = vld [vmem:[%s15888_s5 + $0x1b0] sm:$0xff] }
0x2f78   : > { %v14123_v1 = vpop.eup %14122 }
0x2f79   : > { %v14125_v20 = vpop.eup %14124  ;;  %v6842_v21 = vsel %vm1074_vm7, %v14123_v1, 0.0 }
0x2f7a   : > { %6843 = vadd.xlane.f32.xlu1 %v6842_v21  ;;  %v6839_v35 = vsel %vm1074_vm7, %v14125_v20, 0.0 }
0x2f7b   : > { %6840 = vadd.xlane.f32.xlu0 %v6839_v35 }
0x2f8b   : > { %13914 = vrot.lane.b32.xlu1 %v15108_v55, %s15899_s13 }
0x2f8f   : > { %5634 = vrot.lane.b32.xlu1 %v15090_v42, %s14279_s16 }
0x2f91   : > { %6646 = vrot.lane.b32.xlu0 %v15063_v37, %s15900_s26 }
0x2f95   : > { %6938 = vrot.lane.b32.xlu0 %v15068_v38, %s15900_s26 }
0x2fb5   : > { %v13065_v22 = vpop.f32.mrb[60].mxu0 }
0x2fb6   : > { %v6635_v27 = vpop.f32.mrb[61].mxu0 }
0x2fb7   : > { %13068 = vmatprep.mubr.msk.f32.mxu0 %vm988_vm5, %v6635_v27 }
0x3007   : > { %v6844_v28 = vpop.xlane.xlu1 %6843 }
0x3008   : > { %14126 = vrcp.f32 %v6844_v28  ;;  %v6841_v29 = vpop.xlane.xlu0 %6840 }
0x3009   : > { %14128 = vrcp.f32 %v6841_v29 }
0x300b   : > { %v13915_v25 = vpop.permute.xlu1 %13914 }
0x300c   : > { %v13917_v24 = vunpack.i.h.bf16 %v13915_v25  ;;  %v13916_v55 = vunpack.i.l.bf16 %v13915_v25  ;;  %v6647_v30 = vpop.permute.xlu0 %6646 }
0x300d   : > { %13066 = vmatprep.subr.mxu0 %v6647_v30 }
0x300e   : > { %13067 = vmatpush3.msra.mxu0 %v6647_v30  ;;  %v13582_v42 = vpack.c.bf16 %v13917_v24, %v13916_v55 }
0x300f   : > { %v5635_v31 = vpop.permute.xlu1 %5634  ;;  %13069 = vmatmul.mubr.msk.f32.vlgmr.msra.gmra.mrb[58].mxu0 %vm988_vm5, %v13065_v22 }
0x3010   : > { %v5707_v37 = vadd.f32 %v15146_v61, %v5635_v31  ;;  %13583 = vmatprep.subr.bf16.mxu0 %v13582_v42  ;;  %v6939_v51 = vpop.permute.xlu0 %6938 }
0x3011   : > { %13585 = vmatpush3.bf16.msra.mxu0 %v13582_v42 }
0x3012   : > { %v14127_v38 = vpop.eup %14126  ;;  %v5710_v32 = vadd.f32 %v5707_v37, %v15070_v48  ;;  %13085 = vmatprep.subr.mxu0 %v6939_v51 }
0x3013   : > { %v14129_v7 = vpop.eup %14128  ;;  %v6848_v49 = vmul.f32 %v14127_v38, %v14123_v1  ;;  %v13923_v1 = vpack.i.bf16 %v15262_v19, %v15257_v2 }
0x3014   : > { %v5712_v46 = vsel %vm5484_vm9, %v5710_v32, 0.0  ;;  %v6847_v39 = vmul.f32 %v14129_v7, %v14125_v20  ;;  %v12026_v20 = vld [vmem:[%s15889_s6 + $0xc] ss:$0 sm:$0xff]  ;;  %v12063_v7 = vld [vmem:[%s15889_s6 + $0x12] ss:$0 sm:$0xff] }
0x3015   : > { %5713 = vadd.xlane.f32.xlu1 %v5712_v46 }
0x3016   : > { %13082 = vmatprep.mubr.msk.f32.mxu0 %vm1074_vm7, %v6847_v39 }
0x3017   : > { %13083 = vmatmul.mubr.msk.f32.vlgmr.msra.gmra.mrb[62].mxu0 %vm1074_vm7, %v6848_v49  ;;  %v13586_v49 = vpack.c.bf16 %v15248_v16, %v15243_v13 }
0x3018   : > { %13086 = vmatpush3.msra.mxu0 %v6939_v51 }
0x3019   : > { %13594 = vmatprep.subr.bf16.mxu0 %v14292_v34  ;;  %13587 = vmatprep.subr.bf16.mxu1 %v13586_v49 }
0x301a   : > { %13589 = vmatpush3.bf16.msra.mxu1 %v13586_v49 }
0x3026   : > { %7030 = vrot.lane.b32.xlu1 %v15096_v11, %s15900_s26 }
0x30a2   : > { %v5714_v61 = vpop.xlane.xlu1 %5713 }
0x30a3   : > { %v5715_v48 = vmul.f32 0.03125, %v5714_v61 }
0x30a5   : > { %v5716_v53 = vsub.f32 %v5710_v32, %v5715_v48  ;;  %v15277_v32 = vld [vmem:[%s15889_s6 + $0x10] ss:$0 sm:$0xff] }
0x30a6   : > { %v7031_v56 = vpop.permute.xlu1 %7030 }
0x30a7   : > { %v5717_v54 = vmul.f32 %v5716_v53, %v5716_v53 }
0x30a9   : > { %v5718_v43 = vsel %vm5484_vm9, %v5717_v54, 0.0 }
0x30aa   : > { %5719 = vadd.xlane.f32.xlu0 %v5718_v43  ;;  %v13590_v43 = vpack.c.bf16 %v15262_v19, %v15257_v2 }
0x30ac   : > { %13591 = vmatprep.subr.bf16.mxu1 %v13590_v43 }
0x30ad   : > { %13593 = vmatpush3.bf16.msra.mxu1 %v13590_v43 }
0x30c0   : > { %5731 = vrot.lane.b32.xlu0 %v12025_v8, %s14279_s16 }
0x30ea   : > { %v13084_v57 = vpop.f32.mrb[62].mxu0 }
0x30eb   : > { %v6927_v11 = vpop.f32.mrb[63].mxu0 }
0x30ec   : > { %13087 = vmatprep.mubr.msk.f32.mxu0 %vm988_vm5, %v6927_v11 }
0x30ed   : > { %13088 = vmatmul.mubr.msk.f32.vlgmr.msra.gmra.mrb[58].mxu0 %vm988_vm5, %v13084_v57 }
0x30ee   : > { %13109 = vmatprep.mubr.msk.f32.mxu0 %vm14293_vm11, %v14294_v5 }
0x3137   : > { %v5720_v58 = vpop.xlane.xlu0 %5719 }
0x3138   : > { %v5721_v59 = vmul.f32 0.03125, %v5720_v58 }
0x313a   : > { %v5722_v60 = vadd.f32 1e-05, %v5721_v59 }
0x313b   : > { %v5732_v3 = vpop.permute.xlu0 %5731 }
0x313c   : > { %14130 = vrsqrt.f32 %v5722_v60 }
0x3146   : > { %v14131_v62 = vpop.eup %14130 }
0x3147   : > { %v5724_v45 = vmul.f32 %v14131_v62, %v5716_v53 }
0x3149   : > { %v5729_v63 = vmul.f32 %v12025_v8, %v5724_v45 }
0x314b   : > { %v5734_v33 = vadd.f32 %v5732_v3, %v5729_v63 }
0x314d   : > { %v5736_v36 = vsel %vm5484_vm9, %v5734_v33, 0.0 }
0x314e   : > { %5737 = vadd.xlane.f32.xlu1 %v5736_v36 }
0x31c0   : > { %v13089_v23 = vpop.f32.mrb[58].mxu0 }
0x31c1   : > { %v7013_v4 = vpop.f32.mrb[59].mxu0  ;;  %v7034_v0 = vadd.f32 %v13089_v23, %v7031_v56 }
0x31c2   : > { %v7033_v14 = vadd.f32 %v7031_v56, %v7013_v4 }
0x31c3   : > { %v7036_v9 = vadd.f32 %v7034_v0, %v15082_v52  ;;  %v13918_v52 = vpack.i.bf16 %v15248_v16, %v15243_v13 }
0x31c4   : > { %v7035_v15 = vadd.f32 %v7033_v14, %v15075_v50 }
0x31c5   : > { %v7041_v12 = vsel %vm895_vm3, %v7036_v9, 0.0 }
0x31c6   : > { %v7038_v10 = vsel %vm895_vm3, %v7035_v15, 0.0 }
0x31c7   : > { %7039 = vadd.xlane.f32.xlu0 %v7038_v10 }
0x31cb   : > { %7042 = vadd.xlane.f32.xlu0 %v7041_v12 }
0x31db   : > { %v5738_v17 = vpop.xlane.xlu1 %5737 }
0x31dc   : > { %v5739_v50 = vmul.f32 0.03125, %v5738_v17 }
0x31de   : > { %v5740_v26 = vsub.f32 %v5734_v33, %v5739_v50 }
0x31e0   : > { %v5741_v6 = vmul.f32 %v5740_v26, %v5740_v26 }
0x31e1   : > { %13919 = vrot.lane.b32.xlu0 %v13918_v52, %s14279_s16 }
0x31e2   : > { %v5742_v18 = vsel %vm5484_vm9, %v5741_v6, 0.0 }
0x31e3   : > { %5743 = vadd.xlane.f32.xlu1 %v5742_v18 }
0x31f4   : > { %13924 = vrot.lane.b32.xlu1 %v13923_v1, %s14279_s16 }
0x31f8   : > { %5755 = vrot.lane.b32.xlu1 %v12026_v20, %s14279_s16 }
0x3254   : > { %v7040_v21 = vpop.xlane.xlu0 %7039 }
0x3255   : > { %v7044_v35 = vmul.f32 0.03125, %v7040_v21 }
0x3257   : > { %v7046_v22 = vsub.f32 %v7035_v15, %v7044_v35 }
0x3258   : > { %v7043_v27 = vpop.xlane.xlu0 %7042 }
0x3259   : > { %v7045_v28 = vmul.f32 0.03125, %v7043_v27  ;;  %v7048_v29 = vmul.f32 %v7046_v22, %v7046_v22 }
0x325b   : > { %v7047_v25 = vsub.f32 %v7036_v9, %v7045_v28  ;;  %v7050_v24 = vsel %vm895_vm3, %v7048_v29, 0.0 }
0x325c   : > { %7051 = vadd.xlane.f32.xlu0 %v7050_v24  ;;  %v13920_v55 = vpop.permute.xlu0 %13919 }
0x325d   : > { %v7049_v30 = vmul.f32 %v7047_v25, %v7047_v25  ;;  %v13922_v42 = vunpack.i.h.bf16 %v13920_v55  ;;  %v13921_v31 = vunpack.i.l.bf16 %v13920_v55 }
0x325f   : > { %v7053_v37 = vsel %vm895_vm3, %v7049_v30, 0.0  ;;  %v13595_v38 = vpack.c.bf16 %v13922_v42, %v13921_v31 }
0x3260   : > { %7054 = vadd.xlane.f32.xlu1 %v7053_v37 }
0x3261   : > { %13596 = vmatpush3.bf16.msra.mxu0 %v13595_v38 }
0x3262   : > { %13597 = vmatprep.subr.bf16.mxu0 %v14292_v34 }
0x3270   : > { %v5744_v46 = vpop.xlane.xlu1 %5743 }
0x3271   : > { %v5745_v39 = vmul.f32 0.03125, %v5744_v46  ;;  %7185 = vrot.lane.b32.xlu1 %v15277_v32, %s14279_s16 }
0x3272   : > { %7071 = vrot.lane.b32.xlu0 %v12063_v7, %s14279_s16 }
0x3273   : > { %v5746_v51 = vadd.f32 1e-05, %v5745_v39 }
0x3274   : > { %v13925_v61 = vpop.permute.xlu1 %13924 }
0x3275   : > { %14132 = vrsqrt.f32 %v5746_v51  ;;  %v13927_v48 = vunpack.i.h.bf16 %v13925_v61  ;;  %v13926_v53 = vunpack.i.l.bf16 %v13925_v61 }
0x3277   : > { %v13598_v54 = vpack.c.bf16 %v13927_v48, %v13926_v53 }
0x3278   : > { %v5756_v11 = vpop.permute.xlu1 %5755 }
0x3279   : > { %13599 = vmatpush3.bf16.msra.mxu0 %v13598_v54 }
0x327f   : > { %v14133_v8 = vpop.eup %14132 }
0x3280   : > { %v5748_v57 = vmul.f32 %v14133_v8, %v5740_v26 }
0x3282   : > { %v5753_v58 = vmul.f32 %v12026_v20, %v5748_v57 }
0x3284   : > { %v15289_v59 = vadd.f32 %v5756_v11, %v5753_v58 }
0x3286   : > { %13110 = vmatmul.mubr.msk.f32.vlgmr.msra.gmra.mrb[64].mxu0 %vm895_vm3, %v15289_v59 }
0x32e9   : > { %v7052_v60 = vpop.xlane.xlu0 %7051 }
0x32ea   : > { %v7056_v62 = vmul.f32 0.03125, %v7052_v60 }
0x32ec   : > { %v7058_v45 = vadd.f32 1e-05, %v7056_v62 }
0x32ed   : > { %v7055_v3 = vpop.xlane.xlu1 %7054  ;;  %v7072_v56 = vpop.permute.xlu0 %7071 }
0x32ee   : > { %14134 = vrsqrt.f32 %v7058_v45  ;;  %v7057_v63 = vmul.f32 0.03125, %v7055_v3 }
0x32f0   : > { %v7059_v33 = vadd.f32 1e-05, %v7057_v63 }
0x32f1   : > { %v7186_v12 = vpop.permute.xlu1 %7185 }
0x32f2   : > { %14136 = vrsqrt.f32 %v7059_v33 }
0x32f8   : > { %v14135_v36 = vpop.eup %14134 }
0x32f9   : > { %v7062_v23 = vmul.f32 %v14135_v36, %v7046_v22 }
0x32fb   : > { %v7068_v4 = vmul.f32 %v12063_v7, %v7062_v23 }
0x32fc   : > { %v14137_v0 = vpop.eup %14136 }
0x32fd   : > { %v7063_v14 = vmul.f32 %v14137_v0, %v7047_v25  ;;  %v15293_v15 = vadd.f32 %v7072_v56, %v7068_v4 }
0x32ff   : > { %v7069_v9 = vmul.f32 %v12063_v7, %v7063_v14  ;;  %13098 = vmatprep.mubr.msk.f32.mxu1 %vm895_vm3, %v15293_v15 }
0x3301   : > { %v15297_v10 = vadd.f32 %v7072_v56, %v7069_v9 }
0x3303   : > { %13099 = vmatmul.mubr.msk.f32.vlgmr.msra.gmra.mrb[52].mxu1 %vm895_vm3, %v15297_v10 }
0x3359   : > { %v7257_v17 = vpop.f32.mrb[64].mxu0 }
0x335a   : > { %v7258_v50 = vadd.f32 %v7257_v17, %v7186_v12  ;;  %v13111_v52 = vpop.f32.mrb[65].mxu0 }
0x335c   : > { %7262 = vrot.lane.b32.xlu0 %v7258_v50, %s15900_s26 }
0x33ce   : > { %v7263_v20 = vpop.permute.xlu0 %7262 }
0x33d6   : > { %v13100_v26 = vpop.f32.mrb[52].mxu1 }
0x33d7   : > { %v7163_v6 = vadd.f32 %v13100_v26, %v15277_v32  ;;  %v7157_v18 = vpop.f32.mrb[53].mxu1 }
0x33d8   : > { %v7158_v1 = vadd.f32 %v15277_v32, %v7157_v18 }
0x33d9   : > { %7167 = vst.msk [vmem:[#allocation2 + $0x8] sm:$0xff] %vm895_vm3, %v7163_v6 }
0x33da   : > { %7166 = vst.msk [vmem:[#allocation2] sm:$0xff] %vm895_vm3, %v7158_v1 }
0x33db   : > { %7266 = vst.msk [vmem:[#allocation2] sm:$0xf] %vm7265_vm14, %v7263_v20 }
0x33e0   : > { %v15317_v22 = vld [vmem:[#allocation2 + $0x8] sm:$0xff] }
0x33e2   : > { %v15307_v21 = vld [vmem:[#allocation2] sm:$0xf] }
0x33e3   : > { %v15309_v35 = vld [vmem:[#allocation2] sm:$0xff]  ;;  %7470 = vrot.lane.b32.xlu0 %v15307_v21, %s14280_s17  ;;  %7271 = vrot.lane.b32.xlu1 %v15307_v21, %s14279_s16 }
0x33e4   : > { %13114 = vmatprep.mubr.msk.f32.mxu1 %vm988_vm5, %v15309_v35 }
0x33e7   : > { %7468 = vrot.lane.b32.xlu0 %v15317_v22, %s14278_s15  ;;  %7466 = vrot.lane.b32.xlu1 %v15309_v35, %s14278_s15 }
0x3455   : > { %v7471_v27 = vpop.permute.xlu0 %7470  ;;  %v7272_v28 = vpop.permute.xlu1 %7271 }
0x3456   : > { %13112 = vmatprep.subr.msk.mxu1 %vm988_vm5, %v7272_v28  ;;  %13122 = vmatprep.subr.msk.mxu0 %vm988_vm5, %v7471_v27 }
0x3457   : > { %13113 = vmatpush3.xpose.msk.msra.mxu1 %vm988_vm5, %v7272_v28  ;;  %13123 = vmatpush3.xpose.msk.msra.mxu0 %vm988_vm5, %v7471_v27 }
0x3459   : > { %v7469_v29 = vpop.permute.xlu0 %7468  ;;  %v7467_v25 = vpop.permute.xlu1 %7466 }
0x345a   : > { %13115 = vmatmul.mubr.msk.f32.vlgmr.msra.gmra.mrb[54].mxu1 %vm988_vm5, %v15317_v22  ;;  %13124 = vmatprep.mubr.msk.f32.mxu0 %vm988_vm5, %v7467_v25 }
0x345b   : > { %13125 = vmatmul.mubr.msk.f32.vlgmr.msra.gmra.mrb[66].mxu0 %vm988_vm5, %v7469_v29 }
0x352d   : > { %v13116_v24 = vpop.f32.mrb[54].mxu1 }
0x352e   : > { %v7357_v55 = vmul.f32 0.35355338, %v13116_v24  ;;  %v7347_v30 = vpop.f32.mrb[55].mxu1  ;;  %v13126_v42 = vpop.f32.mrb[66].mxu0 }
0x352f   : > { %v7356_v31 = vmul.f32 0.35355338, %v7347_v30  ;;  %v7544_v37 = vpop.f32.mrb[67].mxu0  ;;  %v7554_v46 = vmul.f32 0.35355338, %v13126_v42 }
0x3530   : > { %v7553_v38 = vmul.f32 0.35355338, %v7544_v37  ;;  %v7361_v7 = vsel %vm339_vm1, %v7357_v55, -inf }
0x3531   : > { %7362 = vmax.xlane.f32.xlu0 %v7361_v7  ;;  %v7358_v39 = vsel %vm339_vm1, %v7356_v31, -inf  ;;  %v7558_v51 = vsel %vm339_vm1, %v7554_v46, -inf }
0x3532   : > { %7359 = vmax.xlane.f32.xlu1 %v7358_v39  ;;  %v7555_v49 = vsel %vm339_vm1, %v7553_v38, -inf }
0x3535   : > { %7556 = vmax.xlane.f32.xlu0 %v7555_v49 }
0x3536   : > { %7559 = vmax.xlane.f32.xlu1 %v7558_v51 }
0x35be   : > { %v7363_v61 = vpop.xlane.xlu0 %7362 }
0x35bf   : > { %v7365_v48 = vsub.f32 %v7357_v55, %v7363_v61  ;;  %v7360_v53 = vpop.xlane.xlu1 %7359 }
0x35c0   : > { %v7364_v54 = vsub.f32 %v7356_v31, %v7360_v53 }
0x35c1   : > { %v7368_v43 = vmul.f32 1.442695, %v7365_v48 }
0x35c2   : > { %v7366_v8 = vmul.f32 1.442695, %v7364_v54  ;;  %v7557_v36 = vpop.xlane.xlu0 %7556 }
0x35c3   : > { %14138 = vpow2.f32 %v7368_v43  ;;  %v7560_v57 = vpop.xlane.xlu1 %7559  ;;  %v7561_v23 = vsub.f32 %v7553_v38, %v7557_v36 }
0x35c4   : > { %14140 = vpow2.f32 %v7366_v8  ;;  %v7562_v11 = vsub.f32 %v7554_v46, %v7560_v57 }
0x35c5   : > { %v7563_v56 = vmul.f32 1.442695, %v7561_v23 }
0x35c6   : > { %v7565_v58 = vmul.f32 1.442695, %v7562_v11 }
0x35c8   : > { %14142 = vpow2.f32 %v7565_v58 }
0x35c9   : > { %14144 = vpow2.f32 %v7563_v56 }
0x35cd   : > { %v14139_v60 = vpop.eup %14138 }
0x35ce   : > { %v14141_v62 = vpop.eup %14140  ;;  %v7373_v45 = vsel %vm339_vm1, %v14139_v60, 0.0 }
0x35cf   : > { %7374 = vadd.xlane.f32.xlu1 %v7373_v45  ;;  %v7370_v3 = vsel %vm339_vm1, %v14141_v62, 0.0 }
0x35d0   : > { %7371 = vadd.xlane.f32.xlu0 %v7370_v3 }
0x35d2   : > { %v14143_v63 = vpop.eup %14142 }
0x35d3   : > { %v7570_v33 = vsel %vm339_vm1, %v14143_v63, 0.0  ;;  %v14145_v4 = vpop.eup %14144 }
0x35d4   : > { %7571 = vadd.xlane.f32.xlu1 %v7570_v33  ;;  %v7567_v0 = vsel %vm339_vm1, %v14145_v4, 0.0 }
0x35e5   : > { %7577 = vrot.lane.b32.xlu1 %v15307_v21, %s14283_s20 }
0x35e6   : > { %7380 = vrot.lane.b32.xlu0 %v15307_v21, %s14285_s22 }
0x35e9   : > { %7837 = vrot.lane.b32.xlu1 %v15307_v21, %s14282_s19 }
0x35ed   : > { %7835 = vrot.lane.b32.xlu1 %v15317_v22, %s14281_s18 }
0x3605   : > { %7568 = vadd.xlane.f32.xlu0 %v7567_v0 }
0x361b   : > { %7833 = vrot.lane.b32.xlu0 %v15309_v35, %s14281_s18 }
0x365c   : > { %v7375_v14 = vpop.xlane.xlu1 %7374 }
0x365d   : > { %14146 = vrcp.f32 %v7375_v14  ;;  %v7372_v9 = vpop.xlane.xlu0 %7371 }
0x365e   : > { %14148 = vrcp.f32 %v7372_v9 }
0x3661   : > { %v7572_v12 = vpop.xlane.xlu1 %7571  ;;  %v7381_v17 = vpop.permute.xlu0 %7380 }
0x3662   : > { %13117 = vmatprep.subr.msk.mxu1 %vm359_vm0, %v7381_v17  ;;  %14150 = vrcp.f32 %v7572_v12 }
0x3663   : > { %13118 = vmatpush3.msk.msra.mxu1 %vm359_vm0, %v7381_v17 }
0x3665   : > { %v7578_v50 = vpop.permute.xlu1 %7577 }
0x3666   : > { %13127 = vmatprep.subr.msk.mxu1 %vm359_vm0, %v7578_v50 }
0x3667   : > { %v14147_v52 = vpop.eup %14146 }
0x3668   : > { %v14149_v26 = vpop.eup %14148  ;;  %v7379_v18 = vmul.f32 %v14147_v52, %v14139_v60 }
0x3669   : > { %v7378_v6 = vmul.f32 %v14149_v26, %v14141_v62  ;;  %v7838_v1 = vpop.permute.xlu1 %7837 }
0x366b   : > { %13119 = vmatprep.mubr.msk.f32.mxu1 %vm339_vm1, %v7378_v6 }
0x366c   : > { %13120 = vmatmul.mubr.msk.f32.vlgmr.msra.gmra.mrb[56].mxu1 %vm339_vm1, %v7379_v18  ;;  %v14151_v27 = vpop.eup %14150 }
0x366d   : > { %13128 = vmatpush3.msk.msra.mxu1 %vm359_vm0, %v7578_v50  ;;  %v7576_v25 = vmul.f32 %v14151_v27, %v14143_v63  ;;  %v7836_v55 = vpop.permute.xlu1 %7835 }
0x366e   : > { %13142 = vmatprep.subr.msk.mxu1 %vm988_vm5, %v7838_v1 }
0x3692   : > { %v7569_v20 = vpop.xlane.xlu0 %7568 }
0x3693   : > { %14152 = vrcp.f32 %v7569_v20 }
0x3696   : > { %v7834_v24 = vpop.permute.xlu0 %7833 }
0x369d   : > { %v14153_v28 = vpop.eup %14152 }
0x369e   : > { %v7575_v29 = vmul.f32 %v14153_v28, %v14145_v4 }
0x36a0   : > { %13129 = vmatprep.mubr.msk.f32.mxu1 %vm339_vm1, %v7575_v29 }
0x36a1   : > { %13130 = vmatmul.mubr.msk.f32.vlgmr.msra.gmra.mrb[58].mxu1 %vm339_vm1, %v7576_v25 }
0x36a2   : > { %13143 = vmatpush3.xpose.msk.msra.mxu1 %vm988_vm5, %v7838_v1  ;;  %13144 = vmatprep.mubr.msk.f32.mxu1 %vm988_vm5, %v7834_v24 }
0x36a5   : > { %13145 = vmatmul.mubr.msk.f32.vlgmr.msra.gmra.mrb[60].mxu1 %vm988_vm5, %v7836_v55 }
0x373f   : > { %v15361_v30 = vpop.f32.mrb[56].mxu1 }
0x3740   : > { %v15363_v42 = vpop.f32.mrb[57].mxu1 }
0x3774   : > { %v15365_v31 = vpop.f32.mrb[58].mxu1 }
0x3775   : > { %v7653_v37 = vpop.f32.mrb[59].mxu1 }
0x3776   : > { %13134 = vmatprep.mubr.msk.f32.mxu0 %vm988_vm5, %v7653_v37 }
0x3778   : > { %v13146_v38 = vpop.f32.mrb[60].mxu1 }
0x3779   : > { %v7921_v7 = vmul.f32 0.35355338, %v13146_v38  ;;  %v7911_v46 = vpop.f32.mrb[61].mxu1 }
0x377a   : > { %v7920_v39 = vmul.f32 0.35355338, %v7911_v46 }
0x377b   : > { %v7925_v49 = vsel %vm339_vm1, %v7921_v7, -inf }
0x377c   : > { %7926 = vmax.xlane.f32.xlu1 %v7925_v49  ;;  %v7922_v51 = vsel %vm339_vm1, %v7920_v39, -inf }
0x377d   : > { %7923 = vmax.xlane.f32.xlu0 %v7922_v51 }
0x378d   : > { %7944 = vrot.lane.b32.xlu1 %v15307_v21, %s15901_s27 }
0x3791   : > { %8117 = vrot.lane.b32.xlu1 %v15309_v35, %s14286_s23 }
0x3795   : > { %8119 = vrot.lane.b32.xlu1 %v15317_v22, %s14286_s23 }
0x3809   : > { %v7927_v61 = vpop.xlane.xlu1 %7926 }
0x380a   : > { %v7929_v48 = vsub.f32 %v7921_v7, %v7927_v61  ;;  %v7924_v53 = vpop.xlane.xlu0 %7923 }
0x380b   : > { %v7928_v54 = vsub.f32 %v7920_v39, %v7924_v53 }
0x380c   : > { %v7932_v43 = vmul.f32 1.442695, %v7929_v48 }
0x380d   : > { %v7930_v8 = vmul.f32 1.442695, %v7928_v54  ;;  %v7945_v57 = vpop.permute.xlu1 %7944 }
0x380e   : > { %14154 = vpow2.f32 %v7932_v43  ;;  %13147 = vmatprep.subr.msk.mxu1 %vm359_vm0, %v7945_v57 }
0x380f   : > { %13148 = vmatpush3.msk.msra.mxu1 %vm359_vm0, %v7945_v57  ;;  %14156 = vpow2.f32 %v7930_v8  ;;  %v12101_v8 = vld [vmem:[%s15889_s6 + $0x13] ss:$0 sm:$0xff] }
0x3811   : > { %v8118_v33 = vpop.permute.xlu1 %8117 }
0x3815   : > { %v8120_v56 = vpop.permute.xlu1 %8119 }
0x3818   : > { %v14155_v11 = vpop.eup %14154 }
0x3819   : > { %v7937_v58 = vsel %vm339_vm1, %v14155_v11, 0.0  ;;  %v14157_v35 = vpop.eup %14156 }
0x381a   : > { %7938 = vadd.xlane.f32.xlu0 %v7937_v58  ;;  %v7934_v22 = vsel %vm339_vm1, %v14157_v35, 0.0 }
0x381e   : > { %7935 = vadd.xlane.f32.xlu0 %v7934_v22 }
0x3834   : > { %8121 = vrot.lane.b32.xlu0 %v15307_v21, %s14284_s21 }
0x38a7   : > { %v7939_v60 = vpop.xlane.xlu0 %7938 }
0x38a8   : > { %14158 = vrcp.f32 %v7939_v60 }
0x38ab   : > { %v7936_v62 = vpop.xlane.xlu0 %7935 }
0x38ac   : > { %14160 = vrcp.f32 %v7936_v62 }
0x38af   : > { %v8122_v45 = vpop.permute.xlu0 %8121 }
0x38b0   : > { %13157 = vmatprep.subr.msk.mxu1 %vm988_vm5, %v8122_v45 }
0x38b2   : > { %v14159_v3 = vpop.eup %14158 }
0x38b3   : > { %v7943_v23 = vmul.f32 %v14159_v3, %v14155_v11  ;;  %v8453_v3 = vld [vmem:[%s15888_s5 + $0x50] sm:$0xff] }
0x38b6   : > { %v14161_v63 = vpop.eup %14160 }
0x38b7   : > { %v7942_v36 = vmul.f32 %v14161_v63, %v14157_v35  ;;  %v8454_v63 = vld [vmem:[%s15888_s5 + $0xc8] sm:$0xff] }
0x38b9   : > { %13149 = vmatprep.mubr.msk.f32.mxu1 %vm339_vm1, %v7942_v36  ;;  %v13600_v36 = vpack.c.bf16 %v8454_v63, %v8453_v3 }
0x38ba   : > { %13150 = vmatmul.mubr.msk.f32.vlgmr.msra.gmra.mrb[62].mxu1 %vm339_vm1, %v7943_v23  ;;  %v8455_v23 = vld [vmem:[%s15888_s5 + $0x140] sm:$0xff] }
0x38bb   : > { %13158 = vmatpush3.xpose.msk.msra.mxu1 %vm988_vm5, %v8122_v45  ;;  %13159 = vmatprep.mubr.msk.f32.mxu1 %vm988_vm5, %v8118_v33  ;;  %v13928_v33 = vpack.i.bf16 %v8454_v63, %v8453_v3 }
0x38bc   : > { %13601 = vmatprep.subr.bf16.mxu1 %v13600_v36 }
0x38be   : > { %13160 = vmatmul.mubr.msk.f32.vlgmr.msra.gmra.mrb[64].mxu1 %vm988_vm5, %v8120_v56  ;;  %v8456_v56 = vld [vmem:[%s15888_s5 + $0x1b8] sm:$0xff] }
0x38bf   : > { %13603 = vmatpush3.bf16.msra.mxu1 %v13600_v36 }
0x398d   : > { %v13151_v4 = vpop.f32.mrb[62].mxu1 }
0x398e   : > { %v8020_v0 = vpop.f32.mrb[63].mxu1 }
0x3991   : > { %v13161_v14 = vpop.f32.mrb[64].mxu1 }
0x3992   : > { %v8205_v9 = vmul.f32 0.35355338, %v13161_v14  ;;  %v8195_v12 = vpop.f32.mrb[65].mxu1 }
0x3993   : > { %v8204_v17 = vmul.f32 0.35355338, %v8195_v12 }
0x3994   : > { %v8209_v50 = vsel %vm339_vm1, %v8205_v9, -inf }
0x3995   : > { %8210 = vmax.xlane.f32.xlu1 %v8209_v50  ;;  %v8206_v52 = vsel %vm339_vm1, %v8204_v17, -inf }
0x3996   : > { %8207 = vmax.xlane.f32.xlu0 %v8206_v52 }
0x39a6   : > { %7664 = vrot.lane.b32.xlu1 %v15248_v16, %s15900_s26 }
0x39aa   : > { %8031 = vrot.lane.b32.xlu1 %v15257_v2, %s15900_s26 }
0x39ae   : > { %8228 = vrot.lane.b32.xlu1 %v15307_v21, %s15899_s13 }
0x39b2   : > { %8407 = vrot.lane.b32.xlu1 %v15277_v32, %s15900_s26 }
0x3a22   : > { %v8211_v26 = vpop.xlane.xlu1 %8210 }
0x3a23   : > { %v8213_v6 = vsub.f32 %v8205_v9, %v8211_v26  ;;  %v8208_v18 = vpop.xlane.xlu0 %8207 }
0x3a24   : > { %v8212_v1 = vsub.f32 %v8204_v17, %v8208_v18 }
0x3a25   : > { %v8216_v20 = vmul.f32 1.442695, %v8213_v6 }
0x3a26   : > { %v8214_v27 = vmul.f32 1.442695, %v8212_v1  ;;  %v7665_v28 = vpop.permute.xlu1 %7664 }
0x3a27   : > { %14162 = vpow2.f32 %v8216_v20  ;;  %13132 = vmatprep.subr.mxu0 %v7665_v28 }
0x3a28   : > { %13133 = vmatpush3.msra.mxu0 %v7665_v28  ;;  %14164 = vpow2.f32 %v8214_v27 }
0x3a29   : > { %13135 = vmatmul.mubr.msk.f32.vlgmr.msra.gmra.mrb[68].mxu0 %vm988_vm5, %v15365_v31 }
0x3a2a   : > { %13139 = vmatprep.mubr.msk.f32.mxu0 %vm988_vm5, %v15363_v42  ;;  %v8032_v24 = vpop.permute.xlu1 %8031 }
0x3a2e   : > { %v8229_v42 = vpop.permute.xlu1 %8228 }
0x3a31   : > { %v14163_v16 = vpop.eup %14162 }
0x3a32   : > { %v8221_v2 = vsel %vm339_vm1, %v14163_v16, 0.0  ;;  %v14165_v32 = vpop.eup %14164  ;;  %v8408_v46 = vpop.permute.xlu1 %8407 }
0x3a33   : > { %8222 = vadd.xlane.f32.xlu0 %v8221_v2  ;;  %v8218_v21 = vsel %vm339_vm1, %v14165_v32, 0.0 }
0x3a37   : > { %8219 = vadd.xlane.f32.xlu0 %v8218_v21 }
0x3a4d   : > { %7749 = vrot.lane.b32.xlu0 %v15243_v13, %s15900_s26 }
0x3a51   : > { %8315 = vrot.lane.b32.xlu0 %v15262_v19, %s15900_s26 }
0x3ac0   : > { %v8223_v29 = vpop.xlane.xlu0 %8222 }
0x3ac4   : > { %v8220_v25 = vpop.xlane.xlu0 %8219 }
0x3ac5   : > { %14166 = vrcp.f32 %v8220_v25 }
0x3ac6   : > { %14168 = vrcp.f32 %v8223_v29 }
0x3ac8   : > { %v7750_v55 = vpop.permute.xlu0 %7749 }
0x3ac9   : > { %13137 = vmatprep.subr.mxu0 %v7750_v55 }
0x3aca   : > { %13138 = vmatpush3.msra.mxu0 %v7750_v55 }
0x3acb   : > { %13140 = vmatmul.mubr.msk.f32.vlgmr.msra.gmra.mrb[68].mxu0 %vm988_vm5, %v15361_v30  ;;  %13152 = vmatprep.subr.mxu0 %v8032_v24 }
0x3acc   : > { %13153 = vmatpush3.msra.mxu0 %v8032_v24  ;;  %13154 = vmatprep.mubr.msk.f32.mxu0 %vm988_vm5, %v8020_v0  ;;  %v8316_v37 = vpop.permute.xlu0 %8315  ;;  %v13933_v0 = vpack.i.bf16 %v8456_v56, %v8455_v23 }
0x3acd   : > { %13162 = vmatprep.subr.msk.mxu0 %vm359_vm0, %v8229_v42 }
0x3acf   : > { %v14167_v13 = vpop.eup %14166 }
0x3ad0   : > { %v14169_v19 = vpop.eup %14168  ;;  %v8226_v31 = vmul.f32 %v14167_v13, %v14165_v32  ;;  %v12102_v32 = vld [vmem:[%s15889_s6 + $0x11] ss:$0 sm:$0xff] }
0x3ad1   : > { %v8227_v38 = vmul.f32 %v14169_v19, %v14163_v16 }
0x3ad3   : > { %13155 = vmatmul.mubr.msk.f32.vlgmr.msra.gmra.mrb[68].mxu0 %vm988_vm5, %v13151_v4  ;;  %v13604_v4 = vpack.c.bf16 %v8456_v56, %v8455_v23 }
0x3ad4   : > { %13163 = vmatpush3.msk.msra.mxu0 %vm359_vm0, %v8229_v42  ;;  %13164 = vmatprep.mubr.msk.f32.mxu0 %vm339_vm1, %v8226_v31 }
0x3ad5   : > { %13167 = vmatprep.subr.mxu0 %v8316_v37  ;;  %13605 = vmatprep.subr.bf16.mxu1 %v13604_v4 }
0x3ad6   : > { %13607 = vmatpush3.bf16.msra.mxu1 %v13604_v4 }
0x3ad7   : > { %13165 = vmatmul.mubr.msk.f32.vlgmr.msra.gmra.mrb[70].mxu0 %vm339_vm1, %v8227_v38 }
0x3ad8   : > { %13168 = vmatpush3.msra.mxu0 %v8316_v37 }
0x3baa   : > { %v13166_v30 = vpop.f32.mrb[70].mxu0 }
0x3bab   : > { %v8304_v7 = vpop.f32.mrb[71].mxu0 }
0x3bac   : > { %13169 = vmatprep.mubr.msk.f32.mxu0 %vm988_vm5, %v8304_v7 }
0x3bad   : > { %13170 = vmatmul.mubr.msk.f32.vlgmr.msra.gmra.mrb[68].mxu0 %vm988_vm5, %v13166_v30 }
0x3c80   : > { %v13171_v39 = vpop.f32.mrb[68].mxu0 }
0x3c81   : > { %v8411_v49 = vadd.f32 %v13171_v39, %v8408_v46  ;;  %v8390_v51 = vpop.f32.mrb[69].mxu0 }
0x3c82   : > { %v8410_v61 = vadd.f32 %v8408_v46, %v8390_v51 }
0x3c83   : > { %v8413_v48 = vadd.f32 %v8411_v49, %v15297_v10 }
0x3c84   : > { %v8412_v53 = vadd.f32 %v8410_v61, %v15293_v15 }
0x3c85   : > { %v8418_v54 = vsel %vm895_vm3, %v8413_v48, 0.0 }
0x3c86   : > { %8419 = vadd.xlane.f32.xlu1 %v8418_v54  ;;  %v8415_v43 = vsel %vm895_vm3, %v8412_v53, 0.0 }
0x3c87   : > { %8416 = vadd.xlane.f32.xlu0 %v8415_v43 }
0x3c97   : > { %8448 = vrot.lane.b32.xlu1 %v12101_v8, %s14279_s16 }
0x3c9b   : > { %13934 = vrot.lane.b32.xlu1 %v13933_v0, %s14279_s16 }
0x3c9f   : > { %8614 = vrot.lane.b32.xlu1 %v12102_v32, %s14279_s16 }
0x3d13   : > { %v8420_v57 = vpop.xlane.xlu1 %8419 }
0x3d14   : > { %v8422_v11 = vmul.f32 0.03125, %v8420_v57  ;;  %v8417_v58 = vpop.xlane.xlu0 %8416 }
0x3d15   : > { %v8421_v35 = vmul.f32 0.03125, %v8417_v58 }
0x3d16   : > { %v8424_v22 = vsub.f32 %v8413_v48, %v8422_v11 }
0x3d17   : > { %v8423_v10 = vsub.f32 %v8412_v53, %v8421_v35  ;;  %v8449_v18 = vpop.permute.xlu1 %8448 }
0x3d18   : > { %v8426_v62 = vmul.f32 %v8424_v22, %v8424_v22 }
0x3d19   : > { %v8425_v60 = vmul.f32 %v8423_v10, %v8423_v10 }
0x3d1a   : > { %v8430_v45 = vsel %vm895_vm3, %v8426_v62, 0.0 }
0x3d1b   : > { %v8427_v15 = vsel %vm895_vm3, %v8425_v60, 0.0  ;;  %v13935_v55 = vpop.permute.xlu1 %13934 }
0x3d1c   : > { %8428 = vadd.xlane.f32.xlu0 %v8427_v15  ;;  %v13937_v42 = vunpack.i.h.bf16 %v13935_v55  ;;  %v13936_v13 = vunpack.i.l.bf16 %v13935_v55 }
0x3d1e   : > { %v13612_v19 = vpack.c.bf16 %v13937_v42, %v13936_v13 }
0x3d20   : > { %8431 = vadd.xlane.f32.xlu0 %v8430_v45 }
0x3d36   : > { %13929 = vrot.lane.b32.xlu0 %v13928_v33, %s14279_s16 }
0x3da9   : > { %v8429_v14 = vpop.xlane.xlu0 %8428 }
0x3daa   : > { %v8433_v9 = vmul.f32 0.03125, %v8429_v14 }
0x3dac   : > { %v8435_v12 = vadd.f32 1e-05, %v8433_v9 }
0x3dad   : > { %v8432_v17 = vpop.xlane.xlu0 %8431 }
0x3dae   : > { %14170 = vrsqrt.f32 %v8435_v12  ;;  %v8434_v50 = vmul.f32 0.03125, %v8432_v17 }
0x3db0   : > { %v8436_v52 = vadd.f32 1e-05, %v8434_v50 }
0x3db1   : > { %v13930_v21 = vpop.permute.xlu0 %13929 }
0x3db2   : > { %14172 = vrsqrt.f32 %v8436_v52  ;;  %v13932_v29 = vunpack.i.h.bf16 %v13930_v21  ;;  %v13931_v25 = vunpack.i.l.bf16 %v13930_v21 }
0x3db4   : > { %v13608_v24 = vpack.c.bf16 %v13932_v29, %v13931_v25 }
0x3db6   : > { %13609 = vmatprep.subr.bf16.mxu0 %v13608_v24 }
0x3db7   : > { %13611 = vmatpush3.bf16.msra.mxu0 %v13608_v24 }
0x3db8   : > { %v14171_v26 = vpop.eup %14170  ;;  %13613 = vmatprep.subr.bf16.mxu0 %v13612_v19 }
0x3db9   : > { %v8439_v6 = vmul.f32 %v14171_v26, %v8423_v10 }
0x3dbb   : > { %v8445_v1 = vmul.f32 %v12101_v8, %v8439_v6  ;;  %13615 = vmatpush3.bf16.msra.mxu0 %v13612_v19  ;;  %v8615_v19 = vpop.permute.xlu1 %8614 }
0x3dbc   : > { %v14173_v20 = vpop.eup %14172 }
0x3dbd   : > { %v8440_v27 = vmul.f32 %v14173_v20, %v8424_v22  ;;  %v15442_v28 = vadd.f32 %v8449_v18, %v8445_v1 }
0x3dbf   : > { %v8446_v16 = vmul.f32 %v12101_v8, %v8440_v27  ;;  %13180 = vmatprep.mubr.msk.f32.mxu1 %vm895_vm3, %v15442_v28 }
0x3dc1   : > { %v15446_v2 = vadd.f32 %v8449_v18, %v8446_v16 }
0x3dc3   : > { %13181 = vmatmul.mubr.msk.f32.vlgmr.msra.gmra.mrb[66].mxu1 %vm895_vm3, %v15446_v2 }
0x3e96   : > { %v13182_v31 = vpop.f32.mrb[66].mxu1 }
0x3e97   : > { %v8540_v37 = vadd.f32 %v13182_v31, %v12102_v32  ;;  %v8534_v38 = vpop.f32.mrb[67].mxu1 }
0x3e98   : > { %v8535_v30 = vadd.f32 %v12102_v32, %v8534_v38 }
0x3e99   : > { %v8546_v7 = vmul.f32 0.70710677, %v8540_v37  ;;  %v8544_v55 = vmul.f32 0.5, %v8540_v37 }
0x3e9a   : > { %v8545_v46 = vmul.f32 0.70710677, %v8535_v30  ;;  %v8543_v25 = vmul.f32 0.5, %v8535_v30  ;;  %v12107_v30 = vld [vmem:[%s15889_s6 + $0x14] ss:$0 sm:$0xff] }
0x3e9b   : > { %v8552_v39 = vand.u32 2147483647, %v8546_v7  ;;  %vm8548_vm15 = vcmp.ge.f32.partialorder %v8546_v7, 0.0 }
0x3e9c   : > { %v8551_v49 = vand.u32 2147483647, %v8545_v46  ;;  %vm8547_vm2 = vcmp.ge.f32.partialorder %v8545_v46, 0.0  ;;  %v8550_v20 = vsel %vm8548_vm15, 1.0, %v14290_v40 }
0x3e9d   : > { %v8554_v51 = vmul.f32 0.3275911, %v8552_v39  ;;  %v8580_v54 = vsub.f32 0.0, %v8552_v39  ;;  %v8549_v32 = vsel %vm8547_vm2, 1.0, %v14290_v40 }
0x3e9e   : > { %v8553_v61 = vmul.f32 0.3275911, %v8551_v49  ;;  %v8579_v43 = vsub.f32 0.0, %v8551_v49 }
0x3e9f   : > { %v8556_v48 = vadd.f32 1.0, %v8554_v51  ;;  %v8582_v57 = vmul.f32 %v8580_v54, %v8552_v39 }
0x3ea0   : > { %v8555_v53 = vadd.f32 1.0, %v8553_v61  ;;  %v8581_v35 = vmul.f32 %v8579_v43, %v8551_v49 }
0x3ea1   : > { %14174 = vrcp.f32 %v8556_v48  ;;  %v8585_v60 = vmul.f32 1.442695, %v8582_v57 }
0x3ea2   : > { %14176 = vrcp.f32 %v8555_v53  ;;  %v8583_v45 = vmul.f32 1.442695, %v8581_v35  ;;  %v15476_v35 = vld [vmem:[%s15888_s5 + $0xd0] sm:$0xff] }
0x3ea3   : > { %14178 = vpow2.f32 %v8585_v60  ;;  %v15488_v60 = vld [vmem:[%s15888_s5 + $0x1c0] sm:$0xff] }
0x3ea4   : > { %14180 = vpow2.f32 %v8583_v45 }
0x3eab   : > { %v14175_v8 = vpop.eup %14174 }
0x3eac   : > { %v14177_v11 = vpop.eup %14176  ;;  %v8562_v58 = vmul.f32 1.0614054, %v14175_v8 }
0x3ead   : > { %v8561_v22 = vmul.f32 1.0614054, %v14177_v11  ;;  %v14179_v50 = vpop.eup %14178 }
0x3eae   : > { %v8564_v10 = vadd.f32 -1.4531521, %v8562_v58  ;;  %v14181_v26 = vpop.eup %14180  ;;  %v15471_v58 = vld [vmem:[%s15888_s5 + $0x58] sm:$0xff] }
0x3eaf   : > { %v8563_v15 = vadd.f32 -1.4531521, %v8561_v22  ;;  %v13616_v22 = vpack.c.bf16 %v15476_v35, %v15471_v58 }
0x3eb0   : > { %v8566_v62 = vmul.f32 %v14175_v8, %v8564_v10  ;;  %v15483_v10 = vld [vmem:[%s15888_s5 + $0x148] sm:$0xff] }
0x3eb1   : > { %v8565_v3 = vmul.f32 %v14177_v11, %v8563_v15  ;;  %13617 = vmatprep.subr.bf16.mxu1 %v13616_v22  ;;  %v13620_v15 = vpack.c.bf16 %v15488_v60, %v15483_v10 }
0x3eb2   : > { %v8568_v63 = vadd.f32 1.4214138, %v8566_v62  ;;  %13619 = vmatpush3.bf16.msra.mxu1 %v13616_v22 }
0x3eb3   : > { %v8567_v33 = vadd.f32 1.4214138, %v8565_v3  ;;  %13621 = vmatprep.subr.bf16.mxu1 %v13620_v15 }
0x3eb4   : > { %v8570_v36 = vmul.f32 %v14175_v8, %v8568_v63 }
0x3eb5   : > { %v8569_v23 = vmul.f32 %v14177_v11, %v8567_v33 }
0x3eb6   : > { %v8572_v56 = vadd.f32 -0.28449672, %v8570_v36  ;;  %13623 = vmatpush3.bf16.msra.mxu1 %v13620_v15 }
0x3eb7   : > { %v8571_v4 = vadd.f32 -0.28449672, %v8569_v23 }
0x3eb8   : > { %v8574_v0 = vmul.f32 %v14175_v8, %v8572_v56 }
0x3eb9   : > { %v8573_v14 = vmul.f32 %v14177_v11, %v8571_v4 }
0x3eba   : > { %v8576_v9 = vadd.f32 0.2548296, %v8574_v0 }
0x3ebb   : > { %v8575_v12 = vadd.f32 0.2548296, %v8573_v14 }
0x3ebc   : > { %v8578_v17 = vmul.f32 %v14175_v8, %v8576_v9 }
0x3ebd   : > { %v8577_v52 = vmul.f32 %v14177_v11, %v8575_v12 }
0x3ebe   : > { %v8588_v6 = vmul.f32 %v14179_v50, %v8578_v17 }
0x3ebf   : > { %v8587_v18 = vmul.f32 %v14181_v26, %v8577_v52  ;;  %v15503_v52 = vld [vmem:[%s15889_s6 + $0x15] ss:$0 sm:$0xff] }
0x3ec0   : > { %v8590_v1 = vsub.f32 1.0, %v8588_v6 }
0x3ec1   : > { %v8589_v27 = vsub.f32 1.0, %v8587_v18 }
0x3ec2   : > { %v8592_v16 = vmul.f32 %v8590_v1, %v8550_v20 }
0x3ec3   : > { %v8591_v21 = vmul.f32 %v8589_v27, %v8549_v32 }
0x3ec4   : > { %v8594_v29 = vadd.f32 1.0, %v8592_v16 }
0x3ec5   : > { %v8593_v24 = vadd.f32 1.0, %v8591_v21 }
0x3ec6   : > { %v8596_v13 = vmul.f32 %v8594_v29, %v8544_v55 }
0x3ec7   : > { %v8595_v42 = vmul.f32 %v8593_v24, %v8543_v25 }
0x3ec9   : > { %13191 = vmatprep.mubr.msk.f32.mxu0 %vm895_vm3, %v8595_v42 }
0x3eca   : > { %13192 = vmatmul.mubr.msk.f32.vlgmr.msra.gmra.mrb[72].mxu0 %vm895_vm3, %v8596_v13 }
0x3f9d   : > { %v13193_v31 = vpop.f32.mrb[72].mxu0 }
0x3f9e   : > { %v8695_v38 = vadd.f32 %v13193_v31, %v8615_v19  ;;  %v8689_v7 = vpop.f32.mrb[73].mxu0 }
0x3f9f   : > { %v8690_v46 = vadd.f32 %v8689_v7, %v8615_v19 }
0x3fa0   : > { %v8699_v39 = vadd.f32 %v8695_v38, %v15446_v2 }
0x3fa1   : > { %v8698_v49 = vadd.f32 %v8690_v46, %v15442_v28 }
0x3fa2   : > { %v8704_v51 = vsel %vm895_vm3, %v8699_v39, 0.0 }
0x3fa3   : > { %8705 = vadd.xlane.f32.xlu1 %v8704_v51  ;;  %v8701_v37 = vsel %vm895_vm3, %v8698_v49, 0.0 }
0x3fa4   : > { %8702 = vadd.xlane.f32.xlu0 %v8701_v37 }
0x3fb4   : > { %8734 = vrot.lane.b32.xlu1 %v12107_v30, %s14279_s16 }
0x4030   : > { %v8706_v61 = vpop.xlane.xlu1 %8705 }
0x4031   : > { %v8708_v48 = vmul.f32 0.03125, %v8706_v61  ;;  %v8703_v53 = vpop.xlane.xlu0 %8702 }
0x4032   : > { %v8707_v54 = vmul.f32 0.03125, %v8703_v53 }
0x4033   : > { %v8710_v43 = vsub.f32 %v8699_v39, %v8708_v48 }
0x4034   : > { %v8709_v2 = vsub.f32 %v8698_v49, %v8707_v54  ;;  %v8735_v4 = vpop.permute.xlu1 %8734 }
0x4035   : > { %v8712_v57 = vmul.f32 %v8710_v43, %v8710_v43 }
0x4036   : > { %v8711_v8 = vmul.f32 %v8709_v2, %v8709_v2 }
0x4037   : > { %v8716_v11 = vsel %vm895_vm3, %v8712_v57, 0.0 }
0x4038   : > { %v8713_v28 = vsel %vm895_vm3, %v8711_v8, 0.0 }
0x4039   : > { %8714 = vadd.xlane.f32.xlu0 %v8713_v28 }
0x403d   : > { %8717 = vadd.xlane.f32.xlu0 %v8716_v11 }
0x40c6   : > { %v8715_v62 = vpop.xlane.xlu0 %8714 }
0x40c7   : > { %v8719_v45 = vmul.f32 0.03125, %v8715_v62 }
0x40c9   : > { %v8721_v3 = vadd.f32 1e-05, %v8719_v45 }
0x40ca   : > { %v8718_v63 = vpop.xlane.xlu0 %8717 }
0x40cb   : > { %14182 = vrsqrt.f32 %v8721_v3  ;;  %v8720_v33 = vmul.f32 0.03125, %v8718_v63 }
0x40cd   : > { %v8722_v36 = vadd.f32 1e-05, %v8720_v33 }
0x40cf   : > { %14184 = vrsqrt.f32 %v8722_v36 }
0x40d5   : > { %v14183_v23 = vpop.eup %14182 }
0x40d6   : > { %v8725_v56 = vmul.f32 %v14183_v23, %v8709_v2 }
0x40d8   : > { %v8731_v0 = vmul.f32 %v12107_v30, %v8725_v56 }
0x40d9   : > { %v14185_v14 = vpop.eup %14184 }
0x40da   : > { %v8726_v9 = vmul.f32 %v14185_v14, %v8710_v43  ;;  %v15492_v12 = vadd.f32 %v8735_v4, %v8731_v0 }
0x40dc   : > { %v8732_v17 = vmul.f32 %v12107_v30, %v8726_v9  ;;  %13202 = vmatprep.mubr.msk.f32.mxu1 %vm895_vm3, %v15492_v12 }
0x40de   : > { %v15496_v50 = vadd.f32 %v8735_v4, %v8732_v17 }
0x40e0   : > { %13203 = vmatmul.mubr.msk.f32.vlgmr.msra.gmra.mrb[68].mxu1 %vm895_vm3, %v15496_v50 }
0x41b3   : > { %v13204_v26 = vpop.f32.mrb[68].mxu1 }
0x41b4   : > { %v8826_v6 = vadd.f32 %v13204_v26, %v15503_v52  ;;  %v8820_v18 = vpop.f32.mrb[69].mxu1 }
0x41b5   : > { %v8821_v1 = vadd.f32 %v15503_v52, %v8820_v18 }
0x41b6   : > { %8830 = vst.msk [vmem:[#allocation2 + $0x8] sm:$0xff] %vm977_vm4, %v8826_v6 }
0x41b7   : > { %8829 = vst.msk [vmem:[#allocation2] sm:$0xff] %vm977_vm4, %v8821_v1 }
0x41bd   : > { %v15509_v20 = vld [vmem:[#allocation2 + $0x8] sm:$0xff] }
0x41be   : > { %v15511_v27 = vld [vmem:[#allocation2] sm:$0xff] }
0x41bf   : > { %13209 = vmatprep.mubr.msk.f32.mxu0 %vm988_vm5, %v15511_v27  ;;  %v15517_v16 = vpack.i.bf16 %v15509_v20, %v15511_v27 }
0x41c1   : > { %13939 = vrot.lane.b32.xlu0 %v15517_v16, %s14279_s16 }
0x4233   : > { %v13940_v32 = vpop.permute.xlu0 %13939 }
0x4234   : > { %v13942_v21 = vunpack.i.h.bf16 %v13940_v32  ;;  %v13941_v29 = vunpack.i.l.bf16 %v13940_v32 }
0x4236   : > { %v13624_v25 = vpack.c.bf16 %v13942_v21, %v13941_v29 }
0x4238   : > { %13626 = vmatprep.subr.msk.bf16.mxu0 %vm14482_vm6, %v13624_v25 }
0x4239   : > { %13629 = vmatpush3.bf16.xpose.msk.msra.mxu0 %vm14482_vm6, %v13624_v25 }
0x4240   : > { %13210 = vmatmul.mubr.msk.f32.vlgmr.msra.gmra.mrb[74].mxu0 %vm988_vm5, %v15509_v20 }
0x4313   : > { %v13211_v24 = vpop.f32.mrb[74].mxu0 }
0x4314   : > { %v8923_v55 = vmul.f32 0.35355338, %v13211_v24  ;;  %v8913_v42 = vpop.f32.mrb[75].mxu0 }
0x4315   : > { %v8922_v13 = vmul.f32 0.35355338, %v8913_v42 }
0x4316   : > { %v8925_v19 = vadd.f32 %v8923_v55, %v15148_v41 }
0x4317   : > { %v8924_v31 = vadd.f32 %v8922_v13, %v15150_v44 }
0x4318   : > { %v8929_v38 = vsel %vm1074_vm7, %v8925_v19, -inf }
0x4319   : > { %8930 = vmax.xlane.f32.xlu0 %v8929_v38  ;;  %v8926_v7 = vsel %vm1074_vm7, %v8924_v31, -inf }
0x431a   : > { %8927 = vmax.xlane.f32.xlu1 %v8926_v7 }
0x432b   : > { %13944 = vrot.lane.b32.xlu1 %v15517_v16, %s14285_s22 }
0x432f   : > { %9036 = vrot.lane.b32.xlu1 %v15511_v27, %s14278_s15 }
0x43a6   : > { %v8931_v46 = vpop.xlane.xlu0 %8930 }
0x43a7   : > { %v8933_v39 = vsub.f32 %v8925_v19, %v8931_v46  ;;  %v8928_v49 = vpop.xlane.xlu1 %8927 }
0x43a8   : > { %v8932_v51 = vsub.f32 %v8924_v31, %v8928_v49 }
0x43a9   : > { %v8936_v37 = vmul.f32 1.442695, %v8933_v39 }
0x43aa   : > { %v8934_v30 = vmul.f32 1.442695, %v8932_v51 }
0x43ab   : > { %14186 = vpow2.f32 %v8936_v37  ;;  %v13945_v61 = vpop.permute.xlu1 %13944 }
0x43ac   : > { %14188 = vpow2.f32 %v8934_v30  ;;  %v13947_v48 = vunpack.i.h.bf16 %v13945_v61  ;;  %v13946_v53 = vunpack.i.l.bf16 %v13945_v61 }
0x43ae   : > { %v13630_v54 = vpack.c.bf16 %v13947_v48, %v13946_v53 }
0x43af   : > { %v9037_v57 = vpop.permute.xlu1 %9036 }
0x43b0   : > { %13631 = vmatprep.subr.bf16.mxu1 %v13630_v54 }
0x43b1   : > { %13633 = vmatpush3.bf16.msra.mxu1 %v13630_v54 }
0x43b5   : > { %v14187_v43 = vpop.eup %14186 }
0x43b6   : > { %v14189_v2 = vpop.eup %14188  ;;  %v8941_v8 = vsel %vm1074_vm7, %v14187_v43, 0.0 }
0x43b7   : > { %8942 = vadd.xlane.f32.xlu0 %v8941_v8  ;;  %v8938_v28 = vsel %vm1074_vm7, %v14189_v2, 0.0 }
0x43b8   : > { %8939 = vadd.xlane.f32.xlu1 %v8938_v28 }
0x43c9   : > { %9038 = vrot.lane.b32.xlu1 %v15509_v20, %s14278_s15 }
0x43cd   : > { %13949 = vrot.lane.b32.xlu0 %v15517_v16, %s14280_s17  ;;  %9411 = vrot.lane.b32.xlu1 %v15511_v27, %s14281_s18 }
0x43d1   : > { %13954 = vrot.lane.b32.xlu0 %v15517_v16, %s14282_s19 }
0x43d5   : > { %9413 = vrot.lane.b32.xlu0 %v15509_v20, %s14281_s18 }
0x4444   : > { %v8943_v11 = vpop.xlane.xlu0 %8942 }
0x4445   : > { %14190 = vrcp.f32 %v8943_v11  ;;  %v8940_v22 = vpop.xlane.xlu1 %8939 }
0x4446   : > { %14192 = vrcp.f32 %v8940_v22 }
0x4448   : > { %v13950_v15 = vpop.permute.xlu0 %13949 }
0x4449   : > { %v13952_v62 = vunpack.i.h.bf16 %v13950_v15  ;;  %v13951_v45 = vunpack.i.l.bf16 %v13950_v15  ;;  %v9039_v9 = vpop.permute.xlu1 %9038 }
0x444b   : > { %v13634_v3 = vpack.c.bf16 %v13952_v62, %v13951_v45 }
0x444c   : > { %v13955_v63 = vpop.permute.xlu0 %13954 }
0x444d   : > { %13636 = vmatprep.subr.msk.bf16.mxu1 %vm14482_vm6, %v13634_v3  ;;  %v13957_v23 = vunpack.i.h.bf16 %v13955_v63  ;;  %v13956_v56 = vunpack.i.l.bf16 %v13955_v63  ;;  %v9412_v17 = vpop.permute.xlu1 %9411 }
0x444f   : > { %v14191_v33 = vpop.eup %14190  ;;  %v13644_v14 = vpack.c.bf16 %v13957_v23, %v13956_v56 }
0x4450   : > { %v14193_v36 = vpop.eup %14192  ;;  %v8947_v0 = vmul.f32 %v14191_v33, %v14187_v43  ;;  %v9414_v26 = vpop.permute.xlu0 %9413 }
0x4451   : > { %v8946_v4 = vmul.f32 %v14193_v36, %v14189_v2 }
0x4453   : > { %13216 = vmatprep.mubr.msk.f32.mxu1 %vm1074_vm7, %v8946_v4 }
0x4454   : > { %13217 = vmatmul.mubr.msk.f32.vlgmr.msra.gmra.mrb[70].mxu1 %vm1074_vm7, %v8947_v0 }
0x4455   : > { %13639 = vmatpush3.bf16.xpose.msk.msra.mxu1 %vm14482_vm6, %v13634_v3  ;;  %13223 = vmatprep.mubr.msk.f32.mxu1 %vm988_vm5, %v9037_v57 }
0x4456   : > { %13646 = vmatprep.subr.msk.bf16.mxu1 %vm14482_vm6, %v13644_v14 }
0x445c   : > { %13224 = vmatmul.mubr.msk.f32.vlgmr.msra.gmra.mrb[72].mxu1 %vm988_vm5, %v9039_v9 }
0x445d   : > { %13649 = vmatpush3.bf16.xpose.msk.msra.mxu1 %vm14482_vm6, %v13644_v14  ;;  %13247 = vmatprep.mubr.msk.f32.mxu1 %vm988_vm5, %v9412_v17 }
0x4464   : > { %13248 = vmatmul.mubr.msk.f32.vlgmr.msra.gmra.mrb[74].mxu1 %vm988_vm5, %v9414_v26 }
0x4527   : > { %v15561_v6 = vpop.f32.mrb[70].mxu1 }
0x4528   : > { %v15563_v18 = vpop.f32.mrb[71].mxu1 }
0x452f   : > { %v13225_v1 = vpop.f32.mrb[72].mxu1 }
0x4530   : > { %v9128_v32 = vmul.f32 0.35355338, %v13225_v1  ;;  %v9118_v21 = vpop.f32.mrb[73].mxu1 }
0x4531   : > { %v9127_v29 = vmul.f32 0.35355338, %v9118_v21 }
0x4532   : > { %v9130_v25 = vadd.f32 %v9128_v32, %v15148_v41 }
0x4533   : > { %v9129_v24 = vadd.f32 %v9127_v29, %v15150_v44 }
0x4534   : > { %v9134_v55 = vsel %vm1074_vm7, %v9130_v25, -inf }
0x4535   : > { %9135 = vmax.xlane.f32.xlu0 %v9134_v55  ;;  %v9131_v42 = vsel %vm1074_vm7, %v9129_v24, -inf }
0x4536   : > { %9132 = vmax.xlane.f32.xlu1 %v9131_v42 }
0x4537   : > { %v13249_v13 = vpop.f32.mrb[74].mxu1 }
0x4538   : > { %v9493_v19 = vpop.f32.mrb[75].mxu1  ;;  %v9503_v53 = vmul.f32 0.35355338, %v13249_v13 }
0x4539   : > { %v9502_v48 = vmul.f32 0.35355338, %v9493_v19 }
0x453a   : > { %v9505_v43 = vadd.f32 %v9503_v53, %v15148_v41 }
0x453b   : > { %v9504_v54 = vadd.f32 %v9502_v48, %v15150_v44 }
0x453c   : > { %v9509_v8 = vsel %vm1074_vm7, %v9505_v43, -inf }
0x453d   : > { %v9506_v2 = vsel %vm1074_vm7, %v9504_v54, -inf }
0x45c2   : > { %v9136_v31 = vpop.xlane.xlu0 %9135 }
0x45c3   : > { %v9138_v38 = vsub.f32 %v9130_v25, %v9136_v31  ;;  %v9133_v7 = vpop.xlane.xlu1 %9132 }
0x45c4   : > { %v9137_v46 = vsub.f32 %v9129_v24, %v9133_v7 }
0x45c5   : > { %v9141_v39 = vmul.f32 1.442695, %v9138_v38 }
0x45c6   : > { %v9139_v49 = vmul.f32 1.442695, %v9137_v46 }
0x45c7   : > { %14194 = vpow2.f32 %v9141_v39 }
0x45c8   : > { %14196 = vpow2.f32 %v9139_v49 }
0x45d1   : > { %v14195_v51 = vpop.eup %14194 }
0x45d2   : > { %v14197_v37 = vpop.eup %14196  ;;  %v9146_v30 = vsel %vm1074_vm7, %v14195_v51, 0.0 }
0x45d3   : > { %9147 = vadd.xlane.f32.xlu1 %v9146_v30  ;;  %v9143_v61 = vsel %vm1074_vm7, %v14197_v37, 0.0 }
0x45d4   : > { %9144 = vadd.xlane.f32.xlu0 %v9143_v61 }
0x45e4   : > { %13964 = vrot.lane.b32.xlu1 %v15517_v16, %s14284_s21 }
0x45e8   : > { %9703 = vrot.lane.b32.xlu1 %v15511_v27, %s14286_s23 }
0x45ea   : > { %13959 = vrot.lane.b32.xlu0 %v15517_v16, %s14283_s20 }
0x45ee   : > { %9705 = vrot.lane.b32.xlu0 %v15509_v20, %s14286_s23 }
0x460c   : > { %9507 = vmax.xlane.f32.xlu1 %v9506_v2 }
0x460d   : > { %9510 = vmax.xlane.f32.xlu0 %v9509_v8 }
0x4660   : > { %v9148_v28 = vpop.xlane.xlu1 %9147 }
0x4661   : > { %14198 = vrcp.f32 %v9148_v28  ;;  %v9145_v27 = vpop.xlane.xlu0 %9144 }
0x4662   : > { %14200 = vrcp.f32 %v9145_v27 }
0x4664   : > { %v13965_v57 = vpop.permute.xlu1 %13964 }
0x4665   : > { %v13967_v11 = vunpack.i.h.bf16 %v13965_v57  ;;  %v13966_v22 = vunpack.i.l.bf16 %v13965_v57  ;;  %v13960_v20 = vpop.permute.xlu0 %13959 }
0x4666   : > { %v13962_v15 = vunpack.i.h.bf16 %v13960_v20  ;;  %v13961_v62 = vunpack.i.l.bf16 %v13960_v20 }
0x4667   : > { %v13654_v45 = vpack.c.bf16 %v13967_v11, %v13966_v22 }
0x4668   : > { %v13640_v3 = vpack.c.bf16 %v13962_v15, %v13961_v62  ;;  %v9704_v63 = vpop.permute.xlu1 %9703 }
0x4669   : > { %13656 = vmatprep.subr.msk.bf16.mxu1 %vm14482_vm6, %v13654_v45  ;;  %13266 = vmatprep.mubr.msk.f32.mxu1 %vm988_vm5, %v9704_v63  ;;  %v9706_v4 = vpop.permute.xlu0 %9705 }
0x466a   : > { %13641 = vmatprep.subr.bf16.mxu0 %v13640_v3  ;;  %13659 = vmatpush3.bf16.xpose.msk.msra.mxu1 %vm14482_vm6, %v13654_v45 }
0x466b   : > { %v14199_v33 = vpop.eup %14198  ;;  %13643 = vmatpush3.bf16.msra.mxu0 %v13640_v3 }
0x466c   : > { %v14201_v36 = vpop.eup %14200  ;;  %v9152_v56 = vmul.f32 %v14199_v33, %v14195_v51 }
0x466d   : > { %v9151_v23 = vmul.f32 %v14201_v36, %v14197_v37 }
0x466f   : > { %13230 = vmatprep.mubr.msk.f32.mxu0 %vm1074_vm7, %v9151_v23 }
0x4670   : > { %13231 = vmatmul.mubr.msk.f32.vlgmr.msra.gmra.mrb[76].mxu0 %vm1074_vm7, %v9152_v56 }
0x4671   : > { %13267 = vmatmul.mubr.msk.f32.vlgmr.msra.gmra.mrb[76].mxu1 %vm988_vm5, %v9706_v4 }
0x4699   : > { %v9508_v0 = vpop.xlane.xlu1 %9507 }
0x469a   : > { %v9512_v14 = vsub.f32 %v9504_v54, %v9508_v0  ;;  %v9511_v9 = vpop.xlane.xlu0 %9510 }
0x469b   : > { %v9513_v17 = vsub.f32 %v9505_v43, %v9511_v9 }
0x469c   : > { %v9514_v26 = vmul.f32 1.442695, %v9512_v14 }
0x469d   : > { %v9516_v1 = vmul.f32 1.442695, %v9513_v17 }
0x469e   : > { %14202 = vpow2.f32 %v9514_v26 }
0x469f   : > { %14204 = vpow2.f32 %v9516_v1 }
0x46a8   : > { %v14203_v47 = vpop.eup %14202 }
0x46a9   : > { %v14205_v32 = vpop.eup %14204  ;;  %v9518_v21 = vsel %vm1074_vm7, %v14203_v47, 0.0 }
0x46aa   : > { %9519 = vadd.xlane.f32.xlu0 %v9518_v21  ;;  %v9521_v29 = vsel %vm1074_vm7, %v14205_v32, 0.0 }
0x46ab   : > { %9522 = vadd.xlane.f32.xlu1 %v9521_v29  ;;  %v15637_v29 = vld [vmem:[%s15888_s5 + $0x150] sm:$0xff] }
0x46bc   : > { %9327 = vrot.lane.b32.xlu1 %v15471_v58, %s15900_s26 }
0x46c0   : > { %13969 = vrot.lane.b32.xlu1 %v15517_v16, %s15901_s27  ;;  %9242 = vrot.lane.b32.xlu0 %v15476_v35, %s15900_s26 }
0x4737   : > { %v9520_v25 = vpop.xlane.xlu0 %9519 }
0x4738   : > { %v9523_v24 = vpop.xlane.xlu1 %9522  ;;  %14206 = vrcp.f32 %v9520_v25  ;;  %v15642_v25 = vld [vmem:[%s15888_s5 + $0x1c8] sm:$0xff] }
0x4739   : > { %14208 = vrcp.f32 %v9523_v24  ;;  %v15654_v24 = vld [vmem:[%s15888_s5 + $0xd8] sm:$0xff] }
0x473b   : > { %v9243_v55 = vpop.permute.xlu0 %9242 }
0x473c   : > { %v9328_v42 = vpop.permute.xlu1 %9327  ;;  %13233 = vmatprep.subr.mxu0 %v9243_v55 }
0x473d   : > { %13234 = vmatpush3.msra.mxu0 %v9243_v55 }
0x473e   : > { %13238 = vmatprep.subr.mxu0 %v9328_v42 }
0x4740   : > { %v13970_v13 = vpop.permute.xlu1 %13969 }
0x4741   : > { %v13972_v19 = vunpack.i.h.bf16 %v13970_v13  ;;  %v13971_v31 = vunpack.i.l.bf16 %v13970_v13 }
0x4742   : > { %v14207_v61 = vpop.eup %14206 }
0x4743   : > { %v13232_v38 = vpop.f32.mrb[76].mxu0  ;;  %v13650_v35 = vpack.c.bf16 %v13972_v19, %v13971_v31  ;;  %v14209_v53 = vpop.eup %14208  ;;  %v9526_v54 = vmul.f32 %v14207_v61, %v14203_v47 }
0x4744   : > { %v9231_v58 = vpop.f32.mrb[77].mxu0  ;;  %v13268_v7 = vpop.f32.mrb[76].mxu1 }
0x4745   : > { %v9795_v46 = vmul.f32 0.35355338, %v13268_v7  ;;  %13235 = vmatprep.mubr.msk.f32.mxu0 %vm988_vm5, %v9231_v58  ;;  %v9785_v39 = vpop.f32.mrb[77].mxu1 }
0x4746   : > { %v9794_v49 = vmul.f32 0.35355338, %v9785_v39  ;;  %13236 = vmatmul.mubr.msk.f32.vlgmr.msra.gmra.mrb[78].mxu0 %vm988_vm5, %v13232_v38 }
0x4747   : > { %v9797_v51 = vadd.f32 %v9795_v46, %v15148_v41  ;;  %13239 = vmatpush3.msra.mxu0 %v9328_v42  ;;  %13240 = vmatprep.mubr.msk.f32.mxu0 %vm988_vm5, %v15563_v18  ;;  %v9527_v41 = vmul.f32 %v14209_v53, %v14205_v32 }
0x4748   : > { %v9796_v37 = vadd.f32 %v9794_v49, %v15150_v44  ;;  %13651 = vmatprep.subr.bf16.mxu0 %v13650_v35 }
0x4749   : > { %v9801_v30 = vsel %vm1074_vm7, %v9797_v51, -inf }
0x474a   : > { %9802 = vmax.xlane.f32.xlu1 %v9801_v30  ;;  %v9798_v48 = vsel %vm1074_vm7, %v9796_v37, -inf }
0x474b   : > { %9799 = vmax.xlane.f32.xlu0 %v9798_v48 }
0x474e   : > { %13241 = vmatmul.mubr.msk.f32.vlgmr.msra.gmra.mrb[78].mxu0 %vm988_vm5, %v15561_v6 }
0x474f   : > { %13653 = vmatpush3.bf16.msra.mxu0 %v13650_v35  ;;  %13254 = vmatprep.mubr.msk.f32.mxu0 %vm1074_vm7, %v9526_v54 }
0x4752   : > { %13255 = vmatmul.mubr.msk.f32.vlgmr.msra.gmra.mrb[80].mxu0 %vm1074_vm7, %v9527_v41  ;;  %v15668_v41 = vld [vmem:[%s15889_s6 + $0x16] ss:$0 sm:$0xff] }
0x475b   : > { %9617 = vrot.lane.b32.xlu1 %v15483_v10, %s15900_s26 }
0x475f   : > { %9909 = vrot.lane.b32.xlu1 %v15488_v60, %s15900_s26 }
0x4763   : > { %10001 = vrot.lane.b32.xlu1 %v15503_v52, %s15900_s26 }
0x47d7   : > { %v9803_v44 = vpop.xlane.xlu1 %9802 }
0x47d8   : > { %v9805_v18 = vsub.f32 %v9797_v51, %v9803_v44  ;;  %v9800_v43 = vpop.xlane.xlu0 %9799 }
0x47d9   : > { %v9804_v2 = vsub.f32 %v9796_v37, %v9800_v43 }
0x47da   : > { %v9808_v6 = vmul.f32 1.442695, %v9805_v18  ;;  %v12144_v18 = vld [vmem:[%s15889_s6 + $0x18] ss:$0 sm:$0xff] }
0x47db   : > { %v9806_v8 = vmul.f32 1.442695, %v9804_v2  ;;  %v9618_v28 = vpop.permute.xlu1 %9617 }
0x47dc   : > { %14210 = vpow2.f32 %v9808_v6  ;;  %13257 = vmatprep.subr.mxu0 %v9618_v28 }
0x47dd   : > { %13258 = vmatpush3.msra.mxu0 %v9618_v28  ;;  %14212 = vpow2.f32 %v9806_v8 }
0x47df   : > { %v9910_v63 = vpop.permute.xlu1 %9909 }
0x47e3   : > { %v10002_v0 = vpop.permute.xlu1 %10001 }
0x47e6   : > { %v14211_v27 = vpop.eup %14210 }
0x47e7   : > { %v9813_v10 = vsel %vm1074_vm7, %v14211_v27, 0.0  ;;  %v14213_v57 = vpop.eup %14212 }
0x47e8   : > { %9814 = vadd.xlane.f32.xlu0 %v9813_v10  ;;  %v9810_v60 = vsel %vm1074_vm7, %v14213_v57, 0.0 }
0x47ec   : > { %9811 = vadd.xlane.f32.xlu0 %v9810_v60 }
0x4802   : > { %13974 = vrot.lane.b32.xlu0 %v15517_v16, %s15899_s13 }
0x4825   : > { %v13256_v52 = vpop.f32.mrb[80].mxu0 }
0x4826   : > { %v9606_v11 = vpop.f32.mrb[81].mxu0 }
0x4827   : > { %13259 = vmatprep.mubr.msk.f32.mxu0 %vm988_vm5, %v9606_v11 }
0x4828   : > { %13260 = vmatmul.mubr.msk.f32.vlgmr.msra.gmra.mrb[78].mxu0 %vm988_vm5, %v13256_v52 }
0x4875   : > { %v9815_v22 = vpop.xlane.xlu0 %9814 }
0x4876   : > { %14214 = vrcp.f32 %v9815_v22 }
0x4879   : > { %v9812_v20 = vpop.xlane.xlu0 %9811 }
0x487a   : > { %14216 = vrcp.f32 %v9812_v20 }
0x487d   : > { %v13975_v15 = vpop.permute.xlu0 %13974 }
0x487e   : > { %v13977_v62 = vunpack.i.h.bf16 %v13975_v15  ;;  %v13976_v45 = vunpack.i.l.bf16 %v13975_v15 }
0x4880   : > { %v13660_v3 = vpack.c.bf16 %v13977_v62, %v13976_v45  ;;  %v14215_v33 = vpop.eup %14214 }
0x4881   : > { %v9819_v23 = vmul.f32 %v14215_v33, %v14211_v27 }
0x4882   : > { %13661 = vmatprep.subr.bf16.mxu0 %v13660_v3 }
0x4883   : > { %13663 = vmatpush3.bf16.msra.mxu0 %v13660_v3 }
0x4884   : > { %v14217_v36 = vpop.eup %14216  ;;  %13276 = vmatprep.subr.mxu0 %v9910_v63 }
0x4885   : > { %v9818_v16 = vmul.f32 %v14217_v36, %v14213_v57 }
0x4887   : > { %13273 = vmatprep.mubr.msk.f32.mxu0 %vm1074_vm7, %v9818_v16 }
0x4888   : > { %13274 = vmatmul.mubr.msk.f32.vlgmr.msra.gmra.mrb[82].mxu0 %vm1074_vm7, %v9819_v23 }
0x4889   : > { %13277 = vmatpush3.msra.mxu0 %v9910_v63 }
0x488a   : > { %13672 = vmatprep.subr.bf16.mxu0 %v14292_v34 }
0x495b   : > { %v13275_v56 = vpop.f32.mrb[82].mxu0 }
0x495c   : > { %v9898_v4 = vpop.f32.mrb[83].mxu0 }
0x495d   : > { %13278 = vmatprep.mubr.msk.f32.mxu0 %vm988_vm5, %v9898_v4 }
0x495e   : > { %13279 = vmatmul.mubr.msk.f32.vlgmr.msra.gmra.mrb[78].mxu0 %vm988_vm5, %v13275_v56 }
0x495f   : > { %13300 = vmatprep.mubr.msk.f32.mxu0 %vm14293_vm11, %v14294_v5 }
0x4a31   : > { %v13280_v14 = vpop.f32.mrb[78].mxu0 }
0x4a32   : > { %v10005_v9 = vadd.f32 %v13280_v14, %v10002_v0  ;;  %v9984_v17 = vpop.f32.mrb[79].mxu0 }
0x4a33   : > { %v10004_v26 = vadd.f32 %v10002_v0, %v9984_v17 }
0x4a34   : > { %v10007_v1 = vadd.f32 %v10005_v9, %v15496_v50  ;;  %v13983_v50 = vpack.i.bf16 %v15642_v25, %v15637_v29 }
0x4a35   : > { %v10006_v47 = vadd.f32 %v10004_v26, %v15492_v12  ;;  %v15649_v12 = vld [vmem:[%s15888_s5 + $0x60] sm:$0xff] }
0x4a36   : > { %v10012_v32 = vsel %vm895_vm3, %v10007_v1, 0.0  ;;  %v13978_v55 = vpack.i.bf16 %v15654_v24, %v15649_v12  ;;  %v13664_v44 = vpack.c.bf16 %v15654_v24, %v15649_v12 }
0x4a37   : > { %10013 = vadd.xlane.f32.xlu1 %v10012_v32  ;;  %v10009_v21 = vsel %vm895_vm3, %v10006_v47, 0.0 }
0x4a38   : > { %10010 = vadd.xlane.f32.xlu0 %v10009_v21  ;;  %13665 = vmatprep.subr.bf16.mxu1 %v13664_v44 }
0x4a39   : > { %13667 = vmatpush3.bf16.msra.mxu1 %v13664_v44 }
0x4a48   : > { %13984 = vrot.lane.b32.xlu1 %v13983_v50, %s14279_s16 }
0x4a4e   : > { %13979 = vrot.lane.b32.xlu0 %v13978_v55, %s14279_s16 }
0x4ac4   : > { %v10014_v42 = vpop.xlane.xlu1 %10013 }
0x4ac5   : > { %v10016_v13 = vmul.f32 0.03125, %v10014_v42  ;;  %v10011_v19 = vpop.xlane.xlu0 %10010 }
0x4ac6   : > { %v10015_v31 = vmul.f32 0.03125, %v10011_v19 }
0x4ac7   : > { %v10018_v38 = vsub.f32 %v10007_v1, %v10016_v13 }
0x4ac8   : > { %v10017_v58 = vsub.f32 %v10006_v47, %v10015_v31  ;;  %v13985_v7 = vpop.permute.xlu1 %13984 }
0x4ac9   : > { %v13980_v46 = vpop.permute.xlu0 %13979  ;;  %v10020_v39 = vmul.f32 %v10018_v38, %v10018_v38  ;;  %v13987_v35 = vunpack.i.h.bf16 %v13985_v7  ;;  %v13986_v37 = vunpack.i.l.bf16 %v13985_v7 }
0x4aca   : > { %v13982_v49 = vunpack.i.h.bf16 %v13980_v46  ;;  %v13981_v51 = vunpack.i.l.bf16 %v13980_v46  ;;  %v10019_v30 = vmul.f32 %v10017_v58, %v10017_v58 }
0x4acb   : > { %v10024_v61 = vsel %vm895_vm3, %v10020_v39, 0.0  ;;  %v13676_v54 = vpack.c.bf16 %v13987_v35, %v13986_v37 }
0x4acc   : > { %v13673_v48 = vpack.c.bf16 %v13982_v49, %v13981_v51  ;;  %10025 = vadd.xlane.f32.xlu1 %v10024_v61  ;;  %v10021_v53 = vsel %vm895_vm3, %v10019_v30, 0.0 }
0x4acd   : > { %10022 = vadd.xlane.f32.xlu0 %v10021_v53 }
0x4ace   : > { %13674 = vmatpush3.bf16.msra.mxu0 %v13673_v48 }
0x4acf   : > { %13675 = vmatprep.subr.bf16.mxu0 %v14292_v34 }
0x4ad2   : > { %13677 = vmatpush3.bf16.msra.mxu0 %v13676_v54 }
0x4ad5   : > { %13301 = vmatmul.mubr.msk.f32.vlgmr.msra.gmra.mrb[84].mxu0 %vm895_vm3, %v15289_v59  ;;  %v13668_v59 = vpack.c.bf16 %v15642_v25, %v15637_v29 }
0x4ad7   : > { %13669 = vmatprep.subr.bf16.mxu1 %v13668_v59 }
0x4ad8   : > { %13671 = vmatpush3.bf16.msra.mxu1 %v13668_v59 }
0x4add   : > { %10156 = vrot.lane.b32.xlu1 %v15668_v41, %s14279_s16 }
0x4ae3   : > { %10042 = vrot.lane.b32.xlu0 %v12144_v18, %s14279_s16 }
0x4b59   : > { %v10026_v43 = vpop.xlane.xlu1 %10025 }
0x4b5a   : > { %v10028_v2 = vmul.f32 0.03125, %v10026_v43  ;;  %v10023_v6 = vpop.xlane.xlu0 %10022 }
0x4b5b   : > { %v10027_v8 = vmul.f32 0.03125, %v10023_v6 }
0x4b5c   : > { %v10030_v28 = vadd.f32 1e-05, %v10028_v2 }
0x4b5d   : > { %v10029_v27 = vadd.f32 1e-05, %v10027_v8  ;;  %v10157_v45 = vpop.permute.xlu1 %10156 }
0x4b5e   : > { %14218 = vrsqrt.f32 %v10030_v28  ;;  %v10043_v22 = vpop.permute.xlu0 %10042 }
0x4b5f   : > { %14220 = vrsqrt.f32 %v10029_v27 }
0x4b68   : > { %v14219_v10 = vpop.eup %14218 }
0x4b69   : > { %v14221_v57 = vpop.eup %14220  ;;  %v10034_v60 = vmul.f32 %v14219_v10, %v10018_v38 }
0x4b6a   : > { %v10033_v52 = vmul.f32 %v14221_v57, %v10017_v58 }
0x4b6b   : > { %v10040_v11 = vmul.f32 %v12144_v18, %v10034_v60 }
0x4b6c   : > { %v10039_v20 = vmul.f32 %v12144_v18, %v10033_v52 }
0x4b6d   : > { %v15682_v62 = vadd.f32 %v10043_v22, %v10040_v11 }
0x4b6e   : > { %v15680_v15 = vadd.f32 %v10043_v22, %v10039_v20 }
0x4b70   : > { %13289 = vmatprep.mubr.msk.f32.mxu1 %vm895_vm3, %v15680_v15 }
0x4b71   : > { %13290 = vmatmul.mubr.msk.f32.vlgmr.msra.gmra.mrb[78].mxu1 %vm895_vm3, %v15682_v62 }
0x4ba8   : > { %v10225_v3 = vpop.f32.mrb[84].mxu0 }
0x4ba9   : > { %v10226_v63 = vadd.f32 %v10225_v3, %v10157_v45  ;;  %v13302_v33 = vpop.f32.mrb[85].mxu0 }
0x4bab   : > { %10230 = vrot.lane.b32.xlu0 %v10226_v63, %s15900_s26 }
0x4c1d   : > { %v10231_v4 = vpop.permute.xlu0 %10230 }
0x4c44   : > { %v13291_v36 = vpop.f32.mrb[78].mxu1 }
0x4c45   : > { %v10134_v16 = vadd.f32 %v13291_v36, %v15668_v41  ;;  %v10128_v23 = vpop.f32.mrb[79].mxu1 }
0x4c46   : > { %v10129_v56 = vadd.f32 %v15668_v41, %v10128_v23 }
0x4c47   : > { %10138 = vst.msk [vmem:[#allocation2 + $0x8] sm:$0xff] %vm895_vm3, %v10134_v16 }
0x4c48   : > { %10137 = vst.msk [vmem:[#allocation2] sm:$0xff] %vm895_vm3, %v10129_v56 }
0x4c49   : > { %10233 = vst.msk [vmem:[#allocation2] sm:$0xf] %vm7265_vm14, %v10231_v4 }
0x4c4e   : > { %v15704_v9 = vld [vmem:[#allocation2 + $0x8] sm:$0xff] }
0x4c50   : > { %v15694_v0 = vld [vmem:[#allocation2] sm:$0xf] }
0x4c51   : > { %v15696_v14 = vld [vmem:[#allocation2] sm:$0xff]  ;;  %10437 = vrot.lane.b32.xlu0 %v15694_v0, %s14280_s17  ;;  %10238 = vrot.lane.b32.xlu1 %v15694_v0, %s14279_s16 }
0x4c52   : > { %13305 = vmatprep.mubr.msk.f32.mxu1 %vm988_vm5, %v15696_v14 }
0x4c55   : > { %10435 = vrot.lane.b32.xlu0 %v15704_v9, %s14278_s15  ;;  %10433 = vrot.lane.b32.xlu1 %v15696_v14, %s14278_s15 }
0x4cc3   : > { %v10438_v17 = vpop.permute.xlu0 %10437  ;;  %v10239_v26 = vpop.permute.xlu1 %10238 }
0x4cc4   : > { %13303 = vmatprep.subr.msk.mxu1 %vm988_vm5, %v10239_v26  ;;  %13313 = vmatprep.subr.msk.mxu0 %vm988_vm5, %v10438_v17 }
0x4cc5   : > { %13304 = vmatpush3.xpose.msk.msra.mxu1 %vm988_vm5, %v10239_v26  ;;  %13314 = vmatpush3.xpose.msk.msra.mxu0 %vm988_vm5, %v10438_v17 }
0x4cc7   : > { %v10436_v1 = vpop.permute.xlu0 %10435  ;;  %v10434_v47 = vpop.permute.xlu1 %10433 }
0x4cc8   : > { %13306 = vmatmul.mubr.msk.f32.vlgmr.msra.gmra.mrb[80].mxu1 %vm988_vm5, %v15704_v9  ;;  %13315 = vmatprep.mubr.msk.f32.mxu0 %vm988_vm5, %v10434_v47 }
0x4cc9   : > { %13316 = vmatmul.mubr.msk.f32.vlgmr.msra.gmra.mrb[86].mxu0 %vm988_vm5, %v10436_v1 }
0x4d9b   : > { %v13307_v32 = vpop.f32.mrb[80].mxu1 }
0x4d9c   : > { %v10324_v21 = vmul.f32 0.35355338, %v13307_v32  ;;  %v10314_v50 = vpop.f32.mrb[81].mxu1  ;;  %v13317_v55 = vpop.f32.mrb[86].mxu0 }
0x4d9d   : > { %v10323_v42 = vmul.f32 0.35355338, %v10314_v50  ;;  %v10511_v13 = vpop.f32.mrb[87].mxu0  ;;  %v10521_v38 = vmul.f32 0.35355338, %v13317_v55 }
0x4d9e   : > { %v10520_v19 = vmul.f32 0.35355338, %v10511_v13  ;;  %v10328_v31 = vsel %vm339_vm1, %v10324_v21, -inf }
0x4d9f   : > { %10329 = vmax.xlane.f32.xlu0 %v10328_v31  ;;  %v10325_v58 = vsel %vm339_vm1, %v10323_v42, -inf  ;;  %v10525_v46 = vsel %vm339_vm1, %v10521_v38, -inf }
0x4da0   : > { %10326 = vmax.xlane.f32.xlu1 %v10325_v58  ;;  %v10522_v7 = vsel %vm339_vm1, %v10520_v19, -inf }
0x4da3   : > { %10523 = vmax.xlane.f32.xlu0 %v10522_v7 }
0x4da4   : > { %10526 = vmax.xlane.f32.xlu1 %v10525_v46 }
0x4e2c   : > { %v10330_v39 = vpop.xlane.xlu0 %10329 }
0x4e2d   : > { %v10332_v35 = vsub.f32 %v10324_v21, %v10330_v39  ;;  %v10327_v49 = vpop.xlane.xlu1 %10326 }
0x4e2e   : > { %v10331_v51 = vsub.f32 %v10323_v42, %v10327_v49 }
0x4e2f   : > { %v10335_v37 = vmul.f32 1.442695, %v10332_v35 }
0x4e30   : > { %v10333_v30 = vmul.f32 1.442695, %v10331_v51  ;;  %v10524_v6 = vpop.xlane.xlu0 %10523 }
0x4e31   : > { %14222 = vpow2.f32 %v10335_v37  ;;  %v10527_v61 = vpop.xlane.xlu1 %10526  ;;  %v10528_v8 = vsub.f32 %v10520_v19, %v10524_v6 }
0x4e32   : > { %14224 = vpow2.f32 %v10333_v30  ;;  %v10529_v48 = vsub.f32 %v10521_v38, %v10527_v61 }
0x4e33   : > { %v10530_v28 = vmul.f32 1.442695, %v10528_v8 }
0x4e34   : > { %v10532_v53 = vmul.f32 1.442695, %v10529_v48 }
0x4e36   : > { %14226 = vpow2.f32 %v10532_v53 }
0x4e37   : > { %14228 = vpow2.f32 %v10530_v28 }
0x4e3b   : > { %v14223_v54 = vpop.eup %14222 }
0x4e3c   : > { %v14225_v44 = vpop.eup %14224  ;;  %v10340_v18 = vsel %vm339_vm1, %v14223_v54, 0.0 }
0x4e3d   : > { %10341 = vadd.xlane.f32.xlu1 %v10340_v18  ;;  %v10337_v59 = vsel %vm339_vm1, %v14225_v44, 0.0 }
0x4e3e   : > { %10338 = vadd.xlane.f32.xlu0 %v10337_v59 }
0x4e40   : > { %v14227_v43 = vpop.eup %14226 }
0x4e41   : > { %v10537_v2 = vsel %vm339_vm1, %v14227_v43, 0.0  ;;  %v14229_v27 = vpop.eup %14228 }
0x4e42   : > { %10538 = vadd.xlane.f32.xlu1 %v10537_v2  ;;  %v10534_v10 = vsel %vm339_vm1, %v14229_v27, 0.0 }
0x4e53   : > { %10544 = vrot.lane.b32.xlu1 %v15694_v0, %s14283_s20 }
0x4e54   : > { %10347 = vrot.lane.b32.xlu0 %v15694_v0, %s14285_s22 }
0x4e57   : > { %10804 = vrot.lane.b32.xlu1 %v15694_v0, %s14282_s19 }
0x4e5b   : > { %10802 = vrot.lane.b32.xlu1 %v15704_v9, %s14281_s18 }
0x4e73   : > { %10535 = vadd.xlane.f32.xlu0 %v10534_v10 }
0x4e89   : > { %10800 = vrot.lane.b32.xlu0 %v15696_v14, %s14281_s18 }
0x4eca   : > { %v10342_v57 = vpop.xlane.xlu1 %10341 }
0x4ecb   : > { %14230 = vrcp.f32 %v10342_v57  ;;  %v10339_v60 = vpop.xlane.xlu0 %10338 }
0x4ecc   : > { %14232 = vrcp.f32 %v10339_v60 }
0x4ecf   : > { %v10539_v52 = vpop.xlane.xlu1 %10538  ;;  %v10348_v11 = vpop.permute.xlu0 %10347 }
0x4ed0   : > { %13308 = vmatprep.subr.msk.mxu1 %vm359_vm0, %v10348_v11  ;;  %14234 = vrcp.f32 %v10539_v52 }
0x4ed1   : > { %13309 = vmatpush3.msk.msra.mxu1 %vm359_vm0, %v10348_v11 }
0x4ed3   : > { %v10545_v22 = vpop.permute.xlu1 %10544 }
0x4ed4   : > { %13318 = vmatprep.subr.msk.mxu1 %vm359_vm0, %v10545_v22 }
0x4ed5   : > { %v14231_v20 = vpop.eup %14230 }
0x4ed6   : > { %v14233_v45 = vpop.eup %14232  ;;  %v10346_v63 = vmul.f32 %v14231_v20, %v14223_v54 }
0x4ed7   : > { %v10345_v3 = vmul.f32 %v14233_v45, %v14225_v44  ;;  %v10805_v33 = vpop.permute.xlu1 %10804 }
0x4ed9   : > { %13310 = vmatprep.mubr.msk.f32.mxu1 %vm339_vm1, %v10345_v3 }
0x4eda   : > { %13311 = vmatmul.mubr.msk.f32.vlgmr.msra.gmra.mrb[82].mxu1 %vm339_vm1, %v10346_v63  ;;  %v14235_v16 = vpop.eup %14234 }
0x4edb   : > { %13319 = vmatpush3.msk.msra.mxu1 %vm359_vm0, %v10545_v22  ;;  %v10543_v4 = vmul.f32 %v14235_v16, %v14227_v43  ;;  %v10803_v26 = vpop.permute.xlu1 %10802 }
0x4edc   : > { %13333 = vmatprep.subr.msk.mxu1 %vm988_vm5, %v10805_v33 }
0x4f00   : > { %v10536_v36 = vpop.xlane.xlu0 %10535 }
0x4f01   : > { %14236 = vrcp.f32 %v10536_v36 }
0x4f04   : > { %v10801_v17 = vpop.permute.xlu0 %10800 }
0x4f0b   : > { %v14237_v23 = vpop.eup %14236 }
0x4f0c   : > { %v10542_v56 = vmul.f32 %v14237_v23, %v14229_v27 }
0x4f0e   : > { %13320 = vmatprep.mubr.msk.f32.mxu1 %vm339_vm1, %v10542_v56 }
0x4f0f   : > { %13321 = vmatmul.mubr.msk.f32.vlgmr.msra.gmra.mrb[84].mxu1 %vm339_vm1, %v10543_v4 }
0x4f10   : > { %13334 = vmatpush3.xpose.msk.msra.mxu1 %vm988_vm5, %v10805_v33  ;;  %13335 = vmatprep.mubr.msk.f32.mxu1 %vm988_vm5, %v10801_v17 }
0x4f13   : > { %13336 = vmatmul.mubr.msk.f32.vlgmr.msra.gmra.mrb[86].mxu1 %vm988_vm5, %v10803_v26 }
0x4fad   : > { %v15748_v1 = vpop.f32.mrb[82].mxu1 }
0x4fae   : > { %v15750_v47 = vpop.f32.mrb[83].mxu1 }
0x4fe2   : > { %v15752_v32 = vpop.f32.mrb[84].mxu1 }
0x4fe3   : > { %v10620_v21 = vpop.f32.mrb[85].mxu1 }
0x4fe4   : > { %13325 = vmatprep.mubr.msk.f32.mxu0 %vm988_vm5, %v10620_v21 }
0x4fe6   : > { %v13337_v50 = vpop.f32.mrb[86].mxu1 }
0x4fe7   : > { %v10888_v55 = vmul.f32 0.35355338, %v13337_v50  ;;  %v10878_v42 = vpop.f32.mrb[87].mxu1 }
0x4fe8   : > { %v10887_v13 = vmul.f32 0.35355338, %v10878_v42 }
0x4fe9   : > { %v10892_v19 = vsel %vm339_vm1, %v10888_v55, -inf }
0x4fea   : > { %10893 = vmax.xlane.f32.xlu1 %v10892_v19  ;;  %v10889_v31 = vsel %vm339_vm1, %v10887_v13, -inf }
0x4feb   : > { %10890 = vmax.xlane.f32.xlu0 %v10889_v31 }
0x4ffb   : > { %10911 = vrot.lane.b32.xlu1 %v15694_v0, %s15901_s27 }
0x4fff   : > { %11084 = vrot.lane.b32.xlu1 %v15696_v14, %s14286_s23 }
0x5003   : > { %11086 = vrot.lane.b32.xlu1 %v15704_v9, %s14286_s23 }
0x5077   : > { %v10894_v38 = vpop.xlane.xlu1 %10893 }
0x5078   : > { %v10896_v58 = vsub.f32 %v10888_v55, %v10894_v38  ;;  %v10891_v7 = vpop.xlane.xlu0 %10890 }
0x5079   : > { %v10895_v46 = vsub.f32 %v10887_v13, %v10891_v7 }
0x507a   : > { %v10899_v39 = vmul.f32 1.442695, %v10896_v58  ;;  %v12182_v58 = vld [vmem:[%s15889_s6 + $0x19] ss:$0 sm:$0xff] }
0x507b   : > { %v10897_v35 = vmul.f32 1.442695, %v10895_v46  ;;  %v10912_v49 = vpop.permute.xlu1 %10911 }
0x507c   : > { %14238 = vpow2.f32 %v10899_v39  ;;  %13338 = vmatprep.subr.msk.mxu1 %vm359_vm0, %v10912_v49 }
0x507d   : > { %13339 = vmatpush3.msk.msra.mxu1 %vm359_vm0, %v10912_v49  ;;  %14240 = vpow2.f32 %v10897_v35 }
0x507f   : > { %v11085_v44 = vpop.permute.xlu1 %11084 }
0x5083   : > { %v11087_v43 = vpop.permute.xlu1 %11086 }
0x5086   : > { %v14239_v51 = vpop.eup %14238 }
0x5087   : > { %v10904_v37 = vsel %vm339_vm1, %v14239_v51, 0.0  ;;  %v14241_v14 = vpop.eup %14240 }
0x5088   : > { %10905 = vadd.xlane.f32.xlu0 %v10904_v37  ;;  %v10901_v9 = vsel %vm339_vm1, %v14241_v14, 0.0 }
0x508c   : > { %10902 = vadd.xlane.f32.xlu0 %v10901_v9  ;;  %v11420_v9 = vld [vmem:[%s15888_s5 + $0x68] sm:$0xff] }
0x50a2   : > { %11088 = vrot.lane.b32.xlu0 %v15694_v0, %s14284_s21 }
0x5115   : > { %v10906_v30 = vpop.xlane.xlu0 %10905 }
0x5116   : > { %14242 = vrcp.f32 %v10906_v30  ;;  %v11421_v30 = vld [vmem:[%s15888_s5 + $0xe0] sm:$0xff] }
0x5119   : > { %v10903_v61 = vpop.xlane.xlu0 %10902 }
0x511a   : > { %14244 = vrcp.f32 %v10903_v61  ;;  %v13988_v61 = vpack.i.bf16 %v11421_v30, %v11420_v9 }
0x511d   : > { %v11089_v48 = vpop.permute.xlu0 %11088 }
0x511e   : > { %13348 = vmatprep.subr.msk.mxu1 %vm988_vm5, %v11089_v48 }
0x5120   : > { %v14243_v53 = vpop.eup %14242 }
0x5121   : > { %v10910_v59 = vmul.f32 %v14243_v53, %v14239_v51  ;;  %v11422_v53 = vld [vmem:[%s15888_s5 + $0x158] sm:$0xff] }
0x5124   : > { %v14245_v54 = vpop.eup %14244 }
0x5125   : > { %v10909_v18 = vmul.f32 %v14245_v54, %v14241_v14  ;;  %v11423_v54 = vld [vmem:[%s15888_s5 + $0x1d0] sm:$0xff] }
0x5127   : > { %13340 = vmatprep.mubr.msk.f32.mxu1 %vm339_vm1, %v10909_v18  ;;  %v13993_v18 = vpack.i.bf16 %v11423_v54, %v11422_v53 }
0x5128   : > { %13341 = vmatmul.mubr.msk.f32.vlgmr.msra.gmra.mrb[88].mxu1 %vm339_vm1, %v10910_v59 }
0x5129   : > { %13349 = vmatpush3.xpose.msk.msra.mxu1 %vm988_vm5, %v11089_v48  ;;  %13350 = vmatprep.mubr.msk.f32.mxu1 %vm988_vm5, %v11085_v44  ;;  %v13678_v48 = vpack.c.bf16 %v11421_v30, %v11420_v9  ;;  %v13682_v44 = vpack.c.bf16 %v11423_v54, %v11422_v53 }
0x512b   : > { %13679 = vmatprep.subr.bf16.mxu1 %v13678_v48 }
0x512c   : > { %13351 = vmatmul.mubr.msk.f32.vlgmr.msra.gmra.mrb[90].mxu1 %vm988_vm5, %v11087_v43 }
0x512d   : > { %13681 = vmatpush3.bf16.msra.mxu1 %v13678_v48 }
0x512e   : > { %13683 = vmatprep.subr.bf16.mxu1 %v13682_v44 }
0x5131   : > { %13685 = vmatpush3.bf16.msra.mxu1 %v13682_v44 }
0x5132   : > { %13694 = vmatprep.subr.bf16.mxu1 %v14292_v34 }
0x51fb   : > { %v13342_v2 = vpop.f32.mrb[88].mxu1 }
0x51fc   : > { %v10987_v6 = vpop.f32.mrb[89].mxu1 }
0x51ff   : > { %v13352_v8 = vpop.f32.mrb[90].mxu1 }
0x5200   : > { %v11172_v28 = vmul.f32 0.35355338, %v13352_v8  ;;  %v11162_v27 = vpop.f32.mrb[91].mxu1 }
0x5201   : > { %v11171_v10 = vmul.f32 0.35355338, %v11162_v27 }
0x5202   : > { %v11176_v57 = vsel %vm339_vm1, %v11172_v28, -inf }
0x5203   : > { %11177 = vmax.xlane.f32.xlu1 %v11176_v57  ;;  %v11173_v60 = vsel %vm339_vm1, %v11171_v10, -inf }
0x5204   : > { %11174 = vmax.xlane.f32.xlu0 %v11173_v60 }
0x5214   : > { %10631 = vrot.lane.b32.xlu1 %v15654_v24, %s15900_s26 }
0x5218   : > { %10998 = vrot.lane.b32.xlu1 %v15637_v29, %s15900_s26 }
0x521c   : > { %11195 = vrot.lane.b32.xlu1 %v15694_v0, %s15899_s13 }
0x5220   : > { %11374 = vrot.lane.b32.xlu1 %v15668_v41, %s15900_s26 }
0x5290   : > { %v11178_v52 = vpop.xlane.xlu1 %11177 }
0x5291   : > { %v11180_v11 = vsub.f32 %v11172_v28, %v11178_v52  ;;  %v11175_v22 = vpop.xlane.xlu0 %11174 }
0x5292   : > { %v11179_v20 = vsub.f32 %v11171_v10, %v11175_v22 }
0x5293   : > { %v11183_v45 = vmul.f32 1.442695, %v11180_v11 }
0x5294   : > { %v11181_v3 = vmul.f32 1.442695, %v11179_v20  ;;  %v10632_v63 = vpop.permute.xlu1 %10631 }
0x5295   : > { %14246 = vpow2.f32 %v11183_v45  ;;  %13323 = vmatprep.subr.mxu0 %v10632_v63 }
0x5296   : > { %13324 = vmatpush3.msra.mxu0 %v10632_v63  ;;  %14248 = vpow2.f32 %v11181_v3  ;;  %v12183_v3 = vld [vmem:[%s15889_s6 + $0x17] ss:$0 sm:$0xff] }
0x5297   : > { %13326 = vmatmul.mubr.msk.f32.vlgmr.msra.gmra.mrb[88].mxu0 %vm988_vm5, %v15752_v32 }
0x5298   : > { %13330 = vmatprep.mubr.msk.f32.mxu0 %vm988_vm5, %v15750_v47  ;;  %v10999_v16 = vpop.permute.xlu1 %10998 }
0x529c   : > { %v11196_v56 = vpop.permute.xlu1 %11195 }
0x529f   : > { %v14247_v29 = vpop.eup %14246 }
0x52a0   : > { %v11188_v24 = vsel %vm339_vm1, %v14247_v29, 0.0  ;;  %v14249_v41 = vpop.eup %14248  ;;  %v11375_v32 = vpop.permute.xlu1 %11374 }
0x52a1   : > { %11189 = vadd.xlane.f32.xlu0 %v11188_v24  ;;  %v11185_v0 = vsel %vm339_vm1, %v14249_v41, 0.0 }
0x52a5   : > { %11186 = vadd.xlane.f32.xlu0 %v11185_v0 }
0x52bb   : > { %10716 = vrot.lane.b32.xlu0 %v15649_v12, %s15900_s26 }
0x52bf   : > { %11282 = vrot.lane.b32.xlu0 %v15642_v25, %s15900_s26 }
0x532e   : > { %v11190_v33 = vpop.xlane.xlu0 %11189 }
0x5332   : > { %v11187_v36 = vpop.xlane.xlu0 %11186 }
0x5333   : > { %14250 = vrcp.f32 %v11187_v36 }
0x5334   : > { %14252 = vrcp.f32 %v11190_v33 }
0x5336   : > { %v10717_v23 = vpop.permute.xlu0 %10716 }
0x5337   : > { %13328 = vmatprep.subr.mxu0 %v10717_v23 }
0x5338   : > { %13329 = vmatpush3.msra.mxu0 %v10717_v23 }
0x5339   : > { %13331 = vmatmul.mubr.msk.f32.vlgmr.msra.gmra.mrb[88].mxu0 %vm988_vm5, %v15748_v1  ;;  %13343 = vmatprep.subr.mxu0 %v10999_v16 }
0x533a   : > { %13344 = vmatpush3.msra.mxu0 %v10999_v16  ;;  %13345 = vmatprep.mubr.msk.f32.mxu0 %vm988_vm5, %v10987_v6  ;;  %v11283_v26 = vpop.permute.xlu0 %11282 }
0x533b   : > { %13353 = vmatprep.subr.msk.mxu0 %vm359_vm0, %v11196_v56 }
0x533d   : > { %v14251_v12 = vpop.eup %14250 }
0x533e   : > { %v14253_v25 = vpop.eup %14252  ;;  %v11193_v4 = vmul.f32 %v14251_v12, %v14249_v41 }
0x533f   : > { %v11194_v17 = vmul.f32 %v14253_v25, %v14247_v29 }
0x5341   : > { %13346 = vmatmul.mubr.msk.f32.vlgmr.msra.gmra.mrb[88].mxu0 %vm988_vm5, %v13342_v2 }
0x5342   : > { %13354 = vmatpush3.msk.msra.mxu0 %vm359_vm0, %v11196_v56  ;;  %13355 = vmatprep.mubr.msk.f32.mxu0 %vm339_vm1, %v11193_v4 }
0x5343   : > { %13358 = vmatprep.subr.mxu0 %v11283_v26 }
0x5345   : > { %13356 = vmatmul.mubr.msk.f32.vlgmr.msra.gmra.mrb[90].mxu0 %vm339_vm1, %v11194_v17 }
0x5346   : > { %13359 = vmatpush3.msra.mxu0 %v11283_v26 }
0x5418   : > { %v13357_v1 = vpop.f32.mrb[90].mxu0 }
0x5419   : > { %v11271_v47 = vpop.f32.mrb[91].mxu0 }
0x541a   : > { %13360 = vmatprep.mubr.msk.f32.mxu0 %vm988_vm5, %v11271_v47 }
0x541b   : > { %13361 = vmatmul.mubr.msk.f32.vlgmr.msra.gmra.mrb[88].mxu0 %vm988_vm5, %v13357_v1 }
0x54ee   : > { %v13362_v21 = vpop.f32.mrb[88].mxu0 }
0x54ef   : > { %v11378_v50 = vadd.f32 %v13362_v21, %v11375_v32  ;;  %v11357_v55 = vpop.f32.mrb[89].mxu0 }
0x54f0   : > { %v11377_v42 = vadd.f32 %v11375_v32, %v11357_v55 }
0x54f1   : > { %v11380_v13 = vadd.f32 %v11378_v50, %v15682_v62 }
0x54f2   : > { %v11379_v19 = vadd.f32 %v11377_v42, %v15680_v15 }
0x54f3   : > { %v11385_v31 = vsel %vm895_vm3, %v11380_v13, 0.0 }
0x54f4   : > { %11386 = vadd.xlane.f32.xlu1 %v11385_v31  ;;  %v11382_v38 = vsel %vm895_vm3, %v11379_v19, 0.0 }
0x54f5   : > { %11383 = vadd.xlane.f32.xlu0 %v11382_v38 }
0x5505   : > { %11415 = vrot.lane.b32.xlu1 %v12182_v58, %s14279_s16 }
0x5509   : > { %13994 = vrot.lane.b32.xlu1 %v13993_v18, %s14279_s16 }
0x550d   : > { %11581 = vrot.lane.b32.xlu1 %v12183_v3, %s14279_s16 }
0x5581   : > { %v11387_v7 = vpop.xlane.xlu1 %11386 }
0x5582   : > { %v11389_v46 = vmul.f32 0.03125, %v11387_v7  ;;  %v11384_v39 = vpop.xlane.xlu0 %11383 }
0x5583   : > { %v11388_v35 = vmul.f32 0.03125, %v11384_v39 }
0x5584   : > { %v11391_v49 = vsub.f32 %v11380_v13, %v11389_v46 }
0x5585   : > { %v11390_v62 = vsub.f32 %v11379_v19, %v11388_v35  ;;  %v11416_v57 = vpop.permute.xlu1 %11415 }
0x5586   : > { %v11393_v37 = vmul.f32 %v11391_v49, %v11391_v49 }
0x5587   : > { %v11392_v51 = vmul.f32 %v11390_v62, %v11390_v62 }
0x5588   : > { %v11397_v14 = vsel %vm895_vm3, %v11393_v37, 0.0 }
0x5589   : > { %v11394_v15 = vsel %vm895_vm3, %v11392_v51, 0.0  ;;  %v13995_v0 = vpop.permute.xlu1 %13994 }
0x558a   : > { %11395 = vadd.xlane.f32.xlu0 %v11394_v15  ;;  %v13997_v33 = vunpack.i.h.bf16 %v13995_v0  ;;  %v13996_v36 = vunpack.i.l.bf16 %v13995_v0 }
0x558c   : > { %v13690_v16 = vpack.c.bf16 %v13997_v33, %v13996_v36 }
0x558e   : > { %11398 = vadd.xlane.f32.xlu0 %v11397_v14 }
0x55a4   : > { %13989 = vrot.lane.b32.xlu0 %v13988_v61, %s14279_s16 }
0x5617   : > { %v11396_v59 = vpop.xlane.xlu0 %11395 }
0x5618   : > { %v11400_v43 = vmul.f32 0.03125, %v11396_v59 }
0x561a   : > { %v11402_v2 = vadd.f32 1e-05, %v11400_v43 }
0x561b   : > { %v11399_v6 = vpop.xlane.xlu0 %11398 }
0x561c   : > { %14254 = vrsqrt.f32 %v11402_v2  ;;  %v11401_v8 = vmul.f32 0.03125, %v11399_v6 }
0x561e   : > { %v11403_v28 = vadd.f32 1e-05, %v11401_v8 }
0x561f   : > { %v13990_v63 = vpop.permute.xlu0 %13989 }
0x5620   : > { %14256 = vrsqrt.f32 %v11403_v28  ;;  %v13992_v29 = vunpack.i.h.bf16 %v13990_v63  ;;  %v13991_v24 = vunpack.i.l.bf16 %v13990_v63 }
0x5622   : > { %v13686_v41 = vpack.c.bf16 %v13992_v29, %v13991_v24  ;;  %v11582_v29 = vpop.permute.xlu1 %11581 }
0x5624   : > { %13687 = vmatprep.subr.bf16.mxu0 %v13686_v41 }
0x5625   : > { %13689 = vmatpush3.bf16.msra.mxu0 %v13686_v41 }
0x5626   : > { %v14255_v27 = vpop.eup %14254  ;;  %13691 = vmatprep.subr.bf16.mxu0 %v13690_v16 }
0x5627   : > { %v11406_v10 = vmul.f32 %v14255_v27, %v11390_v62 }
0x5629   : > { %v11412_v60 = vmul.f32 %v12182_v58, %v11406_v10  ;;  %13693 = vmatpush3.bf16.msra.mxu0 %v13690_v16 }
0x562a   : > { %v14257_v52 = vpop.eup %14256 }
0x562b   : > { %v11407_v11 = vmul.f32 %v14257_v52, %v11391_v49  ;;  %v11418_v22 = vadd.f32 %v11416_v57, %v11412_v60 }
0x562d   : > { %v11413_v20 = vmul.f32 %v12182_v58, %v11407_v11  ;;  %13371 = vmatprep.mubr.msk.f32.mxu1 %vm895_vm3, %v11418_v22 }
0x562f   : > { %v15831_v45 = vadd.f32 %v11416_v57, %v11413_v20 }
0x5631   : > { %13372 = vmatmul.mubr.msk.f32.vlgmr.msra.gmra.mrb[92].mxu1 %vm895_vm3, %v15831_v45 }
0x5632   : > { %13393 = vmatprep.mubr.msk.f32.mxu1 %vm14293_vm11, %v14294_v5 }
0x5704   : > { %v13373_v23 = vpop.f32.mrb[92].mxu1 }
0x5705   : > { %v11507_v5 = vadd.f32 %v13373_v23, %v12183_v3  ;;  %v11501_v56 = vpop.f32.mrb[93].mxu1 }
0x5706   : > { %v11502_v12 = vadd.f32 %v12183_v3, %v11501_v56 }
0x5707   : > { %v11513_v25 = vmul.f32 0.70710677, %v11507_v5  ;;  %v11511_v20 = vmul.f32 0.5, %v11507_v5 }
0x5708   : > { %v11512_v4 = vmul.f32 0.70710677, %v11502_v12  ;;  %v11510_v11 = vmul.f32 0.5, %v11502_v12 }
0x5709   : > { %v11519_v17 = vand.u32 2147483647, %v11513_v25  ;;  %vm11515_vm0 = vcmp.ge.f32.partialorder %v11513_v25, 0.0 }
0x570a   : > { %v11518_v26 = vand.u32 2147483647, %v11512_v4  ;;  %vm11514_vm4 = vcmp.ge.f32.partialorder %v11512_v4, 0.0  ;;  %v11517_v28 = vsel %vm11515_vm0, 1.0, %v14290_v40 }
0x570b   : > { %v11521_v1 = vmul.f32 0.3275911, %v11519_v17  ;;  %v11547_v50 = vsub.f32 0.0, %v11519_v17  ;;  %v11516_v57 = vsel %vm11514_vm4, 1.0, %v14290_v40  ;;  %v12188_v40 = vld [vmem:[%s15889_s6 + $0x1a] ss:$0 sm:$0xff] }
0x570c   : > { %v11520_v47 = vmul.f32 0.3275911, %v11518_v26  ;;  %v11546_v55 = vsub.f32 0.0, %v11518_v26 }
0x570d   : > { %v11523_v32 = vadd.f32 1.0, %v11521_v1  ;;  %v11549_v13 = vmul.f32 %v11547_v50, %v11519_v17 }
0x570e   : > { %v11522_v21 = vadd.f32 1.0, %v11520_v47  ;;  %v11548_v38 = vmul.f32 %v11546_v55, %v11518_v26 }
0x570f   : > { %14258 = vrcp.f32 %v11523_v32  ;;  %v11552_v46 = vmul.f32 1.442695, %v11549_v13 }
0x5710   : > { %14260 = vrcp.f32 %v11522_v21  ;;  %v11550_v49 = vmul.f32 1.442695, %v11548_v38  ;;  %v11713_v38 = vld [vmem:[%s15888_s5 + $0x70] sm:$0xff] }
0x5711   : > { %14262 = vpow2.f32 %v11552_v46 }
0x5712   : > { %14264 = vpow2.f32 %v11550_v49 }
0x5719   : > { %v14259_v42 = vpop.eup %14258 }
0x571a   : > { %v14261_v19 = vpop.eup %14260  ;;  %v11529_v31 = vmul.f32 1.0614054, %v14259_v42 }
0x571b   : > { %v11528_v58 = vmul.f32 1.0614054, %v14261_v19  ;;  %v14263_v18 = vpop.eup %14262 }
0x571c   : > { %v11531_v7 = vadd.f32 -1.4531521, %v11529_v31  ;;  %v14265_v43 = vpop.eup %14264  ;;  %v12189_v31 = vld [vmem:[%s15889_s6 + $0x1b] ss:$0 sm:$0xff] }
0x571d   : > { %v11530_v39 = vadd.f32 -1.4531521, %v11528_v58  ;;  %v11714_v58 = vld [vmem:[%s15888_s5 + $0xe8] sm:$0xff] }
0x571e   : > { %v11533_v35 = vmul.f32 %v14259_v42, %v11531_v7  ;;  %v11715_v7 = vld [vmem:[%s15888_s5 + $0x160] sm:$0xff]  ;;  %v13695_v46 = vpack.c.bf16 %v11714_v58, %v11713_v38 }
0x571f   : > { %v11532_v62 = vmul.f32 %v14261_v19, %v11530_v39  ;;  %v11716_v39 = vld [vmem:[%s15888_s5 + $0x1d8] sm:$0xff] }
0x5720   : > { %v11535_v51 = vadd.f32 1.4214138, %v11533_v35  ;;  %13696 = vmatpush3.bf16.msra.mxu1 %v13695_v46  ;;  %v13698_v35 = vpack.c.bf16 %v11716_v39, %v11715_v7 }
0x5721   : > { %v11534_v15 = vadd.f32 1.4214138, %v11532_v62  ;;  %13697 = vmatprep.subr.bf16.mxu1 %v14292_v34 }
0x5722   : > { %v11537_v37 = vmul.f32 %v14259_v42, %v11535_v51 }
0x5723   : > { %v11536_v14 = vmul.f32 %v14261_v19, %v11534_v15 }
0x5724   : > { %v11539_v9 = vadd.f32 -0.28449672, %v11537_v37  ;;  %13699 = vmatpush3.bf16.msra.mxu1 %v13698_v35 }
0x5725   : > { %v11538_v30 = vadd.f32 -0.28449672, %v11536_v14 }
0x5726   : > { %v11541_v61 = vmul.f32 %v14259_v42, %v11539_v9 }
0x5727   : > { %v11540_v48 = vmul.f32 %v14261_v19, %v11538_v30 }
0x5728   : > { %v11543_v53 = vadd.f32 0.2548296, %v11541_v61  ;;  %v12190_v61 = vld [vmem:[%s15889_s6 + $0x1c] ss:$0 sm:$0xff] }
0x5729   : > { %v11542_v54 = vadd.f32 0.2548296, %v11540_v48 }
0x572a   : > { %v11545_v44 = vmul.f32 %v14259_v42, %v11543_v53 }
0x572b   : > { %v11544_v59 = vmul.f32 %v14261_v19, %v11542_v54 }
0x572c   : > { %v11555_v2 = vmul.f32 %v14263_v18, %v11545_v44 }
0x572d   : > { %v11554_v6 = vmul.f32 %v14265_v43, %v11544_v59 }
0x572e   : > { %v11557_v8 = vsub.f32 1.0, %v11555_v2 }
0x572f   : > { %v11556_v27 = vsub.f32 1.0, %v11554_v6 }
0x5730   : > { %v11559_v10 = vmul.f32 %v11557_v8, %v11517_v28 }
0x5731   : > { %v11558_v60 = vmul.f32 %v11556_v27, %v11516_v57 }
0x5732   : > { %v11561_v52 = vadd.f32 1.0, %v11559_v10 }
0x5733   : > { %v11560_v22 = vadd.f32 1.0, %v11558_v60 }
0x5734   : > { %v11563_v63 = vmul.f32 %v11561_v52, %v11511_v20 }
0x5735   : > { %v11562_v3 = vmul.f32 %v11560_v22, %v11510_v11 }
0x5737   : > { %13382 = vmatprep.mubr.msk.f32.mxu0 %vm895_vm3, %v11562_v3 }
0x5738   : > { %13383 = vmatmul.mubr.msk.f32.vlgmr.msra.gmra.mrb[92].mxu0 %vm895_vm3, %v11563_v63 }
0x580b   : > { %v13384_v24 = vpop.f32.mrb[92].mxu0 }
0x580c   : > { %v11661_v41 = vadd.f32 %v13384_v24, %v11582_v29  ;;  %v11656_v0 = vpop.f32.mrb[93].mxu0 }
0x580e   : > { %v11664_v33 = vadd.f32 %v11661_v41, %v15831_v45 }
0x5810   : > { %v11666_v36 = vsel %vm895_vm3, %v11664_v33, 0.0 }
0x5811   : > { %11667 = vadd.xlane.f32.xlu0 %v11666_v36 }
0x5827   : > { %11685 = vrot.lane.b32.xlu0 %v12188_v40, %s14279_s16 }
0x589e   : > { %v11668_v16 = vpop.xlane.xlu0 %11667 }
0x589f   : > { %v11669_v23 = vmul.f32 0.03125, %v11668_v16 }
0x58a1   : > { %v11670_v5 = vsub.f32 %v11664_v33, %v11669_v23 }
0x58a2   : > { %v11686_v1 = vpop.permute.xlu0 %11685 }
0x58a3   : > { %v11671_v56 = vmul.f32 %v11670_v5, %v11670_v5 }
0x58a5   : > { %v11672_v12 = vsel %vm895_vm3, %v11671_v56, 0.0 }
0x58a6   : > { %11673 = vadd.xlane.f32.xlu1 %v11672_v12 }
0x5933   : > { %v11674_v25 = vpop.xlane.xlu1 %11673 }
0x5934   : > { %v11675_v4 = vmul.f32 0.03125, %v11674_v25 }
0x5936   : > { %v11676_v17 = vadd.f32 1e-05, %v11675_v4 }
0x5938   : > { %14266 = vrsqrt.f32 %v11676_v17 }
0x5942   : > { %v14267_v45 = vpop.eup %14266 }
0x5943   : > { %v11678_v26 = vmul.f32 %v14267_v45, %v11670_v5 }
0x5945   : > { %v11683_v47 = vmul.f32 %v12188_v40, %v11678_v26 }
0x5947   : > { %v11688_v32 = vadd.f32 %v11686_v1, %v11683_v47 }
0x5949   : > { %v11690_v21 = vsel %vm895_vm3, %v11688_v32, 0.0 }
0x594a   : > { %11691 = vadd.xlane.f32.xlu1 %v11690_v21 }
0x59d7   : > { %v11692_v50 = vpop.xlane.xlu1 %11691 }
0x59d8   : > { %v11693_v55 = vmul.f32 0.03125, %v11692_v50 }
0x59da   : > { %v11694_v42 = vsub.f32 %v11688_v32, %v11693_v55 }
0x59dc   : > { %v11695_v13 = vmul.f32 %v11694_v42, %v11694_v42 }
0x59de   : > { %v11696_v19 = vsel %vm895_vm3, %v11695_v13, 0.0 }
0x59df   : > { %11697 = vadd.xlane.f32.xlu1 %v11696_v19 }
0x59f0   : > { %11709 = vrot.lane.b32.xlu1 %v12189_v31, %s14279_s16  ;;  %s11898_s16 = sshll.u32 %s15903_s25, 3 }
0x59f1   : > { %s336_s13 = scalar_lea.vmem %s15890_s7, %s11898_s16 }
0x5a6c   : > { %v11698_v49 = vpop.xlane.xlu1 %11697 }
0x5a6d   : > { %v11699_v62 = vmul.f32 0.03125, %v11698_v49 }
0x5a6f   : > { %v11700_v51 = vadd.f32 1e-05, %v11699_v62 }
0x5a70   : > { %v11710_v14 = vpop.permute.xlu1 %11709 }
0x5a71   : > { %14268 = vrsqrt.f32 %v11700_v51 }
0x5a7b   : > { %v14269_v15 = vpop.eup %14268 }
0x5a7c   : > { %v11702_v37 = vmul.f32 %v14269_v15, %v11694_v42 }
0x5a7e   : > { %v11707_v9 = vmul.f32 %v12189_v31, %v11702_v37 }
0x5a80   : > { %v11712_v30 = vadd.f32 %v11710_v14, %v11707_v9 }
0x5a82   : > { %13394 = vmatmul.mubr.msk.f32.vlgmr.msra.gmra.mrb[94].mxu1 %vm895_vm3, %v11712_v30 }
0x5b55   : > { %v11791_v34 = vpop.f32.mrb[94].mxu1 }
0x5b56   : > { %v11792_v48 = vadd.f32 %v12190_v61, %v11791_v34  ;;  %v13395_v53 = vpop.f32.mrb[95].mxu1 }
0x5b58   : > { %11795 = vst.msk [vmem:[%s336_s13] sm:$0xff] %vm339_vm1, %v11792_v48 }
0x5b59 PF: > { %s17_s24 = sadd.s32 1, %s14276_s24  }
0x5b5a   : > { %p14_p4 = scmp.ge.s32.totalorder %s17_s24, 4  }
0x5b5c   :  { %16 = sbr.rel (!%p14_p4) target bundleno = 1 (0x1), region = 87 }

</bundles_post_ra>
